<compile_context>
chip_gen: v7x
topology: tpu7x:2x2x1
jax: 0.10.0
libtpu: 0.0.40
codegen_flags: <defaults>
</compile_context>

<pallas_src>
import functools

import jax
import jax.numpy as jnp
from jax.experimental import pallas as pl
from jax.experimental.pallas import tpu as pltpu

F32 = jnp.float32


# --------------------------- fused forward kernel ---------------------------
def _net_kernel(
    # activations ([T, Bblk, D])
    x_l_ref, x_a_ref, x_v_ref,
    # fused unimodal LSTM (block-diagonal): wih [D_sum, 4H], whh [H, 4H], b [1, 4H]
    uni_wih_ref, uni_whh_ref, uni_b_ref,
    # aggregate LSTM: wih [56, 4*h_dim], whh [h_dim, 4*h_dim], b [1, 4*h_dim]
    ag_wih_ref, ag_whh_ref, ag_b_ref,
    # coattention bilinear weights [dh_a, dh_l], [dh_v, dh_l]
    co_a_ref, co_v_ref,
    # word head: Linear(dh_l, dh_l), Linear(dh_l, 1)
    lin_w_ref, lin_b_ref, wfin_w_ref, wfin_b_ref,
    # attention pooling + fusion head
    att_w_ref, att_v_ref, out_w_ref, out_b_ref, last_w_ref, last_b_ref,
    # outputs
    final_ref, wordfin_ref,
    # VMEM scratch for per-step hidden states (bounds vreg live ranges)
    uni_hs_ref, agg_hs_ref,
    *, dims,
):
    dh_l, dh_a, dh_v, hg = dims
    T, B, d_l = x_l_ref.shape
    d_a = x_a_ref.shape[2]
    d_v = x_v_ref.shape[2]
    H = dh_l + dh_a + dh_v                              # fused unimodal hidden width

    def cell(xp, h, c, whh, n):
        """One LSTM step; xp already holds x@W_ih + b.  Gate cols packed (i,f,o,g):
        ONE packed recurrent matmul, one contiguous sigmoid slice, one tanh slice."""
        gates = xp + jnp.dot(h, whh, preferred_element_type=F32)     # [B, 4n]
        sig = jax.nn.sigmoid(gates[:, :3 * n])
        g = jnp.tanh(gates[:, 3 * n:])
        i, f, o = sig[:, :n], sig[:, n:2 * n], sig[:, 2 * n:]
        c = f * c + i * g
        h = o * jnp.tanh(c)
        return h, c

    def softmax_last(x):
        x = x - jnp.max(x, axis=-1, keepdims=True)
        e = jnp.exp(x)
        return e * pl.reciprocal(jnp.sum(e, axis=-1, keepdims=True), approx=True)

    # ---- hoisted input projection for the fused unimodal LSTM ---------------
    # Distributed over row blocks of the fused W_ih (no lane-misaligned concat),
    # flattened to 2-D matmuls so each MXU push is sublane-dense.
    uni_wih = uni_wih_ref[...]
    xl2 = x_l_ref[...].reshape(T * B, d_l)
    xa2 = x_a_ref[...].reshape(T * B, d_a)
    xv2 = x_v_ref[...].reshape(T * B, d_v)
    xp_uni = (jnp.dot(xl2, uni_wih[:d_l], preferred_element_type=F32)
              + jnp.dot(xa2, uni_wih[d_l:d_l + d_a], preferred_element_type=F32)
              + jnp.dot(xv2, uni_wih[d_l + d_a:], preferred_element_type=F32)
              + uni_b_ref[...]).reshape(T, B, 4 * H)

    # ---- single block-diagonal recurrence for all three modalities ----------
    uni_whh = uni_whh_ref[...]
    h = jnp.zeros((B, H), F32)
    c = jnp.zeros((B, H), F32)
    for t in range(T):                                   # T=8, fully unrolled
        h, c = cell(xp_uni[t], h, c, uni_whh, H)
        uni_hs_ref[t] = h                                # contiguous [B, H] store

    hs_bt = jnp.transpose(uni_hs_ref[...], (1, 0, 2))    # [B, T, H]
    word_bt = hs_bt[:, :, :dh_l]                         # [B, T, dh_l]
    cov_bt = hs_bt[:, :, dh_l:dh_l + dh_a]               # [B, T, dh_a]
    fac_bt = hs_bt[:, :, dh_l + dh_a:]                   # [B, T, dh_v]

    # ---- coattention (softmax over the A-time / lane axis) -------------------
    # TODO(synk): `Coattention` source not provided; bilinear co-attention assumed,
    # with coatt_X = [attended_X, raw_X] giving 2*dh_X features.
    def coattention(a_bt, da, w_ref):
        m = jnp.dot(a_bt.reshape(B * T, da), w_ref[...],
                    preferred_element_type=F32).reshape(B, T, dh_l)
        s = jnp.einsum('bsd,btd->bst', word_bt, m, preferred_element_type=F32)
        alpha = softmax_last(s)                          # over A-time (lane axis)
        return jnp.einsum('bst,bta->bsa', alpha, a_bt, preferred_element_type=F32)

    catt_a = coattention(cov_bt, dh_a, co_a_ref)         # [B, T, dh_a]
    catt_v = coattention(fac_bt, dh_v, co_v_ref)         # [B, T, dh_v]

    # ---- aggregate LSTM: hoisted, distributed input projection ---------------
    # torch.cat([coatt_LA, coatt_LV, word], 2) expressed as row-block matmuls of
    # W_ih over the flattened [B*T, d] operands (no narrow concat materialized).
    ag_wih = ag_wih_ref[...]
    r0, r1, r2, r3 = dh_a, 2 * dh_a, 2 * dh_a + dh_v, 2 * dh_a + 2 * dh_v
    xp_g = (jnp.dot(catt_a.reshape(B * T, dh_a), ag_wih[:r0], preferred_element_type=F32)
            + jnp.dot(cov_bt.reshape(B * T, dh_a), ag_wih[r0:r1], preferred_element_type=F32)
            + jnp.dot(catt_v.reshape(B * T, dh_v), ag_wih[r1:r2], preferred_element_type=F32)
            + jnp.dot(fac_bt.reshape(B * T, dh_v), ag_wih[r2:r3], preferred_element_type=F32)
            + jnp.dot(word_bt.reshape(B * T, dh_l), ag_wih[r3:], preferred_element_type=F32)
            + ag_b_ref[...]).reshape(B, T, 4 * hg)

    ag_whh = ag_whh_ref[...]
    hga = jnp.zeros((B, hg), F32)
    cga = jnp.zeros((B, hg), F32)
    for t in range(T):
        hga, cga = cell(xp_g[:, t, :], hga, cga, ag_whh, hg)
        agg_hs_ref[t] = hga
    agg_bt = jnp.transpose(agg_hs_ref[...], (1, 0, 2))   # [B, T, h_dim]

    # ---- word branch head: Linear -> squash -> Linear(dh_l, 1) ---------------
    # (dropout1 = identity, inference semantics)
    y = (jnp.dot(word_bt.reshape(B * T, dh_l), lin_w_ref[...],
                 preferred_element_type=F32) + lin_b_ref[...]).reshape(B, T, dh_l)
    sq = jnp.sum(y * y, axis=-1, keepdims=True)
    y = (jnp.sqrt(sq) * pl.reciprocal(1.0 + sq, approx=True)) * y        # squash
    wordfin_ref[...] = jnp.sum(y * wfin_w_ref[...], axis=-1) + wfin_b_ref[...]  # [B, T]

    # ---- attention pooling + fusion head -------------------------------------
    # TODO(synk): `Attention` source not provided; additive attention pooling assumed.
    proj = jnp.tanh(jnp.dot(agg_bt.reshape(B * T, hg), att_w_ref[...],
                            preferred_element_type=F32)).reshape(B, T, hg)
    scores = jnp.sum(proj * att_v_ref[...], axis=-1)     # [B, T]
    wts = softmax_last(scores)
    lstm_att = jnp.sum(wts[:, :, None] * agg_bt, axis=1) # [B, h_dim]
    fusion = jnp.mean(agg_bt, axis=1)                    # [B, h_dim]

    out_w = out_w_ref[...]                               # [2*h_dim, final_dims]
    hidden = (jnp.dot(fusion, out_w[:hg], preferred_element_type=F32)
              + jnp.dot(lstm_att, out_w[hg:], preferred_element_type=F32)
              + out_b_ref[...])
    hidden = jnp.maximum(hidden, 0.0)                    # ReLU; dropout2 = identity
    final_ref[...] = (jnp.dot(hidden, last_w_ref[...], preferred_element_type=F32)
                      + last_b_ref[...])                 # [B, 3]


# ------------------------------ wrapper --------------------------------------
def net_forward(kp, x_l, x_v, x_a, *, batch_block=None):
    """Forward pass; kp is the kernel-layout parameter dict from prepare_params.
    Argument order (x_l, x_v, x_a) mirrors the PyTorch forward signature."""
    T, B, d_l = x_l.shape
    d_a = x_a.shape[2]
    d_v = x_v.shape[2]
    dh_a, dh_l = kp['coatt_w'].shape
    dh_v = kp['coatt1_w'].shape[0]
    hg = kp['ag_whh'].shape[0]
    H = kp['uni_whh'].shape[0]

    if batch_block is None:
        batch_block = 8 if B % 8 == 0 else B
    bb = batch_block
    assert B % bb == 0, "batch must be divisible by batch_block"
    grid = (B // bb,)

    def full_spec(a):
        zeros = (0,) * a.ndim
        return pl.BlockSpec(a.shape, lambda i, z=zeros: z)

    weights = (kp['uni_wih'], kp['uni_whh'], kp['uni_b'],
               kp['ag_wih'], kp['ag_whh'], kp['ag_b'],
               kp['coatt_w'], kp['coatt1_w'],
               kp['wordLSTMlinear_w'], kp['wordLSTMlinear_b'],
               kp['wordLSTMfinal_w'], kp['wordLSTMfinal_b'],
               kp['att_w'], kp['att_v'],
               kp['output_w'], kp['output_b'],
               kp['final_w'], kp['final_b'])

    in_specs = [
        pl.BlockSpec((T, bb, d_l), lambda i: (0, i, 0)),
        pl.BlockSpec((T, bb, d_a), lambda i: (0, i, 0)),
        pl.BlockSpec((T, bb, d_v), lambda i: (0, i, 0)),
    ] + [full_spec(w) for w in weights]

    out_specs = (pl.BlockSpec((bb, 3), lambda i: (i, 0)),
                 pl.BlockSpec((bb, T), lambda i: (i, 0)))

    kernel = functools.partial(_net_kernel, dims=(dh_l, dh_a, dh_v, hg))

    final, word_final = pl.pallas_call(
        kernel,
        grid=grid,
        out_shape=(jax.ShapeDtypeStruct((B, 3), F32),
                   jax.ShapeDtypeStruct((B, T), F32)),
        in_specs=in_specs,
        out_specs=out_specs,
        scratch_shapes=[pltpu.VMEM((T, bb, H), F32),      # unimodal hidden states
                        pltpu.VMEM((T, bb, hg), F32)],    # aggregate hidden states
        compiler_params=pltpu.CompilerParams(
            dimension_semantics=("parallel",)),           # batch blocks across TCs (v7x)
    )(x_l, x_a, x_v, *weights)
    return final, word_final


# --------------------------- parameters --------------------------------------
def init_params(key, cfg):
    """Parameters in PyTorch layout (nn.LSTM / nn.Linear conventions)."""
    d_l, d_a, d_v = cfg['input_dims']
    dh_l, dh_a, dh_v = cfg['h_dims']
    h_dim, final_dims = cfg['h_dim'], cfg['final_dims']
    agg_in = dh_a * 2 + dh_v * 2 + dh_l

    def lstm_p(k, d_in, h):
        k = jax.random.split(k, 4)
        return {'w_ih': jax.random.normal(k[0], (4 * h, d_in), F32) * 0.1,
                'w_hh': jax.random.normal(k[1], (4 * h, h), F32) * 0.1,
                'b_ih': jax.random.normal(k[2], (4 * h,), F32) * 0.1,
                'b_hh': jax.random.normal(k[3], (4 * h,), F32) * 0.1}

    def linear_p(k, d_in, d_out):
        k1, k2 = jax.random.split(k)
        return {'w': jax.random.normal(k1, (d_out, d_in), F32) * 0.1,
                'b': jax.random.normal(k2, (d_out,), F32) * 0.1}

    ks = jax.random.split(key, 12)
    return {
        'wordLSTM': lstm_p(ks[0], d_l, dh_l),
        'covarepLSTM': lstm_p(ks[1], d_a, dh_a),
        'facetLSTM': lstm_p(ks[2], d_v, dh_v),
        'aggregateLSTM': lstm_p(ks[3], agg_in, h_dim),
        'coatt_w': jax.random.normal(ks[4], (dh_a, dh_l), F32) * 0.1,
        'coatt1_w': jax.random.normal(ks[5], (dh_v, dh_l), F32) * 0.1,
        'wordLSTMlinear': linear_p(ks[6], dh_l, dh_l),
        'wordLSTMfinal': linear_p(ks[7], dh_l, 1),
        'att_w': jax.random.normal(ks[8], (h_dim, h_dim), F32) * 0.1,
        'att_v': jax.random.normal(ks[9], (1, h_dim), F32) * 0.1,
        'outputlinear': linear_p(ks[10], h_dim * 2, final_dims),
        'finallinear': linear_p(ks[11], final_dims, 3),
    }


def _fused_unimodal(lstm_ps, d_dims, h_dims):
    """Fuse the 3 unimodal LSTMs into one block-diagonal recurrence.

    Fused hidden layout: h = [h_l | h_a | h_v]                     (H = sum(h_dims))
    Fused gate layout:   [i_l i_a i_v | f_l f_a f_v | o_l o_a o_v | g_l g_a g_v]
    nn.LSTM packs gates as (i, f, g, o); we re-pack to (i, f, o, g) so the kernel
    applies sigmoid to one contiguous [*, 3H] slice and tanh to the last H lanes.
    """
    D, H = sum(d_dims), sum(h_dims)
    wih = jnp.zeros((D, 4 * H), F32)
    whh = jnp.zeros((H, 4 * H), F32)
    bias = jnp.zeros((4 * H,), F32)
    d_off = [0, d_dims[0], d_dims[0] + d_dims[1]]
    h_off = [0, h_dims[0], h_dims[0] + h_dims[1]]
    gate_src = (0, 1, 3, 2)                           # dst (i,f,o,g) <- src (i,f,g,o)
    for m in range(3):
        p, dm, hm = lstm_ps[m], d_dims[m], h_dims[m]
        wih_t = jnp.transpose(p['w_ih'])              # [dm, 4hm], cols (i,f,g,o)
        whh_t = jnp.transpose(p['w_hh'])              # [hm, 4hm]
        b_m = p['b_ih'] + p['b_hh']                   # [4hm]
        for g_dst, g_src in enumerate(gate_src):
            c0, s0 = g_dst * H + h_off[m], g_src * hm
            wih = wih.at[d_off[m]:d_off[m] + dm, c0:c0 + hm].set(wih_t[:, s0:s0 + hm])
            whh = whh.at[h_off[m]:h_off[m] + hm, c0:c0 + hm].set(whh_t[:, s0:s0 + hm])
            bias = bias.at[c0:c0 + hm].set(b_m[s0:s0 + hm])
    return wih, whh, bias[None, :]


def _reorder_ifgo_to_ifog(w, h):
    """Re-pack the trailing 4h gate axis from (i,f,g,o) to (i,f,o,g)."""
    return jnp.concatenate([w[..., :2 * h], w[..., 3 * h:], w[..., 2 * h:3 * h]], axis=-1)


def _packed_lstm(p, h):
    wih = _reorder_ifgo_to_ifog(jnp.transpose(p['w_ih']), h)      # [D, 4h]
    whh = _reorder_ifgo_to_ifog(jnp.transpose(p['w_hh']), h)      # [h, 4h]
    b = _reorder_ifgo_to_ifog(p['b_ih'] + p['b_hh'], h)[None, :]  # [1, 4h]
    return wih, whh, b


def prepare_params(p):
    """One-time conversion from PyTorch layout to kernel layout.
    nn.LSTM: W_ih [4H,D] -> [D,4H], W_hh [4H,H] -> [H,4H], bias = b_ih + b_hh,
    gate order re-packed (i,f,g,o) -> (i,f,o,g); the three unimodal LSTMs are
    additionally fused block-diagonally.  nn.Linear: W [out,in] -> [in,out]."""
    dh_l = p['wordLSTM']['w_hh'].shape[1]
    dh_a = p['covarepLSTM']['w_hh'].shape[1]
    dh_v = p['facetLSTM']['w_hh'].shape[1]
    h_dim = p['aggregateLSTM']['w_hh'].shape[1]
    d_l = p['wordLSTM']['w_ih'].shape[1]
    d_a = p['covarepLSTM']['w_ih'].shape[1]
    d_v = p['facetLSTM']['w_ih'].shape[1]

    uni_wih, uni_whh, uni_b = _fused_unimodal(
        [p['wordLSTM'], p['covarepLSTM'], p['facetLSTM']],
        (d_l, d_a, d_v), (dh_l, dh_a, dh_v))
    ag_wih, ag_whh, ag_b = _packed_lstm(p['aggregateLSTM'], h_dim)

    def lin_k(q):
        return jnp.transpose(q['w']), q['b'][None, :]

    lin_w, lin_b = lin_k(p['wordLSTMlinear'])
    out_w, out_b = lin_k(p['outputlinear'])
    last_w, last_b = lin_k(p['finallinear'])
    return {
        'uni_wih': uni_wih, 'uni_whh': uni_whh, 'uni_b': uni_b,
        'ag_wih': ag_wih, 'ag_whh': ag_whh, 'ag_b': ag_b,
        'coatt_w': p['coatt_w'], 'coatt1_w': p['coatt1_w'],
        'wordLSTMlinear_w': lin_w, 'wordLSTMlinear_b': lin_b,
        'wordLSTMfinal_w': p['wordLSTMfinal']['w'],             # [1, dh_l]
        'wordLSTMfinal_b': p['wordLSTMfinal']['b'][None, :],    # [1, 1]
        'att_w': p['att_w'], 'att_v': p['att_v'],
        'output_w': out_w, 'output_b': out_b,
        'final_w': last_w, 'final_b': last_b,
    }


# ------------------------------- main -----------------------------------------
if __name__ == "__main__":
    cfg = {
        'input_dims': [16, 12, 8],   # d_l, d_a, d_v
        'h_dims': [16, 12, 8],       # dh_l, dh_a, dh_v
        'h_dim': 32,
        'final_dims': 16,
        'dropout1': 0.0,
        'dropout2': 0.0,
    }
    # Batch raised to a sublane-filling size (perf feedback); 2 blocks of 8 so the
    # "parallel" batch grid can shard across TensorCores on v7x.
    T, B = 8, 16
    key = jax.random.PRNGKey(0)
    kp_key, kl, kv, ka = jax.random.split(key, 4)
    params = init_params(kp_key, cfg)
    kparams = prepare_params(params)

    x_l = jax.random.normal(kl, (T, B, cfg['input_dims'][0]), F32)
    x_v = jax.random.normal(kv, (T, B, cfg['input_dims'][2]), F32)
    x_a = jax.random.normal(ka, (T, B, cfg['input_dims'][1]), F32)

    fwd = jax.jit(functools.partial(net_forward, batch_block=8))
    final, word_final = fwd(kparams, x_l, x_v, x_a)
    jax.block_until_ready((final, word_final))

    assert final.shape == (B, 3) and word_final.shape == (B, T)
    assert bool(jnp.all(jnp.isfinite(final))) and bool(jnp.all(jnp.isfinite(word_final)))
    print("KERNEL_OK")
</pallas_src>

<mosaic_0001>
module attributes {stable_mosaic.version = 11 : i64} {
  func.func @_net_kernel(%arg0: i32, %arg1: memref<8x8x16xf32, #tpu.memory_space<vmem>>, %arg2: memref<8x8x12xf32, #tpu.memory_space<vmem>>, %arg3: memref<8x8x8xf32, #tpu.memory_space<vmem>>, %arg4: memref<36x144xf32, #tpu.memory_space<vmem>>, %arg5: memref<36x144xf32, #tpu.memory_space<vmem>>, %arg6: memref<1x144xf32, #tpu.memory_space<vmem>>, %arg7: memref<56x128xf32, #tpu.memory_space<vmem>>, %arg8: memref<32x128xf32, #tpu.memory_space<vmem>>, %arg9: memref<1x128xf32, #tpu.memory_space<vmem>>, %arg10: memref<12x16xf32, #tpu.memory_space<vmem>>, %arg11: memref<8x16xf32, #tpu.memory_space<vmem>>, %arg12: memref<16x16xf32, #tpu.memory_space<vmem>>, %arg13: memref<1x16xf32, #tpu.memory_space<vmem>>, %arg14: memref<1x16xf32, #tpu.memory_space<vmem>>, %arg15: memref<1x1xf32, #tpu.memory_space<vmem>>, %arg16: memref<32x32xf32, #tpu.memory_space<vmem>>, %arg17: memref<1x32xf32, #tpu.memory_space<vmem>>, %arg18: memref<64x16xf32, #tpu.memory_space<vmem>>, %arg19: memref<1x16xf32, #tpu.memory_space<vmem>>, %arg20: memref<16x3xf32, #tpu.memory_space<vmem>>, %arg21: memref<1x3xf32, #tpu.memory_space<vmem>>, %arg22: memref<8x3xf32, #tpu.memory_space<vmem>>, %arg23: memref<8x8xf32, #tpu.memory_space<vmem>>, %arg24: memref<8x8x36xf32, #tpu.memory_space<vmem>>, %arg25: memref<8x8x32xf32, #tpu.memory_space<vmem>>) attributes {dimension_semantics = [#tpu.dimension_semantics<parallel>], iteration_bounds = array<i64: 2>, scalar_prefetch = 0 : i64, scratch_operands = 2 : i64, tpu.core_type = #tpu.core_type<tc>, window_params = [{transform_indices = @transform_0, window_bounds = array<i64: 8, 8, 16>}, {transform_indices = @transform_1, window_bounds = array<i64: 8, 8, 12>}, {transform_indices = @transform_2, window_bounds = array<i64: 8, 8, 8>}, {pipeline_mode = #tpu.pipeline_mode<synchronous>, transform_indices = @transform_3, window_bounds = array<i64: 36, 144>}, {pipeline_mode = #tpu.pipeline_mode<synchronous>, transform_indices = @transform_4, window_bounds = array<i64: 36, 144>}, {pipeline_mode = #tpu.pipeline_mode<synchronous>, transform_indices = @transform_5, window_bounds = array<i64: 1, 144>}, {pipeline_mode = #tpu.pipeline_mode<synchronous>, transform_indices = @transform_6, window_bounds = array<i64: 56, 128>}, {pipeline_mode = #tpu.pipeline_mode<synchronous>, transform_indices = @transform_7, window_bounds = array<i64: 32, 128>}, {pipeline_mode = #tpu.pipeline_mode<synchronous>, transform_indices = @transform_8, window_bounds = array<i64: 1, 128>}, {pipeline_mode = #tpu.pipeline_mode<synchronous>, transform_indices = @transform_9, window_bounds = array<i64: 12, 16>}, {pipeline_mode = #tpu.pipeline_mode<synchronous>, transform_indices = @transform_10, window_bounds = array<i64: 8, 16>}, {pipeline_mode = #tpu.pipeline_mode<synchronous>, transform_indices = @transform_11, window_bounds = array<i64: 16, 16>}, {pipeline_mode = #tpu.pipeline_mode<synchronous>, transform_indices = @transform_12, window_bounds = array<i64: 1, 16>}, {pipeline_mode = #tpu.pipeline_mode<synchronous>, transform_indices = @transform_13, window_bounds = array<i64: 1, 16>}, {pipeline_mode = #tpu.pipeline_mode<synchronous>, transform_indices = @transform_14, window_bounds = array<i64: 1, 1>}, {pipeline_mode = #tpu.pipeline_mode<synchronous>, transform_indices = @transform_15, window_bounds = array<i64: 32, 32>}, {pipeline_mode = #tpu.pipeline_mode<synchronous>, transform_indices = @transform_16, window_bounds = array<i64: 1, 32>}, {pipeline_mode = #tpu.pipeline_mode<synchronous>, transform_indices = @transform_17, window_bounds = array<i64: 64, 16>}, {pipeline_mode = #tpu.pipeline_mode<synchronous>, transform_indices = @transform_18, window_bounds = array<i64: 1, 16>}, {pipeline_mode = #tpu.pipeline_mode<synchronous>, transform_indices = @transform_19, window_bounds = array<i64: 16, 3>}, {pipeline_mode = #tpu.pipeline_mode<synchronous>, transform_indices = @transform_20, window_bounds = array<i64: 1, 3>}, {transform_indices = @transform_21, window_bounds = array<i64: 8, 3>}, {transform_indices = @transform_22, window_bounds = array<i64: 8, 8>}]} {
    %c0 = arith.constant 0 : index
    %c0_0 = arith.constant 0 : index
    %0 = vector.load %arg4[%c0, %c0_0] : memref<36x144xf32, #tpu.memory_space<vmem>>, vector<36x144xf32>
    %c0_1 = arith.constant 0 : index
    %c0_2 = arith.constant 0 : index
    %c0_3 = arith.constant 0 : index
    %1 = vector.load %arg1[%c0_1, %c0_2, %c0_3] : memref<8x8x16xf32, #tpu.memory_space<vmem>>, vector<8x8x16xf32>
    %2 = vector.shape_cast %1 : vector<8x8x16xf32> to vector<64x16xf32>
    %c0_4 = arith.constant 0 : index
    %c0_5 = arith.constant 0 : index
    %c0_6 = arith.constant 0 : index
    %3 = vector.load %arg2[%c0_4, %c0_5, %c0_6] : memref<8x8x12xf32, #tpu.memory_space<vmem>>, vector<8x8x12xf32>
    %4 = vector.shape_cast %3 : vector<8x8x12xf32> to vector<64x12xf32>
    %c0_7 = arith.constant 0 : index
    %c0_8 = arith.constant 0 : index
    %c0_9 = arith.constant 0 : index
    %5 = vector.load %arg3[%c0_7, %c0_8, %c0_9] : memref<8x8x8xf32, #tpu.memory_space<vmem>>, vector<8x8x8xf32>
    %6 = vector.shape_cast %5 : vector<8x8x8xf32> to vector<64x8xf32>
    %7 = vector.extract_strided_slice %0 {offsets = [0, 0], sizes = [16, 144], strides = [1, 1]} : vector<36x144xf32> to vector<16x144xf32>
    %cst = arith.constant dense<0.000000e+00> : vector<64x144xf32>
    %8 = tpu.matmul %2, %7, %cst {dimension_numbers = #tpu.dot_dimension_numbers<[1], [0], [0], [1], [0, 0, 1, 1], [], []>} : vector<64x16xf32>, vector<16x144xf32>, vector<64x144xf32> -> vector<64x144xf32>
    %9 = vector.extract_strided_slice %0 {offsets = [16, 0], sizes = [12, 144], strides = [1, 1]} : vector<36x144xf32> to vector<12x144xf32>
    %cst_10 = arith.constant dense<0.000000e+00> : vector<64x144xf32>
    %10 = tpu.matmul %4, %9, %cst_10 {dimension_numbers = #tpu.dot_dimension_numbers<[1], [0], [0], [1], [0, 0, 1, 1], [], []>} : vector<64x12xf32>, vector<12x144xf32>, vector<64x144xf32> -> vector<64x144xf32>
    %11 = arith.addf %8, %10 : vector<64x144xf32>
    %12 = vector.extract_strided_slice %0 {offsets = [28, 0], sizes = [8, 144], strides = [1, 1]} : vector<36x144xf32> to vector<8x144xf32>
    %cst_11 = arith.constant dense<0.000000e+00> : vector<64x144xf32>
    %13 = tpu.matmul %6, %12, %cst_11 {dimension_numbers = #tpu.dot_dimension_numbers<[1], [0], [0], [1], [0, 0, 1, 1], [], []>} : vector<64x8xf32>, vector<8x144xf32>, vector<64x144xf32> -> vector<64x144xf32>
    %14 = arith.addf %11, %13 : vector<64x144xf32>
    %c0_12 = arith.constant 0 : index
    %c0_13 = arith.constant 0 : index
    %15 = vector.load %arg6[%c0_12, %c0_13] : memref<1x144xf32, #tpu.memory_space<vmem>>, vector<1x144xf32>
    %16 = vector.broadcast %15 : vector<1x144xf32> to vector<64x144xf32>
    %17 = arith.addf %14, %16 : vector<64x144xf32>
    %18 = vector.shape_cast %17 : vector<64x144xf32> to vector<8x8x144xf32>
    %c0_14 = arith.constant 0 : index
    %c0_15 = arith.constant 0 : index
    %19 = vector.load %arg5[%c0_14, %c0_15] : memref<36x144xf32, #tpu.memory_space<vmem>>, vector<36x144xf32>
    %cst_16 = arith.constant 0.000000e+00 : f32
    %20 = vector.broadcast %cst_16 : f32 to vector<8x36xf32>
    %cst_17 = arith.constant 0.000000e+00 : f32
    %21 = vector.broadcast %cst_17 : f32 to vector<8x36xf32>
    %22 = vector.extract_strided_slice %18 {offsets = [0, 0, 0], sizes = [1, 8, 144], strides = [1, 1, 1]} : vector<8x8x144xf32> to vector<1x8x144xf32>
    %23 = vector.shape_cast %22 : vector<1x8x144xf32> to vector<8x144xf32>
    %cst_18 = arith.constant dense<0.000000e+00> : vector<8x144xf32>
    %24 = tpu.matmul %20, %19, %cst_18 {dimension_numbers = #tpu.dot_dimension_numbers<[1], [0], [0], [1], [0, 0, 1, 1], [], []>} : vector<8x36xf32>, vector<36x144xf32>, vector<8x144xf32> -> vector<8x144xf32>
    %25 = arith.addf %23, %24 : vector<8x144xf32>
    %26 = vector.extract_strided_slice %25 {offsets = [0, 0], sizes = [8, 108], strides = [1, 1]} : vector<8x144xf32> to vector<8x108xf32>
    %27 = arith.negf %26 : vector<8x108xf32>
    %28 = math.exp %27 : vector<8x108xf32>
    %cst_19 = arith.constant 1.000000e+00 : f32
    %29 = vector.broadcast %cst_19 : f32 to vector<8x108xf32>
    %30 = arith.addf %29, %28 : vector<8x108xf32>
    %31 = arith.divf %29, %30 : vector<8x108xf32>
    %32 = vector.extract_strided_slice %25 {offsets = [0, 108], sizes = [8, 36], strides = [1, 1]} : vector<8x144xf32> to vector<8x36xf32>
    %33 = math.tanh %32 : vector<8x36xf32>
    %34 = vector.extract_strided_slice %31 {offsets = [0, 0], sizes = [8, 36], strides = [1, 1]} : vector<8x108xf32> to vector<8x36xf32>
    %35 = vector.extract_strided_slice %31 {offsets = [0, 36], sizes = [8, 36], strides = [1, 1]} : vector<8x108xf32> to vector<8x36xf32>
    %36 = vector.extract_strided_slice %31 {offsets = [0, 72], sizes = [8, 36], strides = [1, 1]} : vector<8x108xf32> to vector<8x36xf32>
    %37 = arith.mulf %35, %21 : vector<8x36xf32>
    %38 = arith.mulf %34, %33 : vector<8x36xf32>
    %39 = arith.addf %37, %38 : vector<8x36xf32>
    %40 = math.tanh %39 : vector<8x36xf32>
    %41 = arith.mulf %36, %40 : vector<8x36xf32>
    %c0_20 = arith.constant 0 : index
    %c0_21 = arith.constant 0 : index
    %c0_22 = arith.constant 0 : index
    %42 = vector.load %arg24[%c0_20, %c0_21, %c0_22] : memref<8x8x36xf32, #tpu.memory_space<vmem>>, vector<1x8x36xf32>
    %43 = vector.shape_cast %42 : vector<1x8x36xf32> to vector<8x36xf32>
    %44 = vector.shape_cast %41 : vector<8x36xf32> to vector<1x8x36xf32>
    tpu.vector_store %arg24[%c0_20, %c0_21, %c0_22], %44 {strides = array<i32>} : memref<8x8x36xf32, #tpu.memory_space<vmem>>, vector<1x8x36xf32>,
    %45 = vector.extract_strided_slice %18 {offsets = [1, 0, 0], sizes = [1, 8, 144], strides = [1, 1, 1]} : vector<8x8x144xf32> to vector<1x8x144xf32>
    %46 = vector.shape_cast %45 : vector<1x8x144xf32> to vector<8x144xf32>
    %cst_23 = arith.constant dense<0.000000e+00> : vector<8x144xf32>
    %47 = tpu.matmul %41, %19, %cst_23 {dimension_numbers = #tpu.dot_dimension_numbers<[1], [0], [0], [1], [0, 0, 1, 1], [], []>} : vector<8x36xf32>, vector<36x144xf32>, vector<8x144xf32> -> vector<8x144xf32>
    %48 = arith.addf %46, %47 : vector<8x144xf32>
    %49 = vector.extract_strided_slice %48 {offsets = [0, 0], sizes = [8, 108], strides = [1, 1]} : vector<8x144xf32> to vector<8x108xf32>
    %50 = arith.negf %49 : vector<8x108xf32>
    %51 = math.exp %50 : vector<8x108xf32>
    %cst_24 = arith.constant 1.000000e+00 : f32
    %52 = vector.broadcast %cst_24 : f32 to vector<8x108xf32>
    %53 = arith.addf %52, %51 : vector<8x108xf32>
    %54 = arith.divf %52, %53 : vector<8x108xf32>
    %55 = vector.extract_strided_slice %48 {offsets = [0, 108], sizes = [8, 36], strides = [1, 1]} : vector<8x144xf32> to vector<8x36xf32>
    %56 = math.tanh %55 : vector<8x36xf32>
    %57 = vector.extract_strided_slice %54 {offsets = [0, 0], sizes = [8, 36], strides = [1, 1]} : vector<8x108xf32> to vector<8x36xf32>
    %58 = vector.extract_strided_slice %54 {offsets = [0, 36], sizes = [8, 36], strides = [1, 1]} : vector<8x108xf32> to vector<8x36xf32>
    %59 = vector.extract_strided_slice %54 {offsets = [0, 72], sizes = [8, 36], strides = [1, 1]} : vector<8x108xf32> to vector<8x36xf32>
    %60 = arith.mulf %58, %39 : vector<8x36xf32>
    %61 = arith.mulf %57, %56 : vector<8x36xf32>
    %62 = arith.addf %60, %61 : vector<8x36xf32>
    %63 = math.tanh %62 : vector<8x36xf32>
    %64 = arith.mulf %59, %63 : vector<8x36xf32>
    %c1 = arith.constant 1 : index
    %c0_25 = arith.constant 0 : index
    %c0_26 = arith.constant 0 : index
    %65 = vector.load %arg24[%c1, %c0_25, %c0_26] : memref<8x8x36xf32, #tpu.memory_space<vmem>>, vector<1x8x36xf32>
    %66 = vector.shape_cast %65 : vector<1x8x36xf32> to vector<8x36xf32>
    %67 = vector.shape_cast %64 : vector<8x36xf32> to vector<1x8x36xf32>
    tpu.vector_store %arg24[%c1, %c0_25, %c0_26], %67 {strides = array<i32>} : memref<8x8x36xf32, #tpu.memory_space<vmem>>, vector<1x8x36xf32>,
    %68 = vector.extract_strided_slice %18 {offsets = [2, 0, 0], sizes = [1, 8, 144], strides = [1, 1, 1]} : vector<8x8x144xf32> to vector<1x8x144xf32>
    %69 = vector.shape_cast %68 : vector<1x8x144xf32> to vector<8x144xf32>
    %cst_27 = arith.constant dense<0.000000e+00> : vector<8x144xf32>
    %70 = tpu.matmul %64, %19, %cst_27 {dimension_numbers = #tpu.dot_dimension_numbers<[1], [0], [0], [1], [0, 0, 1, 1], [], []>} : vector<8x36xf32>, vector<36x144xf32>, vector<8x144xf32> -> vector<8x144xf32>
    %71 = arith.addf %69, %70 : vector<8x144xf32>
    %72 = vector.extract_strided_slice %71 {offsets = [0, 0], sizes = [8, 108], strides = [1, 1]} : vector<8x144xf32> to vector<8x108xf32>
    %73 = arith.negf %72 : vector<8x108xf32>
    %74 = math.exp %73 : vector<8x108xf32>
    %cst_28 = arith.constant 1.000000e+00 : f32
    %75 = vector.broadcast %cst_28 : f32 to vector<8x108xf32>
    %76 = arith.addf %75, %74 : vector<8x108xf32>
    %77 = arith.divf %75, %76 : vector<8x108xf32>
    %78 = vector.extract_strided_slice %71 {offsets = [0, 108], sizes = [8, 36], strides = [1, 1]} : vector<8x144xf32> to vector<8x36xf32>
    %79 = math.tanh %78 : vector<8x36xf32>
    %80 = vector.extract_strided_slice %77 {offsets = [0, 0], sizes = [8, 36], strides = [1, 1]} : vector<8x108xf32> to vector<8x36xf32>
    %81 = vector.extract_strided_slice %77 {offsets = [0, 36], sizes = [8, 36], strides = [1, 1]} : vector<8x108xf32> to vector<8x36xf32>
    %82 = vector.extract_strided_slice %77 {offsets = [0, 72], sizes = [8, 36], strides = [1, 1]} : vector<8x108xf32> to vector<8x36xf32>
    %83 = arith.mulf %81, %62 : vector<8x36xf32>
    %84 = arith.mulf %80, %79 : vector<8x36xf32>
    %85 = arith.addf %83, %84 : vector<8x36xf32>
    %86 = math.tanh %85 : vector<8x36xf32>
    %87 = arith.mulf %82, %86 : vector<8x36xf32>
    %c2 = arith.constant 2 : index
    %c0_29 = arith.constant 0 : index
    %c0_30 = arith.constant 0 : index
    %88 = vector.load %arg24[%c2, %c0_29, %c0_30] : memref<8x8x36xf32, #tpu.memory_space<vmem>>, vector<1x8x36xf32>
    %89 = vector.shape_cast %88 : vector<1x8x36xf32> to vector<8x36xf32>
    %90 = vector.shape_cast %87 : vector<8x36xf32> to vector<1x8x36xf32>
    tpu.vector_store %arg24[%c2, %c0_29, %c0_30], %90 {strides = array<i32>} : memref<8x8x36xf32, #tpu.memory_space<vmem>>, vector<1x8x36xf32>,
    %91 = vector.extract_strided_slice %18 {offsets = [3, 0, 0], sizes = [1, 8, 144], strides = [1, 1, 1]} : vector<8x8x144xf32> to vector<1x8x144xf32>
    %92 = vector.shape_cast %91 : vector<1x8x144xf32> to vector<8x144xf32>
    %cst_31 = arith.constant dense<0.000000e+00> : vector<8x144xf32>
    %93 = tpu.matmul %87, %19, %cst_31 {dimension_numbers = #tpu.dot_dimension_numbers<[1], [0], [0], [1], [0, 0, 1, 1], [], []>} : vector<8x36xf32>, vector<36x144xf32>, vector<8x144xf32> -> vector<8x144xf32>
    %94 = arith.addf %92, %93 : vector<8x144xf32>
    %95 = vector.extract_strided_slice %94 {offsets = [0, 0], sizes = [8, 108], strides = [1, 1]} : vector<8x144xf32> to vector<8x108xf32>
    %96 = arith.negf %95 : vector<8x108xf32>
    %97 = math.exp %96 : vector<8x108xf32>
    %cst_32 = arith.constant 1.000000e+00 : f32
    %98 = vector.broadcast %cst_32 : f32 to vector<8x108xf32>
    %99 = arith.addf %98, %97 : vector<8x108xf32>
    %100 = arith.divf %98, %99 : vector<8x108xf32>
    %101 = vector.extract_strided_slice %94 {offsets = [0, 108], sizes = [8, 36], strides = [1, 1]} : vector<8x144xf32> to vector<8x36xf32>
    %102 = math.tanh %101 : vector<8x36xf32>
    %103 = vector.extract_strided_slice %100 {offsets = [0, 0], sizes = [8, 36], strides = [1, 1]} : vector<8x108xf32> to vector<8x36xf32>
    %104 = vector.extract_strided_slice %100 {offsets = [0, 36], sizes = [8, 36], strides = [1, 1]} : vector<8x108xf32> to vector<8x36xf32>
    %105 = vector.extract_strided_slice %100 {offsets = [0, 72], sizes = [8, 36], strides = [1, 1]} : vector<8x108xf32> to vector<8x36xf32>
    %106 = arith.mulf %104, %85 : vector<8x36xf32>
    %107 = arith.mulf %103, %102 : vector<8x36xf32>
    %108 = arith.addf %106, %107 : vector<8x36xf32>
    %109 = math.tanh %108 : vector<8x36xf32>
    %110 = arith.mulf %105, %109 : vector<8x36xf32>
    %c3 = arith.constant 3 : index
    %c0_33 = arith.constant 0 : index
    %c0_34 = arith.constant 0 : index
    %111 = vector.load %arg24[%c3, %c0_33, %c0_34] : memref<8x8x36xf32, #tpu.memory_space<vmem>>, vector<1x8x36xf32>
    %112 = vector.shape_cast %111 : vector<1x8x36xf32> to vector<8x36xf32>
    %113 = vector.shape_cast %110 : vector<8x36xf32> to vector<1x8x36xf32>
    tpu.vector_store %arg24[%c3, %c0_33, %c0_34], %113 {strides = array<i32>} : memref<8x8x36xf32, #tpu.memory_space<vmem>>, vector<1x8x36xf32>,
    %114 = vector.extract_strided_slice %18 {offsets = [4, 0, 0], sizes = [1, 8, 144], strides = [1, 1, 1]} : vector<8x8x144xf32> to vector<1x8x144xf32>
    %115 = vector.shape_cast %114 : vector<1x8x144xf32> to vector<8x144xf32>
    %cst_35 = arith.constant dense<0.000000e+00> : vector<8x144xf32>
    %116 = tpu.matmul %110, %19, %cst_35 {dimension_numbers = #tpu.dot_dimension_numbers<[1], [0], [0], [1], [0, 0, 1, 1], [], []>} : vector<8x36xf32>, vector<36x144xf32>, vector<8x144xf32> -> vector<8x144xf32>
    %117 = arith.addf %115, %116 : vector<8x144xf32>
    %118 = vector.extract_strided_slice %117 {offsets = [0, 0], sizes = [8, 108], strides = [1, 1]} : vector<8x144xf32> to vector<8x108xf32>
    %119 = arith.negf %118 : vector<8x108xf32>
    %120 = math.exp %119 : vector<8x108xf32>
    %cst_36 = arith.constant 1.000000e+00 : f32
    %121 = vector.broadcast %cst_36 : f32 to vector<8x108xf32>
    %122 = arith.addf %121, %120 : vector<8x108xf32>
    %123 = arith.divf %121, %122 : vector<8x108xf32>
    %124 = vector.extract_strided_slice %117 {offsets = [0, 108], sizes = [8, 36], strides = [1, 1]} : vector<8x144xf32> to vector<8x36xf32>
    %125 = math.tanh %124 : vector<8x36xf32>
    %126 = vector.extract_strided_slice %123 {offsets = [0, 0], sizes = [8, 36], strides = [1, 1]} : vector<8x108xf32> to vector<8x36xf32>
    %127 = vector.extract_strided_slice %123 {offsets = [0, 36], sizes = [8, 36], strides = [1, 1]} : vector<8x108xf32> to vector<8x36xf32>
    %128 = vector.extract_strided_slice %123 {offsets = [0, 72], sizes = [8, 36], strides = [1, 1]} : vector<8x108xf32> to vector<8x36xf32>
    %129 = arith.mulf %127, %108 : vector<8x36xf32>
    %130 = arith.mulf %126, %125 : vector<8x36xf32>
    %131 = arith.addf %129, %130 : vector<8x36xf32>
    %132 = math.tanh %131 : vector<8x36xf32>
    %133 = arith.mulf %128, %132 : vector<8x36xf32>
    %c4 = arith.constant 4 : index
    %c0_37 = arith.constant 0 : index
    %c0_38 = arith.constant 0 : index
    %134 = vector.load %arg24[%c4, %c0_37, %c0_38] : memref<8x8x36xf32, #tpu.memory_space<vmem>>, vector<1x8x36xf32>
    %135 = vector.shape_cast %134 : vector<1x8x36xf32> to vector<8x36xf32>
    %136 = vector.shape_cast %133 : vector<8x36xf32> to vector<1x8x36xf32>
    tpu.vector_store %arg24[%c4, %c0_37, %c0_38], %136 {strides = array<i32>} : memref<8x8x36xf32, #tpu.memory_space<vmem>>, vector<1x8x36xf32>,
    %137 = vector.extract_strided_slice %18 {offsets = [5, 0, 0], sizes = [1, 8, 144], strides = [1, 1, 1]} : vector<8x8x144xf32> to vector<1x8x144xf32>
    %138 = vector.shape_cast %137 : vector<1x8x144xf32> to vector<8x144xf32>
    %cst_39 = arith.constant dense<0.000000e+00> : vector<8x144xf32>
    %139 = tpu.matmul %133, %19, %cst_39 {dimension_numbers = #tpu.dot_dimension_numbers<[1], [0], [0], [1], [0, 0, 1, 1], [], []>} : vector<8x36xf32>, vector<36x144xf32>, vector<8x144xf32> -> vector<8x144xf32>
    %140 = arith.addf %138, %139 : vector<8x144xf32>
    %141 = vector.extract_strided_slice %140 {offsets = [0, 0], sizes = [8, 108], strides = [1, 1]} : vector<8x144xf32> to vector<8x108xf32>
    %142 = arith.negf %141 : vector<8x108xf32>
    %143 = math.exp %142 : vector<8x108xf32>
    %cst_40 = arith.constant 1.000000e+00 : f32
    %144 = vector.broadcast %cst_40 : f32 to vector<8x108xf32>
    %145 = arith.addf %144, %143 : vector<8x108xf32>
    %146 = arith.divf %144, %145 : vector<8x108xf32>
    %147 = vector.extract_strided_slice %140 {offsets = [0, 108], sizes = [8, 36], strides = [1, 1]} : vector<8x144xf32> to vector<8x36xf32>
    %148 = math.tanh %147 : vector<8x36xf32>
    %149 = vector.extract_strided_slice %146 {offsets = [0, 0], sizes = [8, 36], strides = [1, 1]} : vector<8x108xf32> to vector<8x36xf32>
    %150 = vector.extract_strided_slice %146 {offsets = [0, 36], sizes = [8, 36], strides = [1, 1]} : vector<8x108xf32> to vector<8x36xf32>
    %151 = vector.extract_strided_slice %146 {offsets = [0, 72], sizes = [8, 36], strides = [1, 1]} : vector<8x108xf32> to vector<8x36xf32>
    %152 = arith.mulf %150, %131 : vector<8x36xf32>
    %153 = arith.mulf %149, %148 : vector<8x36xf32>
    %154 = arith.addf %152, %153 : vector<8x36xf32>
    %155 = math.tanh %154 : vector<8x36xf32>
    %156 = arith.mulf %151, %155 : vector<8x36xf32>
    %c5 = arith.constant 5 : index
    %c0_41 = arith.constant 0 : index
    %c0_42 = arith.constant 0 : index
    %157 = vector.load %arg24[%c5, %c0_41, %c0_42] : memref<8x8x36xf32, #tpu.memory_space<vmem>>, vector<1x8x36xf32>
    %158 = vector.shape_cast %157 : vector<1x8x36xf32> to vector<8x36xf32>
    %159 = vector.shape_cast %156 : vector<8x36xf32> to vector<1x8x36xf32>
    tpu.vector_store %arg24[%c5, %c0_41, %c0_42], %159 {strides = array<i32>} : memref<8x8x36xf32, #tpu.memory_space<vmem>>, vector<1x8x36xf32>,
    %160 = vector.extract_strided_slice %18 {offsets = [6, 0, 0], sizes = [1, 8, 144], strides = [1, 1, 1]} : vector<8x8x144xf32> to vector<1x8x144xf32>
    %161 = vector.shape_cast %160 : vector<1x8x144xf32> to vector<8x144xf32>
    %cst_43 = arith.constant dense<0.000000e+00> : vector<8x144xf32>
    %162 = tpu.matmul %156, %19, %cst_43 {dimension_numbers = #tpu.dot_dimension_numbers<[1], [0], [0], [1], [0, 0, 1, 1], [], []>} : vector<8x36xf32>, vector<36x144xf32>, vector<8x144xf32> -> vector<8x144xf32>
    %163 = arith.addf %161, %162 : vector<8x144xf32>
    %164 = vector.extract_strided_slice %163 {offsets = [0, 0], sizes = [8, 108], strides = [1, 1]} : vector<8x144xf32> to vector<8x108xf32>
    %165 = arith.negf %164 : vector<8x108xf32>
    %166 = math.exp %165 : vector<8x108xf32>
    %cst_44 = arith.constant 1.000000e+00 : f32
    %167 = vector.broadcast %cst_44 : f32 to vector<8x108xf32>
    %168 = arith.addf %167, %166 : vector<8x108xf32>
    %169 = arith.divf %167, %168 : vector<8x108xf32>
    %170 = vector.extract_strided_slice %163 {offsets = [0, 108], sizes = [8, 36], strides = [1, 1]} : vector<8x144xf32> to vector<8x36xf32>
    %171 = math.tanh %170 : vector<8x36xf32>
    %172 = vector.extract_strided_slice %169 {offsets = [0, 0], sizes = [8, 36], strides = [1, 1]} : vector<8x108xf32> to vector<8x36xf32>
    %173 = vector.extract_strided_slice %169 {offsets = [0, 36], sizes = [8, 36], strides = [1, 1]} : vector<8x108xf32> to vector<8x36xf32>
    %174 = vector.extract_strided_slice %169 {offsets = [0, 72], sizes = [8, 36], strides = [1, 1]} : vector<8x108xf32> to vector<8x36xf32>
    %175 = arith.mulf %173, %154 : vector<8x36xf32>
    %176 = arith.mulf %172, %171 : vector<8x36xf32>
    %177 = arith.addf %175, %176 : vector<8x36xf32>
    %178 = math.tanh %177 : vector<8x36xf32>
    %179 = arith.mulf %174, %178 : vector<8x36xf32>
    %c6 = arith.constant 6 : index
    %c0_45 = arith.constant 0 : index
    %c0_46 = arith.constant 0 : index
    %180 = vector.load %arg24[%c6, %c0_45, %c0_46] : memref<8x8x36xf32, #tpu.memory_space<vmem>>, vector<1x8x36xf32>
    %181 = vector.shape_cast %180 : vector<1x8x36xf32> to vector<8x36xf32>
    %182 = vector.shape_cast %179 : vector<8x36xf32> to vector<1x8x36xf32>
    tpu.vector_store %arg24[%c6, %c0_45, %c0_46], %182 {strides = array<i32>} : memref<8x8x36xf32, #tpu.memory_space<vmem>>, vector<1x8x36xf32>,
    %183 = vector.extract_strided_slice %18 {offsets = [7, 0, 0], sizes = [1, 8, 144], strides = [1, 1, 1]} : vector<8x8x144xf32> to vector<1x8x144xf32>
    %184 = vector.shape_cast %183 : vector<1x8x144xf32> to vector<8x144xf32>
    %cst_47 = arith.constant dense<0.000000e+00> : vector<8x144xf32>
    %185 = tpu.matmul %179, %19, %cst_47 {dimension_numbers = #tpu.dot_dimension_numbers<[1], [0], [0], [1], [0, 0, 1, 1], [], []>} : vector<8x36xf32>, vector<36x144xf32>, vector<8x144xf32> -> vector<8x144xf32>
    %186 = arith.addf %184, %185 : vector<8x144xf32>
    %187 = vector.extract_strided_slice %186 {offsets = [0, 0], sizes = [8, 108], strides = [1, 1]} : vector<8x144xf32> to vector<8x108xf32>
    %188 = arith.negf %187 : vector<8x108xf32>
    %189 = math.exp %188 : vector<8x108xf32>
    %cst_48 = arith.constant 1.000000e+00 : f32
    %190 = vector.broadcast %cst_48 : f32 to vector<8x108xf32>
    %191 = arith.addf %190, %189 : vector<8x108xf32>
    %192 = arith.divf %190, %191 : vector<8x108xf32>
    %193 = vector.extract_strided_slice %186 {offsets = [0, 108], sizes = [8, 36], strides = [1, 1]} : vector<8x144xf32> to vector<8x36xf32>
    %194 = math.tanh %193 : vector<8x36xf32>
    %195 = vector.extract_strided_slice %192 {offsets = [0, 0], sizes = [8, 36], strides = [1, 1]} : vector<8x108xf32> to vector<8x36xf32>
    %196 = vector.extract_strided_slice %192 {offsets = [0, 36], sizes = [8, 36], strides = [1, 1]} : vector<8x108xf32> to vector<8x36xf32>
    %197 = vector.extract_strided_slice %192 {offsets = [0, 72], sizes = [8, 36], strides = [1, 1]} : vector<8x108xf32> to vector<8x36xf32>
    %198 = arith.mulf %196, %177 : vector<8x36xf32>
    %199 = arith.mulf %195, %194 : vector<8x36xf32>
    %200 = arith.addf %198, %199 : vector<8x36xf32>
    %201 = math.tanh %200 : vector<8x36xf32>
    %202 = arith.mulf %197, %201 : vector<8x36xf32>
    %c7 = arith.constant 7 : index
    %c0_49 = arith.constant 0 : index
    %c0_50 = arith.constant 0 : index
    %203 = vector.load %arg24[%c7, %c0_49, %c0_50] : memref<8x8x36xf32, #tpu.memory_space<vmem>>, vector<1x8x36xf32>
    %204 = vector.shape_cast %203 : vector<1x8x36xf32> to vector<8x36xf32>
    %205 = vector.shape_cast %202 : vector<8x36xf32> to vector<1x8x36xf32>
    tpu.vector_store %arg24[%c7, %c0_49, %c0_50], %205 {strides = array<i32>} : memref<8x8x36xf32, #tpu.memory_space<vmem>>, vector<1x8x36xf32>,
    %c0_51 = arith.constant 0 : index
    %c0_52 = arith.constant 0 : index
    %c0_53 = arith.constant 0 : index
    %206 = vector.load %arg24[%c0_51, %c0_52, %c0_53] : memref<8x8x36xf32, #tpu.memory_space<vmem>>, vector<8x8x36xf32>
    %207 = tpu.transpose %206, [1, 0, 2] : vector<8x8x36xf32> -> vector<8x8x36xf32>
    %208 = vector.extract_strided_slice %207 {offsets = [0, 0, 0], sizes = [8, 8, 16], strides = [1, 1, 1]} : vector<8x8x36xf32> to vector<8x8x16xf32>
    %209 = vector.extract_strided_slice %207 {offsets = [0, 0, 16], sizes = [8, 8, 12], strides = [1, 1, 1]} : vector<8x8x36xf32> to vector<8x8x12xf32>
    %210 = vector.extract_strided_slice %207 {offsets = [0, 0, 28], sizes = [8, 8, 8], strides = [1, 1, 1]} : vector<8x8x36xf32> to vector<8x8x8xf32>
    %211 = vector.shape_cast %209 : vector<8x8x12xf32> to vector<64x12xf32>
    %c0_54 = arith.constant 0 : index
    %c0_55 = arith.constant 0 : index
    %212 = vector.load %arg10[%c0_54, %c0_55] : memref<12x16xf32, #tpu.memory_space<vmem>>, vector<12x16xf32>
    %cst_56 = arith.constant dense<0.000000e+00> : vector<64x16xf32>
    %213 = tpu.matmul %211, %212, %cst_56 {dimension_numbers = #tpu.dot_dimension_numbers<[1], [0], [0], [1], [0, 0, 1, 1], [], []>} : vector<64x12xf32>, vector<12x16xf32>, vector<64x16xf32> -> vector<64x16xf32>
    %214 = vector.shape_cast %213 : vector<64x16xf32> to vector<8x8x16xf32>
    "tpu.trace_start"() <{level = 10 : i32, message = "bsd,btd->bst"}> : () -> ()
    %cst_57 = arith.constant dense<0.000000e+00> : vector<8x8x8xf32>
    %215 = tpu.matmul %208, %214, %cst_57 {dimension_numbers = #tpu.dot_dimension_numbers<[2], [2], [1], [1], [0, 0, 0, 1, 1, 1], [0], [0]>} : vector<8x8x16xf32>, vector<8x8x16xf32>, vector<8x8x8xf32> -> vector<8x8x8xf32>
    "tpu.trace_stop"() : () -> ()
    %cst_58 = arith.constant dense<0xFF800000> : vector<8x8xf32>
    %216 = vector.multi_reduction <maximumf>, %215, %cst_58 [2] : vector<8x8x8xf32> to vector<8x8xf32>
    %217 = vector.shape_cast %216 : vector<8x8xf32> to vector<8x8x1xf32>
    %218 = vector.broadcast %217 : vector<8x8x1xf32> to vector<8x8x8xf32>
    %219 = arith.subf %215, %218 : vector<8x8x8xf32>
    %220 = math.exp %219 : vector<8x8x8xf32>
    %cst_59 = arith.constant dense<0.000000e+00> : vector<8x8xf32>
    %221 = vector.multi_reduction <add>, %220, %cst_59 [2] : vector<8x8x8xf32> to vector<8x8xf32>
    %222 = vector.shape_cast %221 : vector<8x8xf32> to vector<8x8x1xf32>
    %223 = tpu.reciprocal %222 {approx = true} : vector<8x8x1xf32> -> vector<8x8x1xf32>
    %224 = vector.broadcast %223 : vector<8x8x1xf32> to vector<8x8x8xf32>
    %225 = arith.mulf %220, %224 : vector<8x8x8xf32>
    "tpu.trace_start"() <{level = 10 : i32, message = "bst,bta->bsa"}> : () -> ()
    %cst_60 = arith.constant dense<0.000000e+00> : vector<8x8x12xf32>
    %226 = tpu.matmul %225, %209, %cst_60 {dimension_numbers = #tpu.dot_dimension_numbers<[2], [1], [1], [2], [0, 0, 0, 1, 1, 2], [0], [0]>} : vector<8x8x8xf32>, vector<8x8x12xf32>, vector<8x8x12xf32> -> vector<8x8x12xf32>
    "tpu.trace_stop"() : () -> ()
    %227 = vector.shape_cast %210 : vector<8x8x8xf32> to vector<64x8xf32>
    %c0_61 = arith.constant 0 : index
    %c0_62 = arith.constant 0 : index
    %228 = vector.load %arg11[%c0_61, %c0_62] : memref<8x16xf32, #tpu.memory_space<vmem>>, vector<8x16xf32>
    %cst_63 = arith.constant dense<0.000000e+00> : vector<64x16xf32>
    %229 = tpu.matmul %227, %228, %cst_63 {dimension_numbers = #tpu.dot_dimension_numbers<[1], [0], [0], [1], [0, 0, 1, 1], [], []>} : vector<64x8xf32>, vector<8x16xf32>, vector<64x16xf32> -> vector<64x16xf32>
    %230 = vector.shape_cast %229 : vector<64x16xf32> to vector<8x8x16xf32>
    "tpu.trace_start"() <{level = 10 : i32, message = "bsd,btd->bst"}> : () -> ()
    %cst_64 = arith.constant dense<0.000000e+00> : vector<8x8x8xf32>
    %231 = tpu.matmul %208, %230, %cst_64 {dimension_numbers = #tpu.dot_dimension_numbers<[2], [2], [1], [1], [0, 0, 0, 1, 1, 1], [0], [0]>} : vector<8x8x16xf32>, vector<8x8x16xf32>, vector<8x8x8xf32> -> vector<8x8x8xf32>
    "tpu.trace_stop"() : () -> ()
    %cst_65 = arith.constant dense<0xFF800000> : vector<8x8xf32>
    %232 = vector.multi_reduction <maximumf>, %231, %cst_65 [2] : vector<8x8x8xf32> to vector<8x8xf32>
    %233 = vector.shape_cast %232 : vector<8x8xf32> to vector<8x8x1xf32>
    %234 = vector.broadcast %233 : vector<8x8x1xf32> to vector<8x8x8xf32>
    %235 = arith.subf %231, %234 : vector<8x8x8xf32>
    %236 = math.exp %235 : vector<8x8x8xf32>
    %cst_66 = arith.constant dense<0.000000e+00> : vector<8x8xf32>
    %237 = vector.multi_reduction <add>, %236, %cst_66 [2] : vector<8x8x8xf32> to vector<8x8xf32>
    %238 = vector.shape_cast %237 : vector<8x8xf32> to vector<8x8x1xf32>
    %239 = tpu.reciprocal %238 {approx = true} : vector<8x8x1xf32> -> vector<8x8x1xf32>
    %240 = vector.broadcast %239 : vector<8x8x1xf32> to vector<8x8x8xf32>
    %241 = arith.mulf %236, %240 : vector<8x8x8xf32>
    "tpu.trace_start"() <{level = 10 : i32, message = "bst,bta->bsa"}> : () -> ()
    %cst_67 = arith.constant dense<0.000000e+00> : vector<8x8x8xf32>
    %242 = tpu.matmul %241, %210, %cst_67 {dimension_numbers = #tpu.dot_dimension_numbers<[2], [1], [1], [2], [0, 0, 0, 1, 1, 2], [0], [0]>} : vector<8x8x8xf32>, vector<8x8x8xf32>, vector<8x8x8xf32> -> vector<8x8x8xf32>
    "tpu.trace_stop"() : () -> ()
    %c0_68 = arith.constant 0 : index
    %c0_69 = arith.constant 0 : index
    %243 = vector.load %arg7[%c0_68, %c0_69] : memref<56x128xf32, #tpu.memory_space<vmem>>, vector<56x128xf32>
    %244 = vector.shape_cast %226 : vector<8x8x12xf32> to vector<64x12xf32>
    %245 = vector.extract_strided_slice %243 {offsets = [0, 0], sizes = [12, 128], strides = [1, 1]} : vector<56x128xf32> to vector<12x128xf32>
    %cst_70 = arith.constant dense<0.000000e+00> : vector<64x128xf32>
    %246 = tpu.matmul %244, %245, %cst_70 {dimension_numbers = #tpu.dot_dimension_numbers<[1], [0], [0], [1], [0, 0, 1, 1], [], []>} : vector<64x12xf32>, vector<12x128xf32>, vector<64x128xf32> -> vector<64x128xf32>
    %247 = vector.shape_cast %209 : vector<8x8x12xf32> to vector<64x12xf32>
    %248 = vector.extract_strided_slice %243 {offsets = [12, 0], sizes = [12, 128], strides = [1, 1]} : vector<56x128xf32> to vector<12x128xf32>
    %cst_71 = arith.constant dense<0.000000e+00> : vector<64x128xf32>
    %249 = tpu.matmul %247, %248, %cst_71 {dimension_numbers = #tpu.dot_dimension_numbers<[1], [0], [0], [1], [0, 0, 1, 1], [], []>} : vector<64x12xf32>, vector<12x128xf32>, vector<64x128xf32> -> vector<64x128xf32>
    %250 = arith.addf %246, %249 : vector<64x128xf32>
    %251 = vector.shape_cast %242 : vector<8x8x8xf32> to vector<64x8xf32>
    %252 = vector.extract_strided_slice %243 {offsets = [24, 0], sizes = [8, 128], strides = [1, 1]} : vector<56x128xf32> to vector<8x128xf32>
    %cst_72 = arith.constant dense<0.000000e+00> : vector<64x128xf32>
    %253 = tpu.matmul %251, %252, %cst_72 {dimension_numbers = #tpu.dot_dimension_numbers<[1], [0], [0], [1], [0, 0, 1, 1], [], []>} : vector<64x8xf32>, vector<8x128xf32>, vector<64x128xf32> -> vector<64x128xf32>
    %254 = arith.addf %250, %253 : vector<64x128xf32>
    %255 = vector.shape_cast %210 : vector<8x8x8xf32> to vector<64x8xf32>
    %256 = vector.extract_strided_slice %243 {offsets = [32, 0], sizes = [8, 128], strides = [1, 1]} : vector<56x128xf32> to vector<8x128xf32>
    %cst_73 = arith.constant dense<0.000000e+00> : vector<64x128xf32>
    %257 = tpu.matmul %255, %256, %cst_73 {dimension_numbers = #tpu.dot_dimension_numbers<[1], [0], [0], [1], [0, 0, 1, 1], [], []>} : vector<64x8xf32>, vector<8x128xf32>, vector<64x128xf32> -> vector<64x128xf32>
    %258 = arith.addf %254, %257 : vector<64x128xf32>
    %259 = vector.shape_cast %208 : vector<8x8x16xf32> to vector<64x16xf32>
    %260 = vector.extract_strided_slice %243 {offsets = [40, 0], sizes = [16, 128], strides = [1, 1]} : vector<56x128xf32> to vector<16x128xf32>
    %cst_74 = arith.constant dense<0.000000e+00> : vector<64x128xf32>
    %261 = tpu.matmul %259, %260, %cst_74 {dimension_numbers = #tpu.dot_dimension_numbers<[1], [0], [0], [1], [0, 0, 1, 1], [], []>} : vector<64x16xf32>, vector<16x128xf32>, vector<64x128xf32> -> vector<64x128xf32>
    %262 = arith.addf %258, %261 : vector<64x128xf32>
    %c0_75 = arith.constant 0 : index
    %c0_76 = arith.constant 0 : index
    %263 = vector.load %arg9[%c0_75, %c0_76] : memref<1x128xf32, #tpu.memory_space<vmem>>, vector<1x128xf32>
    %264 = vector.broadcast %263 : vector<1x128xf32> to vector<64x128xf32>
    %265 = arith.addf %262, %264 : vector<64x128xf32>
    %266 = vector.shape_cast %265 : vector<64x128xf32> to vector<8x8x128xf32>
    %c0_77 = arith.constant 0 : index
    %c0_78 = arith.constant 0 : index
    %267 = vector.load %arg8[%c0_77, %c0_78] : memref<32x128xf32, #tpu.memory_space<vmem>>, vector<32x128xf32>
    %cst_79 = arith.constant 0.000000e+00 : f32
    %268 = vector.broadcast %cst_79 : f32 to vector<8x32xf32>
    %cst_80 = arith.constant 0.000000e+00 : f32
    %269 = vector.broadcast %cst_80 : f32 to vector<8x32xf32>
    %270 = vector.extract_strided_slice %266 {offsets = [0, 0, 0], sizes = [8, 1, 128], strides = [1, 1, 1]} : vector<8x8x128xf32> to vector<8x1x128xf32>
    %271 = vector.shape_cast %270 : vector<8x1x128xf32> to vector<8x128xf32>
    %cst_81 = arith.constant dense<0.000000e+00> : vector<8x128xf32>
    %272 = tpu.matmul %268, %267, %cst_81 {dimension_numbers = #tpu.dot_dimension_numbers<[1], [0], [0], [1], [0, 0, 1, 1], [], []>} : vector<8x32xf32>, vector<32x128xf32>, vector<8x128xf32> -> vector<8x128xf32>
    %273 = arith.addf %271, %272 : vector<8x128xf32>
    %274 = vector.extract_strided_slice %273 {offsets = [0, 0], sizes = [8, 96], strides = [1, 1]} : vector<8x128xf32> to vector<8x96xf32>
    %275 = arith.negf %274 : vector<8x96xf32>
    %276 = math.exp %275 : vector<8x96xf32>
    %cst_82 = arith.constant 1.000000e+00 : f32
    %277 = vector.broadcast %cst_82 : f32 to vector<8x96xf32>
    %278 = arith.addf %277, %276 : vector<8x96xf32>
    %279 = arith.divf %277, %278 : vector<8x96xf32>
    %280 = vector.extract_strided_slice %273 {offsets = [0, 96], sizes = [8, 32], strides = [1, 1]} : vector<8x128xf32> to vector<8x32xf32>
    %281 = math.tanh %280 : vector<8x32xf32>
    %282 = vector.extract_strided_slice %279 {offsets = [0, 0], sizes = [8, 32], strides = [1, 1]} : vector<8x96xf32> to vector<8x32xf32>
    %283 = vector.extract_strided_slice %279 {offsets = [0, 32], sizes = [8, 32], strides = [1, 1]} : vector<8x96xf32> to vector<8x32xf32>
    %284 = vector.extract_strided_slice %279 {offsets = [0, 64], sizes = [8, 32], strides = [1, 1]} : vector<8x96xf32> to vector<8x32xf32>
    %285 = arith.mulf %283, %269 : vector<8x32xf32>
    %286 = arith.mulf %282, %281 : vector<8x32xf32>
    %287 = arith.addf %285, %286 : vector<8x32xf32>
    %288 = math.tanh %287 : vector<8x32xf32>
    %289 = arith.mulf %284, %288 : vector<8x32xf32>
    %c0_83 = arith.constant 0 : index
    %c0_84 = arith.constant 0 : index
    %c0_85 = arith.constant 0 : index
    %290 = vector.load %arg25[%c0_83, %c0_84, %c0_85] : memref<8x8x32xf32, #tpu.memory_space<vmem>>, vector<1x8x32xf32>
    %291 = vector.shape_cast %290 : vector<1x8x32xf32> to vector<8x32xf32>
    %292 = vector.shape_cast %289 : vector<8x32xf32> to vector<1x8x32xf32>
    tpu.vector_store %arg25[%c0_83, %c0_84, %c0_85], %292 {strides = array<i32>} : memref<8x8x32xf32, #tpu.memory_space<vmem>>, vector<1x8x32xf32>,
    %293 = vector.extract_strided_slice %266 {offsets = [0, 1, 0], sizes = [8, 1, 128], strides = [1, 1, 1]} : vector<8x8x128xf32> to vector<8x1x128xf32>
    %294 = vector.shape_cast %293 : vector<8x1x128xf32> to vector<8x128xf32>
    %cst_86 = arith.constant dense<0.000000e+00> : vector<8x128xf32>
    %295 = tpu.matmul %289, %267, %cst_86 {dimension_numbers = #tpu.dot_dimension_numbers<[1], [0], [0], [1], [0, 0, 1, 1], [], []>} : vector<8x32xf32>, vector<32x128xf32>, vector<8x128xf32> -> vector<8x128xf32>
    %296 = arith.addf %294, %295 : vector<8x128xf32>
    %297 = vector.extract_strided_slice %296 {offsets = [0, 0], sizes = [8, 96], strides = [1, 1]} : vector<8x128xf32> to vector<8x96xf32>
    %298 = arith.negf %297 : vector<8x96xf32>
    %299 = math.exp %298 : vector<8x96xf32>
    %cst_87 = arith.constant 1.000000e+00 : f32
    %300 = vector.broadcast %cst_87 : f32 to vector<8x96xf32>
    %301 = arith.addf %300, %299 : vector<8x96xf32>
    %302 = arith.divf %300, %301 : vector<8x96xf32>
    %303 = vector.extract_strided_slice %296 {offsets = [0, 96], sizes = [8, 32], strides = [1, 1]} : vector<8x128xf32> to vector<8x32xf32>
    %304 = math.tanh %303 : vector<8x32xf32>
    %305 = vector.extract_strided_slice %302 {offsets = [0, 0], sizes = [8, 32], strides = [1, 1]} : vector<8x96xf32> to vector<8x32xf32>
    %306 = vector.extract_strided_slice %302 {offsets = [0, 32], sizes = [8, 32], strides = [1, 1]} : vector<8x96xf32> to vector<8x32xf32>
    %307 = vector.extract_strided_slice %302 {offsets = [0, 64], sizes = [8, 32], strides = [1, 1]} : vector<8x96xf32> to vector<8x32xf32>
    %308 = arith.mulf %306, %287 : vector<8x32xf32>
    %309 = arith.mulf %305, %304 : vector<8x32xf32>
    %310 = arith.addf %308, %309 : vector<8x32xf32>
    %311 = math.tanh %310 : vector<8x32xf32>
    %312 = arith.mulf %307, %311 : vector<8x32xf32>
    %c1_88 = arith.constant 1 : index
    %c0_89 = arith.constant 0 : index
    %c0_90 = arith.constant 0 : index
    %313 = vector.load %arg25[%c1_88, %c0_89, %c0_90] : memref<8x8x32xf32, #tpu.memory_space<vmem>>, vector<1x8x32xf32>
    %314 = vector.shape_cast %313 : vector<1x8x32xf32> to vector<8x32xf32>
    %315 = vector.shape_cast %312 : vector<8x32xf32> to vector<1x8x32xf32>
    tpu.vector_store %arg25[%c1_88, %c0_89, %c0_90], %315 {strides = array<i32>} : memref<8x8x32xf32, #tpu.memory_space<vmem>>, vector<1x8x32xf32>,
    %316 = vector.extract_strided_slice %266 {offsets = [0, 2, 0], sizes = [8, 1, 128], strides = [1, 1, 1]} : vector<8x8x128xf32> to vector<8x1x128xf32>
    %317 = vector.shape_cast %316 : vector<8x1x128xf32> to vector<8x128xf32>
    %cst_91 = arith.constant dense<0.000000e+00> : vector<8x128xf32>
    %318 = tpu.matmul %312, %267, %cst_91 {dimension_numbers = #tpu.dot_dimension_numbers<[1], [0], [0], [1], [0, 0, 1, 1], [], []>} : vector<8x32xf32>, vector<32x128xf32>, vector<8x128xf32> -> vector<8x128xf32>
    %319 = arith.addf %317, %318 : vector<8x128xf32>
    %320 = vector.extract_strided_slice %319 {offsets = [0, 0], sizes = [8, 96], strides = [1, 1]} : vector<8x128xf32> to vector<8x96xf32>
    %321 = arith.negf %320 : vector<8x96xf32>
    %322 = math.exp %321 : vector<8x96xf32>
    %cst_92 = arith.constant 1.000000e+00 : f32
    %323 = vector.broadcast %cst_92 : f32 to vector<8x96xf32>
    %324 = arith.addf %323, %322 : vector<8x96xf32>
    %325 = arith.divf %323, %324 : vector<8x96xf32>
    %326 = vector.extract_strided_slice %319 {offsets = [0, 96], sizes = [8, 32], strides = [1, 1]} : vector<8x128xf32> to vector<8x32xf32>
    %327 = math.tanh %326 : vector<8x32xf32>
    %328 = vector.extract_strided_slice %325 {offsets = [0, 0], sizes = [8, 32], strides = [1, 1]} : vector<8x96xf32> to vector<8x32xf32>
    %329 = vector.extract_strided_slice %325 {offsets = [0, 32], sizes = [8, 32], strides = [1, 1]} : vector<8x96xf32> to vector<8x32xf32>
    %330 = vector.extract_strided_slice %325 {offsets = [0, 64], sizes = [8, 32], strides = [1, 1]} : vector<8x96xf32> to vector<8x32xf32>
    %331 = arith.mulf %329, %310 : vector<8x32xf32>
    %332 = arith.mulf %328, %327 : vector<8x32xf32>
    %333 = arith.addf %331, %332 : vector<8x32xf32>
    %334 = math.tanh %333 : vector<8x32xf32>
    %335 = arith.mulf %330, %334 : vector<8x32xf32>
    %c2_93 = arith.constant 2 : index
    %c0_94 = arith.constant 0 : index
    %c0_95 = arith.constant 0 : index
    %336 = vector.load %arg25[%c2_93, %c0_94, %c0_95] : memref<8x8x32xf32, #tpu.memory_space<vmem>>, vector<1x8x32xf32>
    %337 = vector.shape_cast %336 : vector<1x8x32xf32> to vector<8x32xf32>
    %338 = vector.shape_cast %335 : vector<8x32xf32> to vector<1x8x32xf32>
    tpu.vector_store %arg25[%c2_93, %c0_94, %c0_95], %338 {strides = array<i32>} : memref<8x8x32xf32, #tpu.memory_space<vmem>>, vector<1x8x32xf32>,
    %339 = vector.extract_strided_slice %266 {offsets = [0, 3, 0], sizes = [8, 1, 128], strides = [1, 1, 1]} : vector<8x8x128xf32> to vector<8x1x128xf32>
    %340 = vector.shape_cast %339 : vector<8x1x128xf32> to vector<8x128xf32>
    %cst_96 = arith.constant dense<0.000000e+00> : vector<8x128xf32>
    %341 = tpu.matmul %335, %267, %cst_96 {dimension_numbers = #tpu.dot_dimension_numbers<[1], [0], [0], [1], [0, 0, 1, 1], [], []>} : vector<8x32xf32>, vector<32x128xf32>, vector<8x128xf32> -> vector<8x128xf32>
    %342 = arith.addf %340, %341 : vector<8x128xf32>
    %343 = vector.extract_strided_slice %342 {offsets = [0, 0], sizes = [8, 96], strides = [1, 1]} : vector<8x128xf32> to vector<8x96xf32>
    %344 = arith.negf %343 : vector<8x96xf32>
    %345 = math.exp %344 : vector<8x96xf32>
    %cst_97 = arith.constant 1.000000e+00 : f32
    %346 = vector.broadcast %cst_97 : f32 to vector<8x96xf32>
    %347 = arith.addf %346, %345 : vector<8x96xf32>
    %348 = arith.divf %346, %347 : vector<8x96xf32>
    %349 = vector.extract_strided_slice %342 {offsets = [0, 96], sizes = [8, 32], strides = [1, 1]} : vector<8x128xf32> to vector<8x32xf32>
    %350 = math.tanh %349 : vector<8x32xf32>
    %351 = vector.extract_strided_slice %348 {offsets = [0, 0], sizes = [8, 32], strides = [1, 1]} : vector<8x96xf32> to vector<8x32xf32>
    %352 = vector.extract_strided_slice %348 {offsets = [0, 32], sizes = [8, 32], strides = [1, 1]} : vector<8x96xf32> to vector<8x32xf32>
    %353 = vector.extract_strided_slice %348 {offsets = [0, 64], sizes = [8, 32], strides = [1, 1]} : vector<8x96xf32> to vector<8x32xf32>
    %354 = arith.mulf %352, %333 : vector<8x32xf32>
    %355 = arith.mulf %351, %350 : vector<8x32xf32>
    %356 = arith.addf %354, %355 : vector<8x32xf32>
    %357 = math.tanh %356 : vector<8x32xf32>
    %358 = arith.mulf %353, %357 : vector<8x32xf32>
    %c3_98 = arith.constant 3 : index
    %c0_99 = arith.constant 0 : index
    %c0_100 = arith.constant 0 : index
    %359 = vector.load %arg25[%c3_98, %c0_99, %c0_100] : memref<8x8x32xf32, #tpu.memory_space<vmem>>, vector<1x8x32xf32>
    %360 = vector.shape_cast %359 : vector<1x8x32xf32> to vector<8x32xf32>
    %361 = vector.shape_cast %358 : vector<8x32xf32> to vector<1x8x32xf32>
    tpu.vector_store %arg25[%c3_98, %c0_99, %c0_100], %361 {strides = array<i32>} : memref<8x8x32xf32, #tpu.memory_space<vmem>>, vector<1x8x32xf32>,
    %362 = vector.extract_strided_slice %266 {offsets = [0, 4, 0], sizes = [8, 1, 128], strides = [1, 1, 1]} : vector<8x8x128xf32> to vector<8x1x128xf32>
    %363 = vector.shape_cast %362 : vector<8x1x128xf32> to vector<8x128xf32>
    %cst_101 = arith.constant dense<0.000000e+00> : vector<8x128xf32>
    %364 = tpu.matmul %358, %267, %cst_101 {dimension_numbers = #tpu.dot_dimension_numbers<[1], [0], [0], [1], [0, 0, 1, 1], [], []>} : vector<8x32xf32>, vector<32x128xf32>, vector<8x128xf32> -> vector<8x128xf32>
    %365 = arith.addf %363, %364 : vector<8x128xf32>
    %366 = vector.extract_strided_slice %365 {offsets = [0, 0], sizes = [8, 96], strides = [1, 1]} : vector<8x128xf32> to vector<8x96xf32>
    %367 = arith.negf %366 : vector<8x96xf32>
    %368 = math.exp %367 : vector<8x96xf32>
    %cst_102 = arith.constant 1.000000e+00 : f32
    %369 = vector.broadcast %cst_102 : f32 to vector<8x96xf32>
    %370 = arith.addf %369, %368 : vector<8x96xf32>
    %371 = arith.divf %369, %370 : vector<8x96xf32>
    %372 = vector.extract_strided_slice %365 {offsets = [0, 96], sizes = [8, 32], strides = [1, 1]} : vector<8x128xf32> to vector<8x32xf32>
    %373 = math.tanh %372 : vector<8x32xf32>
    %374 = vector.extract_strided_slice %371 {offsets = [0, 0], sizes = [8, 32], strides = [1, 1]} : vector<8x96xf32> to vector<8x32xf32>
    %375 = vector.extract_strided_slice %371 {offsets = [0, 32], sizes = [8, 32], strides = [1, 1]} : vector<8x96xf32> to vector<8x32xf32>
    %376 = vector.extract_strided_slice %371 {offsets = [0, 64], sizes = [8, 32], strides = [1, 1]} : vector<8x96xf32> to vector<8x32xf32>
    %377 = arith.mulf %375, %356 : vector<8x32xf32>
    %378 = arith.mulf %374, %373 : vector<8x32xf32>
    %379 = arith.addf %377, %378 : vector<8x32xf32>
    %380 = math.tanh %379 : vector<8x32xf32>
    %381 = arith.mulf %376, %380 : vector<8x32xf32>
    %c4_103 = arith.constant 4 : index
    %c0_104 = arith.constant 0 : index
    %c0_105 = arith.constant 0 : index
    %382 = vector.load %arg25[%c4_103, %c0_104, %c0_105] : memref<8x8x32xf32, #tpu.memory_space<vmem>>, vector<1x8x32xf32>
    %383 = vector.shape_cast %382 : vector<1x8x32xf32> to vector<8x32xf32>
    %384 = vector.shape_cast %381 : vector<8x32xf32> to vector<1x8x32xf32>
    tpu.vector_store %arg25[%c4_103, %c0_104, %c0_105], %384 {strides = array<i32>} : memref<8x8x32xf32, #tpu.memory_space<vmem>>, vector<1x8x32xf32>,
    %385 = vector.extract_strided_slice %266 {offsets = [0, 5, 0], sizes = [8, 1, 128], strides = [1, 1, 1]} : vector<8x8x128xf32> to vector<8x1x128xf32>
    %386 = vector.shape_cast %385 : vector<8x1x128xf32> to vector<8x128xf32>
    %cst_106 = arith.constant dense<0.000000e+00> : vector<8x128xf32>
    %387 = tpu.matmul %381, %267, %cst_106 {dimension_numbers = #tpu.dot_dimension_numbers<[1], [0], [0], [1], [0, 0, 1, 1], [], []>} : vector<8x32xf32>, vector<32x128xf32>, vector<8x128xf32> -> vector<8x128xf32>
    %388 = arith.addf %386, %387 : vector<8x128xf32>
    %389 = vector.extract_strided_slice %388 {offsets = [0, 0], sizes = [8, 96], strides = [1, 1]} : vector<8x128xf32> to vector<8x96xf32>
    %390 = arith.negf %389 : vector<8x96xf32>
    %391 = math.exp %390 : vector<8x96xf32>
    %cst_107 = arith.constant 1.000000e+00 : f32
    %392 = vector.broadcast %cst_107 : f32 to vector<8x96xf32>
    %393 = arith.addf %392, %391 : vector<8x96xf32>
    %394 = arith.divf %392, %393 : vector<8x96xf32>
    %395 = vector.extract_strided_slice %388 {offsets = [0, 96], sizes = [8, 32], strides = [1, 1]} : vector<8x128xf32> to vector<8x32xf32>
    %396 = math.tanh %395 : vector<8x32xf32>
    %397 = vector.extract_strided_slice %394 {offsets = [0, 0], sizes = [8, 32], strides = [1, 1]} : vector<8x96xf32> to vector<8x32xf32>
    %398 = vector.extract_strided_slice %394 {offsets = [0, 32], sizes = [8, 32], strides = [1, 1]} : vector<8x96xf32> to vector<8x32xf32>
    %399 = vector.extract_strided_slice %394 {offsets = [0, 64], sizes = [8, 32], strides = [1, 1]} : vector<8x96xf32> to vector<8x32xf32>
    %400 = arith.mulf %398, %379 : vector<8x32xf32>
    %401 = arith.mulf %397, %396 : vector<8x32xf32>
    %402 = arith.addf %400, %401 : vector<8x32xf32>
    %403 = math.tanh %402 : vector<8x32xf32>
    %404 = arith.mulf %399, %403 : vector<8x32xf32>
    %c5_108 = arith.constant 5 : index
    %c0_109 = arith.constant 0 : index
    %c0_110 = arith.constant 0 : index
    %405 = vector.load %arg25[%c5_108, %c0_109, %c0_110] : memref<8x8x32xf32, #tpu.memory_space<vmem>>, vector<1x8x32xf32>
    %406 = vector.shape_cast %405 : vector<1x8x32xf32> to vector<8x32xf32>
    %407 = vector.shape_cast %404 : vector<8x32xf32> to vector<1x8x32xf32>
    tpu.vector_store %arg25[%c5_108, %c0_109, %c0_110], %407 {strides = array<i32>} : memref<8x8x32xf32, #tpu.memory_space<vmem>>, vector<1x8x32xf32>,
    %408 = vector.extract_strided_slice %266 {offsets = [0, 6, 0], sizes = [8, 1, 128], strides = [1, 1, 1]} : vector<8x8x128xf32> to vector<8x1x128xf32>
    %409 = vector.shape_cast %408 : vector<8x1x128xf32> to vector<8x128xf32>
    %cst_111 = arith.constant dense<0.000000e+00> : vector<8x128xf32>
    %410 = tpu.matmul %404, %267, %cst_111 {dimension_numbers = #tpu.dot_dimension_numbers<[1], [0], [0], [1], [0, 0, 1, 1], [], []>} : vector<8x32xf32>, vector<32x128xf32>, vector<8x128xf32> -> vector<8x128xf32>
    %411 = arith.addf %409, %410 : vector<8x128xf32>
    %412 = vector.extract_strided_slice %411 {offsets = [0, 0], sizes = [8, 96], strides = [1, 1]} : vector<8x128xf32> to vector<8x96xf32>
    %413 = arith.negf %412 : vector<8x96xf32>
    %414 = math.exp %413 : vector<8x96xf32>
    %cst_112 = arith.constant 1.000000e+00 : f32
    %415 = vector.broadcast %cst_112 : f32 to vector<8x96xf32>
    %416 = arith.addf %415, %414 : vector<8x96xf32>
    %417 = arith.divf %415, %416 : vector<8x96xf32>
    %418 = vector.extract_strided_slice %411 {offsets = [0, 96], sizes = [8, 32], strides = [1, 1]} : vector<8x128xf32> to vector<8x32xf32>
    %419 = math.tanh %418 : vector<8x32xf32>
    %420 = vector.extract_strided_slice %417 {offsets = [0, 0], sizes = [8, 32], strides = [1, 1]} : vector<8x96xf32> to vector<8x32xf32>
    %421 = vector.extract_strided_slice %417 {offsets = [0, 32], sizes = [8, 32], strides = [1, 1]} : vector<8x96xf32> to vector<8x32xf32>
    %422 = vector.extract_strided_slice %417 {offsets = [0, 64], sizes = [8, 32], strides = [1, 1]} : vector<8x96xf32> to vector<8x32xf32>
    %423 = arith.mulf %421, %402 : vector<8x32xf32>
    %424 = arith.mulf %420, %419 : vector<8x32xf32>
    %425 = arith.addf %423, %424 : vector<8x32xf32>
    %426 = math.tanh %425 : vector<8x32xf32>
    %427 = arith.mulf %422, %426 : vector<8x32xf32>
    %c6_113 = arith.constant 6 : index
    %c0_114 = arith.constant 0 : index
    %c0_115 = arith.constant 0 : index
    %428 = vector.load %arg25[%c6_113, %c0_114, %c0_115] : memref<8x8x32xf32, #tpu.memory_space<vmem>>, vector<1x8x32xf32>
    %429 = vector.shape_cast %428 : vector<1x8x32xf32> to vector<8x32xf32>
    %430 = vector.shape_cast %427 : vector<8x32xf32> to vector<1x8x32xf32>
    tpu.vector_store %arg25[%c6_113, %c0_114, %c0_115], %430 {strides = array<i32>} : memref<8x8x32xf32, #tpu.memory_space<vmem>>, vector<1x8x32xf32>,
    %431 = vector.extract_strided_slice %266 {offsets = [0, 7, 0], sizes = [8, 1, 128], strides = [1, 1, 1]} : vector<8x8x128xf32> to vector<8x1x128xf32>
    %432 = vector.shape_cast %431 : vector<8x1x128xf32> to vector<8x128xf32>
    %cst_116 = arith.constant dense<0.000000e+00> : vector<8x128xf32>
    %433 = tpu.matmul %427, %267, %cst_116 {dimension_numbers = #tpu.dot_dimension_numbers<[1], [0], [0], [1], [0, 0, 1, 1], [], []>} : vector<8x32xf32>, vector<32x128xf32>, vector<8x128xf32> -> vector<8x128xf32>
    %434 = arith.addf %432, %433 : vector<8x128xf32>
    %435 = vector.extract_strided_slice %434 {offsets = [0, 0], sizes = [8, 96], strides = [1, 1]} : vector<8x128xf32> to vector<8x96xf32>
    %436 = arith.negf %435 : vector<8x96xf32>
    %437 = math.exp %436 : vector<8x96xf32>
    %cst_117 = arith.constant 1.000000e+00 : f32
    %438 = vector.broadcast %cst_117 : f32 to vector<8x96xf32>
    %439 = arith.addf %438, %437 : vector<8x96xf32>
    %440 = arith.divf %438, %439 : vector<8x96xf32>
    %441 = vector.extract_strided_slice %434 {offsets = [0, 96], sizes = [8, 32], strides = [1, 1]} : vector<8x128xf32> to vector<8x32xf32>
    %442 = math.tanh %441 : vector<8x32xf32>
    %443 = vector.extract_strided_slice %440 {offsets = [0, 0], sizes = [8, 32], strides = [1, 1]} : vector<8x96xf32> to vector<8x32xf32>
    %444 = vector.extract_strided_slice %440 {offsets = [0, 32], sizes = [8, 32], strides = [1, 1]} : vector<8x96xf32> to vector<8x32xf32>
    %445 = vector.extract_strided_slice %440 {offsets = [0, 64], sizes = [8, 32], strides = [1, 1]} : vector<8x96xf32> to vector<8x32xf32>
    %446 = arith.mulf %444, %425 : vector<8x32xf32>
    %447 = arith.mulf %443, %442 : vector<8x32xf32>
    %448 = arith.addf %446, %447 : vector<8x32xf32>
    %449 = math.tanh %448 : vector<8x32xf32>
    %450 = arith.mulf %445, %449 : vector<8x32xf32>
    %c7_118 = arith.constant 7 : index
    %c0_119 = arith.constant 0 : index
    %c0_120 = arith.constant 0 : index
    %451 = vector.load %arg25[%c7_118, %c0_119, %c0_120] : memref<8x8x32xf32, #tpu.memory_space<vmem>>, vector<1x8x32xf32>
    %452 = vector.shape_cast %451 : vector<1x8x32xf32> to vector<8x32xf32>
    %453 = vector.shape_cast %450 : vector<8x32xf32> to vector<1x8x32xf32>
    tpu.vector_store %arg25[%c7_118, %c0_119, %c0_120], %453 {strides = array<i32>} : memref<8x8x32xf32, #tpu.memory_space<vmem>>, vector<1x8x32xf32>,
    %c0_121 = arith.constant 0 : index
    %c0_122 = arith.constant 0 : index
    %c0_123 = arith.constant 0 : index
    %454 = vector.load %arg25[%c0_121, %c0_122, %c0_123] : memref<8x8x32xf32, #tpu.memory_space<vmem>>, vector<8x8x32xf32>
    %455 = tpu.transpose %454, [1, 0, 2] : vector<8x8x32xf32> -> vector<8x8x32xf32>
    %456 = vector.shape_cast %208 : vector<8x8x16xf32> to vector<64x16xf32>
    %c0_124 = arith.constant 0 : index
    %c0_125 = arith.constant 0 : index
    %457 = vector.load %arg12[%c0_124, %c0_125] : memref<16x16xf32, #tpu.memory_space<vmem>>, vector<16x16xf32>
    %cst_126 = arith.constant dense<0.000000e+00> : vector<64x16xf32>
    %458 = tpu.matmul %456, %457, %cst_126 {dimension_numbers = #tpu.dot_dimension_numbers<[1], [0], [0], [1], [0, 0, 1, 1], [], []>} : vector<64x16xf32>, vector<16x16xf32>, vector<64x16xf32> -> vector<64x16xf32>
    %c0_127 = arith.constant 0 : index
    %c0_128 = arith.constant 0 : index
    %459 = vector.load %arg13[%c0_127, %c0_128] : memref<1x16xf32, #tpu.memory_space<vmem>>, vector<1x16xf32>
    %460 = vector.broadcast %459 : vector<1x16xf32> to vector<64x16xf32>
    %461 = arith.addf %458, %460 : vector<64x16xf32>
    %462 = vector.shape_cast %461 : vector<64x16xf32> to vector<8x8x16xf32>
    %463 = arith.mulf %462, %462 : vector<8x8x16xf32>
    %cst_129 = arith.constant dense<0.000000e+00> : vector<8x8xf32>
    %464 = vector.multi_reduction <add>, %463, %cst_129 [2] : vector<8x8x16xf32> to vector<8x8xf32>
    %465 = vector.shape_cast %464 : vector<8x8xf32> to vector<8x8x1xf32>
    %466 = math.sqrt %465 : vector<8x8x1xf32>
    %cst_130 = arith.constant 1.000000e+00 : f32
    %467 = vector.broadcast %cst_130 : f32 to vector<8x8x1xf32>
    %468 = arith.addf %467, %465 : vector<8x8x1xf32>
    %469 = tpu.reciprocal %468 {approx = true} : vector<8x8x1xf32> -> vector<8x8x1xf32>
    %470 = arith.mulf %466, %469 : vector<8x8x1xf32>
    %471 = vector.broadcast %470 : vector<8x8x1xf32> to vector<8x8x16xf32>
    %472 = arith.mulf %471, %462 : vector<8x8x16xf32>
    %c0_131 = arith.constant 0 : index
    %c0_132 = arith.constant 0 : index
    %473 = vector.load %arg14[%c0_131, %c0_132] : memref<1x16xf32, #tpu.memory_space<vmem>>, vector<1x16xf32>
    %474 = vector.shape_cast %473 : vector<1x16xf32> to vector<1x1x16xf32>
    %475 = vector.broadcast %474 : vector<1x1x16xf32> to vector<8x8x16xf32>
    %476 = arith.mulf %472, %475 : vector<8x8x16xf32>
    %cst_133 = arith.constant dense<0.000000e+00> : vector<8x8xf32>
    %477 = vector.multi_reduction <add>, %476, %cst_133 [2] : vector<8x8x16xf32> to vector<8x8xf32>
    %c0_134 = arith.constant 0 : index
    %c0_135 = arith.constant 0 : index
    %478 = vector.load %arg15[%c0_134, %c0_135] : memref<1x1xf32, #tpu.memory_space<vmem>>, vector<1x1xf32>
    %479 = vector.broadcast %478 : vector<1x1xf32> to vector<8x8xf32>
    %480 = arith.addf %477, %479 : vector<8x8xf32>
    %c0_136 = arith.constant 0 : index
    %c0_137 = arith.constant 0 : index
    %481 = vector.load %arg23[%c0_136, %c0_137] : memref<8x8xf32, #tpu.memory_space<vmem>>, vector<8x8xf32>
    tpu.vector_store %arg23[%c0_136, %c0_137], %480 {strides = array<i32>} : memref<8x8xf32, #tpu.memory_space<vmem>>, vector<8x8xf32>,
    %482 = vector.shape_cast %455 : vector<8x8x32xf32> to vector<64x32xf32>
    %c0_138 = arith.constant 0 : index
    %c0_139 = arith.constant 0 : index
    %483 = vector.load %arg16[%c0_138, %c0_139] : memref<32x32xf32, #tpu.memory_space<vmem>>, vector<32x32xf32>
    %cst_140 = arith.constant dense<0.000000e+00> : vector<64x32xf32>
    %484 = tpu.matmul %482, %483, %cst_140 {dimension_numbers = #tpu.dot_dimension_numbers<[1], [0], [0], [1], [0, 0, 1, 1], [], []>} : vector<64x32xf32>, vector<32x32xf32>, vector<64x32xf32> -> vector<64x32xf32>
    %485 = math.tanh %484 : vector<64x32xf32>
    %486 = vector.shape_cast %485 : vector<64x32xf32> to vector<8x8x32xf32>
    %c0_141 = arith.constant 0 : index
    %c0_142 = arith.constant 0 : index
    %487 = vector.load %arg17[%c0_141, %c0_142] : memref<1x32xf32, #tpu.memory_space<vmem>>, vector<1x32xf32>
    %488 = vector.shape_cast %487 : vector<1x32xf32> to vector<1x1x32xf32>
    %489 = vector.broadcast %488 : vector<1x1x32xf32> to vector<8x8x32xf32>
    %490 = arith.mulf %486, %489 : vector<8x8x32xf32>
    %cst_143 = arith.constant dense<0.000000e+00> : vector<8x8xf32>
    %491 = vector.multi_reduction <add>, %490, %cst_143 [2] : vector<8x8x32xf32> to vector<8x8xf32>
    %cst_144 = arith.constant dense<0xFF800000> : vector<8xf32>
    %492 = vector.multi_reduction <maximumf>, %491, %cst_144 [1] : vector<8x8xf32> to vector<8xf32>
    %493 = vector.shape_cast %492 : vector<8xf32> to vector<8x1xf32>
    %494 = vector.broadcast %493 : vector<8x1xf32> to vector<8x8xf32>
    %495 = arith.subf %491, %494 : vector<8x8xf32>
    %496 = math.exp %495 : vector<8x8xf32>
    %cst_145 = arith.constant dense<0.000000e+00> : vector<8xf32>
    %497 = vector.multi_reduction <add>, %496, %cst_145 [1] : vector<8x8xf32> to vector<8xf32>
    %498 = vector.shape_cast %497 : vector<8xf32> to vector<8x1xf32>
    %499 = tpu.reciprocal %498 {approx = true} : vector<8x1xf32> -> vector<8x1xf32>
    %500 = vector.broadcast %499 : vector<8x1xf32> to vector<8x8xf32>
    %501 = arith.mulf %496, %500 : vector<8x8xf32>
    %502 = vector.shape_cast %501 : vector<8x8xf32> to vector<8x8x1xf32>
    %503 = vector.broadcast %502 : vector<8x8x1xf32> to vector<8x8x32xf32>
    %504 = arith.mulf %503, %455 : vector<8x8x32xf32>
    %cst_146 = arith.constant dense<0.000000e+00> : vector<8x32xf32>
    %505 = vector.multi_reduction <add>, %504, %cst_146 [1] : vector<8x8x32xf32> to vector<8x32xf32>
    %cst_147 = arith.constant dense<0.000000e+00> : vector<8x32xf32>
    %506 = vector.multi_reduction <add>, %455, %cst_147 [1] : vector<8x8x32xf32> to vector<8x32xf32>
    %cst_148 = arith.constant 8.000000e+00 : f32
    %507 = vector.broadcast %cst_148 : f32 to vector<8x32xf32>
    %508 = arith.divf %506, %507 : vector<8x32xf32>
    %c0_149 = arith.constant 0 : index
    %c0_150 = arith.constant 0 : index
    %509 = vector.load %arg18[%c0_149, %c0_150] : memref<64x16xf32, #tpu.memory_space<vmem>>, vector<64x16xf32>
    %510 = vector.extract_strided_slice %509 {offsets = [0, 0], sizes = [32, 16], strides = [1, 1]} : vector<64x16xf32> to vector<32x16xf32>
    %cst_151 = arith.constant dense<0.000000e+00> : vector<8x16xf32>
    %511 = tpu.matmul %508, %510, %cst_151 {dimension_numbers = #tpu.dot_dimension_numbers<[1], [0], [0], [1], [0, 0, 1, 1], [], []>} : vector<8x32xf32>, vector<32x16xf32>, vector<8x16xf32> -> vector<8x16xf32>
    %512 = vector.extract_strided_slice %509 {offsets = [32, 0], sizes = [32, 16], strides = [1, 1]} : vector<64x16xf32> to vector<32x16xf32>
    %cst_152 = arith.constant dense<0.000000e+00> : vector<8x16xf32>
    %513 = tpu.matmul %505, %512, %cst_152 {dimension_numbers = #tpu.dot_dimension_numbers<[1], [0], [0], [1], [0, 0, 1, 1], [], []>} : vector<8x32xf32>, vector<32x16xf32>, vector<8x16xf32> -> vector<8x16xf32>
    %514 = arith.addf %511, %513 : vector<8x16xf32>
    %c0_153 = arith.constant 0 : index
    %c0_154 = arith.constant 0 : index
    %515 = vector.load %arg19[%c0_153, %c0_154] : memref<1x16xf32, #tpu.memory_space<vmem>>, vector<1x16xf32>
    %516 = vector.broadcast %515 : vector<1x16xf32> to vector<8x16xf32>
    %517 = arith.addf %514, %516 : vector<8x16xf32>
    %cst_155 = arith.constant 0.000000e+00 : f32
    %518 = vector.broadcast %cst_155 : f32 to vector<8x16xf32>
    %519 = arith.maximumf %517, %518 : vector<8x16xf32>
    %c0_156 = arith.constant 0 : index
    %c0_157 = arith.constant 0 : index
    %520 = vector.load %arg20[%c0_156, %c0_157] : memref<16x3xf32, #tpu.memory_space<vmem>>, vector<16x3xf32>
    %cst_158 = arith.constant dense<0.000000e+00> : vector<8x3xf32>
    %521 = tpu.matmul %519, %520, %cst_158 {dimension_numbers = #tpu.dot_dimension_numbers<[1], [0], [0], [1], [0, 0, 1, 1], [], []>} : vector<8x16xf32>, vector<16x3xf32>, vector<8x3xf32> -> vector<8x3xf32>
    %c0_159 = arith.constant 0 : index
    %c0_160 = arith.constant 0 : index
    %522 = vector.load %arg21[%c0_159, %c0_160] : memref<1x3xf32, #tpu.memory_space<vmem>>, vector<1x3xf32>
    %523 = vector.broadcast %522 : vector<1x3xf32> to vector<8x3xf32>
    %524 = arith.addf %521, %523 : vector<8x3xf32>
    %c0_161 = arith.constant 0 : index
    %c0_162 = arith.constant 0 : index
    %525 = vector.load %arg22[%c0_161, %c0_162] : memref<8x3xf32, #tpu.memory_space<vmem>>, vector<8x3xf32>
    tpu.vector_store %arg22[%c0_161, %c0_162], %524 {strides = array<i32>} : memref<8x3xf32, #tpu.memory_space<vmem>>, vector<8x3xf32>,
    return
  }
  func.func @transform_0(%arg0: i32) -> (i32, i32, i32) {
    %c0_i32 = arith.constant 0 : i32
    %c0_i32_0 = arith.constant 0 : i32
    %c0_i32_1 = arith.constant 0 : i32
    return %c0_i32, %arg0, %c0_i32_0 : i32, i32, i32
  }
  func.func @transform_1(%arg0: i32) -> (i32, i32, i32) {
    %c0_i32 = arith.constant 0 : i32
    %c0_i32_0 = arith.constant 0 : i32
    %c0_i32_1 = arith.constant 0 : i32
    return %c0_i32, %arg0, %c0_i32_0 : i32, i32, i32
  }
  func.func @transform_2(%arg0: i32) -> (i32, i32, i32) {
    %c0_i32 = arith.constant 0 : i32
    %c0_i32_0 = arith.constant 0 : i32
    %c0_i32_1 = arith.constant 0 : i32
    return %c0_i32, %arg0, %c0_i32_0 : i32, i32, i32
  }
  func.func @transform_3(%arg0: i32) -> (i32, i32) {
    %c0_i32 = arith.constant 0 : i32
    %c0_i32_0 = arith.constant 0 : i32
    %c0_i32_1 = arith.constant 0 : i32
    return %c0_i32, %c0_i32_0 : i32, i32
  }
  func.func @transform_4(%arg0: i32) -> (i32, i32) {
    %c0_i32 = arith.constant 0 : i32
    %c0_i32_0 = arith.constant 0 : i32
    %c0_i32_1 = arith.constant 0 : i32
    return %c0_i32, %c0_i32_0 : i32, i32
  }
  func.func @transform_5(%arg0: i32) -> (i32, i32) {
    %c0_i32 = arith.constant 0 : i32
    %c0_i32_0 = arith.constant 0 : i32
    %c0_i32_1 = arith.constant 0 : i32
    return %c0_i32, %c0_i32_0 : i32, i32
  }
  func.func @transform_6(%arg0: i32) -> (i32, i32) {
    %c0_i32 = arith.constant 0 : i32
    %c0_i32_0 = arith.constant 0 : i32
    %c0_i32_1 = arith.constant 0 : i32
    return %c0_i32, %c0_i32_0 : i32, i32
  }
  func.func @transform_7(%arg0: i32) -> (i32, i32) {
    %c0_i32 = arith.constant 0 : i32
    %c0_i32_0 = arith.constant 0 : i32
    %c0_i32_1 = arith.constant 0 : i32
    return %c0_i32, %c0_i32_0 : i32, i32
  }
  func.func @transform_8(%arg0: i32) -> (i32, i32) {
    %c0_i32 = arith.constant 0 : i32
    %c0_i32_0 = arith.constant 0 : i32
    %c0_i32_1 = arith.constant 0 : i32
    return %c0_i32, %c0_i32_0 : i32, i32
  }
  func.func @transform_9(%arg0: i32) -> (i32, i32) {
    %c0_i32 = arith.constant 0 : i32
    %c0_i32_0 = arith.constant 0 : i32
    %c0_i32_1 = arith.constant 0 : i32
    return %c0_i32, %c0_i32_0 : i32, i32
  }
  func.func @transform_10(%arg0: i32) -> (i32, i32) {
    %c0_i32 = arith.constant 0 : i32
    %c0_i32_0 = arith.constant 0 : i32
    %c0_i32_1 = arith.constant 0 : i32
    return %c0_i32, %c0_i32_0 : i32, i32
  }
  func.func @transform_11(%arg0: i32) -> (i32, i32) {
    %c0_i32 = arith.constant 0 : i32
    %c0_i32_0 = arith.constant 0 : i32
    %c0_i32_1 = arith.constant 0 : i32
    return %c0_i32, %c0_i32_0 : i32, i32
  }
  func.func @transform_12(%arg0: i32) -> (i32, i32) {
    %c0_i32 = arith.constant 0 : i32
    %c0_i32_0 = arith.constant 0 : i32
    %c0_i32_1 = arith.constant 0 : i32
    return %c0_i32, %c0_i32_0 : i32, i32
  }
  func.func @transform_13(%arg0: i32) -> (i32, i32) {
    %c0_i32 = arith.constant 0 : i32
    %c0_i32_0 = arith.constant 0 : i32
    %c0_i32_1 = arith.constant 0 : i32
    return %c0_i32, %c0_i32_0 : i32, i32
  }
  func.func @transform_14(%arg0: i32) -> (i32, i32) {
    %c0_i32 = arith.constant 0 : i32
    %c0_i32_0 = arith.constant 0 : i32
    %c0_i32_1 = arith.constant 0 : i32
    return %c0_i32, %c0_i32_0 : i32, i32
  }
  func.func @transform_15(%arg0: i32) -> (i32, i32) {
    %c0_i32 = arith.constant 0 : i32
    %c0_i32_0 = arith.constant 0 : i32
    %c0_i32_1 = arith.constant 0 : i32
    return %c0_i32, %c0_i32_0 : i32, i32
  }
  func.func @transform_16(%arg0: i32) -> (i32, i32) {
    %c0_i32 = arith.constant 0 : i32
    %c0_i32_0 = arith.constant 0 : i32
    %c0_i32_1 = arith.constant 0 : i32
    return %c0_i32, %c0_i32_0 : i32, i32
  }
  func.func @transform_17(%arg0: i32) -> (i32, i32) {
    %c0_i32 = arith.constant 0 : i32
    %c0_i32_0 = arith.constant 0 : i32
    %c0_i32_1 = arith.constant 0 : i32
    return %c0_i32, %c0_i32_0 : i32, i32
  }
  func.func @transform_18(%arg0: i32) -> (i32, i32) {
    %c0_i32 = arith.constant 0 : i32
    %c0_i32_0 = arith.constant 0 : i32
    %c0_i32_1 = arith.constant 0 : i32
    return %c0_i32, %c0_i32_0 : i32, i32
  }
  func.func @transform_19(%arg0: i32) -> (i32, i32) {
    %c0_i32 = arith.constant 0 : i32
    %c0_i32_0 = arith.constant 0 : i32
    %c0_i32_1 = arith.constant 0 : i32
    return %c0_i32, %c0_i32_0 : i32, i32
  }
  func.func @transform_20(%arg0: i32) -> (i32, i32) {
    %c0_i32 = arith.constant 0 : i32
    %c0_i32_0 = arith.constant 0 : i32
    %c0_i32_1 = arith.constant 0 : i32
    return %c0_i32, %c0_i32_0 : i32, i32
  }
  func.func @transform_21(%arg0: i32) -> (i32, i32) {
    %c0_i32 = arith.constant 0 : i32
    %c0_i32_0 = arith.constant 0 : i32
    return %arg0, %c0_i32 : i32, i32
  }
  func.func @transform_22(%arg0: i32) -> (i32, i32) {
    %c0_i32 = arith.constant 0 : i32
    %c0_i32_0 = arith.constant 0 : i32
    return %arg0, %c0_i32 : i32, i32
  }
}

</mosaic_0001>

<bundles_post_ra>
// kernel: net_forward.1
= control target key start
LH: loop header
LB: loop body
LE: loop exit
PB: predicated region body
PF: predicated region fallthrough
CT: control target
= control target key end

     0   :  { %s15413_s0 = inlined_call_operand.vmem [shape: f32[8,16,16], index: 0, kind: input, shape index: {}]   ;;  %s15414_s1 = inlined_call_operand.vmem [shape: f32[8,16,12], index: 1, kind: input, shape index: {}]   ;;  %s15415_s2 = inlined_call_operand.vmem [shape: f32[8,16,8], index: 2, kind: input, shape index: {}]   ;;  %s15416_s3 = inlined_call_operand.vmem [shape: f32[36,144], index: 3, kind: input, shape index: {}]   ;;  %s15417_s4 = inlined_call_operand.vmem [shape: f32[36,144], index: 4, kind: input, shape index: {}]   ;;  %s15418_s5 = inlined_call_operand.hbm [shape: f32[1,144], index: 5, kind: input, shape index: {}]   ;;  %s15419_s6 = inlined_call_operand.vmem [shape: f32[56,128], index: 6, kind: input, shape index: {}]   ;;  %s15420_s7 = inlined_call_operand.vmem [shape: f32[32,128], index: 7, kind: input, shape index: {}]   ;;  %s15421_s8 = inlined_call_operand.vmem [shape: f32[1,128], index: 8, kind: input, shape index: {}]   ;;  %s15422_s9 = inlined_call_operand.hbm [shape: f32[12,16], index: 9, kind: input, shape index: {}]   ;;  %s15423_s10 = inlined_call_operand.hbm [shape: f32[8,16], index: 10, kind: input, shape index: {}]   ;;  %s15424_s11 = inlined_call_operand.vmem [shape: f32[16,16], index: 11, kind: input, shape index: {}]   ;;  %s15425_s12 = inlined_call_operand.vmem [shape: f32[1,16], index: 12, kind: input, shape index: {}]   ;;  %s15426_s13 = inlined_call_operand.hbm [shape: f32[1,16], index: 13, kind: input, shape index: {}]   ;;  %s15427_s14 = inlined_call_operand.<no memory space> [shape: f32[1,1], index: 14, kind: input, shape index: {}]   ;;  %s15428_s15 = inlined_call_operand.hbm [shape: f32[32,32], index: 15, kind: input, shape index: {}]   ;;  %s15429_s16 = inlined_call_operand.hbm [shape: f32[1,32], index: 16, kind: input, shape index: {}]   ;;  %s15430_s17 = inlined_call_operand.vmem [shape: f32[64,16], index: 17, kind: input, shape index: {}]   ;;  %s15431_s18 = inlined_call_operand.hbm [shape: f32[1,16], index: 18, kind: input, shape index: {}]   ;;  %s15432_s19 = inlined_call_operand.vmem [shape: f32[16,3], index: 19, kind: input, shape index: {}]   ;;  %s15433_s20 = inlined_call_operand.hbm [shape: f32[1,3], index: 20, kind: input, shape index: {}]   ;;  %s15434_s21 = inlined_call_operand.vmem [shape: f32[16,3], index: 21, kind: output, shape index: {0}]   ;;  %s15435_s22 = inlined_call_operand.vmem [shape: f32[16,8], index: 22, kind: output, shape index: {1}]  }
   0x1   :  { %15466 = sst [smem:[#allocation32_spill]] %s15413_s0  ;;  %v28_v0 = vstv %s15427_s14 }
   0x2   :  { %15467 = sst [smem:[#allocation33_spill]] %s15414_s1  ;;  %29 = vst [vmem:[#allocation4] sm:$0x1] %v28_v0 }
   0x3   :  { %15468 = sst [smem:[#allocation34_spill]] %s15415_s2 }
   0x4   :  { %15469 = sst [smem:[#allocation35_spill]] %s15416_s3 }
   0x5   :  { %15470 = sst [smem:[#allocation36_spill]] %s15417_s4 }
   0x6   :  { %15471 = sst [smem:[#allocation37_spill]] %s15418_s5 }
   0x7   :  { %15472 = sst [smem:[#allocation38_spill]] %s15419_s6 }
   0x8   :  { %15473 = sst [smem:[#allocation39_spill]] %s15424_s11 }
   0x9   :  { %15474 = sst [smem:[#allocation40_spill]] %s15425_s12 }
   0xa   :  { %15475 = sst [smem:[#allocation41_spill]] %s15430_s17 }
   0xb   :  { %15476 = sst [smem:[#allocation42_spill]] %s15432_s19 }
   0xc   :  { %15477 = sst [smem:[#allocation43_spill]] %s15434_s21 }
   0xd   :  { %15478 = sst [smem:[#allocation44_spill]] %s15435_s22 }
   0xe   :  { %30 = vsyncpa [#allocation9], 0 }
   0xf   :  { %31 = vsyncpa [#allocation11], 0 }
  0x10   :  { %32 = vsyncpa [#allocation14], 0 }
  0x11   :  { %33 = vsyncpa [#allocation17], 0 }
  0x12   :  { %34 = vsyncpa [#allocation20], 0  ;;  %s12891_s29 = smov 0   ;;  %s12893_s30 = smov 0  }
  0x13   :  { %s12895_s4 = smov 0  }
  0x14 LB: > { %s12907_s14 = sadd.s32 4294967295, %s12747_s4   ;;  %s12910_s0 = sadd.s32 1, %s12747_s4   ;;  %s12747_s4 = sphi %s12895_s4, %s15553_s4   ;;  %s12743_s30 = sphi %s12893_s30, %s15556_s30   ;;  %s12739_s29 = sphi %s12891_s29, %s15555_s29  }
  0x15   : > { %15479 = sst [smem:[#allocation26_spill]] %s12910_s0  ;;  %s44_s23 = ssub.s32 %s12747_s4, %s12910_s0 }
  0x16   : > { %s47_s1 = sadd.s32 1, %s12743_s30  ;;  %p45_p0 = scmp.eq.s32.totalorder %s44_s23, 0 }
  0x17   : > { %p54_p1 = scmp.ne.s32.totalorder %s12743_s30, %s12739_s29  ;;  %p55_p2 = scmp.eq.s32.totalorder %s12747_s4, 0 }
  0x18   : > { %p10426_p3 = scmp.ge.s32.totalorder %s12747_s4, 1  ;;  %p553_p5 = scmp.lt.s32.totalorder %s12747_s4, 3 }
  0x19   : > { %s12920_s5 = scalar_select %p45_p0, %s12743_s30, %s47_s1  }
  0x1a   : > { %p12922_p4 = por %p55_p2, %p54_p1  ;;  %p15442_p6 = scmp.eq.s32.totalorder %s12907_s14, 0 }
  0x1b   : > { %15480 = sst [smem:[#allocation27_spill]] %s12920_s5  ;;  %p12928_p7 = pnand %p10426_p3, %p553_p5 }
  0x1c   : > { %s15481_s24 = scalar_select %p12922_p4, 1, 0 }
  0x1d   : > { %s15482_s6 = scalar_select %p12928_p7, 1, 0 }
  0x1e   : > { %s12749_s25 = smov [#allocation10]   ;;  %p11643_p8 = pneg %p12928_p7 }
  0x1f   : > { %s591_s26 = sshll.u32 %s12749_s25, 4  ;;  %s12750_s27 = smov [#allocation13]   ;;  %s12934_s26 = int_to_ptr.vmem [resolvable:$true] %s591_s26 }
  0x20   : > { %p12938_p9 = pnand %p15442_p6, %p11643_p8  ;;  %s622_s3 = sshll.u32 %s12750_s27, 4  ;;  %s12942_s3 = int_to_ptr.vmem [resolvable:$true] %s622_s3 }
  0x21   : > { %s12751_s28 = smov [#allocation16]   ;;  %s12481_s25 = scalar_lea.hbm %s15422_s9, 256 }
  0x22   : > { %s12944_s23 = sshll.u32 %s12751_s28, 4  ;;  %p12482_p10 = scmp.ne.s32.totalorder %s15422_s9, %s12481_s25  ;;  %s650_s23 = int_to_ptr.vmem [resolvable:$true] %s12944_s23 }
  0x23   : > { %p12954_p11 = pneg %p12938_p9  ;;  %p12488_p0 = scmp.lt.u32.totalorder %s12481_s25, %s15422_s9 }
  0x25   : > { %p12484_p12 = pnand %p12954_p11, %p12482_p10 }
  0x27   : > { %p12485_p13 = pneg %p12484_p12 }
  0x29   : > { %p12490_p1 = pnand %p12488_p0, %p12485_p13 }
  0x2b   : > { %12493 = shalt.err (!%p12490_p1)
}
  0x2c   : > { %s12494_s21 = scalar_lea.vmem %s12934_s26, 256  ;;  %p12502_p8 = scmp.lt.s32.totalorder %s12934_s26, %s12934_s26 }
  0x2d   : > { %p12495_p2 = scmp.ne.s32.totalorder %s12934_s26, %s12494_s21  ;;  %p12503_p6 = scmp.lt.s32.totalorder %s12494_s21, %s12494_s21 }
  0x2f   : > { %p12497_p3 = pnand %p12495_p2, %p12954_p11  ;;  %p12504_p10 = por %p12503_p6, %p12502_p8 }
  0x31   : > { %p12498_p5 = pneg %p12497_p3 }
  0x33   : > { %p12505_p12 = pnand %p12504_p10, %p12498_p5 }
  0x35   : > { %12508 = shalt.err (!%p12505_p12)
}
  0x36   : > { %s15448_s0 = smov 128   ;;  %s15449_s5 = smov 8  }
  0x37   : > { %11649 = dma.hbm_to_vmem [thread:$0]  (!%p12938_p9), %s15422_s9, 256, %s12934_s26, [#allocation11], %s15448_s0, %s15448_s0, %s15449_s5  }
  0x38   : > { %s12509_s21 = scalar_lea.hbm %s15426_s13, 16 }
  0x39   : > { %p12510_p6 = scmp.ne.s32.totalorder %s15426_s13, %s12509_s21  ;;  %p12516_p1 = scmp.lt.u32.totalorder %s12509_s21, %s15426_s13 }
  0x3b   : > { %p12512_p13 = pnand %p12510_p6, %p12954_p11 }
  0x3d   : > { %p12513_p0 = pneg %p12512_p13 }
  0x3f   : > { %p12518_p2 = pnand %p12516_p1, %p12513_p0 }
  0x41   : > { %12521 = shalt.err (!%p12518_p2)
}
  0x42   : > { %s12522_s26 = scalar_lea.vmem %s12942_s3, 16  ;;  %s12529_s17 = scalar_lea.vmem %s12942_s3, 32 }
  0x43   : > { %p12523_p3 = scmp.ne.s32.totalorder %s12942_s3, %s12522_s26  ;;  %p12530_p10 = scmp.lt.s32.totalorder %s12942_s3, %s12942_s3 }
  0x44   : > { %p12531_p12 = scmp.lt.s32.totalorder %s12529_s17, %s12522_s26 }
  0x45   : > { %p12525_p5 = pnand %p12523_p3, %p12954_p11 }
  0x46   : > { %p12532_p6 = por %p12531_p12, %p12530_p10 }
  0x47   : > { %p12526_p8 = pneg %p12525_p5 }
  0x49   : > { %p12533_p13 = pnand %p12532_p6, %p12526_p8 }
  0x4b   : > { %12536 = shalt.err (!%p12533_p13)
}
  0x4c   : > { %11655 = dma.hbm_to_vmem [thread:$0]  (!%p12938_p9), %s15426_s13, 16, %s12942_s3, [#allocation14]  }
  0x4d   : > { %s12537_s25 = scalar_lea.hbm %s15429_s16, 16 }
  0x4e   : > { %p12538_p0 = scmp.ne.s32.totalorder %s15429_s16, %s12537_s25  ;;  %p12544_p3 = scmp.lt.u32.totalorder %s12537_s25, %s15429_s16 }
  0x50   : > { %p12540_p1 = pnand %p12538_p0, %p12954_p11 }
  0x52   : > { %p12541_p2 = pneg %p12540_p1 }
  0x54   : > { %p12546_p5 = pnand %p12544_p3, %p12541_p2 }
  0x56   : > { %12549 = shalt.err (!%p12546_p5)
}
  0x57   : > { %s12550_s17 = scalar_lea.vmem %s650_s23, 16  ;;  %s12557_s3 = scalar_lea.vmem %s650_s23, 32 }
  0x58   : > { %p12551_p8 = scmp.ne.s32.totalorder %s650_s23, %s12550_s17  ;;  %p12558_p6 = scmp.lt.s32.totalorder %s650_s23, %s650_s23 }
  0x59   : > { %p12559_p13 = scmp.lt.s32.totalorder %s12557_s3, %s12550_s17 }
  0x5a   : > { %p12553_p10 = pnand %p12551_p8, %p12954_p11 }
  0x5b   : > { %p12560_p7 = por %p12559_p13, %p12558_p6 }
  0x5c   : > { %p12554_p12 = pneg %p12553_p10 }
  0x5e   : > { %p12561_p4 = pnand %p12560_p7, %p12554_p12 }
  0x60   : > { %12564 = shalt.err (!%p12561_p4)
}
  0x61   : > { %11661 = dma.hbm_to_vmem [thread:$0]  (!%p12938_p9), %s15429_s16, 16, %s650_s23, [#allocation17]  }
  0x62   : > { %s12754_s19 = smov [#allocation8]   ;;  %s12755_s25 = smov [#allocation12]  }
  0x63   : > { %s572_s1 = sshll.u32 %s12754_s19, 4  ;;  %s605_s27 = sshll.u32 %s12755_s25, 4  ;;  %s573_s1 = int_to_ptr.vmem [resolvable:$true] %s572_s1  ;;  %s606_s27 = int_to_ptr.vmem [resolvable:$true] %s605_s27 }
  0x64   : > { %s15485_s26 = sld [smem:[#allocation37_spill]] }
  0x6a   : > { %s12565_s0 = scalar_lea.hbm %s15485_s26, 32 }
  0x6b   : > { %p12566_p4 = scmp.ne.s32.totalorder %s15485_s26, %s12565_s0  ;;  %p12572_p1 = scmp.lt.u32.totalorder %s12565_s0, %s15485_s26 }
  0x6d   : > { %p12568_p7 = pnand %p12566_p4, %p12954_p11 }
  0x6f   : > { %p12569_p0 = pneg %p12568_p7 }
  0x71   : > { %p12574_p2 = pnand %p12572_p1, %p12569_p0 }
  0x73   : > { %12577 = shalt.err (!%p12574_p2)
}
  0x74   : > { %s12578_s23 = scalar_lea.vmem %s573_s1, 32  ;;  %p12586_p10 = scmp.lt.s32.totalorder %s573_s1, %s573_s1 }
  0x75   : > { %p12579_p3 = scmp.ne.s32.totalorder %s573_s1, %s12578_s23  ;;  %p12587_p12 = scmp.lt.s32.totalorder %s12578_s23, %s12578_s23 }
  0x77   : > { %p12581_p5 = pnand %p12579_p3, %p12954_p11  ;;  %p12588_p6 = por %p12587_p12, %p12586_p10 }
  0x79   : > { %p12582_p8 = pneg %p12581_p5 }
  0x7b   : > { %p12589_p13 = pnand %p12588_p6, %p12582_p8 }
  0x7d   : > { %12592 = shalt.err (!%p12589_p13)
}
  0x7e   : > { %11646 = dma.hbm_to_vmem [thread:$0]  (!%p12938_p9), %s15485_s26, 32, %s573_s1, [#allocation9]  }
  0x7f   : > { %s12593_s25 = scalar_lea.hbm %s15423_s10, 128 }
  0x80   : > { %p12594_p4 = scmp.ne.s32.totalorder %s15423_s10, %s12593_s25  ;;  %p12600_p1 = scmp.lt.u32.totalorder %s12593_s25, %s15423_s10 }
  0x82   : > { %p12596_p7 = pnand %p12594_p4, %p12954_p11 }
  0x84   : > { %p12597_p0 = pneg %p12596_p7 }
  0x86   : > { %p12602_p2 = pnand %p12600_p1, %p12597_p0 }
  0x88   : > { %12605 = shalt.err (!%p12602_p2)
}
  0x89   : > { %s12606_s11 = scalar_lea.vmem %s606_s27, 128  ;;  %p12614_p10 = scmp.lt.s32.totalorder %s606_s27, %s606_s27 }
  0x8a   : > { %p12607_p3 = scmp.ne.s32.totalorder %s606_s27, %s12606_s11  ;;  %p12615_p12 = scmp.lt.s32.totalorder %s12606_s11, %s12606_s11 }
  0x8c   : > { %p12609_p5 = pnand %p12607_p3, %p12954_p11  ;;  %p12616_p6 = por %p12615_p12, %p12614_p10 }
  0x8e   : > { %p12610_p8 = pneg %p12609_p5 }
  0x90   : > { %p12617_p13 = pnand %p12616_p6, %p12610_p8 }
  0x92   : > { %12620 = shalt.err (!%p12617_p13)
}
  0x93   : > { %11652 = dma.hbm_to_vmem [thread:$0]  (!%p12938_p9), %s15423_s10, 128, %s606_s27, [#allocation11]  }
  0x94   : > { %s12756_s12 = smov [#allocation15]   ;;  %s12757_s0 = smov [#allocation18]  }
  0x95   : > { %s635_s19 = sshll.u32 %s12756_s12, 4  ;;  %s663_s5 = sshll.u32 %s12757_s0, 4  ;;  %s636_s19 = int_to_ptr.vmem [resolvable:$true] %s635_s19  ;;  %s664_s5 = int_to_ptr.vmem [resolvable:$true] %s663_s5 }
  0x96   : > { %s12621_s21 = scalar_lea.hbm %s15428_s15, 512 }
  0x97   : > { %p12622_p4 = scmp.ne.s32.totalorder %s15428_s15, %s12621_s21  ;;  %p12628_p1 = scmp.lt.u32.totalorder %s12621_s21, %s15428_s15 }
  0x99   : > { %p12624_p7 = pnand %p12622_p4, %p12954_p11 }
  0x9b   : > { %p12625_p0 = pneg %p12624_p7 }
  0x9d   : > { %p12630_p2 = pnand %p12628_p1, %p12625_p0 }
  0x9f   : > { %12633 = shalt.err (!%p12630_p2)
}
  0xa0   : > { %s12634_s27 = scalar_lea.vmem %s636_s19, 512  ;;  %p12642_p10 = scmp.lt.s32.totalorder %s636_s19, %s636_s19 }
  0xa1   : > { %p12635_p3 = scmp.ne.s32.totalorder %s636_s19, %s12634_s27  ;;  %p12643_p12 = scmp.lt.s32.totalorder %s12634_s27, %s12634_s27 }
  0xa3   : > { %p12637_p5 = pnand %p12635_p3, %p12954_p11  ;;  %p12644_p6 = por %p12643_p12, %p12642_p10 }
  0xa5   : > { %p12638_p8 = pneg %p12637_p5 }
  0xa7   : > { %p12645_p13 = pnand %p12644_p6, %p12638_p8 }
  0xa9   : > { %12648 = shalt.err (!%p12645_p13)
}
  0xaa   : > { %s15486_s23 = smov 8   ;;  %s15487_s12 = smov 128  }
  0xab   : > { %11658 = dma.hbm_to_vmem [thread:$0]  (!%p12938_p9), %s15428_s15, 512, %s636_s19, [#allocation14], %s15487_s12, %s15487_s12, %s15486_s23  }
  0xac   : > { %s12649_s17 = scalar_lea.hbm %s15431_s18, 16 }
  0xad   : > { %p12650_p4 = scmp.ne.s32.totalorder %s15431_s18, %s12649_s17  ;;  %p12656_p1 = scmp.lt.u32.totalorder %s12649_s17, %s15431_s18 }
  0xaf   : > { %p12652_p7 = pnand %p12650_p4, %p12954_p11 }
  0xb1   : > { %p12653_p0 = pneg %p12652_p7 }
  0xb3   : > { %p12658_p2 = pnand %p12656_p1, %p12653_p0 }
  0xb5   : > { %12661 = shalt.err (!%p12658_p2)
}
  0xb6   : > { %s12662_s0 = scalar_lea.vmem %s664_s5, 16  ;;  %s12669_s19 = scalar_lea.vmem %s664_s5, 32 }
  0xb7   : > { %p12663_p3 = scmp.ne.s32.totalorder %s664_s5, %s12662_s0  ;;  %p12670_p10 = scmp.lt.s32.totalorder %s664_s5, %s664_s5 }
  0xb8   : > { %p12671_p12 = scmp.lt.s32.totalorder %s12669_s19, %s12662_s0 }
  0xb9   : > { %p12665_p5 = pnand %p12663_p3, %p12954_p11 }
  0xba   : > { %p12672_p6 = por %p12671_p12, %p12670_p10 }
  0xbb   : > { %p12666_p8 = pneg %p12665_p5 }
  0xbd   : > { %p12673_p13 = pnand %p12672_p6, %p12666_p8 }
  0xbf   : > { %12676 = shalt.err (!%p12673_p13)
}
  0xc0   : > { %11664 = dma.hbm_to_vmem [thread:$0]  (!%p12938_p9), %s15431_s18, 16, %s664_s5, [#allocation17]  }
  0xc1   : > { %s12758_s25 = smov [#allocation19]   ;;  %s12677_s3 = scalar_lea.hbm %s15433_s20, 16 }
  0xc2   : > { %s677_s28 = sshll.u32 %s12758_s25, 4  ;;  %p12678_p4 = scmp.ne.s32.totalorder %s15433_s20, %s12677_s3  ;;  %s678_s28 = int_to_ptr.vmem [resolvable:$true] %s677_s28 }
  0xc3   : > { %p12684_p1 = scmp.lt.u32.totalorder %s12677_s3, %s15433_s20 }
  0xc4   : > { %p12680_p7 = pnand %p12678_p4, %p12954_p11 }
  0xc6   : > { %p12681_p0 = pneg %p12680_p7 }
  0xc8   : > { %p12686_p2 = pnand %p12684_p1, %p12681_p0 }
  0xca   : > { %12689 = shalt.err (!%p12686_p2)
}
  0xcb   : > { %s12690_s5 = scalar_lea.vmem %s678_s28, 16  ;;  %s12697_s19 = scalar_lea.vmem %s678_s28, 32 }
  0xcc   : > { %p12691_p3 = scmp.ne.s32.totalorder %s678_s28, %s12690_s5  ;;  %p12698_p10 = scmp.lt.s32.totalorder %s678_s28, %s678_s28 }
  0xcd   : > { %p12699_p12 = scmp.lt.s32.totalorder %s12697_s19, %s12690_s5 }
  0xce   : > { %p12693_p5 = pnand %p12691_p3, %p12954_p11 }
  0xcf   : > { %p12700_p6 = por %p12699_p12, %p12698_p10 }
  0xd0   : > { %p12694_p8 = pneg %p12693_p5 }
  0xd2   : > { %p12701_p13 = pnand %p12700_p6, %p12694_p8 }
  0xd4   : > { %12704 = shalt.err (!%p12701_p13)
}
  0xd5   : > { %11667 = dma.hbm_to_vmem [thread:$0]  (!%p12938_p9), %s15433_s20, 16, %s678_s28, [#allocation20]  }
  0xd6   : > { %p10435_p4 = scmp.ge.s32.totalorder %s12747_s4, 2 }
  0xd7   : > { %p15488_p7 = scmp.ne.s32.totalorder (!%p10435_p4), %s15481_s24, 0 }
  0xd8   : > { %684 = sbr.rel (%p10435_p4) target bundleno = 267 (0x10b), region = 88 }
  0xdf   : > { %687 = sbr.rel (!%p15488_p7) target bundleno = 237 (0xed), region = 92  ;;  %s689_s22 = sand.u32 (%p15488_p7), 1, %s12743_s30  }
  0xe0   : > { %s10437_s25 = sshll.u32 (%p15488_p7), %s12747_s4, 3  ;;  %s10436_s21 = sshll.u32 (%p15488_p7), %s689_s22, 6 }
  0xe1   : > { %s15489_s11 = sld [smem:[#allocation32_spill]] (%p15488_p7)  ;;  %s691_s2 = scalar_lea.vmem (%p15488_p7), [#allocation5], %s10436_s21 }
  0xe7   : > { %s693_s1 = scalar_lea.vmem %s15489_s11, %s10437_s25 }
  0xe8   : > { %v735_v1 = vld [vmem:[%s693_s1] sm:$0xff]  ;;  %v737_v2 = vld [vmem:[%s693_s1 + $0x10] sm:$0xff] }
  0xe9   : > { %v739_v3 = vld [vmem:[%s693_s1 + $0x20] sm:$0xff]  ;;  %736 = vst [vmem:[%s691_s2] sm:$0xff] %v735_v1  ;;  %738 = vst [vmem:[%s691_s2 + $0x8] sm:$0xff] %v737_v2  ;;  %v741_v4 = vld [vmem:[%s693_s1 + $0x30] sm:$0xff] }
  0xea   : > { %740 = vst [vmem:[%s691_s2 + $0x10] sm:$0xff] %v739_v3  ;;  %v743_v5 = vld [vmem:[%s693_s1 + $0x40] sm:$0xff]  ;;  %v745_v6 = vld [vmem:[%s693_s1 + $0x50] sm:$0xff]  ;;  %742 = vst [vmem:[%s691_s2 + $0x18] sm:$0xff] %v741_v4 }
  0xeb   : > { %744 = vst [vmem:[%s691_s2 + $0x20] sm:$0xff] %v743_v5  ;;  %746 = vst [vmem:[%s691_s2 + $0x28] sm:$0xff] %v745_v6  ;;  %v747_v7 = vld [vmem:[%s693_s1 + $0x60] sm:$0xff]  ;;  %v749_v8 = vld [vmem:[%s693_s1 + $0x70] sm:$0xff] }
  0xec   : > { %748 = vst [vmem:[%s691_s2 + $0x30] sm:$0xff] %v747_v7  ;;  %750 = vst [vmem:[%s691_s2 + $0x38] sm:$0xff] %v749_v8 }
  0xed PF: > { %p15490_p9 = scmp.ne.s32.totalorder %s15481_s24, 0 }
  0xee   : > { %s758_s28 = sand.u32 (%p15490_p9), 1, %s12743_s30   ;;  %s10439_s27 = sshll.u32 (%p15490_p9), %s12747_s4, 3 }
  0xef   : > { %756 = sbr.rel (!%p15490_p9) target bundleno = 252 (0xfc), region = 130  ;;  %s10438_s0 = sshll.u32 (%p15490_p9), %s758_s28, 6 }
  0xf0   : > { %s15491_s23 = sld [smem:[#allocation33_spill]] (%p15490_p9)  ;;  %s760_s22 = scalar_lea.vmem (%p15490_p9), [#allocation6], %s10438_s0 }
  0xf6   : > { %s762_s12 = scalar_lea.vmem %s15491_s23, %s10439_s27 }
  0xf7   : > { %v804_v9 = vld [vmem:[%s762_s12] sm:$0xff]  ;;  %v806_v10 = vld [vmem:[%s762_s12 + $0x10] sm:$0xff] }
  0xf8   : > { %v808_v11 = vld [vmem:[%s762_s12 + $0x20] sm:$0xff]  ;;  %805 = vst [vmem:[%s760_s22] sm:$0xff] %v804_v9  ;;  %807 = vst [vmem:[%s760_s22 + $0x8] sm:$0xff] %v806_v10  ;;  %v810_v12 = vld [vmem:[%s762_s12 + $0x30] sm:$0xff] }
  0xf9   : > { %809 = vst [vmem:[%s760_s22 + $0x10] sm:$0xff] %v808_v11  ;;  %v812_v13 = vld [vmem:[%s762_s12 + $0x40] sm:$0xff]  ;;  %v814_v14 = vld [vmem:[%s762_s12 + $0x50] sm:$0xff]  ;;  %811 = vst [vmem:[%s760_s22 + $0x18] sm:$0xff] %v810_v12 }
  0xfa   : > { %813 = vst [vmem:[%s760_s22 + $0x20] sm:$0xff] %v812_v13  ;;  %815 = vst [vmem:[%s760_s22 + $0x28] sm:$0xff] %v814_v14  ;;  %v816_v15 = vld [vmem:[%s762_s12 + $0x60] sm:$0xff]  ;;  %v818_v16 = vld [vmem:[%s762_s12 + $0x70] sm:$0xff] }
  0xfb   : > { %817 = vst [vmem:[%s760_s22 + $0x30] sm:$0xff] %v816_v15  ;;  %819 = vst [vmem:[%s760_s22 + $0x38] sm:$0xff] %v818_v16 }
  0xfc PF: > { %p15492_p11 = scmp.ne.s32.totalorder %s15481_s24, 0 }
  0xfd   : > { %s827_s25 = sand.u32 (%p15492_p11), 1, %s12743_s30   ;;  %s10441_s21 = sshll.u32 (%p15492_p11), %s12747_s4, 3 }
  0xfe   : > { %825 = sbr.rel (!%p15492_p11) target bundleno = 267 (0x10b), region = 168  ;;  %s10440_s17 = sshll.u32 (%p15492_p11), %s827_s25, 6 }
  0xff   : > { %s15493_s1 = sld [smem:[#allocation34_spill]] (%p15492_p11)  ;;  %s829_s28 = scalar_lea.vmem (%p15492_p11), [#allocation7], %s10440_s17 }
 0x105   : > { %s831_s2 = scalar_lea.vmem %s15493_s1, %s10441_s21 }
 0x106   : > { %v873_v17 = vld [vmem:[%s831_s2] sm:$0xff]  ;;  %v875_v18 = vld [vmem:[%s831_s2 + $0x10] sm:$0xff] }
 0x107   : > { %v877_v19 = vld [vmem:[%s831_s2 + $0x20] sm:$0xff]  ;;  %874 = vst [vmem:[%s829_s28] sm:$0xff] %v873_v17  ;;  %876 = vst [vmem:[%s829_s28 + $0x8] sm:$0xff] %v875_v18  ;;  %v879_v20 = vld [vmem:[%s831_s2 + $0x30] sm:$0xff] }
 0x108   : > { %878 = vst [vmem:[%s829_s28 + $0x10] sm:$0xff] %v877_v19  ;;  %v881_v21 = vld [vmem:[%s831_s2 + $0x40] sm:$0xff]  ;;  %v883_v22 = vld [vmem:[%s831_s2 + $0x50] sm:$0xff]  ;;  %880 = vst [vmem:[%s829_s28 + $0x18] sm:$0xff] %v879_v20 }
 0x109   : > { %882 = vst [vmem:[%s829_s28 + $0x20] sm:$0xff] %v881_v21  ;;  %884 = vst [vmem:[%s829_s28 + $0x28] sm:$0xff] %v883_v22  ;;  %v885_v23 = vld [vmem:[%s831_s2 + $0x60] sm:$0xff]  ;;  %v887_v24 = vld [vmem:[%s831_s2 + $0x70] sm:$0xff] }
 0x10a   : > { %886 = vst [vmem:[%s829_s28 + $0x30] sm:$0xff] %v885_v23  ;;  %888 = vst [vmem:[%s829_s28 + $0x38] sm:$0xff] %v887_v24 }
 0x10b PF: > { %p15494_p0 = scmp.ne.s32.totalorder %s15482_s6, 0 }
 0x10d   : > { %897 = sbr.rel (%p15494_p0) target bundleno = 15194 (0x3b5a), region = 206 }
 0x114   : > { %s900_s4 = sand.u32 1, %s12739_s29   ;;  %p15495_p1 = scmp.eq.s32.totalorder %s12907_s14, 0 }
 0x115   : > { %s10443_s24 = sshll.u32 %s900_s4, 6 }
 0x116   : > { %s13139_s27 = scalar_lea.vmem [#allocation5], %s10443_s24  ;;  %s13141_s0 = scalar_lea.vmem [#allocation6], %s10443_s24 }
 0x117   : > { %s13143_s5 = scalar_lea.vmem [#allocation7], %s10443_s24 }
 0x118   : > { %12718 = dma.done.wait (%p15495_p1), [#allocation9], 32   ;;  %p15496_p2 = pmov %p15495_p1 }
 0x119   : > { %p15497_p3 = pmov %p15495_p1 }
 0x11a   : > { %12720 = vsyncadd (%p15496_p2), [#allocation9], 4294967264 }
 0x11b   : > { %12722 = dma.done.wait (%p15497_p3), [#allocation11], 384   ;;  %p15498_p5 = pmov %p15495_p1 }
 0x11c   : > { %p15499_p8 = pmov %p15495_p1 }
 0x11d   : > { %12724 = vsyncadd (%p15498_p5), [#allocation11], 4294966912 }
 0x11e   : > { %12726 = dma.done.wait (%p15499_p8), [#allocation14], 528   ;;  %p15500_p10 = pmov %p15495_p1 }
 0x11f   : > { %p15501_p12 = pmov %p15495_p1 }
 0x120   : > { %12728 = vsyncadd (%p15500_p10), [#allocation14], 4294966768 }
 0x121   : > { %12730 = dma.done.wait (%p15501_p12), [#allocation17], 32   ;;  %p15502_p6 = pmov %p15495_p1 }
 0x122   : > { %p15503_p13 = pmov %p15495_p1 }
 0x123   : > { %12732 = vsyncadd (%p15502_p6), [#allocation17], 4294967264 }
 0x124   : > { %12734 = dma.done.wait (%p15503_p13), [#allocation20], 16   ;;  %p15504_p4 = pmov %p15495_p1 }
 0x125   : > { %v15453_v25 = vmov 0.0   ;;  %vm1085_vm0 = vcmask 1043456   ;;  %vm12760_vm1 = vmmov 1   ;;  %s15507_s19 = sld [smem:[#allocation35_spill]]  ;;  %v1044_v37 = vld [vmem:[%s13141_s0] sm:$0xff]  ;;  %vm1060_vm3 = vcmask 97280  }
 0x126   : > { %12736 = vsyncadd (%p15504_p4), [#allocation20], 4294967280  ;;  %1156 = vmatprep.mubr.f32.mxu0 %v15453_v25  ;;  %v1045_v43 = vld [vmem:[%s13141_s0 + $0x8] sm:$0xff]  ;;  %v1046_v45 = vld [vmem:[%s13141_s0 + $0x10] sm:$0xff]  ;;  %s15508_s17 = sld [smem:[#allocation36_spill]]  ;;  %vm15463_vm4 = vcmask 130048   ;;  %v15450_v21 = vlaneseq }
 0x127   : > { %vm13167_vm2 = vmpackc.low %vm1085_vm0, %vm12760_vm1  ;;  %v1047_v46 = vld [vmem:[%s13141_s0 + $0x18] sm:$0xff]  ;;  %v1048_v47 = vld [vmem:[%s13141_s0 + $0x20] sm:$0xff]  ;;  %vm15464_vm5 = vcmask 64512   ;;  %vm1643_vm6 = vcmask 162816   ;;  %s12763_s1 = smov 56   ;;  %vm1545_vm7 = vcmask 293888  }
 0x128   : > { %v1049_v48 = vld [vmem:[%s13141_s0 + $0x28] sm:$0xff]  ;;  %v1050_v49 = vld [vmem:[%s13141_s0 + $0x30] sm:$0xff]  ;;  %v1051_v51 = vld [vmem:[%s13141_s0 + $0x38] sm:$0xff]  ;;  %v13341_v22 = vshrl.u32 %v15450_v21, 7  ;;  %s12762_s0 = smov 36   ;;  %s12766_s2 = smov 112  }
 0x129   : > { %v1036_v56 = vld [vmem:[%s13139_s27] sm:$0xff]  ;;  %v1037_v59 = vld [vmem:[%s13139_s27 + $0x8] sm:$0xff]  ;;  %v1038_v60 = vld [vmem:[%s13139_s27 + $0x10] sm:$0xff]  ;;  %vm12767_vm8 = vmmov 0   ;;  %s12768_s28 = smov 100   ;;  %s15513_s29 = sld [smem:[#allocation38_spill]] }
 0x12a   : > { %v1039_v61 = vld [vmem:[%s13139_s27 + $0x18] sm:$0xff]  ;;  %v1040_v62 = vld [vmem:[%s13139_s27 + $0x20] sm:$0xff]  ;;  %v1041_v63 = vld [vmem:[%s13139_s27 + $0x28] sm:$0xff]  ;;  %15509 = vst [vmem:[#allocation28_spill] sm:$0xff] %v13341_v22  ;;  %v13344_v23 = vsub.s32 0, %v13341_v22  ;;  %s12770_s3 = smov 32  }
 0x12b   : > { %v1031_v27 = vld [vmem:[%s15507_s19 + $0x28] sm:$0xff]  ;;  %v1033_v28 = vld [vmem:[%s15507_s19 + $0x38] sm:$0xff]  ;;  %v1030_v29 = vld [vmem:[%s15507_s19 + $0x20] sm:$0xff]  ;;  %vm6340_vm9 = vcmask 1041409   ;;  %vm6343_vm10 = vcmask 1042434   ;;  %vm6346_vm11 = vcmask 1043459  }
 0x12c   : > { %v11344_v30 = vpack.c.bf16 %v1033_v28, %v1031_v27  ;;  %v1032_v31 = vld [vmem:[%s15507_s19 + $0x30] sm:$0xff]  ;;  %v1027_v33 = vld [vmem:[%s15507_s19 + $0x8] sm:$0xff]  ;;  %v1029_v34 = vld [vmem:[%s15507_s19 + $0x18] sm:$0xff]  ;;  %v1348_v40 = vrot.slane %v1033_v28, 4  ;;  %15510 = vst [vmem:[#allocation29_spill] sm:$0xff] %v13344_v23  ;;  %v13347_v27 = vsub.s32 1, %v13341_v22 }
 0x12d   : > { %v11347_v32 = vpack.c.bf16 %v1032_v31, %v1030_v29  ;;  %v1026_v35 = vld [vmem:[%s15507_s19] sm:$0xff]  ;;  %v1028_v36 = vld [vmem:[%s15507_s19 + $0x10] sm:$0xff]  ;;  %v11350_v38 = vpack.c.bf16 %v1029_v34, %v1027_v33  ;;  %v1035_v41 = vld [vmem:[%s15507_s19 + $0x48] sm:$0xf]  ;;  %v1345_v52 = vrot.slane %v1032_v31, 4  ;;  %vm6349_vm12 = vcmask 1044484  }
 0x12e   : > { %11346 = vmatprep.subr.msk.bf16.mxu0 %vm13167_vm2, %v11344_v30  ;;  %v11352_v39 = vpack.c.bf16 %v1028_v36, %v1026_v35  ;;  %v1349_v42 = vrot.slane %v1035_v41, 4  ;;  %v1034_v50 = vld [vmem:[%s15507_s19 + $0x40] sm:$0xf]  ;;  %v1536_v54 = vld [vmem:[%s15508_s17 + $0x8] sm:$0xff]  ;;  %v1538_v55 = vld [vmem:[%s15508_s17 + $0x18] sm:$0xff]  ;;  %15511 = vst [vmem:[#allocation30_spill] sm:$0xff] %v13347_v27 }
 0x12f   : > { %11349 = vmatpush1.bf16.msk.msra.mxu0 %vm13167_vm2, %v11347_v32  ;;  %v1346_v53 = vrot.slane %v1034_v50, 4  ;;  %v13238_v58 = vpack.c.bf16 %v1538_v55, %v1536_v54  ;;  %v1042_v0 = vld [vmem:[%s13139_s27 + $0x30] sm:$0xff]  ;;  %v1043_v1 = vld [vmem:[%s13139_s27 + $0x38] sm:$0xff]  ;;  %v1540_v4 = vld [vmem:[%s15508_s17 + $0x28] sm:$0xff]  ;;  %s15514_s6 = smov %s15513_s29  ;;  %vm6352_vm13 = vcmask 1045509   ;;  %vm6355_vm14 = vcmask 1046534  }
 0x130   : > { %11351 = vmatprep.subr.bf16.mxu0 %v11350_v38  ;;  %v1350_v44 = vsel %vm1085_vm0, %v1348_v40, %v1349_v42  ;;  %v1535_v2 = vld [vmem:[%s15508_s17] sm:$0xff]  ;;  %v1537_v3 = vld [vmem:[%s15508_s17 + $0x10] sm:$0xff]  ;;  %v1542_v5 = vld [vmem:[%s15508_s17 + $0x38] sm:$0xff]  ;;  %vm15465_vm15 = vcmask 1047559   ;;  %s12771_s11 = smov 64   ;;  %vm6704_vm1 = vcmask 261121  }
 0x131   : > { %v1347_v57 = vsel %vm1085_vm0, %v1345_v52, %v1346_v53  ;;  %v1052_v6 = vld [vmem:[%s13143_s5] sm:$0xff]  ;;  %v13277_v7 = vpack.c.bf16 %v1537_v3, %v1535_v2  ;;  %v13279_v8 = vpack.c.bf16 %v1542_v5, %v1540_v4  ;;  %v1541_v10 = vld [vmem:[%s15508_s17 + $0x30] sm:$0xff]  ;;  %v1055_v16 = vld [vmem:[%s13143_s5 + $0x18] sm:$0xff]  ;;  %s15520_s22 = sld [smem:[#allocation41_spill]]  ;;  %p1018_p7 = scmp.lt.s32.totalorder %s12907_s14, 1 }
 0x132   : > { %10458 = vmatmul.mubr.msk.f32.vlgmr.msra.gmra.mrb[0].mxu0 %vm1060_vm3, %v1044_v37  ;;  %v1539_v9 = vld [vmem:[%s15508_s17 + $0x20] sm:$0xff]  ;;  %v1053_v11 = vld [vmem:[%s13143_s5 + $0x8] sm:$0xff]  ;;  %v1054_v14 = vld [vmem:[%s13143_s5 + $0x10] sm:$0xff]  ;;  %s15548_s23 = sld [smem:[#allocation44_spill]]  ;;  %s15552_s21 = sld [smem:[#allocation43_spill]] }
 0x133   : > { %1162 = vmatprep.mubr.f32.mxu0 %v15453_v25  ;;  %11353 = vmatpush1.bf16.msra.mxu0 %v11352_v39  ;;  %v13291_v12 = vpack.c.bf16 %v1541_v10, %v1539_v9  ;;  %v13297_v13 = vld [vmem:[%s15508_s17 + $0x48] sm:$0xf]  ;;  %v13308_v15 = vld [vmem:[%s15508_s17 + $0x40] sm:$0xf]  ;;  %v1058_v19 = vld [vmem:[%s13143_s5 + $0x30] sm:$0xff]  ;;  %s15558_s14 = smov (!%p1018_p7, %s12907_s14), 1 }
 0x134   : > { %1378 = vmatprep.subr.mxu0 %v1350_v44  ;;  %v1056_v17 = vld [vmem:[%s13143_s5 + $0x20] sm:$0xff]  ;;  %v1057_v18 = vld [vmem:[%s13143_s5 + $0x28] sm:$0xff]  ;;  %v1059_v20 = vld [vmem:[%s13143_s5 + $0x38] sm:$0xff]  ;;  %s12761_s5 = smov 20   ;;  %s10454_s4 = sshll.u32 %s15558_s14, 3 }
 0x135   : > { %v1507_v24 = vld [vmem:[#allocation8] sm:$0x3]  ;;  %v5412_v26 = vld [vmem:[%s15514_s6 + $0x18] sm:$0xff] }
 0x136   : > { %10459 = vmatmul.mubr.msk.f32.gmra.mrb[2].mxu0 %vm1060_vm3, %v1045_v43  ;;  %v13350_v28 = vrot.slane %v1507_v24, %v13344_v23  ;;  %v13353_v29 = vrot.slane %v1507_v24, %v13347_v27 }
 0x137   : > { %1168 = vmatprep.mubr.f32.mxu0 %v15453_v25 }
 0x138   : > { %s1025_s12 = scalar_lea.vmem %s15548_s23, %s10454_s4 }
 0x13a   : > { %10460 = vmatmul.mubr.msk.f32.gmra.mrb[4].mxu0 %vm1060_vm3, %v1046_v45 }
 0x13b   : > { %1174 = vmatprep.mubr.f32.mxu0 %v15453_v25 }
 0x13e   : > { %10461 = vmatmul.mubr.msk.f32.gmra.mrb[6].mxu0 %vm1060_vm3, %v1047_v46 }
 0x13f   : > { %1180 = vmatprep.mubr.f32.mxu0 %v15453_v25 }
 0x142   : > { %10462 = vmatmul.mubr.msk.f32.gmra.mrb[8].mxu0 %vm1060_vm3, %v1048_v47 }
 0x143   : > { %1186 = vmatprep.mubr.f32.mxu0 %v15453_v25 }
 0x146   : > { %10463 = vmatmul.mubr.msk.f32.gmra.mrb[10].mxu0 %vm1060_vm3, %v1049_v48 }
 0x147   : > { %1192 = vmatprep.mubr.f32.mxu0 %v15453_v25 }
 0x14a   : > { %10464 = vmatmul.mubr.msk.f32.gmra.mrb[12].mxu0 %vm1060_vm3, %v1050_v49 }
 0x14b   : > { %1198 = vmatprep.mubr.f32.mxu0 %v15453_v25 }
 0x14e   : > { %10465 = vmatmul.mubr.msk.f32.gmra.mrb[14].mxu0 %vm1060_vm3, %v1051_v51 }
 0x14f   : > { %1294 = vmatprep.mubr.f32.mxu0 %v15453_v25 }
 0x152   : > { %10466 = vmatmul.mubr.msk.f32.vlgmr.msra.gmra.mrb[0].mxu0 %vm15463_vm4, %v1036_v56 }
 0x153   : > { %1300 = vmatprep.mubr.f32.mxu0 %v15453_v25  ;;  %1379 = vmatpush1.msra.mxu0 %v1347_v57 }
 0x154   : > { %11355 = vmatprep.subr.bf16.mxu0 %v13238_v58 }
 0x156   : > { %10467 = vmatmul.mubr.msk.f32.gmra.mrb[2].mxu0 %vm15463_vm4, %v1037_v59 }
 0x157   : > { %1306 = vmatprep.mubr.f32.mxu0 %v15453_v25 }
 0x15a   : > { %10468 = vmatmul.mubr.msk.f32.gmra.mrb[4].mxu0 %vm15463_vm4, %v1038_v60 }
 0x15b   : > { %1312 = vmatprep.mubr.f32.mxu0 %v15453_v25 }
 0x15e   : > { %10469 = vmatmul.mubr.msk.f32.gmra.mrb[6].mxu0 %vm15463_vm4, %v1039_v61 }
 0x15f   : > { %1318 = vmatprep.mubr.f32.mxu0 %v15453_v25 }
 0x162   : > { %10470 = vmatmul.mubr.msk.f32.gmra.mrb[8].mxu0 %vm15463_vm4, %v1040_v62 }
 0x163   : > { %1324 = vmatprep.mubr.f32.mxu0 %v15453_v25 }
 0x166   : > { %10471 = vmatmul.mubr.msk.f32.gmra.mrb[10].mxu0 %vm15463_vm4, %v1041_v63 }
 0x167   : > { %1330 = vmatprep.mubr.f32.mxu0 %v15453_v25 }
 0x16a   : > { %10472 = vmatmul.mubr.msk.f32.gmra.mrb[12].mxu0 %vm15463_vm4, %v1042_v0 }
 0x16b   : > { %1336 = vmatprep.mubr.f32.mxu0 %v15453_v25 }
 0x16e   : > { %10473 = vmatmul.mubr.msk.f32.gmra.mrb[14].mxu0 %vm15463_vm4, %v1043_v1 }
 0x16f   : > { %1442 = vmatprep.mubr.f32.mxu0 %v15453_v25 }
 0x172   : > { %10474 = vmatmul.mubr.msk.f32.vlgmr.msra.gmra.mrb[0].mxu0 %vm15464_vm5, %v1052_v6 }
 0x173   : > { %1448 = vmatprep.mubr.f32.mxu0 %v15453_v25  ;;  %11357 = vmatpush1.bf16.msra.mxu0 %v13277_v7 }
 0x174   : > { %11359 = vmatprep.subr.bf16.mxu0 %v13279_v8 }
 0x176   : > { %10475 = vmatmul.mubr.msk.f32.gmra.mrb[2].mxu0 %vm15464_vm5, %v1053_v11 }
 0x177   : > { %1454 = vmatprep.mubr.f32.mxu0 %v15453_v25  ;;  %11361 = vmatpush1.bf16.msra.mxu0 %v13291_v12 }
 0x178   : > { %10482 = vmatprep.subr.msk.mxu0 %vm1085_vm0, %v13297_v13 }
 0x17a   : > { %10476 = vmatmul.mubr.msk.f32.gmra.mrb[4].mxu0 %vm15464_vm5, %v1054_v14 }
 0x17b   : > { %1460 = vmatprep.mubr.f32.mxu0 %v15453_v25  ;;  %10483 = vmatpush1.msk.msra.mxu0 %vm1085_vm0, %v13308_v15 }
 0x17c   : > { %11363 = vmatprep.subr.bf16.mxu0 %v13238_v58 }
 0x17e   : > { %10477 = vmatmul.mubr.msk.f32.gmra.mrb[6].mxu0 %vm15464_vm5, %v1055_v16 }
 0x17f   : > { %1466 = vmatprep.mubr.f32.mxu0 %v15453_v25 }
 0x182   : > { %10478 = vmatmul.mubr.msk.f32.gmra.mrb[8].mxu0 %vm15464_vm5, %v1056_v17 }
 0x183   : > { %1472 = vmatprep.mubr.f32.mxu0 %v15453_v25 }
 0x186   : > { %10479 = vmatmul.mubr.msk.f32.gmra.mrb[10].mxu0 %vm15464_vm5, %v1057_v18 }
 0x187   : > { %1478 = vmatprep.mubr.f32.mxu0 %v15453_v25 }
 0x18a   : > { %10480 = vmatmul.mubr.msk.f32.gmra.mrb[12].mxu0 %vm15464_vm5, %v1058_v19 }
 0x18b   : > { %1484 = vmatprep.mubr.f32.mxu0 %v15453_v25 }
 0x18e   : > { %10481 = vmatmul.mubr.msk.f32.gmra.mrb[14].mxu0 %vm15464_vm5, %v1059_v20 }
 0x18f   : > { %1619 = vmatprep.mubr.f32.mxu0 %v15453_v25 }
 0x192   : > { %1620 = vmatmul.mubr.f32.vlgmr.msra.gmra.mrb[0].mxu0 %v15453_v25 }
 0x193   : > { %11365 = vmatpush1.bf16.msra.mxu0 %v13277_v7  ;;  %1729 = vmatprep.mubr.f32.mxu0 %v15453_v25 }
 0x194   : > { %11367 = vmatprep.subr.bf16.mxu0 %v13279_v8 }
 0x197   : > { %11369 = vmatpush1.bf16.msra.mxu0 %v13291_v12 }
 0x198   : > { %10485 = vmatprep.subr.msk.mxu0 %vm1085_vm0, %v13297_v13 }
 0x19b   : > { %10486 = vmatpush1.msk.msra.mxu0 %vm1085_vm0, %v13308_v15 }
 0x19c   : > { %11371 = vmatprep.subr.bf16.mxu0 %v13238_v58 }
 0x265   : > { %v1621_v30 = vpop.f32.mrb[0].mxu0 }
 0x266   : > { %v11515_v31 = vadd.f32 %v1621_v30, %v13350_v28  ;;  %v1623_v32 = vpop.f32.mrb[1].mxu0 }
 0x267   : > { %v11516_v33 = vadd.f32 %v1623_v32, %v13353_v29 }
 0x268   : > { %11758 = vtanh.f32 %v11515_v31  ;;  %v10484_v36 = vmul.f32 -1.442695, %v11515_v31 }
 0x269   : > { %11760 = vtanh.f32 %v11516_v33 }
 0x26a   : > { %11762 = vpow2.f32 %v10484_v36 }
 0x272   : > { %v11759_v34 = vpop.eup %11758 }
 0x273   : > { %1639 = vrot.lane.b32.xlu0 %v11759_v34, %s12761_s5  ;;  %v11761_v35 = vpop.eup %11760 }
 0x274   : > { %v11763_v37 = vpop.eup %11762 }
 0x275   : > { %v1631_v38 = vadd.f32 1.0, %v11763_v37 }
 0x277   : > { %1641 = vrot.lane.b32.xlu0 %v11761_v35, %s12761_s5  ;;  %11764 = vrcp.f32 %v1631_v38 }
 0x281   : > { %v11765_v41 = vpop.eup %11764 }
 0x282   : > { %v1636_v44 = vmul.f32 0.0, %v11765_v41 }
 0x2e5   : > { %v1640_v39 = vpop.permute.xlu0 %1639 }
 0x2e9   : > { %v1642_v40 = vpop.permute.xlu0 %1641 }
 0x2ea   : > { %v1644_v42 = vsel %vm1643_vm6, %v1640_v39, %v1642_v40 }
 0x2eb   : > { %v1646_v43 = vmul.f32 %v11765_v41, %v1644_v42 }
 0x2ed   : > { %1648 = vrot.lane.b32.xlu1 %v1646_v43, %s12762_s0 }
 0x35f   : > { %v1649_v45 = vpop.permute.xlu1 %1648 }
 0x360   : > { %v1651_v46 = vadd.f32 %v1649_v45, %v1636_v44 }
 0x362   : > { %11766 = vtanh.f32 %v1651_v46 }
 0x36c   : > { %v11767_v47 = vpop.eup %11766 }
 0x36d   : > { %1654 = vrot.lane.b32.xlu1 %v11767_v47, %s12762_s0 }
 0x3df   : > { %v1655_v48 = vpop.permute.xlu1 %1654 }
 0x3e0   : > { %v1657_v49 = vmul.f32 %v11765_v41, %v1655_v48 }
 0x3e2   : > { %1659 = vrot.lane.b32.xlu0 %v1657_v49, %s12763_s1 }
 0x454   : > { %v1660_v50 = vpop.permute.xlu0 %1659 }
 0x455   : > { %1662 = vst.msk [vmem:[#allocation2] sm:$0xff] %vm1545_vm7, %v1660_v50  ;;  %10487 = vmatmul.mubr.msk.f32.vlgmr.msra.gmra.mrb[2].mxu0 %vm1545_vm7, %v1660_v50 }
 0x456   : > { %11373 = vmatpush1.bf16.msra.mxu0 %v13277_v7  ;;  %1839 = vmatprep.mubr.f32.mxu0 %v15453_v25 }
 0x457   : > { %11375 = vmatprep.subr.bf16.mxu0 %v13279_v8 }
 0x45a   : > { %11377 = vmatpush1.bf16.msra.mxu0 %v13291_v12 }
 0x45b   : > { %10489 = vmatprep.subr.msk.mxu0 %vm1085_vm0, %v13297_v13 }
 0x45e   : > { %10490 = vmatpush1.msk.msra.mxu0 %vm1085_vm0, %v13308_v15 }
 0x45f   : > { %11379 = vmatprep.subr.bf16.mxu0 %v13238_v58 }
 0x528   : > { %v1731_v51 = vpop.f32.mrb[2].mxu0 }
 0x529   : > { %v11517_v52 = vadd.f32 %v1731_v51, %v13350_v28  ;;  %v1733_v53 = vpop.f32.mrb[3].mxu0 }
 0x52a   : > { %v11518_v54 = vadd.f32 %v1733_v53, %v13353_v29 }
 0x52b   : > { %11768 = vtanh.f32 %v11517_v52  ;;  %v10488_v57 = vmul.f32 -1.442695, %v11517_v52 }
 0x52c   : > { %11770 = vtanh.f32 %v11518_v54 }
 0x52d   : > { %11772 = vpow2.f32 %v10488_v57 }
 0x535   : > { %v11769_v55 = vpop.eup %11768 }
 0x536   : > { %v11771_v56 = vpop.eup %11770  ;;  %1749 = vrot.lane.b32.xlu1 %v11769_v55, %s12761_s5 }
 0x537   : > { %1751 = vrot.lane.b32.xlu0 %v11771_v56, %s12761_s5  ;;  %v11773_v59 = vpop.eup %11772 }
 0x538   : > { %v1741_v60 = vadd.f32 1.0, %v11773_v59 }
 0x53a   : > { %11774 = vrcp.f32 %v1741_v60 }
 0x544   : > { %v11775_v63 = vpop.eup %11774 }
 0x545   : > { %v1746_v2 = vmul.f32 %v11775_v63, %v1651_v46 }
 0x5a8   : > { %v1750_v61 = vpop.permute.xlu1 %1749 }
 0x5a9   : > { %v1752_v62 = vpop.permute.xlu0 %1751 }
 0x5aa   : > { %v1753_v0 = vsel %vm1643_vm6, %v1750_v61, %v1752_v62 }
 0x5ab   : > { %v1755_v1 = vmul.f32 %v11775_v63, %v1753_v0 }
 0x5ad   : > { %1757 = vrot.lane.b32.xlu1 %v1755_v1, %s12762_s0 }
 0x61f   : > { %v1758_v3 = vpop.permute.xlu1 %1757 }
 0x620   : > { %v1760_v4 = vadd.f32 %v1758_v3, %v1746_v2 }
 0x622   : > { %11776 = vtanh.f32 %v1760_v4 }
 0x62c   : > { %v11777_v5 = vpop.eup %11776 }
 0x62d   : > { %1763 = vrot.lane.b32.xlu0 %v11777_v5, %s12762_s0 }
 0x69f   : > { %v1764_v6 = vpop.permute.xlu0 %1763 }
 0x6a0   : > { %v1766_v9 = vmul.f32 %v11775_v63, %v1764_v6 }
 0x6a2   : > { %1768 = vrot.lane.b32.xlu1 %v1766_v9, %s12763_s1 }
 0x714   : > { %v1769_v10 = vpop.permute.xlu1 %1768 }
 0x715   : > { %1772 = vst.msk [vmem:[#allocation2 + $0x8] sm:$0xff] %vm1545_vm7, %v1769_v10  ;;  %10491 = vmatmul.mubr.msk.f32.vlgmr.msra.gmra.mrb[4].mxu0 %vm1545_vm7, %v1769_v10 }
 0x716   : > { %11381 = vmatpush1.bf16.msra.mxu0 %v13277_v7  ;;  %1949 = vmatprep.mubr.f32.mxu0 %v15453_v25 }
 0x717   : > { %11383 = vmatprep.subr.bf16.mxu0 %v13279_v8 }
 0x71a   : > { %11385 = vmatpush1.bf16.msra.mxu0 %v13291_v12 }
 0x71b   : > { %10493 = vmatprep.subr.msk.mxu0 %vm1085_vm0, %v13297_v13 }
 0x71e   : > { %10494 = vmatpush1.msk.msra.mxu0 %vm1085_vm0, %v13308_v15 }
 0x71f   : > { %11387 = vmatprep.subr.bf16.mxu0 %v13238_v58 }
 0x7e8   : > { %v1841_v11 = vpop.f32.mrb[4].mxu0 }
 0x7e9   : > { %v11519_v14 = vadd.f32 %v1841_v11, %v13350_v28  ;;  %v1843_v16 = vpop.f32.mrb[5].mxu0 }
 0x7ea   : > { %v11520_v17 = vadd.f32 %v1843_v16, %v13353_v29 }
 0x7eb   : > { %11778 = vtanh.f32 %v11519_v14  ;;  %v10492_v20 = vmul.f32 -1.442695, %v11519_v14 }
 0x7ec   : > { %11780 = vtanh.f32 %v11520_v17 }
 0x7ed   : > { %11782 = vpow2.f32 %v10492_v20 }
 0x7f5   : > { %v11779_v18 = vpop.eup %11778 }
 0x7f6   : > { %v11781_v19 = vpop.eup %11780  ;;  %1859 = vrot.lane.b32.xlu0 %v11779_v18, %s12761_s5 }
 0x7f7   : > { %1861 = vrot.lane.b32.xlu1 %v11781_v19, %s12761_s5  ;;  %v11783_v24 = vpop.eup %11782 }
 0x7f8   : > { %v1851_v30 = vadd.f32 1.0, %v11783_v24 }
 0x7fa   : > { %11784 = vrcp.f32 %v1851_v30 }
 0x804   : > { %v11785_v33 = vpop.eup %11784 }
 0x805   : > { %v1856_v36 = vmul.f32 %v11785_v33, %v1760_v4 }
 0x868   : > { %v1860_v31 = vpop.permute.xlu0 %1859 }
 0x869   : > { %v1862_v32 = vpop.permute.xlu1 %1861 }
 0x86a   : > { %v1863_v34 = vsel %vm1643_vm6, %v1860_v31, %v1862_v32 }
 0x86b   : > { %v1865_v35 = vmul.f32 %v11785_v33, %v1863_v34 }
 0x86d   : > { %1867 = vrot.lane.b32.xlu0 %v1865_v35, %s12762_s0 }
 0x8df   : > { %v1868_v37 = vpop.permute.xlu0 %1867 }
 0x8e0   : > { %v1870_v38 = vadd.f32 %v1868_v37, %v1856_v36 }
 0x8e2   : > { %11786 = vtanh.f32 %v1870_v38 }
 0x8ec   : > { %v11787_v39 = vpop.eup %11786 }
 0x8ed   : > { %1873 = vrot.lane.b32.xlu1 %v11787_v39, %s12762_s0 }
 0x95f   : > { %v1874_v40 = vpop.permute.xlu1 %1873 }
 0x960   : > { %v1876_v41 = vmul.f32 %v11785_v33, %v1874_v40 }
 0x962   : > { %1878 = vrot.lane.b32.xlu0 %v1876_v41, %s12763_s1 }
 0x9d4   : > { %v1879_v42 = vpop.permute.xlu0 %1878 }
 0x9d5   : > { %1882 = vst.msk [vmem:[#allocation2 + $0x10] sm:$0xff] %vm1545_vm7, %v1879_v42  ;;  %10495 = vmatmul.mubr.msk.f32.vlgmr.msra.gmra.mrb[6].mxu0 %vm1545_vm7, %v1879_v42 }
 0x9d6   : > { %11389 = vmatpush1.bf16.msra.mxu0 %v13277_v7  ;;  %2059 = vmatprep.mubr.f32.mxu0 %v15453_v25 }
 0x9d7   : > { %11391 = vmatprep.subr.bf16.mxu0 %v13279_v8 }
 0x9da   : > { %11393 = vmatpush1.bf16.msra.mxu0 %v13291_v12 }
 0x9db   : > { %10497 = vmatprep.subr.msk.mxu0 %vm1085_vm0, %v13297_v13 }
 0x9de   : > { %10498 = vmatpush1.msk.msra.mxu0 %vm1085_vm0, %v13308_v15 }
 0x9df   : > { %11395 = vmatprep.subr.bf16.mxu0 %v13238_v58 }
 0xaa8   : > { %v1951_v43 = vpop.f32.mrb[6].mxu0 }
 0xaa9   : > { %v11521_v44 = vadd.f32 %v1951_v43, %v13350_v28  ;;  %v1953_v45 = vpop.f32.mrb[7].mxu0 }
 0xaaa   : > { %v11522_v46 = vadd.f32 %v1953_v45, %v13353_v29 }
 0xaab   : > { %11788 = vtanh.f32 %v11521_v44  ;;  %v10496_v49 = vmul.f32 -1.442695, %v11521_v44 }
 0xaac   : > { %11790 = vtanh.f32 %v11522_v46 }
 0xaad   : > { %11792 = vpow2.f32 %v10496_v49 }
 0xab5   : > { %v11789_v47 = vpop.eup %11788 }
 0xab6   : > { %v11791_v48 = vpop.eup %11790  ;;  %1969 = vrot.lane.b32.xlu1 %v11789_v47, %s12761_s5 }
 0xab7   : > { %1971 = vrot.lane.b32.xlu0 %v11791_v48, %s12761_s5  ;;  %v11793_v50 = vpop.eup %11792 }
 0xab8   : > { %v1961_v51 = vadd.f32 1.0, %v11793_v50 }
 0xaba   : > { %11794 = vrcp.f32 %v1961_v51 }
 0xac4   : > { %v11795_v54 = vpop.eup %11794 }
 0xac5   : > { %v1966_v57 = vmul.f32 %v11795_v54, %v1870_v38 }
 0xb28   : > { %v1970_v52 = vpop.permute.xlu1 %1969 }
 0xb29   : > { %v1972_v53 = vpop.permute.xlu0 %1971 }
 0xb2a   : > { %v1973_v55 = vsel %vm1643_vm6, %v1970_v52, %v1972_v53 }
 0xb2b   : > { %v1975_v56 = vmul.f32 %v11795_v54, %v1973_v55 }
 0xb2d   : > { %1977 = vrot.lane.b32.xlu1 %v1975_v56, %s12762_s0 }
 0xb9f   : > { %v1978_v59 = vpop.permute.xlu1 %1977 }
 0xba0   : > { %v1980_v60 = vadd.f32 %v1978_v59, %v1966_v57 }
 0xba2   : > { %11796 = vtanh.f32 %v1980_v60 }
 0xbac   : > { %v11797_v61 = vpop.eup %11796 }
 0xbad   : > { %1983 = vrot.lane.b32.xlu0 %v11797_v61, %s12762_s0 }
 0xc1f   : > { %v1984_v62 = vpop.permute.xlu0 %1983 }
 0xc20   : > { %v1986_v63 = vmul.f32 %v11795_v54, %v1984_v62 }
 0xc22   : > { %1988 = vrot.lane.b32.xlu1 %v1986_v63, %s12763_s1 }
 0xc94   : > { %v1989_v0 = vpop.permute.xlu1 %1988 }
 0xc95   : > { %1992 = vst.msk [vmem:[#allocation2 + $0x18] sm:$0xff] %vm1545_vm7, %v1989_v0  ;;  %10499 = vmatmul.mubr.msk.f32.vlgmr.msra.gmra.mrb[8].mxu0 %vm1545_vm7, %v1989_v0 }
 0xc96   : > { %11397 = vmatpush1.bf16.msra.mxu0 %v13277_v7  ;;  %2169 = vmatprep.mubr.f32.mxu0 %v15453_v25 }
 0xc97   : > { %11399 = vmatprep.subr.bf16.mxu0 %v13279_v8 }
 0xc9a   : > { %11401 = vmatpush1.bf16.msra.mxu0 %v13291_v12 }
 0xc9b   : > { %10501 = vmatprep.subr.msk.mxu0 %vm1085_vm0, %v13297_v13 }
 0xc9e   : > { %10502 = vmatpush1.msk.msra.mxu0 %vm1085_vm0, %v13308_v15 }
 0xc9f   : > { %11403 = vmatprep.subr.bf16.mxu0 %v13238_v58 }
 0xd68   : > { %v2061_v1 = vpop.f32.mrb[8].mxu0 }
 0xd69   : > { %v11523_v2 = vadd.f32 %v2061_v1, %v13350_v28  ;;  %v2063_v3 = vpop.f32.mrb[9].mxu0 }
 0xd6a   : > { %v11524_v4 = vadd.f32 %v2063_v3, %v13353_v29 }
 0xd6b   : > { %11798 = vtanh.f32 %v11523_v2  ;;  %v10500_v9 = vmul.f32 -1.442695, %v11523_v2 }
 0xd6c   : > { %11800 = vtanh.f32 %v11524_v4 }
 0xd6d   : > { %11802 = vpow2.f32 %v10500_v9 }
 0xd75   : > { %v11799_v5 = vpop.eup %11798 }
 0xd76   : > { %v11801_v6 = vpop.eup %11800  ;;  %2079 = vrot.lane.b32.xlu0 %v11799_v5, %s12761_s5 }
 0xd77   : > { %2081 = vrot.lane.b32.xlu1 %v11801_v6, %s12761_s5  ;;  %v11803_v10 = vpop.eup %11802 }
 0xd78   : > { %v2071_v11 = vadd.f32 1.0, %v11803_v10 }
 0xd7a   : > { %11804 = vrcp.f32 %v2071_v11 }
 0xd84   : > { %v11805_v17 = vpop.eup %11804 }
 0xd85   : > { %v2076_v20 = vmul.f32 %v11805_v17, %v1980_v60 }
 0xde8   : > { %v2080_v14 = vpop.permute.xlu0 %2079 }
 0xde9   : > { %v2082_v16 = vpop.permute.xlu1 %2081 }
 0xdea   : > { %v2083_v18 = vsel %vm1643_vm6, %v2080_v14, %v2082_v16 }
 0xdeb   : > { %v2085_v19 = vmul.f32 %v11805_v17, %v2083_v18 }
 0xded   : > { %2087 = vrot.lane.b32.xlu0 %v2085_v19, %s12762_s0 }
 0xe5f   : > { %v2088_v24 = vpop.permute.xlu0 %2087 }
 0xe60   : > { %v2090_v30 = vadd.f32 %v2088_v24, %v2076_v20 }
 0xe62   : > { %11806 = vtanh.f32 %v2090_v30 }
 0xe6c   : > { %v11807_v31 = vpop.eup %11806 }
 0xe6d   : > { %2093 = vrot.lane.b32.xlu1 %v11807_v31, %s12762_s0 }
 0xedf   : > { %v2094_v32 = vpop.permute.xlu1 %2093 }
 0xee0   : > { %v2096_v33 = vmul.f32 %v11805_v17, %v2094_v32 }
 0xee2   : > { %2098 = vrot.lane.b32.xlu0 %v2096_v33, %s12763_s1 }
 0xf54   : > { %v2099_v34 = vpop.permute.xlu0 %2098 }
 0xf55   : > { %2102 = vst.msk [vmem:[#allocation2 + $0x20] sm:$0xff] %vm1545_vm7, %v2099_v34  ;;  %10503 = vmatmul.mubr.msk.f32.vlgmr.msra.gmra.mrb[10].mxu0 %vm1545_vm7, %v2099_v34 }
 0xf56   : > { %11405 = vmatpush1.bf16.msra.mxu0 %v13277_v7  ;;  %2279 = vmatprep.mubr.f32.mxu0 %v15453_v25 }
 0xf57   : > { %11407 = vmatprep.subr.bf16.mxu0 %v13279_v8 }
 0xf5a   : > { %11409 = vmatpush1.bf16.msra.mxu0 %v13291_v12 }
 0xf5b   : > { %10505 = vmatprep.subr.msk.mxu0 %vm1085_vm0, %v13297_v13 }
 0xf5e   : > { %10506 = vmatpush1.msk.msra.mxu0 %vm1085_vm0, %v13308_v15 }
 0xf5f   : > { %11411 = vmatprep.subr.bf16.mxu0 %v13238_v58 }
0x1028   : > { %v2171_v35 = vpop.f32.mrb[10].mxu0 }
0x1029   : > { %v11525_v36 = vadd.f32 %v2171_v35, %v13350_v28  ;;  %v2173_v37 = vpop.f32.mrb[11].mxu0 }
0x102a   : > { %v11526_v38 = vadd.f32 %v2173_v37, %v13353_v29 }
0x102b   : > { %11808 = vtanh.f32 %v11525_v36  ;;  %v10504_v41 = vmul.f32 -1.442695, %v11525_v36 }
0x102c   : > { %11810 = vtanh.f32 %v11526_v38 }
0x102d   : > { %11812 = vpow2.f32 %v10504_v41 }
0x1035   : > { %v11809_v39 = vpop.eup %11808 }
0x1036   : > { %v11811_v40 = vpop.eup %11810  ;;  %2189 = vrot.lane.b32.xlu1 %v11809_v39, %s12761_s5  ;;  %v2577_v39 = vld [vmem:[#allocation10] sm:$0xff] }
0x1037   : > { %2191 = vrot.lane.b32.xlu0 %v11811_v40, %s12761_s5  ;;  %v11813_v42 = vpop.eup %11812  ;;  %v2578_v40 = vld [vmem:[#allocation10 + $0x8] sm:$0xf] }
0x1038   : > { %v2181_v43 = vadd.f32 1.0, %v11813_v42  ;;  %v11418_v41 = vpack.c.bf16 %v2578_v40, %v2577_v39  ;;  %v12764_v42 = vmov 1983009808  }
0x103a   : > { %11814 = vrcp.f32 %v2181_v43  ;;  %11420 = vmatprep.subr.msk.bf16.mxu1 %vm13167_vm2, %v11418_v41  ;;  %v2444_v43 = vunpack.c.l.s4 %v12764_v42 }
0x103b   : > { %11423 = vmatpush3.bf16.msk.msra.mxu1 %vm13167_vm2, %v11418_v41 }
0x103c   : > { %10941 = vmatprep.subr.mxu1 %v15453_v25 }
0x1044   : > { %v11815_v45 = vpop.eup %11814 }
0x1045   : > { %v2186_v48 = vmul.f32 %v11815_v45, %v2090_v30 }
0x10a8   : > { %v2190_v58 = vpop.permute.xlu1 %2189 }
0x10a9   : > { %v2192_v44 = vpop.permute.xlu0 %2191 }
0x10aa   : > { %v2193_v46 = vsel %vm1643_vm6, %v2190_v58, %v2192_v44  ;;  %v2445_v44 = vunpack.c.0.s8 %v2444_v43 }
0x10ab   : > { %v2195_v47 = vmul.f32 %v11815_v45, %v2193_v46  ;;  %v12765_v46 = vmov 1934713408  }
0x10ad   : > { %2197 = vrot.lane.b32.xlu1 %v2195_v47, %s12762_s0  ;;  %v2508_v47 = vunpack.c.l.s4 %v12765_v46 }
0x111f   : > { %v2198_v49 = vpop.permute.xlu1 %2197 }
0x1120   : > { %v2200_v50 = vadd.f32 %v2198_v49, %v2186_v48  ;;  %v11734_v48 = vld [vmem:[#allocation2] ss:$16 sps:$4 sm:$0xff]   ;;  %v13493_v49 = vsub.s32 %v2445_v44, %v13341_v22 }
0x1122   : > { %11816 = vtanh.f32 %v2200_v50 }
0x112c   : > { %v11817_v51 = vpop.eup %11816 }
0x112d   : > { %2203 = vrot.lane.b32.xlu0 %v11817_v51, %s12762_s0 }
0x119f   : > { %v2204_v52 = vpop.permute.xlu0 %2203 }
0x11a0   : > { %v2206_v53 = vmul.f32 %v11815_v45, %v2204_v52  ;;  %v11736_v45 = vld [vmem:[#allocation2 + $0x8] ss:$16 sps:$4 sm:$0xff]   ;;  %v2509_v52 = vunpack.c.0.s8 %v2508_v47 }
0x11a2   : > { %2208 = vrot.lane.b32.xlu1 %v2206_v53, %s12763_s1  ;;  %v2449_v53 = vrot.slane %v11734_v48, %v13493_v49 }
0x1214   : > { %v2209_v54 = vpop.permute.xlu1 %2208 }
0x1215   : > { %2212 = vst.msk [vmem:[#allocation2 + $0x28] sm:$0xff] %vm1545_vm7, %v2209_v54  ;;  %10507 = vmatmul.mubr.msk.f32.vlgmr.msra.gmra.mrb[12].mxu0 %vm1545_vm7, %v2209_v54 }
0x1216   : > { %11413 = vmatpush1.bf16.msra.mxu0 %v13277_v7  ;;  %2389 = vmatprep.mubr.f32.mxu0 %v15453_v25 }
0x1217   : > { %11415 = vmatprep.subr.bf16.mxu0 %v13279_v8 }
0x121a   : > { %11417 = vmatpush1.bf16.msra.mxu0 %v13291_v12 }
0x121b   : > { %10509 = vmatprep.subr.msk.mxu0 %vm1085_vm0, %v13297_v13 }
0x121e   : > { %10510 = vmatpush1.msk.msra.mxu0 %vm1085_vm0, %v13308_v15 }
0x12e8   : > { %v2281_v55 = vpop.f32.mrb[12].mxu0 }
0x12e9   : > { %v11527_v56 = vadd.f32 %v2281_v55, %v13350_v28  ;;  %v2283_v57 = vpop.f32.mrb[13].mxu0 }
0x12ea   : > { %v11528_v59 = vadd.f32 %v2283_v57, %v13353_v29 }
0x12eb   : > { %11818 = vtanh.f32 %v11527_v56  ;;  %v10508_v8 = vmul.f32 -1.442695, %v11527_v56  ;;  %v11743_v56 = vld [vmem:[#allocation2 + $0xc] ss:$16 sps:$4 sm:$0xff]  }
0x12ec   : > { %11820 = vtanh.f32 %v11528_v59 }
0x12ed   : > { %11822 = vpow2.f32 %v10508_v8 }
0x12f5   : > { %v11819_v7 = vpop.eup %11818 }
0x12f6   : > { %v11821_v60 = vpop.eup %11820  ;;  %2299 = vrot.lane.b32.xlu0 %v11819_v7, %s12761_s5 }
0x12f7   : > { %2301 = vrot.lane.b32.xlu1 %v11821_v60, %s12761_s5  ;;  %v11823_v12 = vpop.eup %11822  ;;  %v13500_v60 = vsub.s32 %v2509_v52, %v13341_v22 }
0x12f8   : > { %v2291_v13 = vadd.f32 1.0, %v11823_v12  ;;  %v11742_v12 = vld [vmem:[#allocation2 + $0x4] ss:$16 sps:$4 sm:$0xff]  }
0x12f9   : > { %15512 = vst [vmem:[#allocation31_spill] sm:$0xff] %v13500_v60 }
0x12fa   : > { %11824 = vrcp.f32 %v2291_v13 }
0x1304   : > { %v11825_v62 = vpop.eup %11824 }
0x1305   : > { %v2296_v1 = vmul.f32 %v11825_v62, %v2200_v50  ;;  %v2465_v50 = vrot.slane %v11736_v45, %v13493_v49 }
0x1307   : > { %v2505_v7 = vcombine.low %v2449_v53, %v2465_v50 }
0x1368   : > { %v2300_v15 = vpop.permute.xlu0 %2299 }
0x1369   : > { %v2302_v61 = vpop.permute.xlu1 %2301 }
0x136a   : > { %v2303_v63 = vsel %vm1643_vm6, %v2300_v15, %v2302_v61 }
0x136b   : > { %v2305_v0 = vmul.f32 %v11825_v62, %v2303_v63  ;;  %v2513_v63 = vrot.slane %v2505_v7, %v13500_v60 }
0x136d   : > { %2307 = vrot.lane.b32.xlu0 %v2305_v0, %s12762_s0 }
0x13df   : > { %v2308_v2 = vpop.permute.xlu0 %2307 }
0x13e0   : > { %v2310_v3 = vadd.f32 %v2308_v2, %v2296_v1  ;;  %v2506_v1 = vcombine.high %v2449_v53, %v2465_v50 }
0x13e2   : > { %11826 = vtanh.f32 %v2310_v3 }
0x13ec   : > { %v11827_v4 = vpop.eup %11826 }
0x13ed   : > { %2313 = vrot.lane.b32.xlu1 %v11827_v4, %s12762_s0 }
0x145f   : > { %v2314_v5 = vpop.permute.xlu1 %2313 }
0x1460   : > { %v2316_v6 = vmul.f32 %v11825_v62, %v2314_v5  ;;  %v2472_v62 = vrot.slane %v11743_v56, %v13493_v49 }
0x1462   : > { %2318 = vrot.lane.b32.xlu0 %v2316_v6, %s12763_s1 }
0x14d4   : > { %v2319_v9 = vpop.permute.xlu0 %2318 }
0x14d5   : > { %2322 = vst.msk [vmem:[#allocation2 + $0x30] sm:$0xff] %vm1545_vm7, %v2319_v9  ;;  %10511 = vmatmul.mubr.msk.f32.vlgmr.msra.gmra.mrb[14].mxu0 %vm1545_vm7, %v2319_v9 }
0x14d6   : > { %11199 = vmatprep.mubr.msk.f32.mxu0 %vm12767_vm8, %v15453_v25 }
0x14dc   : > { %v11738_v51 = vld [vmem:[#allocation2 + $0x20] ss:$16 sps:$4 sm:$0xff]   ;;  %v11744_v8 = vld [vmem:[#allocation2 + $0x24] ss:$16 sps:$4 sm:$0xff]  }
0x14dd   : > { %v2481_v57 = vrot.slane %v11738_v51, %v13493_v49  ;;  %v2488_v2 = vrot.slane %v11744_v8, %v13493_v49 }
0x15a8   : > { %v2391_v10 = vpop.f32.mrb[14].mxu0 }
0x15a9   : > { %v11529_v11 = vadd.f32 %v2391_v10, %v13350_v28  ;;  %v2393_v14 = vpop.f32.mrb[15].mxu0  ;;  %v2520_v10 = vrot.slane %v2506_v1, %v13500_v60 }
0x15aa   : > { %v11530_v16 = vadd.f32 %v2393_v14, %v13353_v29 }
0x15ab   : > { %11828 = vtanh.f32 %v11529_v11  ;;  %v10512_v19 = vmul.f32 -1.442695, %v11529_v11 }
0x15ac   : > { %11830 = vtanh.f32 %v11530_v16 }
0x15ad   : > { %11832 = vpow2.f32 %v10512_v19 }
0x15b5   : > { %v11829_v17 = vpop.eup %11828 }
0x15b6   : > { %v11831_v18 = vpop.eup %11830  ;;  %2409 = vrot.lane.b32.xlu1 %v11829_v17, %s12761_s5 }
0x15b7   : > { %2411 = vrot.lane.b32.xlu0 %v11831_v18, %s12761_s5  ;;  %v11833_v20 = vpop.eup %11832 }
0x15b8   : > { %v2401_v24 = vadd.f32 1.0, %v11833_v20 }
0x15ba   : > { %11834 = vrcp.f32 %v2401_v24 }
0x15c4   : > { %v11835_v32 = vpop.eup %11834 }
0x15c5   : > { %v2406_v29 = vmul.f32 %v11835_v32, %v2310_v3  ;;  %v2456_v3 = vrot.slane %v11742_v12, %v13493_v49 }
0x15c7   : > { %v2521_v11 = vcombine.low %v2456_v3, %v2472_v62  ;;  %v2522_v20 = vcombine.high %v2456_v3, %v2472_v62 }
0x15c9   : > { %v2529_v19 = vrot.slane %v2521_v11, %v13500_v60 }
0x1628   : > { %v2410_v30 = vpop.permute.xlu1 %2409 }
0x1629   : > { %v2412_v31 = vpop.permute.xlu0 %2411 }
0x162a   : > { %v2413_v28 = vsel %vm1643_vm6, %v2410_v30, %v2412_v31  ;;  %vm7066_vm6 = vcmask 254976  }
0x162b   : > { %v2415_v33 = vmul.f32 %v11835_v32, %v2413_v28 }
0x162d   : > { %2417 = vrot.lane.b32.xlu1 %v2415_v33, %s12762_s0 }
0x169f   : > { %v2418_v34 = vpop.permute.xlu1 %2417 }
0x16a0   : > { %v2420_v35 = vadd.f32 %v2418_v34, %v2406_v29 }
0x16a2   : > { %11836 = vtanh.f32 %v2420_v35 }
0x16ac   : > { %v11837_v36 = vpop.eup %11836 }
0x16ad   : > { %2423 = vrot.lane.b32.xlu0 %v11837_v36, %s12762_s0  ;;  %s15547_s0 = sld [smem:[#allocation42_spill]] }
0x171f   : > { %v2424_v37 = vpop.permute.xlu0 %2423 }
0x1720   : > { %v2426_v38 = vmul.f32 %v11835_v32, %v2424_v37  ;;  %v2536_v32 = vrot.slane %v2522_v20, %v13500_v60 }
0x1722   : > { %2428 = vrot.lane.b32.xlu1 %v2426_v38, %s12763_s1  ;;  %s15517_s1 = sld [smem:[#allocation39_spill]] }
0x1794   : > { %v2429_v58 = vpop.permute.xlu1 %2428 }
0x1795   : > { %2432 = vst.msk [vmem:[#allocation2 + $0x38] sm:$0xff] %vm1545_vm7, %v2429_v58  ;;  %vm7424_vm7 = vcmask 261123  }
0x179c   : > { %v11740_v54 = vld [vmem:[#allocation2 + $0x28] ss:$16 sps:$4 sm:$0xff]   ;;  %v11745_v55 = vld [vmem:[#allocation2 + $0x2c] ss:$16 sps:$4 sm:$0xff]  }
0x179d   : > { %v2497_v59 = vrot.slane %v11740_v54, %v13493_v49  ;;  %v2504_v61 = vrot.slane %v11745_v55, %v13493_v49 }
0x179f   : > { %v2537_v13 = vcombine.low %v2481_v57, %v2497_v59  ;;  %v2538_v15 = vcombine.high %v2481_v57, %v2497_v59  ;;  %v2553_v9 = vcombine.low %v2488_v2, %v2504_v61  ;;  %v2554_v18 = vcombine.high %v2488_v2, %v2504_v61 }
0x17a1   : > { %v2545_v0 = vrot.slane %v2537_v13, %v13500_v60  ;;  %v2552_v6 = vrot.slane %v2538_v15, %v13500_v60  ;;  %v2561_v17 = vrot.slane %v2553_v9, %v13500_v60  ;;  %v2568_v31 = vrot.slane %v2554_v18, %v13500_v60 }
0x17a3   : > { %v13508_v4 = vcombine.high %v2513_v63, %v2545_v0  ;;  %v13510_v5 = vcombine.low %v2513_v63, %v2545_v0  ;;  %v13516_v14 = vcombine.high %v2520_v10, %v2552_v6  ;;  %v13518_v16 = vcombine.low %v2520_v10, %v2552_v6 }
0x17a4   : > { %v13524_v24 = vcombine.high %v2529_v19, %v2561_v17  ;;  %v13526_v30 = vcombine.low %v2529_v19, %v2561_v17  ;;  %v13532_v28 = vcombine.high %v2536_v32, %v2568_v31  ;;  %v13534_v33 = vcombine.low %v2536_v32, %v2568_v31 }
0x17a5   : > { %2589 = vrot.lane.b32.xlu1 %v13508_v4, %s12766_s2  ;;  %2587 = vrot.lane.b32.xlu0 %v13510_v5, %s12766_s2 }
0x17a9   : > { %2593 = vrot.lane.b32.xlu1 %v13516_v14, %s12766_s2  ;;  %2591 = vrot.lane.b32.xlu0 %v13518_v16, %s12766_s2 }
0x17ad   : > { %2597 = vrot.lane.b32.xlu1 %v13524_v24, %s12766_s2  ;;  %2595 = vrot.lane.b32.xlu0 %v13526_v30, %s12766_s2 }
0x17b1   : > { %2601 = vrot.lane.b32.xlu1 %v13532_v28, %s12766_s2  ;;  %2599 = vrot.lane.b32.xlu0 %v13534_v33, %s12766_s2 }
0x1817   : > { %v13538_v29 = vpop.permute.xlu1 %2589  ;;  %v13540_v34 = vpop.permute.xlu0 %2587 }
0x1818   : > { %10929 = vmatprep.mubr.msk.f32.mxu1 %vm1060_vm3, %v13540_v34 }
0x1819   : > { %10930 = vmatmul.mubr.msk.f32.vlgmr.msra.gmra.mrb[0].mxu1 %vm1060_vm3, %v13538_v29 }
0x181b   : > { %v13546_v35 = vpop.permute.xlu1 %2593  ;;  %v13548_v36 = vpop.permute.xlu0 %2591 }
0x181c   : > { %10932 = vmatprep.mubr.msk.f32.mxu1 %vm1060_vm3, %v13548_v36 }
0x181d   : > { %10933 = vmatmul.mubr.msk.f32.gmra.mrb[2].mxu1 %vm1060_vm3, %v13546_v35 }
0x181f   : > { %v13554_v37 = vpop.permute.xlu1 %2597  ;;  %v13556_v38 = vpop.permute.xlu0 %2595 }
0x1820   : > { %10935 = vmatprep.mubr.msk.f32.mxu1 %vm1060_vm3, %v13556_v38 }
0x1821   : > { %10936 = vmatmul.mubr.msk.f32.gmra.mrb[4].mxu1 %vm1060_vm3, %v13554_v37 }
0x1823   : > { %v13562_v39 = vpop.permute.xlu1 %2601  ;;  %v13564_v40 = vpop.permute.xlu0 %2599 }
0x1824   : > { %10938 = vmatprep.mubr.msk.f32.mxu1 %vm1060_vm3, %v13564_v40 }
0x1825   : > { %10939 = vmatmul.mubr.msk.f32.gmra.mrb[6].mxu1 %vm1060_vm3, %v13562_v39 }
0x1826   : > { %10943 = vmatprep.mubr.msk.f32.mxu1 %vm12767_vm8, %v15453_v25 }
0x18ec   : > { %v10931_v41 = vpop.f32.mrb[0].mxu1 }
0x18ed   : > { %v2688_v42 = vpop.f32.mrb[1].mxu1 }
0x18ee   : > { %10942 = vmatpush3.xpose.msk.msra.mxu1 %vm15463_vm4, %v2688_v42 }
0x18ef   : > { %10946 = vmatprep.subr.mxu1 %v15453_v25 }
0x18f0   : > { %v10934_v43 = vpop.f32.mrb[2].mxu1 }
0x18f1   : > { %v2698_v58 = vpop.f32.mrb[3].mxu1  ;;  %10944 = vmatmul.mubr.msk.f32.vlgmr.msra.gmra.mrb[8].mxu1 %vm15463_vm4, %v13510_v5 }
0x18f2   : > { %10947 = vmatpush3.xpose.msk.msra.mxu1 %vm15463_vm4, %v10931_v41  ;;  %10948 = vmatprep.mubr.msk.f32.mxu1 %vm12767_vm8, %v15453_v25 }
0x18f3   : > { %10951 = vmatprep.subr.mxu1 %v15453_v25 }
0x18f4   : > { %v10937_v44 = vpop.f32.mrb[4].mxu1 }
0x18f5   : > { %v2708_v45 = vpop.f32.mrb[5].mxu1  ;;  %10949 = vmatmul.mubr.msk.f32.vlgmr.msra.gmra.mrb[10].mxu1 %vm15463_vm4, %v13508_v4 }
0x18f6   : > { %10952 = vmatpush3.xpose.msk.msra.mxu1 %vm15463_vm4, %v2698_v58  ;;  %10953 = vmatprep.mubr.msk.f32.mxu1 %vm12767_vm8, %v15453_v25 }
0x18f7   : > { %10956 = vmatprep.subr.mxu1 %v15453_v25 }
0x18f8   : > { %v10940_v46 = vpop.f32.mrb[6].mxu1 }
0x18f9   : > { %v2718_v47 = vpop.f32.mrb[7].mxu1  ;;  %10954 = vmatmul.mubr.msk.f32.vlgmr.msra.gmra.mrb[12].mxu1 %vm15463_vm4, %v13518_v16 }
0x18fa   : > { %10957 = vmatpush3.xpose.msk.msra.mxu1 %vm15463_vm4, %v10934_v43  ;;  %10958 = vmatprep.mubr.msk.f32.mxu1 %vm12767_vm8, %v15453_v25 }
0x18fb   : > { %10961 = vmatprep.subr.mxu1 %v15453_v25 }
0x18fd   : > { %10959 = vmatmul.mubr.msk.f32.vlgmr.msra.gmra.mrb[14].mxu1 %vm15463_vm4, %v13516_v14 }
0x18fe   : > { %10962 = vmatpush3.xpose.msk.msra.mxu1 %vm15463_vm4, %v2708_v45  ;;  %10963 = vmatprep.mubr.msk.f32.mxu1 %vm12767_vm8, %v15453_v25 }
0x18ff   : > { %10966 = vmatprep.subr.mxu1 %v15453_v25 }
0x1901   : > { %10964 = vmatmul.mubr.msk.f32.vlgmr.msra.gmra.mrb[16].mxu1 %vm15463_vm4, %v13526_v30 }
0x1902   : > { %10967 = vmatpush3.xpose.msk.msra.mxu1 %vm15463_vm4, %v10937_v44  ;;  %10968 = vmatprep.mubr.msk.f32.mxu1 %vm12767_vm8, %v15453_v25 }
0x1903   : > { %10971 = vmatprep.subr.mxu1 %v15453_v25 }
0x1905   : > { %10969 = vmatmul.mubr.msk.f32.vlgmr.msra.gmra.mrb[18].mxu1 %vm15463_vm4, %v13524_v24 }
0x1906   : > { %10972 = vmatpush3.xpose.msk.msra.mxu1 %vm15463_vm4, %v2718_v47  ;;  %10973 = vmatprep.mubr.msk.f32.mxu1 %vm12767_vm8, %v15453_v25 }
0x1907   : > { %10976 = vmatprep.subr.mxu1 %v15453_v25 }
0x1909   : > { %10974 = vmatmul.mubr.msk.f32.vlgmr.msra.gmra.mrb[20].mxu1 %vm15463_vm4, %v13534_v33 }
0x190a   : > { %10977 = vmatpush3.xpose.msk.msra.mxu1 %vm15463_vm4, %v10940_v46  ;;  %10978 = vmatprep.mubr.msk.f32.mxu1 %vm12767_vm8, %v15453_v25 }
0x190b   : > { %10981 = vmatprep.subr.mxu1 %v15453_v25 }
0x190d   : > { %10979 = vmatmul.mubr.msk.f32.vlgmr.msra.gmra.mrb[22].mxu1 %vm15463_vm4, %v13532_v28 }
0x190e   : > { %10982 = vmatpush3.msra.mxu1 %v13540_v34  ;;  %10983 = vmatprep.mubr.msk.f32.mxu1 %vm12767_vm8, %v15453_v25 }
0x190f   : > { %10986 = vmatprep.subr.mxu1 %v15453_v25 }
0x19c4   : > { %v2798_v48 = vpop.f32.mrb[8].mxu1 }
0x19c5   : > { %v10945_v50 = vpop.f32.mrb[9].mxu1  ;;  %v3327_v51 = vsel %vm15464_vm5, %v2798_v48, -inf }
0x19c6   : > { %3328 = vmax.xlane.f32.xlu0 %v3327_v51 }
0x19c8   : > { %v2873_v52 = vpop.f32.mrb[10].mxu1 }
0x19c9   : > { %v10950_v53 = vpop.f32.mrb[11].mxu1  ;;  %v3330_v54 = vsel %vm15464_vm5, %v2873_v52, -inf }
0x19ca   : > { %3331 = vmax.xlane.f32.xlu1 %v3330_v54 }
0x19cc   : > { %v2948_v55 = vpop.f32.mrb[12].mxu1 }
0x19cd   : > { %v10955_v56 = vpop.f32.mrb[13].mxu1  ;;  %v3333_v57 = vsel %vm15464_vm5, %v2948_v55, -inf }
0x19ce   : > { %3334 = vmax.xlane.f32.xlu0 %v3333_v57 }
0x19d0   : > { %v3023_v59 = vpop.f32.mrb[14].mxu1 }
0x19d1   : > { %v10960_v7 = vpop.f32.mrb[15].mxu1  ;;  %v3336_v8 = vsel %vm15464_vm5, %v3023_v59, -inf }
0x19d2   : > { %3337 = vmax.xlane.f32.xlu0 %v3336_v8 }
0x19d4   : > { %v3098_v12 = vpop.f32.mrb[16].mxu1 }
0x19d5   : > { %v10965_v13 = vpop.f32.mrb[17].mxu1  ;;  %v3339_v15 = vsel %vm15464_vm5, %v3098_v12, -inf }
0x19d6   : > { %3340 = vmax.xlane.f32.xlu1 %v3339_v15 }
0x19d8   : > { %v3173_v61 = vpop.f32.mrb[18].mxu1 }
0x19d9   : > { %v10970_v62 = vpop.f32.mrb[19].mxu1  ;;  %v3342_v63 = vsel %vm15464_vm5, %v3173_v61, -inf }
0x19da   : > { %3343 = vmax.xlane.f32.xlu0 %v3342_v63 }
0x19dc   : > { %v3248_v0 = vpop.f32.mrb[20].mxu1 }
0x19dd   : > { %v10975_v1 = vpop.f32.mrb[21].mxu1  ;;  %v3345_v2 = vsel %vm15464_vm5, %v3248_v0, -inf }
0x19de   : > { %3346 = vmax.xlane.f32.xlu1 %v3345_v2 }
0x19e0   : > { %v3323_v3 = vpop.f32.mrb[22].mxu1 }
0x19e1   : > { %v10980_v6 = vpop.f32.mrb[23].mxu1  ;;  %v3348_v9 = vsel %vm15464_vm5, %v3323_v3, -inf }
0x19e2   : > { %3349 = vmax.xlane.f32.xlu0 %v3348_v9 }
0x1a53   : > { %v3329_v10 = vpop.xlane.xlu0 %3328 }
0x1a54   : > { %v3351_v11 = vsub.f32 %v2798_v48, %v3329_v10 }
0x1a56   : > { %v3359_v17 = vmul.f32 1.442695, %v3351_v11 }
0x1a57   : > { %v3332_v18 = vpop.xlane.xlu1 %3331 }
0x1a58   : > { %11838 = vpow2.f32 %v3359_v17  ;;  %v3352_v19 = vsub.f32 %v2873_v52, %v3332_v18 }
0x1a5a   : > { %v3361_v20 = vmul.f32 1.442695, %v3352_v19 }
0x1a5b   : > { %v3335_v31 = vpop.xlane.xlu0 %3334 }
0x1a5c   : > { %11840 = vpow2.f32 %v3361_v20  ;;  %v3353_v32 = vsub.f32 %v2948_v55, %v3335_v31 }
0x1a5e   : > { %v3363_v41 = vmul.f32 1.442695, %v3353_v32 }
0x1a5f   : > { %v3338_v42 = vpop.xlane.xlu0 %3337 }
0x1a60   : > { %11842 = vpow2.f32 %v3363_v41  ;;  %v3354_v43 = vsub.f32 %v3023_v59, %v3338_v42 }
0x1a62   : > { %v11839_v58 = vpop.eup %11838  ;;  %v3365_v44 = vmul.f32 1.442695, %v3354_v43 }
0x1a63   : > { %v3341_v45 = vpop.xlane.xlu1 %3340  ;;  %v3375_v46 = vsel %vm15464_vm5, %v11839_v58, 0.0 }
0x1a64   : > { %11844 = vpow2.f32 %v3365_v44  ;;  %v3355_v47 = vsub.f32 %v3098_v12, %v3341_v45  ;;  %3376 = vadd.xlane.f32.xlu1 %v3375_v46 }
0x1a66   : > { %v11841_v48 = vpop.eup %11840  ;;  %v3367_v50 = vmul.f32 1.442695, %v3355_v47 }
0x1a67   : > { %v3344_v51 = vpop.xlane.xlu0 %3343  ;;  %v3378_v52 = vsel %vm15464_vm5, %v11841_v48, 0.0 }
0x1a68   : > { %11846 = vpow2.f32 %v3367_v50  ;;  %v3356_v53 = vsub.f32 %v3173_v61, %v3344_v51  ;;  %3379 = vadd.xlane.f32.xlu0 %v3378_v52 }
0x1a6a   : > { %v11843_v54 = vpop.eup %11842  ;;  %v3369_v55 = vmul.f32 1.442695, %v3356_v53 }
0x1a6b   : > { %v3347_v56 = vpop.xlane.xlu1 %3346  ;;  %v3381_v57 = vsel %vm15464_vm5, %v11843_v54, 0.0 }
0x1a6c   : > { %11848 = vpow2.f32 %v3369_v55  ;;  %v3357_v59 = vsub.f32 %v3248_v0, %v3347_v56  ;;  %3382 = vadd.xlane.f32.xlu1 %v3381_v57  ;;  %v4007_v56 = vld [vmem:[#allocation12] sm:$0xff] }
0x1a6e   : > { %v11845_v7 = vpop.eup %11844  ;;  %v3371_v8 = vmul.f32 1.442695, %v3357_v59 }
0x1a6f   : > { %v3350_v12 = vpop.xlane.xlu0 %3349  ;;  %v3384_v13 = vsel %vm15464_vm5, %v11845_v7, 0.0 }
0x1a70   : > { %11850 = vpow2.f32 %v3371_v8  ;;  %v3358_v15 = vsub.f32 %v3323_v3, %v3350_v12  ;;  %3385 = vadd.xlane.f32.xlu0 %v3384_v13 }
0x1a72   : > { %v13636_v62 = vpop.eup %11846  ;;  %v3373_v61 = vmul.f32 1.442695, %v3358_v15 }
0x1a73   : > { %v3387_v63 = vsel %vm15464_vm5, %v13636_v62, 0.0 }
0x1a74   : > { %11852 = vpow2.f32 %v3373_v61  ;;  %3388 = vadd.xlane.f32.xlu1 %v3387_v63 }
0x1a76   : > { %v13640_v1 = vpop.eup %11848 }
0x1a77   : > { %v3390_v0 = vsel %vm15464_vm5, %v13640_v1, 0.0 }
0x1a78   : > { %3391 = vadd.xlane.f32.xlu0 %v3390_v0 }
0x1a7a   : > { %v13644_v2 = vpop.eup %11850 }
0x1a7b   : > { %v3393_v3 = vsel %vm15464_vm5, %v13644_v2, 0.0 }
0x1a7c   : > { %3394 = vadd.xlane.f32.xlu1 %v3393_v3 }
0x1a7e   : > { %v13648_v6 = vpop.eup %11852 }
0x1a7f   : > { %v3396_v9 = vsel %vm15464_vm5, %v13648_v6, 0.0 }
0x1a80   : > { %3397 = vadd.xlane.f32.xlu0 %v3396_v9 }
0x1a8d   : > { %4008 = vrot.lane.b32.xlu1 %v13510_v5, %s12768_s28 }
0x1a91   : > { %4012 = vrot.lane.b32.xlu1 %v13518_v16, %s12768_s28 }
0x1a95   : > { %4014 = vrot.lane.b32.xlu1 %v13516_v14, %s12768_s28 }
0x1a96   : > { %4010 = vrot.lane.b32.xlu0 %v13508_v4, %s12768_s28 }
0x1a99   : > { %4018 = vrot.lane.b32.xlu1 %v13524_v24, %s12768_s28 }
0x1a9a   : > { %4016 = vrot.lane.b32.xlu0 %v13526_v30, %s12768_s28 }
0x1a9d   : > { %4022 = vrot.lane.b32.xlu1 %v13532_v28, %s12768_s28 }
0x1a9e   : > { %4020 = vrot.lane.b32.xlu0 %v13534_v33, %s12768_s28 }
0x1af1   : > { %v3377_v10 = vpop.xlane.xlu1 %3376 }
0x1af2   : > { %11854 = vrcp.f32 %v3377_v10 }
0x1af5   : > { %v3380_v11 = vpop.xlane.xlu0 %3379 }
0x1af6   : > { %11856 = vrcp.f32 %v3380_v11 }
0x1af9   : > { %v3383_v17 = vpop.xlane.xlu1 %3382 }
0x1afa   : > { %11858 = vrcp.f32 %v3383_v17 }
0x1afc   : > { %v11855_v18 = vpop.eup %11854 }
0x1afd   : > { %v3386_v19 = vpop.xlane.xlu0 %3385  ;;  %v3407_v20 = vmul.f32 %v11855_v18, %v11839_v58 }
0x1afe   : > { %11860 = vrcp.f32 %v3386_v19 }
0x1aff   : > { %10984 = vmatmul.mubr.msk.f32.vlgmr.msra.gmra.mrb[24].mxu1 %vm15464_vm5, %v3407_v20 }
0x1b00   : > { %v11857_v31 = vpop.eup %11856  ;;  %10987 = vmatpush3.msra.mxu1 %v13538_v29  ;;  %10988 = vmatprep.mubr.msk.f32.mxu1 %vm12767_vm8, %v15453_v25 }
0x1b01   : > { %v3389_v32 = vpop.xlane.xlu1 %3388  ;;  %10991 = vmatprep.subr.mxu1 %v15453_v25  ;;  %v3408_v41 = vmul.f32 %v11857_v31, %v11841_v48 }
0x1b02   : > { %11862 = vrcp.f32 %v3389_v32 }
0x1b03   : > { %10989 = vmatmul.mubr.msk.f32.vlgmr.msra.gmra.mrb[26].mxu1 %vm15464_vm5, %v3408_v41 }
0x1b04   : > { %v11859_v42 = vpop.eup %11858  ;;  %10992 = vmatpush3.msra.mxu1 %v13548_v36  ;;  %10993 = vmatprep.mubr.msk.f32.mxu1 %vm12767_vm8, %v15453_v25 }
0x1b05   : > { %v3392_v43 = vpop.xlane.xlu0 %3391  ;;  %10996 = vmatprep.subr.mxu1 %v15453_v25  ;;  %v3409_v58 = vmul.f32 %v11859_v42, %v11843_v54 }
0x1b06   : > { %11864 = vrcp.f32 %v3392_v43 }
0x1b07   : > { %10994 = vmatmul.mubr.msk.f32.vlgmr.msra.gmra.mrb[28].mxu1 %vm15464_vm5, %v3409_v58 }
0x1b08   : > { %v11861_v44 = vpop.eup %11860  ;;  %10997 = vmatpush3.msra.mxu1 %v13546_v35  ;;  %10998 = vmatprep.mubr.msk.f32.mxu1 %vm12767_vm8, %v15453_v25 }
0x1b09   : > { %v3395_v45 = vpop.xlane.xlu1 %3394  ;;  %11001 = vmatprep.subr.mxu1 %v15453_v25  ;;  %v3410_v46 = vmul.f32 %v11861_v44, %v11845_v7 }
0x1b0a   : > { %11866 = vrcp.f32 %v3395_v45 }
0x1b0b   : > { %10999 = vmatmul.mubr.msk.f32.vlgmr.msra.gmra.mrb[30].mxu1 %vm15464_vm5, %v3410_v46 }
0x1b0c   : > { %v11863_v47 = vpop.eup %11862  ;;  %11002 = vmatpush3.msra.mxu1 %v13556_v38  ;;  %11003 = vmatprep.mubr.msk.f32.mxu1 %vm12767_vm8, %v15453_v25 }
0x1b0d   : > { %v3398_v48 = vpop.xlane.xlu0 %3397  ;;  %11006 = vmatprep.subr.mxu1 %v15453_v25  ;;  %v3411_v50 = vmul.f32 %v11863_v47, %v13636_v62  ;;  %v13687_v53 = vpop.permute.xlu1 %4008 }
0x1b0e   : > { %11868 = vrcp.f32 %v3398_v48 }
0x1b0f   : > { %11004 = vmatmul.mubr.msk.f32.vlgmr.msra.gmra.mrb[32].mxu1 %vm15464_vm5, %v3411_v50 }
0x1b10   : > { %v11865_v51 = vpop.eup %11864  ;;  %11007 = vmatpush3.msra.mxu1 %v13554_v37  ;;  %11008 = vmatprep.mubr.msk.f32.mxu1 %vm12767_vm8, %v15453_v25 }
0x1b11   : > { %11011 = vmatprep.subr.mxu1 %v15453_v25  ;;  %v3412_v52 = vmul.f32 %v11865_v51, %v13640_v1  ;;  %v13696_v59 = vpop.permute.xlu1 %4012  ;;  %v13702_v8 = vpop.permute.xlu0 %4010 }
0x1b13   : > { %11009 = vmatmul.mubr.msk.f32.vlgmr.msra.gmra.mrb[34].mxu1 %vm15464_vm5, %v3412_v52 }
0x1b14   : > { %v11867_v54 = vpop.eup %11866  ;;  %11012 = vmatpush3.msra.mxu1 %v13564_v40  ;;  %11013 = vmatprep.mubr.msk.f32.mxu1 %vm12767_vm8, %v15453_v25 }
0x1b15   : > { %11016 = vmatprep.subr.mxu1 %v15453_v25  ;;  %v3413_v55 = vmul.f32 %v11867_v54, %v13644_v2  ;;  %v13708_v12 = vpop.permute.xlu1 %4014  ;;  %v13714_v13 = vpop.permute.xlu0 %4016 }
0x1b17   : > { %11014 = vmatmul.mubr.msk.f32.vlgmr.msra.gmra.mrb[36].mxu1 %vm15464_vm5, %v3413_v55 }
0x1b18   : > { %v11869_v57 = vpop.eup %11868  ;;  %11017 = vmatpush3.msra.mxu1 %v13562_v39  ;;  %11018 = vmatprep.mubr.msk.f32.mxu1 %vm12767_vm8, %v15453_v25 }
0x1b19   : > { %v3414_v7 = vmul.f32 %v11869_v57, %v13648_v6  ;;  %11021 = vmatprep.subr.mxu1 %v4007_v56  ;;  %v13718_v15 = vpop.permute.xlu1 %4018  ;;  %v13722_v62 = vpop.permute.xlu0 %4020 }
0x1b1b   : > { %11019 = vmatmul.mubr.msk.f32.vlgmr.msra.gmra.mrb[38].mxu1 %vm15464_vm5, %v3414_v7 }
0x1b1c   : > { %11023 = vmatprep.mubr.msk.f32.mxu1 %vm15464_vm5, %v13687_v53  ;;  %11022 = vmatpush3.msra.mxu1 %v4007_v56 }
0x1b1d   : > { %11035 = vmatprep.subr.mxu1 %v15453_v25  ;;  %v13728_v61 = vpop.permute.xlu1 %4022 }
0x1b1f   : > { %11024 = vmatmul.mubr.msk.f32.vlgmr.msra.gmra.mrb[40].mxu1 %vm15464_vm5, %v13702_v8 }
0x1b20   : > { %11026 = vmatprep.mubr.msk.f32.mxu1 %vm15464_vm5, %v13696_v59 }
0x1b23   : > { %11027 = vmatmul.mubr.msk.f32.gmra.mrb[42].mxu1 %vm15464_vm5, %v13708_v12 }
0x1b24   : > { %11029 = vmatprep.mubr.msk.f32.mxu1 %vm15464_vm5, %v13714_v13 }
0x1b27   : > { %11030 = vmatmul.mubr.msk.f32.gmra.mrb[44].mxu1 %vm15464_vm5, %v13718_v15 }
0x1b28   : > { %11032 = vmatprep.mubr.msk.f32.mxu1 %vm15464_vm5, %v13722_v62 }
0x1b2b   : > { %11033 = vmatmul.mubr.msk.f32.gmra.mrb[46].mxu1 %vm15464_vm5, %v13728_v61 }
0x1b2c   : > { %11037 = vmatprep.mubr.msk.f32.mxu1 %vm12767_vm8, %v15453_v25 }
0x1bd2   : > { %v13734_v63 = vpop.f32.mrb[24].mxu1 }
0x1bd3   : > { %v10985_v1 = vpop.f32.mrb[25].mxu1 }
0x1bd6   : > { %v13736_v0 = vpop.f32.mrb[26].mxu1 }
0x1bd7   : > { %v10990_v2 = vpop.f32.mrb[27].mxu1 }
0x1bda   : > { %v13738_v3 = vpop.f32.mrb[28].mxu1 }
0x1bdb   : > { %v10995_v6 = vpop.f32.mrb[29].mxu1 }
0x1bde   : > { %v13740_v9 = vpop.f32.mrb[30].mxu1 }
0x1bdf   : > { %v11000_v10 = vpop.f32.mrb[31].mxu1 }
0x1be2   : > { %v13742_v11 = vpop.f32.mrb[32].mxu1 }
0x1be3   : > { %v11005_v17 = vpop.f32.mrb[33].mxu1 }
0x1be6   : > { %v13744_v18 = vpop.f32.mrb[34].mxu1 }
0x1be7   : > { %v11010_v19 = vpop.f32.mrb[35].mxu1 }
0x1bea   : > { %v13746_v20 = vpop.f32.mrb[36].mxu1 }
0x1beb   : > { %v11015_v31 = vpop.f32.mrb[37].mxu1 }
0x1bee   : > { %v13748_v32 = vpop.f32.mrb[38].mxu1 }
0x1bef   : > { %v11020_v41 = vpop.f32.mrb[39].mxu1 }
0x1bf2   : > { %v11025_v42 = vpop.f32.mrb[40].mxu1 }
0x1bf3   : > { %v4106_v43 = vpop.f32.mrb[41].mxu1 }
0x1bf4   : > { %11036 = vmatpush3.xpose.msk.msra.mxu1 %vm15463_vm4, %v4106_v43 }
0x1bf5   : > { %11040 = vmatprep.subr.mxu1 %v15453_v25 }
0x1bf6   : > { %v11028_v58 = vpop.f32.mrb[42].mxu1 }
0x1bf7   : > { %v4116_v44 = vpop.f32.mrb[43].mxu1  ;;  %11038 = vmatmul.mubr.msk.f32.vlgmr.msra.gmra.mrb[48].mxu1 %vm15463_vm4, %v13510_v5 }
0x1bf8   : > { %11041 = vmatpush3.xpose.msk.msra.mxu1 %vm15463_vm4, %v11025_v42  ;;  %11042 = vmatprep.mubr.msk.f32.mxu1 %vm12767_vm8, %v15453_v25 }
0x1bf9   : > { %11045 = vmatprep.subr.mxu1 %v15453_v25 }
0x1bfa   : > { %v11031_v45 = vpop.f32.mrb[44].mxu1 }
0x1bfb   : > { %v4126_v46 = vpop.f32.mrb[45].mxu1  ;;  %11043 = vmatmul.mubr.msk.f32.vlgmr.msra.gmra.mrb[50].mxu1 %vm15463_vm4, %v13508_v4 }
0x1bfc   : > { %11046 = vmatpush3.xpose.msk.msra.mxu1 %vm15463_vm4, %v4116_v44  ;;  %11047 = vmatprep.mubr.msk.f32.mxu1 %vm12767_vm8, %v15453_v25 }
0x1bfd   : > { %11050 = vmatprep.subr.mxu1 %v15453_v25 }
0x1bfe   : > { %v11034_v47 = vpop.f32.mrb[46].mxu1 }
0x1bff   : > { %v4136_v48 = vpop.f32.mrb[47].mxu1  ;;  %11048 = vmatmul.mubr.msk.f32.vlgmr.msra.gmra.mrb[52].mxu1 %vm15463_vm4, %v13518_v16 }
0x1c00   : > { %11051 = vmatpush3.xpose.msk.msra.mxu1 %vm15463_vm4, %v11028_v58  ;;  %11052 = vmatprep.mubr.msk.f32.mxu1 %vm12767_vm8, %v15453_v25 }
0x1c01   : > { %11055 = vmatprep.subr.mxu1 %v15453_v25 }
0x1c03   : > { %11053 = vmatmul.mubr.msk.f32.vlgmr.msra.gmra.mrb[54].mxu1 %vm15463_vm4, %v13516_v14 }
0x1c04   : > { %11056 = vmatpush3.xpose.msk.msra.mxu1 %vm15463_vm4, %v4126_v46  ;;  %11057 = vmatprep.mubr.msk.f32.mxu1 %vm12767_vm8, %v15453_v25 }
0x1c05   : > { %11060 = vmatprep.subr.mxu1 %v15453_v25 }
0x1c07   : > { %11058 = vmatmul.mubr.msk.f32.vlgmr.msra.gmra.mrb[56].mxu1 %vm15463_vm4, %v13526_v30 }
0x1c08   : > { %11061 = vmatpush3.xpose.msk.msra.mxu1 %vm15463_vm4, %v11031_v45  ;;  %11062 = vmatprep.mubr.msk.f32.mxu1 %vm12767_vm8, %v15453_v25 }
0x1c09   : > { %11065 = vmatprep.subr.mxu1 %v15453_v25 }
0x1c0b   : > { %11063 = vmatmul.mubr.msk.f32.vlgmr.msra.gmra.mrb[58].mxu1 %vm15463_vm4, %v13524_v24 }
0x1c0c   : > { %11066 = vmatpush3.xpose.msk.msra.mxu1 %vm15463_vm4, %v4136_v48  ;;  %11067 = vmatprep.mubr.msk.f32.mxu1 %vm12767_vm8, %v15453_v25 }
0x1c0d   : > { %11070 = vmatprep.subr.mxu1 %v15453_v25 }
0x1c0f   : > { %11068 = vmatmul.mubr.msk.f32.vlgmr.msra.gmra.mrb[60].mxu1 %vm15463_vm4, %v13534_v33 }
0x1c10   : > { %11071 = vmatpush3.xpose.msk.msra.mxu1 %vm15463_vm4, %v11034_v47  ;;  %11072 = vmatprep.mubr.msk.f32.mxu1 %vm12767_vm8, %v15453_v25 }
0x1c11   : > { %11075 = vmatprep.subr.mxu1 %v15453_v25 }
0x1c13   : > { %11073 = vmatmul.mubr.msk.f32.vlgmr.msra.gmra.mrb[62].mxu1 %vm15463_vm4, %v13532_v28 }
0x1c14   : > { %11076 = vmatpush3.msra.mxu1 %v13687_v53  ;;  %11077 = vmatprep.mubr.msk.f32.mxu1 %vm12767_vm8, %v15453_v25 }
0x1c15   : > { %11080 = vmatprep.subr.mxu1 %v15453_v25 }
0x1cca   : > { %v4214_v50 = vpop.f32.mrb[48].mxu1 }
0x1ccb   : > { %v11039_v51 = vpop.f32.mrb[49].mxu1  ;;  %v4729_v52 = vsel %vm15464_vm5, %v4214_v50, -inf }
0x1ccc   : > { %4730 = vmax.xlane.f32.xlu0 %v4729_v52 }
0x1cce   : > { %v4287_v54 = vpop.f32.mrb[50].mxu1 }
0x1ccf   : > { %v11044_v55 = vpop.f32.mrb[51].mxu1  ;;  %v4732_v56 = vsel %vm15464_vm5, %v4287_v54, -inf }
0x1cd0   : > { %4733 = vmax.xlane.f32.xlu1 %v4732_v56 }
0x1cd2   : > { %v4360_v57 = vpop.f32.mrb[52].mxu1 }
0x1cd3   : > { %v11049_v7 = vpop.f32.mrb[53].mxu1  ;;  %v4735_v1 = vsel %vm15464_vm5, %v4360_v57, -inf }
0x1cd4   : > { %4736 = vmax.xlane.f32.xlu0 %v4735_v1 }
0x1cd6   : > { %v4433_v2 = vpop.f32.mrb[54].mxu1 }
0x1cd7   : > { %v11054_v6 = vpop.f32.mrb[55].mxu1  ;;  %v4738_v10 = vsel %vm15464_vm5, %v4433_v2, -inf }
0x1cd8   : > { %4739 = vmax.xlane.f32.xlu0 %v4738_v10 }
0x1cda   : > { %v4506_v17 = vpop.f32.mrb[56].mxu1 }
0x1cdb   : > { %v11059_v19 = vpop.f32.mrb[57].mxu1  ;;  %v4741_v31 = vsel %vm15464_vm5, %v4506_v17, -inf }
0x1cdc   : > { %4742 = vmax.xlane.f32.xlu1 %v4741_v31 }
0x1cde   : > { %v4579_v41 = vpop.f32.mrb[58].mxu1 }
0x1cdf   : > { %v11064_v42 = vpop.f32.mrb[59].mxu1  ;;  %v4744_v43 = vsel %vm15464_vm5, %v4579_v41, -inf }
0x1ce0   : > { %4745 = vmax.xlane.f32.xlu0 %v4744_v43 }
0x1ce2   : > { %v4652_v58 = vpop.f32.mrb[60].mxu1 }
0x1ce3   : > { %v11069_v44 = vpop.f32.mrb[61].mxu1  ;;  %v4747_v45 = vsel %vm15464_vm5, %v4652_v58, -inf }
0x1ce4   : > { %4748 = vmax.xlane.f32.xlu1 %v4747_v45 }
0x1ce6   : > { %v4725_v46 = vpop.f32.mrb[62].mxu1 }
0x1ce7   : > { %v11074_v47 = vpop.f32.mrb[63].mxu1  ;;  %v4750_v48 = vsel %vm15464_vm5, %v4725_v46, -inf }
0x1ce8   : > { %4751 = vmax.xlane.f32.xlu0 %v4750_v48 }
0x1d59   : > { %v4731_v51 = vpop.xlane.xlu0 %4730 }
0x1d5a   : > { %v4753_v52 = vsub.f32 %v4214_v50, %v4731_v51 }
0x1d5c   : > { %v4761_v55 = vmul.f32 1.442695, %v4753_v52 }
0x1d5d   : > { %v4734_v56 = vpop.xlane.xlu1 %4733 }
0x1d5e   : > { %11870 = vpow2.f32 %v4761_v55  ;;  %v4754_v7 = vsub.f32 %v4287_v54, %v4734_v56 }
0x1d60   : > { %v4763_v1 = vmul.f32 1.442695, %v4754_v7 }
0x1d61   : > { %v4737_v6 = vpop.xlane.xlu0 %4736 }
0x1d62   : > { %11872 = vpow2.f32 %v4763_v1  ;;  %v4755_v10 = vsub.f32 %v4360_v57, %v4737_v6 }
0x1d64   : > { %v4765_v19 = vmul.f32 1.442695, %v4755_v10 }
0x1d65   : > { %v4740_v31 = vpop.xlane.xlu0 %4739 }
0x1d66   : > { %11874 = vpow2.f32 %v4765_v19  ;;  %v4756_v42 = vsub.f32 %v4433_v2, %v4740_v31 }
0x1d68   : > { %v11871_v43 = vpop.eup %11870  ;;  %v4767_v44 = vmul.f32 1.442695, %v4756_v42 }
0x1d69   : > { %v4743_v45 = vpop.xlane.xlu1 %4742  ;;  %v4777_v47 = vsel %vm15464_vm5, %v11871_v43, 0.0 }
0x1d6a   : > { %11876 = vpow2.f32 %v4767_v44  ;;  %v4757_v48 = vsub.f32 %v4506_v17, %v4743_v45  ;;  %4778 = vadd.xlane.f32.xlu1 %v4777_v47 }
0x1d6c   : > { %v11873_v50 = vpop.eup %11872  ;;  %v4769_v51 = vmul.f32 1.442695, %v4757_v48 }
0x1d6d   : > { %v4746_v52 = vpop.xlane.xlu0 %4745  ;;  %v4780_v54 = vsel %vm15464_vm5, %v11873_v50, 0.0 }
0x1d6e   : > { %11878 = vpow2.f32 %v4769_v51  ;;  %v4758_v55 = vsub.f32 %v4579_v41, %v4746_v52  ;;  %4781 = vadd.xlane.f32.xlu0 %v4780_v54 }
0x1d70   : > { %v11875_v57 = vpop.eup %11874  ;;  %v4771_v56 = vmul.f32 1.442695, %v4758_v55 }
0x1d71   : > { %v4749_v7 = vpop.xlane.xlu1 %4748  ;;  %v4783_v2 = vsel %vm15464_vm5, %v11875_v57, 0.0 }
0x1d72   : > { %11880 = vpow2.f32 %v4771_v56  ;;  %v4759_v1 = vsub.f32 %v4652_v58, %v4749_v7  ;;  %4784 = vadd.xlane.f32.xlu1 %v4783_v2 }
0x1d74   : > { %v11877_v6 = vpop.eup %11876  ;;  %v4773_v10 = vmul.f32 1.442695, %v4759_v1 }
0x1d75   : > { %v4752_v17 = vpop.xlane.xlu0 %4751  ;;  %v4786_v19 = vsel %vm15464_vm5, %v11877_v6, 0.0 }
0x1d76   : > { %11882 = vpow2.f32 %v4773_v10  ;;  %v4760_v31 = vsub.f32 %v4725_v46, %v4752_v17  ;;  %4787 = vadd.xlane.f32.xlu0 %v4786_v19 }
0x1d78   : > { %v11879_v42 = vpop.eup %11878  ;;  %v4775_v44 = vmul.f32 1.442695, %v4760_v31 }
0x1d79   : > { %v4789_v41 = vsel %vm15464_vm5, %v11879_v42, 0.0 }
0x1d7a   : > { %11884 = vpow2.f32 %v4775_v44  ;;  %4790 = vadd.xlane.f32.xlu1 %v4789_v41 }
0x1d7c   : > { %v11881_v45 = vpop.eup %11880 }
0x1d7d   : > { %v4792_v47 = vsel %vm15464_vm5, %v11881_v45, 0.0 }
0x1d7e   : > { %4793 = vadd.xlane.f32.xlu0 %v4792_v47  ;;  %v5411_v47 = vld [vmem:[%s15514_s6 + $0x10] sm:$0xff] }
0x1d80   : > { %v13814_v58 = vpop.eup %11882 }
0x1d81   : > { %v4795_v48 = vsel %vm15464_vm5, %v13814_v58, 0.0 }
0x1d82   : > { %4796 = vadd.xlane.f32.xlu1 %v4795_v48 }
0x1d84   : > { %v13818_v51 = vpop.eup %11884 }
0x1d85   : > { %v4798_v46 = vsel %vm15464_vm5, %v13818_v51, 0.0 }
0x1d86   : > { %4799 = vadd.xlane.f32.xlu0 %v4798_v46 }
0x1df7   : > { %v4779_v52 = vpop.xlane.xlu1 %4778 }
0x1df8   : > { %11886 = vrcp.f32 %v4779_v52 }
0x1dfb   : > { %v4782_v54 = vpop.xlane.xlu0 %4781 }
0x1dfc   : > { %11888 = vrcp.f32 %v4782_v54  ;;  %v5419_v54 = vrot.slane %v5411_v47, 4 }
0x1dff   : > { %v4785_v55 = vpop.xlane.xlu1 %4784 }
0x1e00   : > { %11890 = vrcp.f32 %v4785_v55 }
0x1e02   : > { %v11887_v56 = vpop.eup %11886 }
0x1e03   : > { %v4788_v7 = vpop.xlane.xlu0 %4787  ;;  %v4809_v2 = vmul.f32 %v11887_v56, %v11871_v43 }
0x1e04   : > { %11892 = vrcp.f32 %v4788_v7 }
0x1e05   : > { %11078 = vmatmul.mubr.msk.f32.vlgmr.msra.gmra.mrb[64].mxu1 %vm15464_vm5, %v4809_v2 }
0x1e06   : > { %v11889_v1 = vpop.eup %11888  ;;  %11081 = vmatpush3.msra.mxu1 %v13702_v8  ;;  %11082 = vmatprep.mubr.msk.f32.mxu1 %vm12767_vm8, %v15453_v25 }
0x1e07   : > { %v4791_v10 = vpop.xlane.xlu1 %4790  ;;  %11085 = vmatprep.subr.mxu1 %v15453_v25  ;;  %v4810_v17 = vmul.f32 %v11889_v1, %v11873_v50 }
0x1e08   : > { %11894 = vrcp.f32 %v4791_v10  ;;  %v5409_v10 = vld [vmem:[%s15514_s6] sm:$0xff] }
0x1e09   : > { %11083 = vmatmul.mubr.msk.f32.vlgmr.msra.gmra.mrb[66].mxu1 %vm15464_vm5, %v4810_v17 }
0x1e0a   : > { %v11891_v19 = vpop.eup %11890  ;;  %11086 = vmatpush3.msra.mxu1 %v13696_v59  ;;  %11087 = vmatprep.mubr.msk.f32.mxu1 %vm12767_vm8, %v15453_v25 }
0x1e0b   : > { %v4794_v43 = vpop.xlane.xlu0 %4793  ;;  %11090 = vmatprep.subr.mxu1 %v15453_v25  ;;  %v4811_v31 = vmul.f32 %v11891_v19, %v11875_v57  ;;  %v5410_v57 = vld [vmem:[%s15513_s29 + $0x8] sm:$0xff]  ;;  %s15518_s29 = sld [smem:[#allocation40_spill]] }
0x1e0c   : > { %11896 = vrcp.f32 %v4794_v43  ;;  %v5418_v52 = vrot.slane %v5410_v57, 4  ;;  %v11430_v19 = vpack.c.bf16 %v5410_v57, %v5409_v10 }
0x1e0d   : > { %11088 = vmatmul.mubr.msk.f32.vlgmr.msra.gmra.mrb[68].mxu1 %vm15464_vm5, %v4811_v31 }
0x1e0e   : > { %v11893_v44 = vpop.eup %11892  ;;  %11091 = vmatpush3.msra.mxu1 %v13708_v12  ;;  %11092 = vmatprep.mubr.msk.f32.mxu1 %vm12767_vm8, %v15453_v25  ;;  %v5420_v7 = vsel %vm1085_vm0, %v5418_v52, %v5419_v54  ;;  %vm6042_vm0 = vcmask 261120  }
0x1e0f   : > { %v4797_v50 = vpop.xlane.xlu1 %4796  ;;  %11095 = vmatprep.subr.mxu1 %v15453_v25  ;;  %v4812_v41 = vmul.f32 %v11893_v44, %v11877_v6  ;;  %v11424_v1 = vpack.c.bf16 %v5419_v54, %v5420_v7 }
0x1e10   : > { %11898 = vrcp.f32 %v4797_v50 }
0x1e11   : > { %11093 = vmatmul.mubr.msk.f32.vlgmr.msra.gmra.mrb[70].mxu1 %vm15464_vm5, %v4812_v41  ;;  %s15519_s27 = smov %s15518_s29 }
0x1e12   : > { %v11895_v48 = vpop.eup %11894  ;;  %11096 = vmatpush3.msra.mxu1 %v13714_v13  ;;  %11097 = vmatprep.mubr.msk.f32.mxu1 %vm12767_vm8, %v15453_v25 }
0x1e13   : > { %v4800_v46 = vpop.xlane.xlu0 %4799  ;;  %11100 = vmatprep.subr.mxu1 %v15453_v25  ;;  %v4813_v6 = vmul.f32 %v11895_v48, %v11879_v42 }
0x1e14   : > { %11900 = vrcp.f32 %v4800_v46 }
0x1e15   : > { %11098 = vmatmul.mubr.msk.f32.vlgmr.msra.gmra.mrb[72].mxu1 %vm15464_vm5, %v4813_v6 }
0x1e16   : > { %v11897_v55 = vpop.eup %11896  ;;  %11101 = vmatpush3.msra.mxu1 %v13718_v15  ;;  %11102 = vmatprep.mubr.msk.f32.mxu1 %vm12767_vm8, %v15453_v25 }
0x1e17   : > { %11105 = vmatprep.subr.mxu1 %v15453_v25  ;;  %v4814_v56 = vmul.f32 %v11897_v55, %v11881_v45 }
0x1e19   : > { %11103 = vmatmul.mubr.msk.f32.vlgmr.msra.gmra.mrb[74].mxu1 %vm15464_vm5, %v4814_v56 }
0x1e1a   : > { %v11899_v2 = vpop.eup %11898  ;;  %11106 = vmatpush3.msra.mxu1 %v13722_v62  ;;  %11107 = vmatprep.mubr.msk.f32.mxu1 %vm12767_vm8, %v15453_v25 }
0x1e1b   : > { %11110 = vmatprep.subr.mxu1 %v15453_v25  ;;  %v4815_v42 = vmul.f32 %v11899_v2, %v13814_v58 }
0x1e1d   : > { %11108 = vmatmul.mubr.msk.f32.vlgmr.msra.gmra.mrb[76].mxu1 %vm15464_vm5, %v4815_v42 }
0x1e1e   : > { %v11901_v45 = vpop.eup %11900  ;;  %11111 = vmatpush3.msra.mxu1 %v13728_v61  ;;  %11112 = vmatprep.mubr.msk.f32.mxu1 %vm12767_vm8, %v15453_v25 }
0x1e1f   : > { %v4816_v17 = vmul.f32 %v11901_v45, %v13818_v51  ;;  %11426 = vmatprep.subr.msk.bf16.mxu1 %vm13167_vm2, %v11424_v1 }
0x1e21   : > { %11113 = vmatmul.mubr.msk.f32.vlgmr.msra.gmra.mrb[78].mxu1 %vm15464_vm5, %v4816_v17 }
0x1e22   : > { %11429 = vmatpush3.bf16.msk.msra.mxu1 %vm13167_vm2, %v11424_v1  ;;  %11119 = vmatprep.mubr.msk.f32.mxu1 %vm1060_vm3, %v13540_v34  ;;  %v6038_v34 = vld [vmem:[%s15420_s7] sm:$0xff] }
0x1e23   : > { %11432 = vmatprep.subr.msk.bf16.mxu1 %vm13167_vm2, %v11430_v19 }
0x1e25   : > { %11120 = vmatmul.mubr.msk.f32.vlgmr.msra.gmra.mrb[80].mxu1 %vm1060_vm3, %v13538_v29  ;;  %v5413_v29 = vld [vmem:[%s15514_s6 + $0x20] sm:$0xff] }
0x1e26   : > { %11122 = vmatprep.mubr.msk.f32.mxu1 %vm1060_vm3, %v13548_v36  ;;  %11435 = vmatpush3.bf16.msk.msra.mxu1 %vm13167_vm2, %v11430_v19  ;;  %vm6706_vm2 = vcmask 253952  }
0x1e27   : > { %11147 = vmatprep.subr.mxu1 %v5412_v26 }
0x1e29   : > { %11123 = vmatmul.mubr.msk.f32.gmra.mrb[82].mxu1 %vm1060_vm3, %v13546_v35  ;;  %v6039_v35 = vld [vmem:[%s15420_s7 + $0x8] sm:$0xff] }
0x1e2a   : > { %11125 = vmatprep.mubr.msk.f32.mxu1 %vm1060_vm3, %v13556_v38  ;;  %v13921_v36 = vpack.c.bf16 %v6039_v35, %v6038_v34  ;;  %v6040_v38 = vld [vmem:[%s15420_s7 + $0x10] sm:$0xff] }
0x1e2d   : > { %11126 = vmatmul.mubr.msk.f32.gmra.mrb[84].mxu1 %vm1060_vm3, %v13554_v37  ;;  %v15451_v37 = vmov 0.0|0.0  }
0x1e2e   : > { %11128 = vmatprep.mubr.msk.f32.mxu1 %vm1060_vm3, %v13564_v40  ;;  %11440 = vmatprep.subr.bf16.mxu0 %v15451_v37 }
0x1e2f   : > { %11442 = vmatpush3.bf16.msra.mxu0 %v13921_v36 }
0x1e30   : > { %11443 = vmatprep.subr.bf16.mxu0 %v15451_v37 }
0x1e31   : > { %11129 = vmatmul.mubr.msk.f32.gmra.mrb[86].mxu1 %vm1060_vm3, %v13562_v39  ;;  %v6041_v39 = vld [vmem:[%s15420_s7 + $0x18] sm:$0xff] }
0x1e32   : > { %11135 = vmatprep.mubr.msk.f32.mxu1 %vm1060_vm3, %v13734_v63  ;;  %v13932_v40 = vpack.c.bf16 %v6041_v39, %v6040_v38 }
0x1e34   : > { %11445 = vmatpush3.bf16.msra.mxu0 %v13932_v40 }
0x1e35   : > { %11136 = vmatmul.mubr.msk.f32.vlgmr.msra.gmra.mrb[80].mxu1 %vm1060_vm3, %v13736_v0  ;;  %11446 = vmatprep.subr.bf16.mxu0 %v15451_v37  ;;  %v5414_v0 = vld [vmem:[%s15514_s6 + $0x28] sm:$0xff] }
0x1e36   : > { %11138 = vmatprep.mubr.msk.f32.mxu1 %vm1060_vm3, %v13738_v3  ;;  %11148 = vmatpush3.msra.mxu1 %v5412_v26  ;;  %v5415_v3 = vld [vmem:[%s15514_s6 + $0x30] sm:$0xff] }
0x1e37   : > { %11161 = vmatprep.subr.mxu1 %v5413_v29  ;;  %11200 = vmatmul.mubr.f32.vlgmr.msra.gmra.mrb[16].mxu0 %v15453_v25 }
0x1e38   : > { %11448 = vmatpush3.bf16.msra.mxu0 %v13921_v36  ;;  %11210 = vmatprep.mubr.msk.f32.mxu0 %vm12767_vm8, %v15453_v25 }
0x1e39   : > { %11139 = vmatmul.mubr.msk.f32.gmra.mrb[82].mxu1 %vm1060_vm3, %v13740_v9  ;;  %11449 = vmatprep.subr.bf16.mxu0 %v15451_v37 }
0x1e3a   : > { %11141 = vmatprep.mubr.msk.f32.mxu1 %vm1060_vm3, %v13742_v11  ;;  %v11436_v11 = vpack.c.bf16 %v5415_v3, %v5414_v0 }
0x1e3c   : > { %11451 = vmatpush3.bf16.msra.mxu0 %v13932_v40 }
0x1e3d   : > { %11142 = vmatmul.mubr.msk.f32.gmra.mrb[84].mxu1 %vm1060_vm3, %v13744_v18  ;;  %11452 = vmatprep.subr.bf16.mxu0 %v15451_v37 }
0x1e3e   : > { %11144 = vmatprep.mubr.msk.f32.mxu1 %vm1060_vm3, %v13746_v20 }
0x1e41   : > { %11145 = vmatmul.mubr.msk.f32.gmra.mrb[86].mxu1 %vm1060_vm3, %v13748_v32  ;;  %vm7064_vm3 = vcmask 261122  }
0x1ed8   : > { %v4887_v63 = vpop.f32.mrb[64].mxu1 }
0x1ed9   : > { %v11079_v9 = vpop.f32.mrb[65].mxu1  ;;  %11149 = vmatprep.mubr.msk.f32.mxu1 %vm15464_vm5, %v4887_v63 }
0x1edc   : > { %v4961_v18 = vpop.f32.mrb[66].mxu1 }
0x1edd   : > { %v11084_v20 = vpop.f32.mrb[67].mxu1  ;;  %11150 = vmatmul.mubr.msk.f32.vlgmr.msra.gmra.mrb[80].mxu1 %vm15464_vm5, %v4961_v18 }
0x1ede   : > { %11162 = vmatpush3.msra.mxu1 %v5413_v29 }
0x1edf   : > { %11437 = vmatprep.subr.bf16.mxu1 %v11436_v11 }
0x1ee0   : > { %v5035_v32 = vpop.f32.mrb[68].mxu1 }
0x1ee1   : > { %v11089_v58 = vpop.f32.mrb[69].mxu1  ;;  %11152 = vmatprep.mubr.msk.f32.mxu1 %vm15464_vm5, %v5035_v32 }
0x1ee4   : > { %v5109_v51 = vpop.f32.mrb[70].mxu1 }
0x1ee5   : > { %v11094_v43 = vpop.f32.mrb[71].mxu1  ;;  %11153 = vmatmul.mubr.msk.f32.gmra.mrb[82].mxu1 %vm15464_vm5, %v5109_v51 }
0x1ee8   : > { %v5183_v31 = vpop.f32.mrb[72].mxu1 }
0x1ee9   : > { %v11099_v44 = vpop.f32.mrb[73].mxu1  ;;  %11155 = vmatprep.mubr.msk.f32.mxu1 %vm15464_vm5, %v5183_v31 }
0x1eec   : > { %v5257_v50 = vpop.f32.mrb[74].mxu1 }
0x1eed   : > { %v11104_v41 = vpop.f32.mrb[75].mxu1  ;;  %11156 = vmatmul.mubr.msk.f32.gmra.mrb[84].mxu1 %vm15464_vm5, %v5257_v50 }
0x1ef0   : > { %v5331_v57 = vpop.f32.mrb[76].mxu1 }
0x1ef1   : > { %v11109_v47 = vpop.f32.mrb[77].mxu1  ;;  %11158 = vmatprep.mubr.msk.f32.mxu1 %vm15464_vm5, %v5331_v57 }
0x1ef4   : > { %v5405_v48 = vpop.f32.mrb[78].mxu1 }
0x1ef5   : > { %v11114_v46 = vpop.f32.mrb[79].mxu1  ;;  %11159 = vmatmul.mubr.msk.f32.gmra.mrb[86].mxu1 %vm15464_vm5, %v5405_v48 }
0x1ef6   : > { %11163 = vmatprep.mubr.msk.f32.mxu1 %vm15464_vm5, %v13687_v53 }
0x1ef9   : > { %11164 = vmatmul.mubr.msk.f32.vlgmr.msra.gmra.mrb[80].mxu1 %vm15464_vm5, %v13702_v8  ;;  %v10620_v8 = vld [vmem:[%s15421_s8] ss:$0 sm:$0xff] }
0x1efa   : > { %11166 = vmatprep.mubr.msk.f32.mxu1 %vm15464_vm5, %v13696_v59  ;;  %11439 = vmatpush3.bf16.msra.mxu1 %v11436_v11 }
0x1efd   : > { %11167 = vmatmul.mubr.msk.f32.gmra.mrb[82].mxu1 %vm15464_vm5, %v13708_v12 }
0x1efe   : > { %11169 = vmatprep.mubr.msk.f32.mxu1 %vm15464_vm5, %v13714_v13 }
0x1f01   : > { %11170 = vmatmul.mubr.msk.f32.gmra.mrb[84].mxu1 %vm15464_vm5, %v13718_v15 }
0x1f02   : > { %11172 = vmatprep.mubr.msk.f32.mxu1 %vm15464_vm5, %v13722_v62 }
0x1f05   : > { %11173 = vmatmul.mubr.msk.f32.gmra.mrb[86].mxu1 %vm15464_vm5, %v13728_v61  ;;  %vm7784_vm5 = vcmask 261124  }
0x1f06   : > { %11179 = vmatprep.mubr.msk.f32.mxu1 %vm15463_vm4, %v13510_v5 }
0x1f09   : > { %11180 = vmatmul.mubr.msk.f32.vlgmr.msra.gmra.mrb[80].mxu1 %vm15463_vm4, %v13508_v4 }
0x1f0a   : > { %11182 = vmatprep.mubr.msk.f32.mxu1 %vm15463_vm4, %v13518_v16  ;;  %v6111_v53 = vpop.f32.mrb[16].mxu0 }
0x1f0b   : > { %v11201_v59 = vpop.f32.mrb[17].mxu0  ;;  %v6116_v12 = vrot.slane %v6111_v53, 1  ;;  %v6117_v7 = vrot.slane %v6111_v53, 2  ;;  %v6118_v42 = vrot.slane %v6111_v53, 3  ;;  %v6119_v26 = vrot.slane %v6111_v53, 4 }
0x1f0c   : > { %v6120_v34 = vrot.slane %v6111_v53, 5  ;;  %v6121_v3 = vrot.slane %v6111_v53, 6  ;;  %v6122_v18 = vrot.slane %v6111_v53, 7 }
0x1f0d   : > { %11183 = vmatmul.mubr.msk.f32.gmra.mrb[82].mxu1 %vm15463_vm4, %v13516_v14 }
0x1f0e   : > { %11185 = vmatprep.mubr.msk.f32.mxu1 %vm15463_vm4, %v13526_v30 }
0x1f11   : > { %11186 = vmatmul.mubr.msk.f32.gmra.mrb[84].mxu1 %vm15463_vm4, %v13524_v24 }
0x1f12   : > { %11188 = vmatprep.mubr.msk.f32.mxu1 %vm15463_vm4, %v13534_v33 }
0x1f15   : > { %11189 = vmatmul.mubr.msk.f32.gmra.mrb[86].mxu1 %vm15463_vm4, %v13532_v28 }
0x1fdc   : > { %v11181_v13 = vpop.f32.mrb[80].mxu1 }
0x1fdd   : > { %v13992_v15 = vadd.f32 %v11181_v13, %v10620_v8  ;;  %v5976_v62 = vpop.f32.mrb[81].mxu1 }
0x1fde   : > { %v13994_v61 = vadd.f32 %v10620_v8, %v5976_v62 }
0x1fdf   : > { %v6132_v6 = vadd.f32 %v6116_v12, %v13992_v15 }
0x1fe0   : > { %v11184_v52 = vpop.f32.mrb[82].mxu1  ;;  %v6131_v56 = vadd.f32 %v6111_v53, %v13994_v61 }
0x1fe1   : > { %11902 = vtanh.f32 %v6132_v6  ;;  %v13997_v54 = vadd.f32 %v11184_v52, %v10620_v8  ;;  %v5986_v55 = vpop.f32.mrb[83].mxu1  ;;  %v10622_v57 = vmul.f32 -1.442695, %v6132_v6 }
0x1fe2   : > { %v14000_v2 = vadd.f32 %v10620_v8, %v5986_v55  ;;  %11904 = vtanh.f32 %v6131_v56  ;;  %v10621_v47 = vmul.f32 -1.442695, %v6131_v56 }
0x1fe3   : > { %v6134_v19 = vadd.f32 %v6118_v42, %v13997_v54 }
0x1fe4   : > { %v11187_v1 = vpop.f32.mrb[84].mxu1  ;;  %v6133_v10 = vadd.f32 %v6117_v7, %v14000_v2 }
0x1fe5   : > { %v14003_v45 = vadd.f32 %v11187_v1, %v10620_v8  ;;  %v5996_v17 = vpop.f32.mrb[85].mxu1  ;;  %v10624_v48 = vmul.f32 -1.442695, %v6134_v19 }
0x1fe6   : > { %v14006_v29 = vadd.f32 %v10620_v8, %v5996_v17  ;;  %11906 = vtanh.f32 %v6133_v10  ;;  %v10623_v53 = vmul.f32 -1.442695, %v6133_v10 }
0x1fe7   : > { %11908 = vtanh.f32 %v6134_v19  ;;  %v6136_v0 = vadd.f32 %v6120_v34, %v14003_v45 }
0x1fe8   : > { %v11190_v35 = vpop.f32.mrb[86].mxu1  ;;  %v6135_v38 = vadd.f32 %v6119_v26, %v14006_v29 }
0x1fe9   : > { %v14009_v39 = vadd.f32 %v11190_v35, %v10620_v8  ;;  %v6006_v63 = vpop.f32.mrb[87].mxu1  ;;  %v10626_v12 = vmul.f32 -1.442695, %v6136_v0 }
0x1fea   : > { %v14012_v9 = vadd.f32 %v10620_v8, %v6006_v63  ;;  %11910 = vtanh.f32 %v6135_v38  ;;  %v10625_v46 = vmul.f32 -1.442695, %v6135_v38 }
0x1feb   : > { %v11903_v11 = vpop.eup %11902  ;;  %11912 = vtanh.f32 %v6136_v0  ;;  %v6138_v32 = vadd.f32 %v6122_v18, %v14009_v39 }
0x1fec   : > { %6213 = vrot.lane.b32.xlu1 %v11903_v11, %s12770_s3  ;;  %v6137_v20 = vadd.f32 %v6121_v3, %v14012_v9  ;;  %v11905_v58 = vpop.eup %11904 }
0x1fed   : > { %v10628_v52 = vmul.f32 -1.442695, %v6138_v32 }
0x1fee   : > { %11914 = vtanh.f32 %v6137_v20  ;;  %v10627_v59 = vmul.f32 -1.442695, %v6137_v20 }
0x1fef   : > { %11916 = vtanh.f32 %v6138_v32 }
0x1ff0   : > { %v11907_v51 = vpop.eup %11906  ;;  %6211 = vrot.lane.b32.xlu1 %v11905_v58, %s12770_s3  ;;  %11918 = vpow2.f32 %v10622_v57 }
0x1ff1   : > { %6215 = vrot.lane.b32.xlu0 %v11907_v51, %s12770_s3  ;;  %v11909_v43 = vpop.eup %11908  ;;  %11920 = vpow2.f32 %v10621_v47 }
0x1ff2   : > { %11922 = vpow2.f32 %v10624_v48 }
0x1ff3   : > { %11924 = vpow2.f32 %v10625_v46 }
0x1ff4   : > { %v11911_v31 = vpop.eup %11910  ;;  %6217 = vrot.lane.b32.xlu1 %v11909_v43, %s12770_s3  ;;  %11926 = vpow2.f32 %v10623_v53 }
0x1ff5   : > { %6219 = vrot.lane.b32.xlu0 %v11911_v31, %s12770_s3  ;;  %v11913_v44 = vpop.eup %11912  ;;  %11928 = vpow2.f32 %v10627_v59 }
0x1ff6   : > { %11930 = vpow2.f32 %v10626_v12 }
0x1ff8   : > { %v11915_v50 = vpop.eup %11914  ;;  %6221 = vrot.lane.b32.xlu1 %v11913_v44, %s12770_s3 }
0x1ff9   : > { %6223 = vrot.lane.b32.xlu0 %v11915_v50, %s12770_s3  ;;  %v11917_v41 = vpop.eup %11916 }
0x1ffa   : > { %v11919_v8 = vpop.eup %11918 }
0x1ffb   : > { %v6164_v13 = vadd.f32 1.0, %v11919_v8  ;;  %v11921_v62 = vpop.eup %11920 }
0x1ffc   : > { %6225 = vrot.lane.b32.xlu1 %v11917_v41, %s12770_s3  ;;  %v6163_v55 = vadd.f32 1.0, %v11921_v62  ;;  %v11923_v6 = vpop.eup %11922 }
0x1ffd   : > { %11932 = vrcp.f32 %v6164_v13  ;;  %v11925_v7 = vpop.eup %11924  ;;  %v6166_v56 = vadd.f32 1.0, %v11923_v6 }
0x1ffe   : > { %11934 = vpow2.f32 %v10628_v52  ;;  %v11927_v42 = vpop.eup %11926  ;;  %v6167_v1 = vadd.f32 1.0, %v11925_v7 }
0x1fff   : > { %11936 = vrcp.f32 %v6163_v55  ;;  %v11929_v10 = vpop.eup %11928  ;;  %v6165_v17 = vadd.f32 1.0, %v11927_v42 }
0x2000   : > { %11938 = vrcp.f32 %v6166_v56  ;;  %v11931_v19 = vpop.eup %11930  ;;  %v6169_v26 = vadd.f32 1.0, %v11929_v10 }
0x2001   : > { %11940 = vrcp.f32 %v6167_v1  ;;  %v6168_v63 = vadd.f32 1.0, %v11931_v19 }
0x2002   : > { %11942 = vrcp.f32 %v6165_v17 }
0x2003   : > { %11944 = vrcp.f32 %v6169_v26 }
0x2004   : > { %11946 = vrcp.f32 %v6168_v63 }
0x2007   : > { %v14024_v34 = vpop.eup %11932 }
0x2008   : > { %v11935_v0 = vpop.eup %11934  ;;  %v6196_v52 = vmul.f32 0.0, %v14024_v34 }
0x2009   : > { %v14028_v3 = vpop.eup %11936  ;;  %v6170_v32 = vadd.f32 1.0, %v11935_v0 }
0x200a   : > { %v14032_v58 = vpop.eup %11938  ;;  %v6195_v7 = vmul.f32 0.0, %v14028_v3 }
0x200b   : > { %v14034_v43 = vpop.eup %11940  ;;  %11948 = vrcp.f32 %v6170_v32  ;;  %v6198_v1 = vmul.f32 0.0, %v14032_v58 }
0x200c   : > { %v14039_v41 = vpop.eup %11942  ;;  %v6199_v17 = vmul.f32 0.0, %v14034_v43 }
0x200d   : > { %v14042_v47 = vpop.eup %11944 }
0x200e   : > { %v14047_v59 = vpop.eup %11946  ;;  %v6201_v0 = vmul.f32 0.0, %v14042_v47 }
0x2015   : > { %v14052_v13 = vpop.eup %11948 }
0x205e   : > { %v6214_v35 = vpop.permute.xlu1 %6213 }
0x205f   : > { %v6236_v38 = vmul.f32 %v14024_v34, %v6214_v35 }
0x2061   : > { %6253 = vrot.lane.b32.xlu0 %v6236_v38, %s12770_s3  ;;  %v6197_v38 = vmul.f32 0.0, %v14039_v41 }
0x2062   : > { %v6212_v11 = vpop.permute.xlu1 %6211 }
0x2063   : > { %v6235_v18 = vmul.f32 %v14028_v3, %v6212_v11  ;;  %v6216_v20 = vpop.permute.xlu0 %6215 }
0x2064   : > { %v6237_v48 = vmul.f32 %v14039_v41, %v6216_v20 }
0x2065   : > { %6251 = vrot.lane.b32.xlu0 %v6235_v18, %s12770_s3 }
0x2066   : > { %v6218_v51 = vpop.permute.xlu1 %6217 }
0x2067   : > { %v6238_v31 = vmul.f32 %v14032_v58, %v6218_v51  ;;  %v6220_v44 = vpop.permute.xlu0 %6219  ;;  %v6200_v51 = vmul.f32 0.0, %v14047_v59 }
0x2068   : > { %v6239_v50 = vmul.f32 %v14034_v43, %v6220_v44 }
0x2069   : > { %6257 = vrot.lane.b32.xlu1 %v6238_v31, %s12770_s3 }
0x206a   : > { %v6222_v57 = vpop.permute.xlu1 %6221  ;;  %6259 = vrot.lane.b32.xlu0 %v6239_v50, %s12770_s3 }
0x206b   : > { %v6224_v46 = vpop.permute.xlu0 %6223  ;;  %v6240_v8 = vmul.f32 %v14047_v59, %v6222_v57  ;;  %v6202_v57 = vmul.f32 0.0, %v14052_v13 }
0x206c   : > { %v6241_v53 = vmul.f32 %v14042_v47, %v6224_v46 }
0x206d   : > { %6255 = vrot.lane.b32.xlu1 %v6237_v48, %s12770_s3 }
0x206e   : > { %6263 = vrot.lane.b32.xlu0 %v6241_v53, %s12770_s3  ;;  %v6226_v12 = vpop.permute.xlu1 %6225 }
0x206f   : > { %v6242_v62 = vmul.f32 %v14052_v13, %v6226_v12 }
0x2071   : > { %6261 = vrot.lane.b32.xlu1 %v6240_v8, %s12770_s3 }
0x2075   : > { %6265 = vrot.lane.b32.xlu1 %v6242_v62, %s12770_s3 }
0x20d3   : > { %v6254_v55 = vpop.permute.xlu0 %6253 }
0x20d4   : > { %v14057_v6 = vadd.f32 %v6254_v55, %v6196_v52 }
0x20d6   : > { %11950 = vtanh.f32 %v14057_v6 }
0x20d7   : > { %v6252_v56 = vpop.permute.xlu0 %6251 }
0x20d8   : > { %v14061_v42 = vadd.f32 %v6252_v56, %v6195_v7 }
0x20da   : > { %11952 = vtanh.f32 %v14061_v42 }
0x20db   : > { %v6258_v10 = vpop.permute.xlu1 %6257 }
0x20dc   : > { %v14066_v19 = vadd.f32 %v6258_v10, %v6198_v1  ;;  %v6260_v26 = vpop.permute.xlu0 %6259 }
0x20dd   : > { %v14068_v35 = vadd.f32 %v6260_v26, %v6199_v17 }
0x20de   : > { %11954 = vtanh.f32 %v14066_v19 }
0x20df   : > { %11956 = vtanh.f32 %v14068_v35  ;;  %v6256_v63 = vpop.permute.xlu1 %6255 }
0x20e0   : > { %v11951_v11 = vpop.eup %11950  ;;  %v14074_v18 = vadd.f32 %v6256_v63, %v6197_v38  ;;  %v6264_v20 = vpop.permute.xlu0 %6263 }
0x20e1   : > { %v14076_v32 = vadd.f32 %v6264_v20, %v6201_v0  ;;  %6301 = vrot.lane.b32.xlu0 %v11951_v11, %s12770_s3 }
0x20e2   : > { %11958 = vtanh.f32 %v14074_v18 }
0x20e3   : > { %11960 = vtanh.f32 %v14076_v32  ;;  %v6262_v31 = vpop.permute.xlu1 %6261 }
0x20e4   : > { %v11953_v44 = vpop.eup %11952  ;;  %v14082_v50 = vadd.f32 %v6262_v31, %v6200_v51 }
0x20e5   : > { %6299 = vrot.lane.b32.xlu0 %v11953_v44, %s12770_s3 }
0x20e6   : > { %11962 = vtanh.f32 %v14082_v50 }
0x20e7   : > { %v6266_v48 = vpop.permute.xlu1 %6265 }
0x20e8   : > { %v11955_v46 = vpop.eup %11954  ;;  %v14087_v53 = vadd.f32 %v6266_v48, %v6202_v57 }
0x20e9   : > { %v11957_v8 = vpop.eup %11956  ;;  %6305 = vrot.lane.b32.xlu1 %v11955_v46, %s12770_s3 }
0x20ea   : > { %11964 = vtanh.f32 %v14087_v53  ;;  %6307 = vrot.lane.b32.xlu0 %v11957_v8, %s12770_s3 }
0x20ec   : > { %v11959_v12 = vpop.eup %11958 }
0x20ed   : > { %v11961_v62 = vpop.eup %11960  ;;  %6303 = vrot.lane.b32.xlu1 %v11959_v12, %s12770_s3 }
0x20ee   : > { %6311 = vrot.lane.b32.xlu0 %v11961_v62, %s12770_s3 }
0x20f0   : > { %v11963_v52 = vpop.eup %11962 }
0x20f1   : > { %6309 = vrot.lane.b32.xlu1 %v11963_v52, %s12770_s3 }
0x20f4   : > { %v11965_v55 = vpop.eup %11964 }
0x20f5   : > { %6313 = vrot.lane.b32.xlu1 %v11965_v55, %s12770_s3 }
0x2153   : > { %v6302_v7 = vpop.permute.xlu0 %6301 }
0x2154   : > { %v6324_v17 = vmul.f32 %v14024_v34, %v6302_v7 }
0x2156   : > { %v6339_v20 = vrot.slane %v6324_v17, 7 }
0x2157   : > { %v6300_v56 = vpop.permute.xlu0 %6299 }
0x2158   : > { %v6323_v26 = vmul.f32 %v14028_v3, %v6300_v56 }
0x215a   : > { %v6341_v44 = vsel %vm6340_vm9, %v6339_v20, %v6323_v26 }
0x215b   : > { %v6306_v1 = vpop.permute.xlu1 %6305 }
0x215c   : > { %v6308_v10 = vpop.permute.xlu0 %6307  ;;  %v6326_v38 = vmul.f32 %v14032_v58, %v6306_v1 }
0x215d   : > { %v6327_v0 = vmul.f32 %v14034_v43, %v6308_v10 }
0x215e   : > { %v6345_v57 = vrot.slane %v6326_v38, 5 }
0x215f   : > { %v6304_v63 = vpop.permute.xlu1 %6303  ;;  %v6348_v48 = vrot.slane %v6327_v0, 4 }
0x2160   : > { %v6325_v11 = vmul.f32 %v14039_v41, %v6304_v63  ;;  %v6312_v31 = vpop.permute.xlu0 %6311 }
0x2161   : > { %v6329_v43 = vmul.f32 %v14042_v47, %v6312_v31 }
0x2162   : > { %v6342_v51 = vrot.slane %v6325_v11, 6 }
0x2163   : > { %v6310_v34 = vpop.permute.xlu1 %6309  ;;  %v6354_v55 = vrot.slane %v6329_v43, 2 }
0x2164   : > { %v6344_v3 = vsel %vm6343_vm10, %v6342_v51, %v6341_v44  ;;  %v6328_v58 = vmul.f32 %v14047_v59, %v6310_v34 }
0x2165   : > { %v6347_v46 = vsel %vm6346_vm11, %v6345_v57, %v6344_v3 }
0x2166   : > { %v6350_v41 = vsel %vm6349_vm12, %v6348_v48, %v6347_v46  ;;  %v6351_v8 = vrot.slane %v6328_v58, 3 }
0x2167   : > { %v6314_v12 = vpop.permute.xlu1 %6313 }
0x2168   : > { %v6353_v62 = vsel %vm6352_vm13, %v6351_v8, %v6350_v41  ;;  %v6330_v52 = vmul.f32 %v14052_v13, %v6314_v12 }
0x2169   : > { %v6356_v56 = vsel %vm6355_vm14, %v6354_v55, %v6353_v62 }
0x216a   : > { %v6357_v7 = vrot.slane %v6330_v52, 1 }
0x216c   : > { %v6359_v59 = vsel %vm15465_vm15, %v6357_v7, %v6356_v56 }
0x216d   : > { %6360 = vrot.lane.b32.xlu0 %v6359_v59, %s12771_s11 }
0x21df   : > { %v6361_v47 = vpop.permute.xlu0 %6360 }
0x21e0   : > { %6363 = vst.msk [vmem:[#allocation3] sm:$0xff] %vm6042_vm0, %v6361_v47  ;;  %11211 = vmatmul.mubr.msk.f32.vlgmr.msra.gmra.mrb[18].mxu0 %vm6042_vm0, %v6361_v47 }
0x21e1   : > { %11454 = vmatpush3.bf16.msra.mxu0 %v13921_v36  ;;  %11221 = vmatprep.mubr.msk.f32.mxu0 %vm12767_vm8, %v15453_v25 }
0x21e2   : > { %11455 = vmatprep.subr.bf16.mxu0 %v15451_v37 }
0x21e5   : > { %11457 = vmatpush3.bf16.msra.mxu0 %v13932_v40 }
0x21e6   : > { %11458 = vmatprep.subr.bf16.mxu0 %v15451_v37 }
0x22b3   : > { %v6432_v13 = vpop.f32.mrb[18].mxu0 }
0x22b4   : > { %v11212_v1 = vpop.f32.mrb[19].mxu0  ;;  %v6438_v10 = vrot.slane %v6432_v13, 1  ;;  %v6437_v17 = vrot.slane %v6432_v13, 7  ;;  %v6453_v26 = vadd.f32 %v6432_v13, %v13992_v15  ;;  %v6439_v38 = vrot.slane %v6432_v13, 2 }
0x22b5   : > { %v6440_v0 = vrot.slane %v6432_v13, 3  ;;  %v6441_v20 = vrot.slane %v6432_v13, 4  ;;  %v6442_v31 = vrot.slane %v6432_v13, 5  ;;  %v6443_v57 = vrot.slane %v6432_v13, 6 }
0x22b6   : > { %v6454_v63 = vadd.f32 %v6438_v10, %v14000_v2  ;;  %v6452_v11 = vadd.f32 %v6437_v17, %v13994_v61  ;;  %11966 = vtanh.f32 %v6453_v26  ;;  %v6455_v51 = vadd.f32 %v6439_v38, %v13997_v54 }
0x22b7   : > { %v6456_v44 = vadd.f32 %v6440_v0, %v14006_v29  ;;  %v6457_v34 = vadd.f32 %v6441_v20, %v14003_v45  ;;  %v6458_v48 = vadd.f32 %v6442_v31, %v14012_v9  ;;  %v6459_v3 = vadd.f32 %v6443_v57, %v14009_v39 }
0x22b8   : > { %11968 = vtanh.f32 %v6454_v63  ;;  %v10631_v55 = vmul.f32 -1.442695, %v6453_v26  ;;  %v10632_v7 = vmul.f32 -1.442695, %v6454_v63  ;;  %v10630_v56 = vmul.f32 -1.442695, %v6452_v11 }
0x22b9   : > { %11970 = vtanh.f32 %v6452_v11  ;;  %v10633_v59 = vmul.f32 -1.442695, %v6455_v51  ;;  %v10634_v47 = vmul.f32 -1.442695, %v6456_v44  ;;  %v10635_v13 = vmul.f32 -1.442695, %v6457_v34 }
0x22ba   : > { %11972 = vtanh.f32 %v6455_v51  ;;  %v10636_v1 = vmul.f32 -1.442695, %v6458_v48  ;;  %v10637_v10 = vmul.f32 -1.442695, %v6459_v3 }
0x22bb   : > { %11974 = vtanh.f32 %v6456_v44 }
0x22bc   : > { %11976 = vtanh.f32 %v6457_v34 }
0x22bd   : > { %11978 = vtanh.f32 %v6458_v48 }
0x22be   : > { %11980 = vtanh.f32 %v6459_v3 }
0x22bf   : > { %11982 = vpow2.f32 %v10631_v55 }
0x22c0   : > { %v11967_v58 = vpop.eup %11966  ;;  %11984 = vpow2.f32 %v10632_v7 }
0x22c1   : > { %6558 = vrot.lane.b32.xlu1 %v11967_v58, %s12770_s3  ;;  %11986 = vpow2.f32 %v10630_v56 }
0x22c2   : > { %v11969_v46 = vpop.eup %11968  ;;  %11988 = vpow2.f32 %v10633_v59 }
0x22c3   : > { %6560 = vrot.lane.b32.xlu0 %v11969_v46, %s12770_s3  ;;  %v11971_v43 = vpop.eup %11970  ;;  %11990 = vpow2.f32 %v10634_v47 }
0x22c4   : > { %v11973_v41 = vpop.eup %11972  ;;  %11992 = vpow2.f32 %v10635_v13 }
0x22c5   : > { %6556 = vrot.lane.b32.xlu1 %v11971_v43, %s12770_s3  ;;  %v11975_v8 = vpop.eup %11974  ;;  %11994 = vpow2.f32 %v10636_v1 }
0x22c6   : > { %v11977_v12 = vpop.eup %11976  ;;  %11996 = vpow2.f32 %v10637_v10 }
0x22c7   : > { %6562 = vrot.lane.b32.xlu0 %v11973_v41, %s12770_s3  ;;  %v11979_v62 = vpop.eup %11978 }
0x22c8   : > { %v11981_v52 = vpop.eup %11980 }
0x22c9   : > { %6564 = vrot.lane.b32.xlu1 %v11975_v8, %s12770_s3  ;;  %v11983_v17 = vpop.eup %11982 }
0x22ca   : > { %v11985_v38 = vpop.eup %11984  ;;  %v6485_v0 = vadd.f32 1.0, %v11983_v17 }
0x22cb   : > { %6566 = vrot.lane.b32.xlu0 %v11977_v12, %s12770_s3  ;;  %v11987_v20 = vpop.eup %11986  ;;  %v6486_v26 = vadd.f32 1.0, %v11985_v38 }
0x22cc   : > { %v11989_v63 = vpop.eup %11988  ;;  %11998 = vrcp.f32 %v6485_v0  ;;  %v6484_v11 = vadd.f32 1.0, %v11987_v20 }
0x22cd   : > { %6568 = vrot.lane.b32.xlu1 %v11979_v62, %s12770_s3  ;;  %v11991_v31 = vpop.eup %11990  ;;  %12000 = vrcp.f32 %v6486_v26  ;;  %v6487_v51 = vadd.f32 1.0, %v11989_v63 }
0x22ce   : > { %v11993_v44 = vpop.eup %11992  ;;  %12002 = vrcp.f32 %v6484_v11  ;;  %v6488_v57 = vadd.f32 1.0, %v11991_v31 }
0x22cf   : > { %6570 = vrot.lane.b32.xlu0 %v11981_v52, %s12770_s3  ;;  %v11995_v34 = vpop.eup %11994  ;;  %12004 = vrcp.f32 %v6487_v51  ;;  %v6489_v48 = vadd.f32 1.0, %v11993_v44 }
0x22d0   : > { %v11997_v3 = vpop.eup %11996  ;;  %12006 = vrcp.f32 %v6488_v57  ;;  %v6490_v58 = vadd.f32 1.0, %v11995_v34  ;;  %v6525_v57 = vrot.slane %v14057_v6, 7  ;;  %v6526_v34 = vrot.slane %v14074_v18, 7 }
0x22d1   : > { %12008 = vrcp.f32 %v6489_v48  ;;  %v6491_v46 = vadd.f32 1.0, %v11997_v3 }
0x22d2   : > { %12010 = vrcp.f32 %v6490_v58 }
0x22d3   : > { %12012 = vrcp.f32 %v6491_v46  ;;  %v6524_v46 = vrot.slane %v14061_v42, 7 }
0x22d6   : > { %v14136_v43 = vpop.eup %11998 }
0x22d7   : > { %v14138_v8 = vpop.eup %12000  ;;  %v6541_v48 = vmul.f32 %v14136_v43, %v6525_v57 }
0x22d8   : > { %v14143_v55 = vpop.eup %12002  ;;  %v6542_v58 = vmul.f32 %v14138_v8, %v6526_v34 }
0x22d9   : > { %v14146_v56 = vpop.eup %12004  ;;  %v6540_v6 = vmul.f32 %v14143_v55, %v6524_v46 }
0x22da   : > { %v14151_v1 = vpop.eup %12006 }
0x22db   : > { %v14154_v17 = vpop.eup %12008 }
0x22dc   : > { %v14159_v26 = vpop.eup %12010 }
0x22dd   : > { %v14162_v11 = vpop.eup %12012 }
0x2333   : > { %v6559_v41 = vpop.permute.xlu1 %6558 }
0x2334   : > { %v6581_v12 = vmul.f32 %v14136_v43, %v6559_v41 }
0x2335   : > { %v6561_v62 = vpop.permute.xlu0 %6560 }
0x2336   : > { %v6582_v52 = vmul.f32 %v14138_v8, %v6561_v62  ;;  %6598 = vrot.lane.b32.xlu1 %v6581_v12, %s12770_s3  ;;  %v6527_v62 = vrot.slane %v14066_v19, 7 }
0x2337   : > { %v6557_v7 = vpop.permute.xlu1 %6556 }
0x2338   : > { %6600 = vrot.lane.b32.xlu0 %v6582_v52, %s12770_s3  ;;  %v6580_v59 = vmul.f32 %v14143_v55, %v6557_v7  ;;  %v6543_v7 = vmul.f32 %v14146_v56, %v6527_v62 }
0x2339   : > { %v6563_v47 = vpop.permute.xlu0 %6562 }
0x233a   : > { %v6583_v13 = vmul.f32 %v14146_v56, %v6563_v47  ;;  %6596 = vrot.lane.b32.xlu1 %v6580_v59, %s12770_s3  ;;  %v6528_v59 = vrot.slane %v14068_v35, 7 }
0x233b   : > { %v6565_v10 = vpop.permute.xlu1 %6564 }
0x233c   : > { %6602 = vrot.lane.b32.xlu0 %v6583_v13, %s12770_s3  ;;  %v6584_v38 = vmul.f32 %v14151_v1, %v6565_v10  ;;  %v6529_v13 = vrot.slane %v14082_v50, 7  ;;  %v6544_v19 = vmul.f32 %v14151_v1, %v6528_v59 }
0x233d   : > { %v6567_v0 = vpop.permute.xlu0 %6566 }
0x233e   : > { %v6585_v20 = vmul.f32 %v14154_v17, %v6567_v0  ;;  %6604 = vrot.lane.b32.xlu1 %v6584_v38, %s12770_s3  ;;  %v6545_v0 = vmul.f32 %v14154_v17, %v6529_v13 }
0x233f   : > { %v6569_v63 = vpop.permute.xlu1 %6568 }
0x2340   : > { %6606 = vrot.lane.b32.xlu0 %v6585_v20, %s12770_s3  ;;  %v6586_v31 = vmul.f32 %v14159_v26, %v6569_v63  ;;  %v6530_v20 = vrot.slane %v14076_v32, 7 }
0x2341   : > { %v6571_v51 = vpop.permute.xlu0 %6570 }
0x2342   : > { %v6587_v44 = vmul.f32 %v14162_v11, %v6571_v51  ;;  %6608 = vrot.lane.b32.xlu1 %v6586_v31, %s12770_s3  ;;  %v6531_v31 = vrot.slane %v14087_v53, 7  ;;  %v6546_v50 = vmul.f32 %v14159_v26, %v6530_v20 }
0x2344   : > { %6610 = vrot.lane.b32.xlu0 %v6587_v44, %s12770_s3  ;;  %v6547_v57 = vmul.f32 %v14162_v11, %v6531_v31 }
0x23a8   : > { %v6599_v3 = vpop.permute.xlu1 %6598 }
0x23a9   : > { %v14173_v41 = vadd.f32 %v6599_v3, %v6541_v48 }
0x23aa   : > { %v6601_v12 = vpop.permute.xlu0 %6600 }
0x23ab   : > { %v14176_v52 = vadd.f32 %v6601_v12, %v6542_v58  ;;  %12014 = vtanh.f32 %v14173_v41 }
0x23ac   : > { %v6597_v18 = vpop.permute.xlu1 %6596 }
0x23ad   : > { %12016 = vtanh.f32 %v14176_v52  ;;  %v14183_v47 = vadd.f32 %v6597_v18, %v6540_v6 }
0x23ae   : > { %v6603_v42 = vpop.permute.xlu0 %6602 }
0x23af   : > { %v14186_v10 = vadd.f32 %v6603_v42, %v6543_v7  ;;  %12018 = vtanh.f32 %v14183_v47 }
0x23b0   : > { %v6605_v38 = vpop.permute.xlu1 %6604 }
0x23b1   : > { %12020 = vtanh.f32 %v14186_v10  ;;  %v14193_v63 = vadd.f32 %v6605_v38, %v6544_v19 }
0x23b2   : > { %v6607_v35 = vpop.permute.xlu0 %6606 }
0x23b3   : > { %v14196_v51 = vadd.f32 %v6607_v35, %v6545_v0  ;;  %12022 = vtanh.f32 %v14193_v63 }
0x23b4   : > { %v6609_v44 = vpop.permute.xlu1 %6608 }
0x23b5   : > { %12024 = vtanh.f32 %v14196_v51  ;;  %v12015_v34 = vpop.eup %12014  ;;  %v14202_v48 = vadd.f32 %v6609_v44, %v6546_v50 }
0x23b6   : > { %v6611_v32 = vpop.permute.xlu0 %6610  ;;  %6646 = vrot.lane.b32.xlu1 %v12015_v34, %s12770_s3 }
0x23b7   : > { %v12017_v3 = vpop.eup %12016  ;;  %v14204_v58 = vadd.f32 %v6611_v32, %v6547_v57  ;;  %12026 = vtanh.f32 %v14202_v48 }
0x23b8   : > { %6648 = vrot.lane.b32.xlu0 %v12017_v3, %s12770_s3 }
0x23b9   : > { %12028 = vtanh.f32 %v14204_v58  ;;  %v12019_v53 = vpop.eup %12018 }
0x23ba   : > { %6644 = vrot.lane.b32.xlu1 %v12019_v53, %s12770_s3 }
0x23bb   : > { %v12021_v46 = vpop.eup %12020 }
0x23bc   : > { %6650 = vrot.lane.b32.xlu0 %v12021_v46, %s12770_s3 }
0x23bd   : > { %v12023_v12 = vpop.eup %12022 }
0x23be   : > { %6652 = vrot.lane.b32.xlu1 %v12023_v12, %s12770_s3 }
0x23bf   : > { %v12025_v62 = vpop.eup %12024 }
0x23c0   : > { %6654 = vrot.lane.b32.xlu0 %v12025_v62, %s12770_s3 }
0x23c1   : > { %v12027_v6 = vpop.eup %12026 }
0x23c2   : > { %6656 = vrot.lane.b32.xlu1 %v12027_v6, %s12770_s3 }
0x23c3   : > { %v12029_v18 = vpop.eup %12028 }
0x23c4   : > { %6658 = vrot.lane.b32.xlu0 %v12029_v18, %s12770_s3 }
0x2428   : > { %v6647_v7 = vpop.permute.xlu1 %6646 }
0x2429   : > { %v6669_v59 = vmul.f32 %v14136_v43, %v6647_v7 }
0x242a   : > { %v6649_v42 = vpop.permute.xlu0 %6648 }
0x242b   : > { %v6670_v13 = vmul.f32 %v14138_v8, %v6649_v42  ;;  %v6684_v0 = vrot.slane %v6669_v59, 7 }
0x242c   : > { %v6645_v38 = vpop.permute.xlu1 %6644 }
0x242d   : > { %v6686_v19 = vrot.slane %v6670_v13, 6  ;;  %v6668_v20 = vmul.f32 %v14143_v55, %v6645_v38  ;;  %v6710_v57 = vrot.slane %v6670_v13, 7 }
0x242e   : > { %v6651_v35 = vpop.permute.xlu0 %6650 }
0x242f   : > { %v6671_v31 = vmul.f32 %v14146_v56, %v6651_v35  ;;  %v6685_v50 = vsel %vm6343_vm10, %v6684_v0, %v6668_v20  ;;  %v6708_v44 = vrot.slane %v6668_v20, 1 }
0x2430   : > { %v6687_v34 = vsel %vm6346_vm11, %v6686_v19, %v6685_v50  ;;  %v6653_v43 = vpop.permute.xlu1 %6652 }
0x2431   : > { %v6688_v32 = vrot.slane %v6671_v31, 5  ;;  %v6712_v3 = vrot.slane %v6671_v31, 6  ;;  %v6709_v53 = vsel %vm6340_vm9, %v6669_v59, %v6708_v44  ;;  %v6672_v8 = vmul.f32 %v14151_v1, %v6653_v43 }
0x2432   : > { %v6655_v46 = vpop.permute.xlu0 %6654  ;;  %v6711_v55 = vsel %vm6343_vm10, %v6710_v57, %v6709_v53 }
0x2433   : > { %v6689_v12 = vsel %vm6349_vm12, %v6688_v32, %v6687_v34  ;;  %v6673_v56 = vmul.f32 %v14154_v17, %v6655_v46  ;;  %v6713_v62 = vsel %vm6346_vm11, %v6712_v3, %v6711_v55  ;;  %v6690_v6 = vrot.slane %v6672_v8, 4 }
0x2434   : > { %v6714_v18 = vrot.slane %v6672_v8, 5  ;;  %v6657_v13 = vpop.permute.xlu1 %6656 }
0x2435   : > { %v6692_v7 = vrot.slane %v6673_v56, 3  ;;  %v6716_v42 = vrot.slane %v6673_v56, 4  ;;  %v6674_v59 = vmul.f32 %v14159_v26, %v6657_v13  ;;  %v6691_v1 = vsel %vm6352_vm13, %v6690_v6, %v6689_v12 }
0x2436   : > { %v6715_v19 = vsel %vm6349_vm12, %v6714_v18, %v6713_v62  ;;  %v6659_v38 = vpop.permute.xlu0 %6658 }
0x2437   : > { %v14232_v0 = vmul.f32 %v14162_v11, %v6659_v38  ;;  %v6717_v20 = vsel %vm6352_vm13, %v6716_v42, %v6715_v19  ;;  %v6693_v17 = vsel %vm6355_vm14, %v6692_v7, %v6691_v1  ;;  %v6694_v35 = vrot.slane %v6674_v59, 2 }
0x2438   : > { %v6718_v31 = vrot.slane %v6674_v59, 3 }
0x2439   : > { %v6720_v50 = vrot.slane %v14232_v0, 2  ;;  %v14239_v57 = vsel %vm15465_vm15, %v6694_v35, %v6693_v17 }
0x243a   : > { %v6719_v44 = vsel %vm6355_vm14, %v6718_v31, %v6717_v20 }
0x243b   : > { %v6721_v26 = vsel %vm15465_vm15, %v6720_v50, %v6719_v44 }
0x243c   : > { %6722 = vrot.lane.b32.xlu1 %v6721_v26, %s12771_s11 }
0x24ae   : > { %v6723_v34 = vpop.permute.xlu1 %6722 }
0x24af   : > { %11222 = vmatmul.mubr.msk.f32.vlgmr.msra.gmra.mrb[20].mxu0 %vm6042_vm0, %v6723_v34 }
0x24b0   : > { %11460 = vmatpush3.bf16.msra.mxu0 %v13921_v36  ;;  %11232 = vmatprep.mubr.msk.f32.mxu0 %vm12767_vm8, %v15453_v25 }
0x24b1   : > { %11461 = vmatprep.subr.bf16.mxu0 %v15451_v37 }
0x24b4   : > { %11463 = vmatpush3.bf16.msra.mxu0 %v13932_v40 }
0x24b5   : > { %11464 = vmatprep.subr.bf16.mxu0 %v15451_v37 }
0x2582   : > { %v6792_v11 = vpop.f32.mrb[20].mxu0 }
0x2583   : > { %v6797_v32 = vrot.slane %v6792_v11, 6  ;;  %v11223_v3 = vpop.f32.mrb[21].mxu0  ;;  %v6799_v53 = vrot.slane %v6792_v11, 1  ;;  %v6798_v8 = vrot.slane %v6792_v11, 7  ;;  %v6814_v46 = vadd.f32 %v6792_v11, %v14000_v2 }
0x2584   : > { %v6800_v12 = vrot.slane %v6792_v11, 2  ;;  %v6801_v62 = vrot.slane %v6792_v11, 3  ;;  %v6802_v18 = vrot.slane %v6792_v11, 4  ;;  %v6803_v42 = vrot.slane %v6792_v11, 5 }
0x2585   : > { %v6812_v43 = vadd.f32 %v6797_v32, %v13994_v61  ;;  %v6815_v55 = vadd.f32 %v6799_v53, %v13997_v54  ;;  %v6813_v6 = vadd.f32 %v6798_v8, %v13992_v15  ;;  %v10641_v26 = vmul.f32 -1.442695, %v6814_v46 }
0x2586   : > { %v6816_v7 = vadd.f32 %v6800_v12, %v14006_v29  ;;  %v6817_v13 = vadd.f32 %v6801_v62, %v14003_v45  ;;  %v6818_v19 = vadd.f32 %v6802_v18, %v14012_v9  ;;  %v6819_v59 = vadd.f32 %v6803_v42, %v14009_v39 }
0x2587   : > { %12030 = vtanh.f32 %v6812_v43  ;;  %v10639_v44 = vmul.f32 -1.442695, %v6812_v43  ;;  %v10642_v34 = vmul.f32 -1.442695, %v6815_v55  ;;  %v10640_v32 = vmul.f32 -1.442695, %v6813_v6 }
0x2588   : > { %12032 = vtanh.f32 %v6814_v46  ;;  %v10643_v3 = vmul.f32 -1.442695, %v6816_v7  ;;  %v10644_v8 = vmul.f32 -1.442695, %v6817_v13  ;;  %v10645_v12 = vmul.f32 -1.442695, %v6818_v19 }
0x2589   : > { %12034 = vtanh.f32 %v6815_v55 }
0x258a   : > { %12036 = vtanh.f32 %v6813_v6 }
0x258b   : > { %12038 = vtanh.f32 %v6816_v7 }
0x258c   : > { %12040 = vtanh.f32 %v6817_v13 }
0x258d   : > { %12042 = vtanh.f32 %v6818_v19 }
0x258e   : > { %12044 = vtanh.f32 %v6819_v59 }
0x258f   : > { %12046 = vpow2.f32 %v10639_v44 }
0x2590   : > { %12048 = vpow2.f32 %v10641_v26 }
0x2591   : > { %v12031_v56 = vpop.eup %12030  ;;  %12050 = vpow2.f32 %v10642_v34 }
0x2592   : > { %6916 = vrot.lane.b32.xlu0 %v12031_v56, %s12770_s3  ;;  %v12033_v38 = vpop.eup %12032  ;;  %12052 = vpow2.f32 %v10640_v32  ;;  %v10646_v56 = vmul.f32 -1.442695, %v6819_v59 }
0x2593   : > { %v12035_v1 = vpop.eup %12034  ;;  %6920 = vrot.lane.b32.xlu1 %v12033_v38, %s12770_s3  ;;  %12054 = vpow2.f32 %v10643_v3 }
0x2594   : > { %v12037_v20 = vpop.eup %12036 }
0x2595   : > { %v12039_v17 = vpop.eup %12038 }
0x2596   : > { %6922 = vrot.lane.b32.xlu0 %v12035_v1, %s12770_s3  ;;  %v12041_v35 = vpop.eup %12040 }
0x2597   : > { %6918 = vrot.lane.b32.xlu1 %v12037_v20, %s12770_s3  ;;  %v12043_v31 = vpop.eup %12042 }
0x2598   : > { %v12045_v50 = vpop.eup %12044 }
0x2599   : > { %v12047_v11 = vpop.eup %12046 }
0x259a   : > { %6924 = vrot.lane.b32.xlu0 %v12039_v17, %s12770_s3  ;;  %v6844_v53 = vadd.f32 1.0, %v12047_v11  ;;  %v12049_v62 = vpop.eup %12048 }
0x259b   : > { %6926 = vrot.lane.b32.xlu1 %v12041_v35, %s12770_s3  ;;  %v12051_v18 = vpop.eup %12050  ;;  %v6846_v43 = vadd.f32 1.0, %v12049_v62 }
0x259c   : > { %12056 = vrcp.f32 %v6844_v53  ;;  %v12053_v46 = vpop.eup %12052  ;;  %v6847_v55 = vadd.f32 1.0, %v12051_v18 }
0x259d   : > { %12058 = vpow2.f32 %v10644_v8  ;;  %v12055_v42 = vpop.eup %12054  ;;  %v6845_v38 = vadd.f32 1.0, %v12053_v46 }
0x259e   : > { %6928 = vrot.lane.b32.xlu0 %v12043_v31, %s12770_s3  ;;  %12060 = vpow2.f32 %v10645_v12  ;;  %v6848_v19 = vadd.f32 1.0, %v12055_v42 }
0x259f   : > { %6930 = vrot.lane.b32.xlu1 %v12045_v50, %s12770_s3  ;;  %12062 = vpow2.f32 %v10646_v56 }
0x25a0   : > { %12064 = vrcp.f32 %v6846_v43 }
0x25a1   : > { %12066 = vrcp.f32 %v6847_v55 }
0x25a2   : > { %12068 = vrcp.f32 %v6845_v38 }
0x25a3   : > { %12070 = vrcp.f32 %v6848_v19  ;;  %v6884_v19 = vrot.slane %v14183_v47, 7 }
0x25a6   : > { %v14266_v6 = vpop.eup %12056 }
0x25a7   : > { %v12059_v1 = vpop.eup %12058 }
0x25a8   : > { %v12061_v20 = vpop.eup %12060  ;;  %v6849_v59 = vadd.f32 1.0, %v12059_v1 }
0x25a9   : > { %v12063_v17 = vpop.eup %12062  ;;  %v6850_v35 = vadd.f32 1.0, %v12061_v20  ;;  %v6900_v20 = vmul.f32 %v14266_v6, %v6884_v19 }
0x25aa   : > { %12072 = vrcp.f32 %v6849_v59  ;;  %v6851_v31 = vadd.f32 1.0, %v12063_v17  ;;  %v14270_v50 = vpop.eup %12064 }
0x25ab   : > { %12074 = vrcp.f32 %v6850_v35  ;;  %v14272_v26 = vpop.eup %12066  ;;  %v6886_v35 = vrot.slane %v14176_v52, 7 }
0x25ac   : > { %12076 = vrcp.f32 %v6851_v31  ;;  %v14277_v3 = vpop.eup %12068  ;;  %v6887_v31 = vrot.slane %v14186_v10, 7 }
0x25ad   : > { %v14280_v8 = vpop.eup %12070 }
0x25b4   : > { %v14285_v18 = vpop.eup %12072 }
0x25b5   : > { %v14288_v46 = vpop.eup %12074 }
0x25b6   : > { %v14293_v38 = vpop.eup %12076 }
0x2604   : > { %v6917_v7 = vpop.permute.xlu0 %6916 }
0x2605   : > { %v6940_v13 = vmul.f32 %v14266_v6, %v6917_v7  ;;  %v6921_v44 = vpop.permute.xlu1 %6920 }
0x2606   : > { %v6942_v34 = vmul.f32 %v14270_v50, %v6921_v44  ;;  %v6902_v44 = vmul.f32 %v14270_v50, %v6886_v35 }
0x2607   : > { %6956 = vrot.lane.b32.xlu0 %v6940_v13, %s12770_s3 }
0x2608   : > { %v6923_v11 = vpop.permute.xlu0 %6922  ;;  %6960 = vrot.lane.b32.xlu1 %v6942_v34, %s12770_s3 }
0x2609   : > { %v6943_v32 = vmul.f32 %v14272_v26, %v6923_v11  ;;  %v6919_v53 = vpop.permute.xlu1 %6918  ;;  %v6903_v11 = vmul.f32 %v14272_v26, %v6887_v31 }
0x260a   : > { %v6941_v12 = vmul.f32 %v14277_v3, %v6919_v53 }
0x260b   : > { %6962 = vrot.lane.b32.xlu0 %v6943_v32, %s12770_s3  ;;  %v6885_v32 = vrot.slane %v14173_v41, 7  ;;  %v6889_v41 = vrot.slane %v14196_v51, 7 }
0x260c   : > { %v6925_v56 = vpop.permute.xlu0 %6924  ;;  %6958 = vrot.lane.b32.xlu1 %v6941_v12, %s12770_s3  ;;  %v6888_v12 = vrot.slane %v14193_v63, 7  ;;  %v6890_v63 = vrot.slane %v14202_v48, 7 }
0x260d   : > { %v6944_v62 = vmul.f32 %v14280_v8, %v6925_v56  ;;  %v6927_v43 = vpop.permute.xlu1 %6926  ;;  %v6901_v52 = vmul.f32 %v14277_v3, %v6885_v32 }
0x260e   : > { %v6945_v55 = vmul.f32 %v14285_v18, %v6927_v43  ;;  %v6904_v43 = vmul.f32 %v14280_v8, %v6888_v12  ;;  %v6906_v19 = vmul.f32 %v14288_v46, %v6890_v63 }
0x260f   : > { %6964 = vrot.lane.b32.xlu0 %v6944_v62, %s12770_s3 }
0x2610   : > { %v6929_v42 = vpop.permute.xlu0 %6928  ;;  %6966 = vrot.lane.b32.xlu1 %v6945_v55, %s12770_s3 }
0x2611   : > { %v6946_v7 = vmul.f32 %v14288_v46, %v6929_v42  ;;  %v6931_v1 = vpop.permute.xlu1 %6930 }
0x2612   : > { %v6947_v13 = vmul.f32 %v14293_v38, %v6931_v1  ;;  %v6905_v1 = vmul.f32 %v14285_v18, %v6889_v41 }
0x2613   : > { %6968 = vrot.lane.b32.xlu0 %v6946_v7, %s12770_s3 }
0x2614   : > { %6970 = vrot.lane.b32.xlu1 %v6947_v13, %s12770_s3 }
0x2679   : > { %v6957_v59 = vpop.permute.xlu0 %6956 }
0x267a   : > { %v14300_v17 = vadd.f32 %v6957_v59, %v6900_v20  ;;  %v6961_v34 = vpop.permute.xlu1 %6960  ;;  %v6891_v20 = vrot.slane %v14204_v58, 7 }
0x267b   : > { %v14308_v53 = vadd.f32 %v6961_v34, %v6902_v44 }
0x267c   : > { %12078 = vtanh.f32 %v14300_v17  ;;  %v6907_v48 = vmul.f32 %v14293_v38, %v6891_v20 }
0x267d   : > { %v6963_v47 = vpop.permute.xlu0 %6962  ;;  %12080 = vtanh.f32 %v14308_v53 }
0x267e   : > { %v14311_v56 = vadd.f32 %v6963_v47, %v6903_v11  ;;  %v6959_v10 = vpop.permute.xlu1 %6958 }
0x267f   : > { %v14319_v55 = vadd.f32 %v6959_v10, %v6901_v52 }
0x2680   : > { %12082 = vtanh.f32 %v14311_v56 }
0x2681   : > { %v6965_v42 = vpop.permute.xlu0 %6964  ;;  %12084 = vtanh.f32 %v14319_v55 }
0x2682   : > { %v14322_v7 = vadd.f32 %v6965_v42, %v6904_v43  ;;  %v6967_v13 = vpop.permute.xlu1 %6966 }
0x2683   : > { %v14329_v59 = vadd.f32 %v6967_v13, %v6905_v1 }
0x2684   : > { %12086 = vtanh.f32 %v14322_v7 }
0x2685   : > { %v6969_v51 = vpop.permute.xlu0 %6968  ;;  %12088 = vtanh.f32 %v14329_v59 }
0x2686   : > { %v12079_v62 = vpop.eup %12078  ;;  %v14331_v35 = vadd.f32 %v6969_v51, %v6906_v19  ;;  %v6971_v31 = vpop.permute.xlu1 %6970 }
0x2687   : > { %7004 = vrot.lane.b32.xlu0 %v12079_v62, %s12770_s3  ;;  %v12081_v44 = vpop.eup %12080  ;;  %v14336_v34 = vadd.f32 %v6971_v31, %v6907_v48 }
0x2688   : > { %12090 = vtanh.f32 %v14331_v35  ;;  %7008 = vrot.lane.b32.xlu1 %v12081_v44, %s12770_s3 }
0x2689   : > { %12092 = vtanh.f32 %v14336_v34 }
0x268a   : > { %v12083_v11 = vpop.eup %12082 }
0x268b   : > { %7010 = vrot.lane.b32.xlu0 %v12083_v11, %s12770_s3  ;;  %v12085_v58 = vpop.eup %12084 }
0x268c   : > { %7006 = vrot.lane.b32.xlu1 %v12085_v58, %s12770_s3 }
0x268e   : > { %v12087_v32 = vpop.eup %12086 }
0x268f   : > { %7012 = vrot.lane.b32.xlu0 %v12087_v32, %s12770_s3  ;;  %v12089_v47 = vpop.eup %12088 }
0x2690   : > { %7014 = vrot.lane.b32.xlu1 %v12089_v47, %s12770_s3 }
0x2692   : > { %v12091_v12 = vpop.eup %12090 }
0x2693   : > { %7016 = vrot.lane.b32.xlu0 %v12091_v12, %s12770_s3  ;;  %v12093_v62 = vpop.eup %12092 }
0x2694   : > { %7018 = vrot.lane.b32.xlu1 %v12093_v62, %s12770_s3 }
0x26f9   : > { %v7005_v52 = vpop.permute.xlu0 %7004 }
0x26fa   : > { %v7009_v10 = vpop.permute.xlu1 %7008  ;;  %v7028_v41 = vmul.f32 %v14266_v6, %v7005_v52 }
0x26fb   : > { %v7030_v63 = vmul.f32 %v14270_v50, %v7009_v10 }
0x26fc   : > { %v7068_v20 = vrot.slane %v7028_v41, 2 }
0x26fd   : > { %v7011_v43 = vpop.permute.xlu0 %7010  ;;  %v7046_v58 = vrot.slane %v7030_v63, 6 }
0x26fe   : > { %v7031_v42 = vmul.f32 %v14272_v26, %v7011_v43  ;;  %v7007_v1 = vpop.permute.xlu1 %7006 }
0x26ff   : > { %v7029_v13 = vmul.f32 %v14277_v3, %v7007_v1 }
0x2700   : > { %v7048_v44 = vrot.slane %v7031_v42, 5  ;;  %v7072_v11 = vrot.slane %v7031_v42, 7 }
0x2701   : > { %v7013_v19 = vpop.permute.xlu0 %7012  ;;  %v7044_v48 = vrot.slane %v7029_v13, 7  ;;  %v7069_v31 = vrot.slane %v7029_v13, 1 }
0x2702   : > { %v7032_v51 = vmul.f32 %v14280_v8, %v7013_v19  ;;  %v7015_v32 = vpop.permute.xlu1 %7014 }
0x2703   : > { %v7045_v6 = vsel %vm6346_vm11, %v7044_v48, %v7028_v41  ;;  %v7070_v26 = vsel %vm6340_vm9, %v7069_v31, %v7068_v20  ;;  %v7033_v50 = vmul.f32 %v14285_v18, %v7015_v32 }
0x2704   : > { %v7050_v47 = vrot.slane %v7032_v51, 4  ;;  %v7074_v12 = vrot.slane %v7032_v51, 6  ;;  %v7071_v3 = vsel %vm6343_vm10, %v7030_v63, %v7070_v26  ;;  %v7047_v8 = vsel %vm6349_vm12, %v7046_v58, %v7045_v6 }
0x2705   : > { %v7017_v62 = vpop.permute.xlu0 %7016  ;;  %v7073_v10 = vsel %vm6346_vm11, %v7072_v11, %v7071_v3  ;;  %v7052_v43 = vrot.slane %v7033_v50, 3  ;;  %v7076_v42 = vrot.slane %v7033_v50, 5  ;;  %v7049_v1 = vsel %vm6352_vm13, %v7048_v44, %v7047_v8 }
0x2706   : > { %v7034_v52 = vmul.f32 %v14288_v46, %v7017_v62  ;;  %v7075_v13 = vsel %vm6349_vm12, %v7074_v12, %v7073_v10  ;;  %v7019_v41 = vpop.permute.xlu1 %7018  ;;  %v7051_v20 = vsel %vm6355_vm14, %v7050_v47, %v7049_v1 }
0x2707   : > { %v7035_v18 = vmul.f32 %v14293_v38, %v7019_v41  ;;  %v7077_v63 = vsel %vm6352_vm13, %v7076_v42, %v7075_v13  ;;  %v14364_v46 = vsel %vm15465_vm15, %v7052_v43, %v7051_v20 }
0x2708   : > { %v7078_v19 = vrot.slane %v7034_v52, 4  ;;  %v7054_v51 = vrot.slane %v7034_v52, 2 }
0x2709   : > { %v7055_v31 = vrot.slane %v7035_v18, 1  ;;  %v7080_v11 = vrot.slane %v7035_v18, 3 }
0x270a   : > { %v7079_v48 = vsel %vm6355_vm14, %v7078_v19, %v7077_v63 }
0x270b   : > { %v7081_v44 = vsel %vm15465_vm15, %v7080_v11, %v7079_v48  ;;  %v14369_v58 = vsel %vm6340_vm9, %v7055_v31, %v7054_v51 }
0x270c   : > { %7082 = vrot.lane.b32.xlu0 %v7081_v44, %s12771_s11 }
0x277e   : > { %v7083_v32 = vpop.permute.xlu0 %7082 }
0x277f   : > { %11233 = vmatmul.mubr.msk.f32.vlgmr.msra.gmra.mrb[22].mxu0 %vm6042_vm0, %v7083_v32 }
0x2780   : > { %11466 = vmatpush3.bf16.msra.mxu0 %v13921_v36  ;;  %11243 = vmatprep.mubr.msk.f32.mxu0 %vm12767_vm8, %v15453_v25 }
0x2781   : > { %11467 = vmatprep.subr.bf16.mxu0 %v15451_v37 }
0x2784   : > { %11469 = vmatpush3.bf16.msra.mxu0 %v13932_v40 }
0x2785   : > { %11470 = vmatprep.subr.bf16.mxu0 %v15451_v37 }
0x2852   : > { %v7152_v38 = vpop.f32.mrb[22].mxu0 }
0x2853   : > { %v11234_v47 = vpop.f32.mrb[23].mxu0  ;;  %v7158_v12 = vrot.slane %v7152_v38, 6  ;;  %v7160_v6 = vrot.slane %v7152_v38, 1  ;;  %v7157_v50 = vrot.slane %v7152_v38, 5  ;;  %v7175_v62 = vadd.f32 %v7152_v38, %v13997_v54 }
0x2854   : > { %v7161_v3 = vrot.slane %v7152_v38, 2  ;;  %v7159_v8 = vrot.slane %v7152_v38, 7  ;;  %v7163_v43 = vrot.slane %v7152_v38, 4  ;;  %v7162_v1 = vrot.slane %v7152_v38, 3 }
0x2855   : > { %v7173_v26 = vadd.f32 %v7158_v12, %v13992_v15  ;;  %v7176_v52 = vadd.f32 %v7160_v6, %v14006_v29  ;;  %v7172_v10 = vadd.f32 %v7157_v50, %v13994_v61  ;;  %v10651_v38 = vmul.f32 -1.442695, %v7175_v62 }
0x2856   : > { %v7177_v42 = vadd.f32 %v7161_v3, %v14003_v45  ;;  %v7174_v13 = vadd.f32 %v7159_v8, %v14000_v2  ;;  %v7179_v41 = vadd.f32 %v7163_v43, %v14009_v39  ;;  %v7178_v20 = vadd.f32 %v7162_v1, %v14012_v9 }
0x2857   : > { %12094 = vtanh.f32 %v7173_v26  ;;  %v10649_v32 = vmul.f32 -1.442695, %v7173_v26  ;;  %v10652_v47 = vmul.f32 -1.442695, %v7176_v52  ;;  %v10648_v12 = vmul.f32 -1.442695, %v7172_v10 }
0x2858   : > { %12096 = vtanh.f32 %v7175_v62  ;;  %v10653_v6 = vmul.f32 -1.442695, %v7177_v42  ;;  %v10650_v50 = vmul.f32 -1.442695, %v7174_v13  ;;  %v10655_v3 = vmul.f32 -1.442695, %v7179_v41 }
0x2859   : > { %12098 = vtanh.f32 %v7176_v52  ;;  %v10654_v43 = vmul.f32 -1.442695, %v7178_v20 }
0x285a   : > { %12100 = vtanh.f32 %v7172_v10 }
0x285b   : > { %12102 = vtanh.f32 %v7177_v42 }
0x285c   : > { %12104 = vtanh.f32 %v7174_v13 }
0x285d   : > { %12106 = vtanh.f32 %v7179_v41 }
0x285e   : > { %12108 = vtanh.f32 %v7178_v20 }
0x285f   : > { %12110 = vpow2.f32 %v10649_v32 }
0x2860   : > { %12112 = vpow2.f32 %v10651_v38 }
0x2861   : > { %v12095_v19 = vpop.eup %12094  ;;  %12114 = vpow2.f32 %v10652_v47 }
0x2862   : > { %7278 = vrot.lane.b32.xlu0 %v12095_v19, %s12770_s3  ;;  %v12097_v18 = vpop.eup %12096  ;;  %12116 = vpow2.f32 %v10648_v12 }
0x2863   : > { %7282 = vrot.lane.b32.xlu1 %v12097_v18, %s12770_s3  ;;  %v12099_v51 = vpop.eup %12098  ;;  %12118 = vpow2.f32 %v10653_v6 }
0x2864   : > { %v12101_v63 = vpop.eup %12100  ;;  %12120 = vpow2.f32 %v10650_v50 }
0x2865   : > { %v12103_v48 = vpop.eup %12102  ;;  %12122 = vpow2.f32 %v10655_v3 }
0x2866   : > { %7284 = vrot.lane.b32.xlu0 %v12099_v51, %s12770_s3  ;;  %v12105_v31 = vpop.eup %12104  ;;  %12124 = vpow2.f32 %v10654_v43 }
0x2867   : > { %7276 = vrot.lane.b32.xlu1 %v12101_v63, %s12770_s3  ;;  %v12107_v11 = vpop.eup %12106 }
0x2868   : > { %v12109_v44 = vpop.eup %12108 }
0x2869   : > { %v12111_v8 = vpop.eup %12110 }
0x286a   : > { %7286 = vrot.lane.b32.xlu0 %v12103_v48, %s12770_s3  ;;  %v12113_v1 = vpop.eup %12112  ;;  %v7205_v19 = vadd.f32 1.0, %v12111_v8 }
0x286b   : > { %7280 = vrot.lane.b32.xlu1 %v12105_v31, %s12770_s3  ;;  %v12115_v18 = vpop.eup %12114  ;;  %v7207_v26 = vadd.f32 1.0, %v12113_v1 }
0x286c   : > { %v12117_v62 = vpop.eup %12116  ;;  %12126 = vrcp.f32 %v7205_v19  ;;  %v7208_v52 = vadd.f32 1.0, %v12115_v18 }
0x286d   : > { %v12119_v10 = vpop.eup %12118  ;;  %12128 = vrcp.f32 %v7207_v26  ;;  %v7204_v51 = vadd.f32 1.0, %v12117_v62 }
0x286e   : > { %7290 = vrot.lane.b32.xlu0 %v12107_v11, %s12770_s3  ;;  %v12121_v42 = vpop.eup %12120  ;;  %12130 = vrcp.f32 %v7208_v52  ;;  %v7209_v13 = vadd.f32 1.0, %v12119_v10 }
0x286f   : > { %7288 = vrot.lane.b32.xlu1 %v12109_v44, %s12770_s3  ;;  %v12123_v63 = vpop.eup %12122  ;;  %12132 = vrcp.f32 %v7204_v51  ;;  %v7206_v41 = vadd.f32 1.0, %v12121_v42 }
0x2870   : > { %v12125_v48 = vpop.eup %12124  ;;  %12134 = vrcp.f32 %v7209_v13  ;;  %v7211_v20 = vadd.f32 1.0, %v12123_v63 }
0x2871   : > { %12136 = vrcp.f32 %v7206_v41  ;;  %v7210_v44 = vadd.f32 1.0, %v12125_v48 }
0x2872   : > { %12138 = vrcp.f32 %v7211_v20  ;;  %v7245_v20 = vrot.slane %v14319_v55, 7 }
0x2873   : > { %12140 = vrcp.f32 %v7210_v44 }
0x2876   : > { %v14395_v31 = vpop.eup %12126 }
0x2877   : > { %v14398_v38 = vpop.eup %12128  ;;  %v7261_v44 = vmul.f32 %v14395_v31, %v7245_v20 }
0x2878   : > { %v14402_v6 = vpop.eup %12130 }
0x2879   : > { %v14406_v8 = vpop.eup %12132 }
0x287a   : > { %v14410_v19 = vpop.eup %12134 }
0x287b   : > { %v14414_v62 = vpop.eup %12136 }
0x287c   : > { %v14418_v51 = vpop.eup %12138 }
0x287d   : > { %v14422_v63 = vpop.eup %12140 }
0x28d4   : > { %v7279_v11 = vpop.permute.xlu0 %7278 }
0x28d5   : > { %v7301_v32 = vmul.f32 %v14395_v31, %v7279_v11  ;;  %v7283_v47 = vpop.permute.xlu1 %7282  ;;  %v7247_v11 = vrot.slane %v14311_v56, 7  ;;  %v7249_v56 = vrot.slane %v14329_v59, 7 }
0x28d6   : > { %v7303_v12 = vmul.f32 %v14398_v38, %v7283_v47  ;;  %v7248_v47 = vrot.slane %v14322_v7, 7 }
0x28d7   : > { %7318 = vrot.lane.b32.xlu0 %v7301_v32, %s12770_s3 }
0x28d8   : > { %v7285_v50 = vpop.permute.xlu0 %7284  ;;  %7322 = vrot.lane.b32.xlu1 %v7303_v12, %s12770_s3  ;;  %v7263_v12 = vmul.f32 %v14398_v38, %v7247_v11  ;;  %v7264_v55 = vmul.f32 %v14402_v6, %v7248_v47  ;;  %v7250_v11 = vrot.slane %v14331_v35, 7 }
0x28d9   : > { %v7304_v3 = vmul.f32 %v14402_v6, %v7285_v50  ;;  %v7277_v43 = vpop.permute.xlu1 %7276 }
0x28da   : > { %v7300_v1 = vmul.f32 %v14406_v8, %v7277_v43  ;;  %v7244_v43 = vrot.slane %v14300_v17, 7  ;;  %v7265_v17 = vmul.f32 %v14410_v19, %v7249_v56 }
0x28db   : > { %7324 = vrot.lane.b32.xlu0 %v7304_v3, %s12770_s3 }
0x28dc   : > { %v7287_v18 = vpop.permute.xlu0 %7286  ;;  %7316 = vrot.lane.b32.xlu1 %v7300_v1, %s12770_s3  ;;  %v7260_v7 = vmul.f32 %v14406_v8, %v7244_v43 }
0x28dd   : > { %v7305_v26 = vmul.f32 %v14410_v19, %v7287_v18  ;;  %v7281_v52 = vpop.permute.xlu1 %7280 }
0x28de   : > { %v7302_v10 = vmul.f32 %v14414_v62, %v7281_v52 }
0x28df   : > { %7326 = vrot.lane.b32.xlu0 %v7305_v26, %s12770_s3 }
0x28e0   : > { %v7291_v42 = vpop.permute.xlu0 %7290  ;;  %7320 = vrot.lane.b32.xlu1 %v7302_v10, %s12770_s3  ;;  %v7246_v10 = vrot.slane %v14308_v53, 7 }
0x28e1   : > { %v7307_v13 = vmul.f32 %v14418_v51, %v7291_v42  ;;  %v7289_v41 = vpop.permute.xlu1 %7288 }
0x28e2   : > { %v7306_v48 = vmul.f32 %v14422_v63, %v7289_v41  ;;  %v7251_v41 = vrot.slane %v14336_v34, 7  ;;  %v7262_v59 = vmul.f32 %v14414_v62, %v7246_v10  ;;  %v7266_v34 = vmul.f32 %v14422_v63, %v7250_v11 }
0x28e3   : > { %7330 = vrot.lane.b32.xlu0 %v7307_v13, %s12770_s3 }
0x28e4   : > { %7328 = vrot.lane.b32.xlu1 %v7306_v48, %s12770_s3  ;;  %v7267_v53 = vmul.f32 %v14418_v51, %v7251_v41 }
0x2949   : > { %v7319_v32 = vpop.permute.xlu0 %7318 }
0x294a   : > { %v14432_v50 = vadd.f32 %v7319_v32, %v7261_v44  ;;  %v7323_v3 = vpop.permute.xlu1 %7322 }
0x294b   : > { %v14435_v1 = vadd.f32 %v7323_v3, %v7263_v12 }
0x294c   : > { %12142 = vtanh.f32 %v14432_v50 }
0x294d   : > { %v7325_v18 = vpop.permute.xlu0 %7324  ;;  %12144 = vtanh.f32 %v14435_v1 }
0x294e   : > { %v14442_v26 = vadd.f32 %v7325_v18, %v7264_v55  ;;  %v7317_v52 = vpop.permute.xlu1 %7316 }
0x294f   : > { %v14445_v42 = vadd.f32 %v7317_v52, %v7260_v7 }
0x2950   : > { %12146 = vtanh.f32 %v14442_v26 }
0x2951   : > { %v7327_v13 = vpop.permute.xlu0 %7326  ;;  %12148 = vtanh.f32 %v14445_v42 }
0x2952   : > { %v14452_v48 = vadd.f32 %v7327_v13, %v7265_v17  ;;  %v7321_v20 = vpop.permute.xlu1 %7320 }
0x2953   : > { %v14455_v44 = vadd.f32 %v7321_v20, %v7262_v59 }
0x2954   : > { %12150 = vtanh.f32 %v14452_v48 }
0x2955   : > { %v7331_v32 = vpop.permute.xlu0 %7330  ;;  %12152 = vtanh.f32 %v14455_v44 }
0x2956   : > { %v12143_v47 = vpop.eup %12142  ;;  %v14461_v12 = vadd.f32 %v7331_v32, %v7267_v53  ;;  %v7329_v3 = vpop.permute.xlu1 %7328 }
0x2957   : > { %7366 = vrot.lane.b32.xlu0 %v12143_v47, %s12770_s3  ;;  %v12145_v43 = vpop.eup %12144  ;;  %v14464_v55 = vadd.f32 %v7329_v3, %v7266_v34 }
0x2958   : > { %12154 = vtanh.f32 %v14461_v12  ;;  %7370 = vrot.lane.b32.xlu1 %v12145_v43, %s12770_s3 }
0x2959   : > { %12156 = vtanh.f32 %v14464_v55 }
0x295a   : > { %v12147_v35 = vpop.eup %12146 }
0x295b   : > { %7372 = vrot.lane.b32.xlu0 %v12147_v35, %s12770_s3  ;;  %v12149_v18 = vpop.eup %12148 }
0x295c   : > { %7364 = vrot.lane.b32.xlu1 %v12149_v18, %s12770_s3 }
0x295e   : > { %v12151_v56 = vpop.eup %12150 }
0x295f   : > { %7374 = vrot.lane.b32.xlu0 %v12151_v56, %s12770_s3  ;;  %v12153_v7 = vpop.eup %12152 }
0x2960   : > { %7368 = vrot.lane.b32.xlu1 %v12153_v7, %s12770_s3 }
0x2962   : > { %v12155_v52 = vpop.eup %12154 }
0x2963   : > { %7378 = vrot.lane.b32.xlu0 %v12155_v52, %s12770_s3  ;;  %v12157_v10 = vpop.eup %12156 }
0x2964   : > { %7376 = vrot.lane.b32.xlu1 %v12157_v10, %s12770_s3 }
0x29c9   : > { %v7367_v17 = vpop.permute.xlu0 %7366 }
0x29ca   : > { %v7389_v13 = vmul.f32 %v14395_v31, %v7367_v17  ;;  %v7371_v41 = vpop.permute.xlu1 %7370 }
0x29cb   : > { %v7391_v34 = vmul.f32 %v14398_v38, %v7371_v41 }
0x29cc   : > { %v7404_v20 = vrot.slane %v7389_v13, 7  ;;  %v7429_v31 = vrot.slane %v7389_v13, 2 }
0x29cd   : > { %v7373_v59 = vpop.permute.xlu0 %7372 }
0x29ce   : > { %v7365_v11 = vpop.permute.xlu1 %7364  ;;  %v7392_v43 = vmul.f32 %v14402_v6, %v7373_v59 }
0x29cf   : > { %v7388_v53 = vmul.f32 %v14406_v8, %v7365_v11  ;;  %v7408_v8 = vrot.slane %v7391_v34, 5 }
0x29d0   : > { %v7434_v41 = vrot.slane %v7392_v43, 7 }
0x29d1   : > { %v7375_v32 = vpop.permute.xlu0 %7374  ;;  %v7405_v47 = vsel %vm6349_vm12, %v7404_v20, %v7388_v53  ;;  %v7428_v3 = vrot.slane %v7388_v53, 3  ;;  %v7410_v20 = vrot.slane %v7392_v43, 4 }
0x29d2   : > { %v7369_v35 = vpop.permute.xlu1 %7368  ;;  %v7393_v18 = vmul.f32 %v14410_v19, %v7375_v32 }
0x29d3   : > { %v7390_v56 = vmul.f32 %v14414_v62, %v7369_v35  ;;  %v7430_v11 = vsel %vm6340_vm9, %v7429_v31, %v7428_v3 }
0x29d4   : > { %v7436_v21 = vrot.slane %v7393_v18, 6  ;;  %v7412_v59 = vrot.slane %v7393_v18, 3 }
0x29d5   : > { %v7379_v7 = vpop.permute.xlu0 %7378  ;;  %v7406_v52 = vrot.slane %v7390_v56, 6  ;;  %v7431_v10 = vrot.slane %v7390_v56, 1 }
0x29d6   : > { %v7395_v17 = vmul.f32 %v14418_v51, %v7379_v7  ;;  %v7377_v38 = vpop.permute.xlu1 %7376 }
0x29d7   : > { %v7432_v6 = vsel %vm6343_vm10, %v7431_v10, %v7430_v11  ;;  %v7394_v19 = vmul.f32 %v14422_v63, %v7377_v38  ;;  %v7407_v32 = vsel %vm6352_vm13, %v7406_v52, %v7405_v47 }
0x29d8   : > { %v7433_v62 = vsel %vm6346_vm11, %v7391_v34, %v7432_v6  ;;  %v7415_v13 = vrot.slane %v7395_v17, 1  ;;  %v7440_v53 = vrot.slane %v7395_v17, 4  ;;  %v7409_v3 = vsel %vm6355_vm14, %v7408_v8, %v7407_v32 }
0x29d9   : > { %v7413_v35 = vrot.slane %v7394_v19, 2  ;;  %v7438_v51 = vrot.slane %v7394_v19, 5  ;;  %v7435_v56 = vsel %vm6349_vm12, %v7434_v41, %v7433_v62  ;;  %v14492_v43 = vsel %vm15465_vm15, %v7410_v20, %v7409_v3 }
0x29da   : > { %v7437_v31 = vsel %vm6352_vm13, %v7436_v21, %v7435_v56 }
0x29db   : > { %v7439_v18 = vsel %vm6355_vm14, %v7438_v51, %v7437_v31  ;;  %v7414_v63 = vsel %vm6340_vm9, %v7413_v35, %v7412_v59 }
0x29dc   : > { %v7441_v34 = vsel %vm15465_vm15, %v7440_v53, %v7439_v18  ;;  %v14498_v7 = vsel %vm6343_vm10, %v7415_v13, %v7414_v63 }
0x29dd   : > { %7442 = vrot.lane.b32.xlu1 %v7441_v34, %s12771_s11 }
0x2a4f   : > { %v7443_v47 = vpop.permute.xlu1 %7442 }
0x2a50   : > { %11244 = vmatmul.mubr.msk.f32.vlgmr.msra.gmra.mrb[24].mxu0 %vm6042_vm0, %v7443_v47 }
0x2a51   : > { %11472 = vmatpush3.bf16.msra.mxu0 %v13921_v36  ;;  %11254 = vmatprep.mubr.msk.f32.mxu0 %vm12767_vm8, %v15453_v25 }
0x2a52   : > { %11473 = vmatprep.subr.bf16.mxu0 %v15451_v37 }
0x2a55   : > { %11475 = vmatpush3.bf16.msra.mxu0 %v13932_v40 }
0x2a56   : > { %11476 = vmatprep.subr.bf16.mxu0 %v15451_v37 }
0x2b23   : > { %v7512_v21 = vpop.f32.mrb[24].mxu0 }
0x2b24   : > { %v7517_v52 = vrot.slane %v7512_v21, 4  ;;  %v11245_v10 = vpop.f32.mrb[25].mxu0  ;;  %v7519_v8 = vrot.slane %v7512_v21, 6  ;;  %v7521_v11 = vrot.slane %v7512_v21, 1  ;;  %v7518_v38 = vrot.slane %v7512_v21, 5 }
0x2b25   : > { %v7536_v41 = vadd.f32 %v7512_v21, %v14006_v29  ;;  %v7522_v59 = vrot.slane %v7512_v21, 2  ;;  %v7520_v62 = vrot.slane %v7512_v21, 7  ;;  %v7523_v32 = vrot.slane %v7512_v21, 3 }
0x2b26   : > { %v7532_v17 = vadd.f32 %v7517_v52, %v13994_v61  ;;  %v7534_v20 = vadd.f32 %v7519_v8, %v14000_v2  ;;  %v7537_v19 = vadd.f32 %v7521_v11, %v14003_v45  ;;  %v7533_v13 = vadd.f32 %v7518_v38, %v13992_v15 }
0x2b27   : > { %v7538_v53 = vadd.f32 %v7522_v59, %v14012_v9  ;;  %v7535_v35 = vadd.f32 %v7520_v62, %v13997_v54  ;;  %v7539_v56 = vadd.f32 %v7523_v32, %v14009_v39  ;;  %v10661_v10 = vmul.f32 -1.442695, %v7536_v41 }
0x2b28   : > { %12158 = vtanh.f32 %v7532_v17  ;;  %v10657_v21 = vmul.f32 -1.442695, %v7532_v17  ;;  %v10659_v52 = vmul.f32 -1.442695, %v7534_v20  ;;  %v10662_v11 = vmul.f32 -1.442695, %v7537_v19 }
0x2b29   : > { %12160 = vtanh.f32 %v7534_v20  ;;  %v10658_v38 = vmul.f32 -1.442695, %v7533_v13  ;;  %v10663_v59 = vmul.f32 -1.442695, %v7538_v53  ;;  %v10660_v62 = vmul.f32 -1.442695, %v7535_v35 }
0x2b2a   : > { %12162 = vtanh.f32 %v7536_v41 }
0x2b2b   : > { %12164 = vtanh.f32 %v7537_v19 }
0x2b2c   : > { %12166 = vtanh.f32 %v7533_v13 }
0x2b2d   : > { %12168 = vtanh.f32 %v7538_v53 }
0x2b2e   : > { %12170 = vtanh.f32 %v7535_v35 }
0x2b2f   : > { %12172 = vtanh.f32 %v7539_v56 }
0x2b30   : > { %12174 = vpow2.f32 %v10657_v21 }
0x2b31   : > { %12176 = vpow2.f32 %v10659_v52 }
0x2b32   : > { %v12159_v6 = vpop.eup %12158  ;;  %12178 = vpow2.f32 %v10661_v10 }
0x2b33   : > { %7636 = vrot.lane.b32.xlu0 %v12159_v6, %s12770_s3  ;;  %v12161_v51 = vpop.eup %12160  ;;  %12180 = vpow2.f32 %v10662_v11 }
0x2b34   : > { %v12163_v3 = vpop.eup %12162  ;;  %12182 = vpow2.f32 %v10658_v38 }
0x2b35   : > { %7644 = vrot.lane.b32.xlu1 %v12163_v3, %s12770_s3  ;;  %v12165_v31 = vpop.eup %12164 }
0x2b36   : > { %v12167_v18 = vpop.eup %12166 }
0x2b37   : > { %7640 = vrot.lane.b32.xlu0 %v12161_v51, %s12770_s3  ;;  %v12169_v63 = vpop.eup %12168  ;;  %v10664_v51 = vmul.f32 -1.442695, %v7539_v56 }
0x2b38   : > { %v12171_v34 = vpop.eup %12170 }
0x2b39   : > { %7638 = vrot.lane.b32.xlu1 %v12167_v18, %s12770_s3  ;;  %v12173_v47 = vpop.eup %12172 }
0x2b3a   : > { %v12175_v8 = vpop.eup %12174 }
0x2b3b   : > { %7646 = vrot.lane.b32.xlu0 %v12165_v31, %s12770_s3  ;;  %v7564_v6 = vadd.f32 1.0, %v12175_v8  ;;  %v12177_v32 = vpop.eup %12176 }
0x2b3c   : > { %v12179_v3 = vpop.eup %12178  ;;  %v7566_v17 = vadd.f32 1.0, %v12177_v32 }
0x2b3d   : > { %7642 = vrot.lane.b32.xlu1 %v12171_v34, %s12770_s3  ;;  %12184 = vrcp.f32 %v7564_v6  ;;  %v12181_v31 = vpop.eup %12180  ;;  %v7568_v20 = vadd.f32 1.0, %v12179_v3 }
0x2b3e   : > { %12186 = vpow2.f32 %v10663_v59  ;;  %v12183_v41 = vpop.eup %12182  ;;  %v7569_v13 = vadd.f32 1.0, %v12181_v31 }
0x2b3f   : > { %7648 = vrot.lane.b32.xlu0 %v12169_v63, %s12770_s3  ;;  %12188 = vpow2.f32 %v10660_v62  ;;  %v7565_v35 = vadd.f32 1.0, %v12183_v41 }
0x2b40   : > { %12190 = vpow2.f32 %v10664_v51 }
0x2b41   : > { %7650 = vrot.lane.b32.xlu1 %v12173_v47, %s12770_s3  ;;  %12192 = vrcp.f32 %v7566_v17 }
0x2b42   : > { %12194 = vrcp.f32 %v7568_v20 }
0x2b43   : > { %12196 = vrcp.f32 %v7569_v13 }
0x2b44   : > { %12198 = vrcp.f32 %v7565_v35 }
0x2b47   : > { %v14524_v18 = vpop.eup %12184 }
0x2b48   : > { %v12187_v63 = vpop.eup %12186 }
0x2b49   : > { %v12189_v34 = vpop.eup %12188  ;;  %v7570_v56 = vadd.f32 1.0, %v12187_v63 }
0x2b4a   : > { %v7567_v47 = vadd.f32 1.0, %v12189_v34  ;;  %v12191_v21 = vpop.eup %12190 }
0x2b4b   : > { %12200 = vrcp.f32 %v7570_v56  ;;  %v14528_v52 = vpop.eup %12192  ;;  %v7571_v8 = vadd.f32 1.0, %v12191_v21 }
0x2b4c   : > { %12202 = vrcp.f32 %v7567_v47  ;;  %v14531_v38 = vpop.eup %12194  ;;  %v7604_v47 = vrot.slane %v14445_v42, 7 }
0x2b4d   : > { %v14535_v62 = vpop.eup %12196  ;;  %12204 = vrcp.f32 %v7571_v8 }
0x2b4e   : > { %v14539_v3 = vpop.eup %12198  ;;  %v7620_v21 = vmul.f32 %v14524_v18, %v7604_v47 }
0x2b55   : > { %v14543_v20 = vpop.eup %12200 }
0x2b56   : > { %v14547_v13 = vpop.eup %12202 }
0x2b57   : > { %v14552_v35 = vpop.eup %12204 }
0x2ba5   : > { %v7637_v19 = vpop.permute.xlu0 %7636 }
0x2ba6   : > { %v7660_v53 = vmul.f32 %v14524_v18, %v7637_v19 }
0x2ba7   : > { %v7645_v6 = vpop.permute.xlu1 %7644 }
0x2ba8   : > { %7676 = vrot.lane.b32.xlu0 %v7660_v53, %s12770_s3  ;;  %v7664_v59 = vmul.f32 %v14531_v38, %v7645_v6  ;;  %v7608_v6 = vrot.slane %v14442_v26, 7 }
0x2ba9   : > { %v7641_v10 = vpop.permute.xlu0 %7640 }
0x2baa   : > { %v7662_v11 = vmul.f32 %v14528_v52, %v7641_v10  ;;  %7684 = vrot.lane.b32.xlu1 %v7664_v59, %s12770_s3 }
0x2bab   : > { %v7639_v17 = vpop.permute.xlu1 %7638 }
0x2bac   : > { %7680 = vrot.lane.b32.xlu0 %v7662_v11, %s12770_s3  ;;  %v7661_v31 = vmul.f32 %v14539_v3, %v7639_v17  ;;  %v7606_v11 = vrot.slane %v14455_v44, 7  ;;  %v7624_v17 = vmul.f32 %v14531_v38, %v7608_v6 }
0x2bad   : > { %v7647_v32 = vpop.permute.xlu0 %7646 }
0x2bae   : > { %v7665_v51 = vmul.f32 %v14535_v62, %v7647_v32  ;;  %7678 = vrot.lane.b32.xlu1 %v7661_v31, %s12770_s3  ;;  %v7622_v59 = vmul.f32 %v14528_v52, %v7606_v11 }
0x2baf   : > { %v7643_v63 = vpop.permute.xlu1 %7642 }
0x2bb0   : > { %7686 = vrot.lane.b32.xlu0 %v7665_v51, %s12770_s3  ;;  %v7663_v53 = vmul.f32 %v14547_v13, %v7643_v63  ;;  %v7609_v51 = vrot.slane %v14452_v48, 7 }
0x2bb1   : > { %v7649_v41 = vpop.permute.xlu0 %7648 }
0x2bb2   : > { %v7666_v19 = vmul.f32 %v14543_v20, %v7649_v41  ;;  %7682 = vrot.lane.b32.xlu1 %v7663_v53, %s12770_s3  ;;  %v7625_v44 = vmul.f32 %v14535_v62, %v7609_v51  ;;  %v7610_v53 = vrot.slane %v14464_v55, 7 }
0x2bb3   : > { %v7651_v34 = vpop.permute.xlu1 %7650 }
0x2bb4   : > { %7688 = vrot.lane.b32.xlu0 %v7666_v19, %s12770_s3  ;;  %v7667_v56 = vmul.f32 %v14552_v35, %v7651_v34  ;;  %v7605_v19 = vrot.slane %v14432_v50, 7  ;;  %v7607_v50 = vrot.slane %v14435_v1, 7 }
0x2bb6   : > { %7690 = vrot.lane.b32.xlu1 %v7667_v56, %s12770_s3  ;;  %v7621_v48 = vmul.f32 %v14539_v3, %v7605_v19  ;;  %v7623_v55 = vmul.f32 %v14547_v13, %v7607_v50 }
0x2c1a   : > { %v7677_v10 = vpop.permute.xlu0 %7676 }
0x2c1b   : > { %v14558_v8 = vadd.f32 %v7677_v10, %v7620_v21  ;;  %v7626_v21 = vmul.f32 %v14543_v20, %v7610_v53 }
0x2c1c   : > { %v7685_v42 = vpop.permute.xlu1 %7684 }
0x2c1d   : > { %12206 = vtanh.f32 %v14558_v8  ;;  %v14569_v63 = vadd.f32 %v7685_v42, %v7624_v17 }
0x2c1e   : > { %v7681_v32 = vpop.permute.xlu0 %7680 }
0x2c1f   : > { %v14566_v31 = vadd.f32 %v7681_v32, %v7622_v59  ;;  %v7611_v59 = vrot.slane %v14461_v12, 7 }
0x2c20   : > { %v7679_v56 = vpop.permute.xlu1 %7678 }
0x2c21   : > { %12208 = vtanh.f32 %v14566_v31  ;;  %v14580_v47 = vadd.f32 %v7679_v56, %v7621_v48  ;;  %v7627_v51 = vmul.f32 %v14552_v35, %v7611_v59 }
0x2c22   : > { %v7687_v26 = vpop.permute.xlu0 %7686  ;;  %12210 = vtanh.f32 %v14569_v63 }
0x2c23   : > { %v14577_v34 = vadd.f32 %v7687_v26, %v7625_v44 }
0x2c24   : > { %v7683_v6 = vpop.permute.xlu1 %7682 }
0x2c25   : > { %12212 = vtanh.f32 %v14577_v34  ;;  %v14589_v32 = vadd.f32 %v7683_v6, %v7623_v55 }
0x2c26   : > { %v7689_v10 = vpop.permute.xlu0 %7688  ;;  %12214 = vtanh.f32 %v14580_v47 }
0x2c27   : > { %v12207_v41 = vpop.eup %12206  ;;  %v14586_v11 = vadd.f32 %v7689_v10, %v7626_v21 }
0x2c28   : > { %7724 = vrot.lane.b32.xlu0 %v12207_v41, %s12770_s3  ;;  %v7691_v17 = vpop.permute.xlu1 %7690 }
0x2c29   : > { %12216 = vtanh.f32 %v14586_v11  ;;  %v14595_v41 = vadd.f32 %v7691_v17, %v7627_v51 }
0x2c2a   : > { %12218 = vtanh.f32 %v14589_v32 }
0x2c2b   : > { %v12209_v1 = vpop.eup %12208  ;;  %12220 = vtanh.f32 %v14595_v41 }
0x2c2c   : > { %7728 = vrot.lane.b32.xlu0 %v12209_v1, %s12770_s3  ;;  %v12211_v42 = vpop.eup %12210 }
0x2c2d   : > { %7732 = vrot.lane.b32.xlu1 %v12211_v42, %s12770_s3 }
0x2c2f   : > { %v12213_v19 = vpop.eup %12212 }
0x2c30   : > { %7734 = vrot.lane.b32.xlu0 %v12213_v19, %s12770_s3  ;;  %v12215_v12 = vpop.eup %12214 }
0x2c31   : > { %7726 = vrot.lane.b32.xlu1 %v12215_v12, %s12770_s3 }
0x2c33   : > { %v12217_v44 = vpop.eup %12216 }
0x2c34   : > { %7736 = vrot.lane.b32.xlu0 %v12217_v44, %s12770_s3  ;;  %v12219_v26 = vpop.eup %12218 }
0x2c35   : > { %7730 = vrot.lane.b32.xlu1 %v12219_v26, %s12770_s3  ;;  %v12221_v53 = vpop.eup %12220 }
0x2c39   : > { %7738 = vrot.lane.b32.xlu1 %v12221_v53, %s12770_s3 }
0x2c9a   : > { %v7725_v48 = vpop.permute.xlu0 %7724 }
0x2c9b   : > { %v7748_v10 = vmul.f32 %v14524_v18, %v7725_v48 }
0x2c9d   : > { %v7788_v19 = vrot.slane %v7748_v10, 4 }
0x2c9e   : > { %v7729_v56 = vpop.permute.xlu0 %7728 }
0x2c9f   : > { %v7733_v50 = vpop.permute.xlu1 %7732  ;;  %v7750_v55 = vmul.f32 %v14528_v52, %v7729_v56 }
0x2ca0   : > { %v7752_v21 = vmul.f32 %v14531_v38, %v7733_v50 }
0x2ca1   : > { %v7766_v12 = vrot.slane %v7750_v55, 6  ;;  %v7791_v44 = vrot.slane %v7750_v55, 2 }
0x2ca2   : > { %v7735_v6 = vpop.permute.xlu0 %7734  ;;  %v7770_v51 = vrot.slane %v7752_v21, 4 }
0x2ca3   : > { %v7753_v59 = vmul.f32 %v14535_v62, %v7735_v6  ;;  %v7727_v1 = vpop.permute.xlu1 %7726 }
0x2ca4   : > { %v7749_v17 = vmul.f32 %v14539_v3, %v7727_v1 }
0x2ca5   : > { %v7771_v42 = vrot.slane %v7753_v59, 3  ;;  %v7796_v3 = vrot.slane %v7753_v59, 7 }
0x2ca6   : > { %v7737_v26 = vpop.permute.xlu0 %7736  ;;  %v7764_v53 = vrot.slane %v7749_v17, 7  ;;  %v7789_v37 = vrot.slane %v7749_v17, 3 }
0x2ca7   : > { %v7754_v38 = vmul.f32 %v14543_v20, %v7737_v26  ;;  %v7772_v18 = vsel %vm6340_vm9, %v7771_v42, %v7770_v51  ;;  %v7731_v48 = vpop.permute.xlu1 %7730 }
0x2ca8   : > { %v7790_v52 = vsel %vm6340_vm9, %v7789_v37, %v7788_v19  ;;  %v7751_v62 = vmul.f32 %v14547_v13, %v7731_v48  ;;  %v7765_v6 = vsel %vm6352_vm13, %v7764_v53, %v7748_v10 }
0x2ca9   : > { %v7773_v56 = vrot.slane %v7754_v38, 2  ;;  %v7792_v50 = vsel %vm6343_vm10, %v7791_v44, %v7790_v52  ;;  %v7767_v25 = vsel %vm6355_vm14, %v7766_v12, %v7765_v6  ;;  %v7798_v26 = vrot.slane %v7754_v38, 6 }
0x2caa   : > { %v7768_v1 = vrot.slane %v7751_v62, 5  ;;  %v7793_v55 = vrot.slane %v7751_v62, 1 }
0x2cab   : > { %v7774_v17 = vsel %vm6343_vm10, %v7773_v56, %v7772_v18  ;;  %v7739_v20 = vpop.permute.xlu1 %7738 }
0x2cac   : > { %v7794_v51 = vsel %vm6346_vm11, %v7793_v55, %v7792_v50  ;;  %v7755_v37 = vmul.f32 %v14552_v35, %v7739_v20  ;;  %v14620_v13 = vsel %vm15465_vm15, %v7768_v1, %v7767_v25  ;;  %v15515_v25 = vmov 0.0  }
0x2cad   : > { %v7795_v42 = vsel %vm6349_vm12, %v7752_v21, %v7794_v51  ;;  %v15516_v35 = vmov 0.0|0.0  }
0x2cae   : > { %v7775_v59 = vrot.slane %v7755_v37, 1  ;;  %v7800_v19 = vrot.slane %v7755_v37, 5  ;;  %v7797_v10 = vsel %vm6352_vm13, %v7796_v3, %v7795_v42 }
0x2caf   : > { %v7799_v44 = vsel %vm6355_vm14, %v7798_v26, %v7797_v10 }
0x2cb0   : > { %v7801_v12 = vsel %vm15465_vm15, %v7800_v19, %v7799_v44  ;;  %v14627_v53 = vsel %vm6346_vm11, %v7775_v59, %v7774_v17 }
0x2cb1   : > { %7802 = vrot.lane.b32.xlu0 %v7801_v12, %s12771_s11 }
0x2d23   : > { %v7803_v38 = vpop.permute.xlu0 %7802 }
0x2d24   : > { %11255 = vmatmul.mubr.msk.f32.vlgmr.msra.gmra.mrb[26].mxu0 %vm6042_vm0, %v7803_v38 }
0x2d25   : > { %11478 = vmatpush3.bf16.msra.mxu0 %v13921_v36  ;;  %11265 = vmatprep.mubr.msk.f32.mxu0 %vm12767_vm8, %v15515_v25 }
0x2d26   : > { %11479 = vmatprep.subr.bf16.mxu0 %v15516_v35 }
0x2d29   : > { %11481 = vmatpush3.bf16.msra.mxu0 %v13932_v40 }
0x2d2a   : > { %11482 = vmatprep.subr.bf16.mxu0 %v15516_v35 }
0x2df7   : > { %v7872_v21 = vpop.f32.mrb[26].mxu0 }
0x2df8   : > { %v7877_v18 = vrot.slane %v7872_v21, 3  ;;  %v11256_v48 = vpop.f32.mrb[27].mxu0  ;;  %v7878_v62 = vrot.slane %v7872_v21, 4  ;;  %v7879_v56 = vrot.slane %v7872_v21, 5  ;;  %v7880_v50 = vrot.slane %v7872_v21, 6 }
0x2df9   : > { %v7881_v6 = vrot.slane %v7872_v21, 7  ;;  %v7882_v55 = vrot.slane %v7872_v21, 1  ;;  %v7883_v51 = vrot.slane %v7872_v21, 2  ;;  %v7897_v42 = vadd.f32 %v7872_v21, %v14003_v45 }
0x2dfa   : > { %v7892_v52 = vadd.f32 %v7877_v18, %v13994_v61  ;;  %v7893_v3 = vadd.f32 %v7878_v62, %v13992_v15  ;;  %v7894_v1 = vadd.f32 %v7879_v56, %v14000_v2  ;;  %v7895_v17 = vadd.f32 %v7880_v50, %v13997_v54 }
0x2dfb   : > { %v7896_v26 = vadd.f32 %v7881_v6, %v14006_v29  ;;  %v7898_v37 = vadd.f32 %v7882_v55, %v14012_v9  ;;  %v7899_v59 = vadd.f32 %v7883_v51, %v14009_v39 }
0x2dfc   : > { %12222 = vtanh.f32 %v7892_v52  ;;  %v10666_v48 = vmul.f32 -1.442695, %v7892_v52  ;;  %v10667_v62 = vmul.f32 -1.442695, %v7893_v3  ;;  %v10668_v56 = vmul.f32 -1.442695, %v7894_v1 }
0x2dfd   : > { %12224 = vtanh.f32 %v7893_v3  ;;  %v10669_v50 = vmul.f32 -1.442695, %v7895_v17  ;;  %v10670_v55 = vmul.f32 -1.442695, %v7896_v26 }
0x2dfe   : > { %12226 = vtanh.f32 %v7894_v1 }
0x2dff   : > { %12228 = vtanh.f32 %v7895_v17 }
0x2e00   : > { %12230 = vtanh.f32 %v7896_v26 }
0x2e01   : > { %12232 = vtanh.f32 %v7898_v37 }
0x2e02   : > { %12234 = vtanh.f32 %v7897_v42 }
0x2e03   : > { %12236 = vtanh.f32 %v7899_v59 }
0x2e04   : > { %12238 = vpow2.f32 %v10666_v48 }
0x2e05   : > { %12240 = vpow2.f32 %v10667_v62 }
0x2e06   : > { %v12223_v20 = vpop.eup %12222  ;;  %12242 = vpow2.f32 %v10668_v56 }
0x2e07   : > { %7996 = vrot.lane.b32.xlu1 %v12223_v20, %s12770_s3  ;;  %v12225_v19 = vpop.eup %12224  ;;  %v10672_v20 = vmul.f32 -1.442695, %v7898_v37  ;;  %12244 = vpow2.f32 %v10669_v50 }
0x2e08   : > { %v12227_v10 = vpop.eup %12226  ;;  %7998 = vrot.lane.b32.xlu0 %v12225_v19, %s12770_s3  ;;  %12246 = vpow2.f32 %v10670_v55  ;;  %v10671_v19 = vmul.f32 -1.442695, %v7897_v42 }
0x2e09   : > { %v12229_v44 = vpop.eup %12228  ;;  %12248 = vpow2.f32 %v10672_v20 }
0x2e0a   : > { %v12231_v12 = vpop.eup %12230 }
0x2e0b   : > { %8000 = vrot.lane.b32.xlu1 %v12227_v10, %s12770_s3  ;;  %v12233_v38 = vpop.eup %12232  ;;  %v10673_v10 = vmul.f32 -1.442695, %v7899_v59 }
0x2e0c   : > { %8002 = vrot.lane.b32.xlu0 %v12229_v44, %s12770_s3  ;;  %v12235_v21 = vpop.eup %12234 }
0x2e0d   : > { %v12237_v18 = vpop.eup %12236 }
0x2e0e   : > { %v12239_v6 = vpop.eup %12238 }
0x2e0f   : > { %8004 = vrot.lane.b32.xlu1 %v12231_v12, %s12770_s3  ;;  %v7924_v51 = vadd.f32 1.0, %v12239_v6  ;;  %v12241_v44 = vpop.eup %12240 }
0x2e10   : > { %8008 = vrot.lane.b32.xlu0 %v12233_v38, %s12770_s3  ;;  %v12243_v12 = vpop.eup %12242  ;;  %v7925_v52 = vadd.f32 1.0, %v12241_v44 }
0x2e11   : > { %12250 = vrcp.f32 %v7924_v51  ;;  %v12245_v3 = vpop.eup %12244  ;;  %v7926_v1 = vadd.f32 1.0, %v12243_v12 }
0x2e12   : > { %12252 = vpow2.f32 %v10671_v19  ;;  %v12247_v38 = vpop.eup %12246 }
0x2e13   : > { %8006 = vrot.lane.b32.xlu1 %v12235_v21, %s12770_s3  ;;  %12254 = vpow2.f32 %v10673_v10  ;;  %v12249_v17 = vpop.eup %12248  ;;  %v7927_v21 = vadd.f32 1.0, %v12245_v3 }
0x2e14   : > { %8010 = vrot.lane.b32.xlu0 %v12237_v18, %s12770_s3  ;;  %12256 = vrcp.f32 %v7925_v52  ;;  %v7928_v18 = vadd.f32 1.0, %v12247_v38  ;;  %v7930_v48 = vadd.f32 1.0, %v12249_v17 }
0x2e15   : > { %12258 = vrcp.f32 %v7926_v1 }
0x2e16   : > { %12260 = vrcp.f32 %v7927_v21 }
0x2e17   : > { %12262 = vrcp.f32 %v7928_v18 }
0x2e18   : > { %12264 = vrcp.f32 %v7930_v48 }
0x2e1b   : > { %v14653_v26 = vpop.eup %12250 }
0x2e1c   : > { %v12253_v42 = vpop.eup %12252 }
0x2e1d   : > { %v12255_v62 = vpop.eup %12254  ;;  %v7929_v56 = vadd.f32 1.0, %v12253_v42 }
0x2e1e   : > { %v7931_v50 = vadd.f32 1.0, %v12255_v62  ;;  %v14657_v6 = vpop.eup %12256 }
0x2e1f   : > { %12266 = vrcp.f32 %v7929_v56  ;;  %v14659_v20 = vpop.eup %12258 }
0x2e20   : > { %12268 = vrcp.f32 %v7931_v50  ;;  %v14664_v44 = vpop.eup %12260  ;;  %v7964_v50 = vrot.slane %v14558_v8, 7 }
0x2e21   : > { %v14667_v52 = vpop.eup %12262 }
0x2e22   : > { %v14672_v17 = vpop.eup %12264 }
0x2e79   : > { %v7997_v37 = vpop.permute.xlu1 %7996 }
0x2e7a   : > { %v8020_v59 = vmul.f32 %v14653_v26, %v7997_v37  ;;  %v7999_v55 = vpop.permute.xlu0 %7998  ;;  %v14675_v37 = vpop.eup %12266 }
0x2e7b   : > { %v8021_v51 = vmul.f32 %v14657_v6, %v7999_v55  ;;  %v14680_v48 = vpop.eup %12268  ;;  %v7980_v55 = vmul.f32 %v14653_v26, %v7964_v50  ;;  %v7970_v50 = vrot.slane %v14586_v11, 7  ;;  %v7971_v11 = vrot.slane %v14595_v41, 7 }
0x2e7c   : > { %8036 = vrot.lane.b32.xlu1 %v8020_v59, %s12770_s3 }
0x2e7d   : > { %v8001_v19 = vpop.permute.xlu1 %8000  ;;  %8038 = vrot.lane.b32.xlu0 %v8021_v51, %s12770_s3 }
0x2e7e   : > { %v8022_v10 = vmul.f32 %v14659_v20, %v8001_v19  ;;  %v8003_v12 = vpop.permute.xlu0 %8002 }
0x2e7f   : > { %v8023_v3 = vmul.f32 %v14664_v44, %v8003_v12  ;;  %v7966_v12 = vrot.slane %v14566_v31, 7 }
0x2e80   : > { %8040 = vrot.lane.b32.xlu1 %v8022_v10, %s12770_s3  ;;  %v7965_v10 = vrot.slane %v14580_v47, 7 }
0x2e81   : > { %v8005_v1 = vpop.permute.xlu1 %8004  ;;  %8042 = vrot.lane.b32.xlu0 %v8023_v3, %s12770_s3 }
0x2e82   : > { %v8024_v38 = vmul.f32 %v14667_v52, %v8005_v1  ;;  %v8009_v21 = vpop.permute.xlu0 %8008  ;;  %v7981_v3 = vmul.f32 %v14657_v6, %v7965_v10  ;;  %v7986_v10 = vmul.f32 %v14672_v17, %v7970_v50 }
0x2e83   : > { %v8026_v18 = vmul.f32 %v14672_v17, %v8009_v21  ;;  %v7967_v21 = vrot.slane %v14589_v32, 7 }
0x2e84   : > { %8044 = vrot.lane.b32.xlu1 %v8024_v38, %s12770_s3  ;;  %v7982_v38 = vmul.f32 %v14659_v20, %v7966_v12 }
0x2e85   : > { %v8007_v42 = vpop.permute.xlu1 %8006  ;;  %8048 = vrot.lane.b32.xlu0 %v8026_v18, %s12770_s3  ;;  %v7983_v47 = vmul.f32 %v14664_v44, %v7967_v21 }
0x2e86   : > { %v8025_v59 = vmul.f32 %v14675_v37, %v8007_v42  ;;  %v8011_v62 = vpop.permute.xlu0 %8010  ;;  %v7968_v42 = vrot.slane %v14569_v63, 7  ;;  %v7969_v63 = vrot.slane %v14577_v34, 7  ;;  %v7987_v34 = vmul.f32 %v14680_v48, %v7971_v11 }
0x2e87   : > { %v8027_v56 = vmul.f32 %v14680_v48, %v8011_v62 }
0x2e88   : > { %8046 = vrot.lane.b32.xlu1 %v8025_v59, %s12770_s3 }
0x2e89   : > { %8050 = vrot.lane.b32.xlu0 %v8027_v56, %s12770_s3  ;;  %v7984_v56 = vmul.f32 %v14667_v52, %v7968_v42 }
0x2eee   : > { %v8037_v51 = vpop.permute.xlu1 %8036 }
0x2eef   : > { %v14687_v19 = vadd.f32 %v8037_v51, %v7980_v55  ;;  %v8039_v1 = vpop.permute.xlu0 %8038 }
0x2ef0   : > { %v14695_v18 = vadd.f32 %v8039_v1, %v7981_v3  ;;  %v7985_v3 = vmul.f32 %v14675_v37, %v7969_v63 }
0x2ef1   : > { %12270 = vtanh.f32 %v14687_v19 }
0x2ef2   : > { %v8041_v8 = vpop.permute.xlu1 %8040  ;;  %12272 = vtanh.f32 %v14695_v18 }
0x2ef3   : > { %v14698_v59 = vadd.f32 %v8041_v8, %v7982_v38  ;;  %v8043_v31 = vpop.permute.xlu0 %8042 }
0x2ef4   : > { %v14705_v32 = vadd.f32 %v8043_v31, %v7983_v47 }
0x2ef5   : > { %12274 = vtanh.f32 %v14698_v59 }
0x2ef6   : > { %v8045_v55 = vpop.permute.xlu1 %8044  ;;  %12276 = vtanh.f32 %v14705_v32 }
0x2ef7   : > { %v14709_v51 = vadd.f32 %v8045_v55, %v7984_v56  ;;  %v8049_v12 = vpop.permute.xlu0 %8048 }
0x2ef8   : > { %v14716_v1 = vadd.f32 %v8049_v12, %v7986_v10 }
0x2ef9   : > { %12278 = vtanh.f32 %v14709_v51 }
0x2efa   : > { %v8047_v38 = vpop.permute.xlu1 %8046  ;;  %12280 = vtanh.f32 %v14716_v1 }
0x2efb   : > { %v12271_v62 = vpop.eup %12270  ;;  %v14718_v21 = vadd.f32 %v8047_v38, %v7985_v3  ;;  %v8051_v8 = vpop.permute.xlu0 %8050 }
0x2efc   : > { %8084 = vrot.lane.b32.xlu1 %v12271_v62, %s12770_s3  ;;  %v12273_v42 = vpop.eup %12272  ;;  %v14723_v47 = vadd.f32 %v8051_v8, %v7987_v34 }
0x2efd   : > { %12282 = vtanh.f32 %v14718_v21  ;;  %8086 = vrot.lane.b32.xlu0 %v12273_v42, %s12770_s3 }
0x2efe   : > { %12284 = vtanh.f32 %v14723_v47 }
0x2eff   : > { %v12275_v62 = vpop.eup %12274 }
0x2f00   : > { %8088 = vrot.lane.b32.xlu1 %v12275_v62, %s12770_s3  ;;  %v12277_v41 = vpop.eup %12276 }
0x2f01   : > { %8090 = vrot.lane.b32.xlu0 %v12277_v41, %s12770_s3 }
0x2f03   : > { %v12279_v31 = vpop.eup %12278 }
0x2f04   : > { %8092 = vrot.lane.b32.xlu1 %v12279_v31, %s12770_s3  ;;  %v12281_v56 = vpop.eup %12280 }
0x2f05   : > { %8096 = vrot.lane.b32.xlu0 %v12281_v56, %s12770_s3 }
0x2f07   : > { %v12283_v50 = vpop.eup %12282 }
0x2f08   : > { %8094 = vrot.lane.b32.xlu1 %v12283_v50, %s12770_s3  ;;  %v12285_v55 = vpop.eup %12284 }
0x2f09   : > { %8098 = vrot.lane.b32.xlu0 %v12285_v55, %s12770_s3 }
0x2f6e   : > { %v8085_v63 = vpop.permute.xlu1 %8084 }
0x2f6f   : > { %v8108_v10 = vmul.f32 %v14653_v26, %v8085_v63  ;;  %v8087_v12 = vpop.permute.xlu0 %8086 }
0x2f70   : > { %v8109_v3 = vmul.f32 %v14657_v6, %v8087_v12 }
0x2f71   : > { %v8148_v11 = vrot.slane %v8108_v10, 5 }
0x2f72   : > { %v8089_v38 = vpop.permute.xlu1 %8088  ;;  %v8124_v8 = vrot.slane %v8109_v3, 7  ;;  %v8149_v42 = vrot.slane %v8109_v3, 4 }
0x2f73   : > { %v8110_v34 = vmul.f32 %v14659_v20, %v8089_v38  ;;  %v8091_v62 = vpop.permute.xlu0 %8090 }
0x2f74   : > { %v8150_v56 = vsel %vm6340_vm9, %v8149_v42, %v8148_v11  ;;  %v8111_v50 = vmul.f32 %v14664_v44, %v8091_v62  ;;  %v8125_v27 = vsel %vm6355_vm14, %v8124_v8, %v8108_v10 }
0x2f75   : > { %v8126_v41 = vrot.slane %v8110_v34, 6  ;;  %v8151_v31 = vrot.slane %v8110_v34, 3 }
0x2f76   : > { %v8093_v55 = vpop.permute.xlu1 %8092  ;;  %v8153_v20 = vrot.slane %v8111_v50, 2  ;;  %v8128_v12 = vrot.slane %v8111_v50, 5 }
0x2f77   : > { %v8152_v26 = vsel %vm6343_vm10, %v8151_v31, %v8150_v56  ;;  %v8112_v6 = vmul.f32 %v14667_v52, %v8093_v55  ;;  %v14742_v63 = vsel %vm15465_vm15, %v8126_v41, %v8125_v27  ;;  %v8097_v3 = vpop.permute.xlu0 %8096 }
0x2f78   : > { %v8114_v34 = vmul.f32 %v14672_v17, %v8097_v3  ;;  %v8154_v11 = vsel %vm6346_vm11, %v8153_v20, %v8152_v26 }
0x2f79   : > { %v8129_v38 = vrot.slane %v8112_v6, 4  ;;  %v8155_v23 = vrot.slane %v8112_v6, 1 }
0x2f7a   : > { %v8095_v44 = vpop.permute.xlu1 %8094  ;;  %v8158_v52 = vrot.slane %v8114_v34, 7  ;;  %v8133_v31 = vrot.slane %v8114_v34, 2 }
0x2f7b   : > { %v8130_v42 = vsel %vm6340_vm9, %v8129_v38, %v8128_v12  ;;  %v8156_v10 = vsel %vm6349_vm12, %v8155_v23, %v8154_v11  ;;  %v8113_v8 = vmul.f32 %v14675_v37, %v8095_v44  ;;  %v8099_v62 = vpop.permute.xlu0 %8098 }
0x2f7c   : > { %v8115_v56 = vmul.f32 %v14680_v48, %v8099_v62 }
0x2f7d   : > { %v8131_v27 = vrot.slane %v8113_v8, 3  ;;  %v8157_v41 = vsel %vm6352_vm13, %v8113_v8, %v8156_v10 }
0x2f7e   : > { %v8159_v50 = vsel %vm6355_vm14, %v8158_v52, %v8157_v41  ;;  %v8135_v55 = vrot.slane %v8115_v56, 1  ;;  %v8160_v26 = vrot.slane %v8115_v56, 6 }
0x2f7f   : > { %v8132_v17 = vsel %vm6343_vm10, %v8131_v27, %v8130_v42 }
0x2f80   : > { %v8134_v6 = vsel %vm6346_vm11, %v8133_v31, %v8132_v17  ;;  %v8161_v23 = vsel %vm15465_vm15, %v8160_v26, %v8159_v50 }
0x2f81   : > { %v14756_v37 = vsel %vm6349_vm12, %v8135_v55, %v8134_v6  ;;  %8162 = vrot.lane.b32.xlu1 %v8161_v23, %s12771_s11 }
0x2ff3   : > { %v8163_v20 = vpop.permute.xlu1 %8162 }
0x2ff4   : > { %11266 = vmatmul.mubr.msk.f32.vlgmr.msra.gmra.mrb[28].mxu0 %vm6042_vm0, %v8163_v20 }
0x2ff5   : > { %11484 = vmatpush3.bf16.msra.mxu0 %v13921_v36  ;;  %11276 = vmatprep.mubr.msk.f32.mxu0 %vm12767_vm8, %v15515_v25 }
0x2ff6   : > { %11485 = vmatprep.subr.bf16.mxu0 %v15516_v35 }
0x2ff9   : > { %11487 = vmatpush3.bf16.msra.mxu0 %v13932_v40 }
0x30c7   : > { %v8232_v48 = vpop.f32.mrb[28].mxu0 }
0x30c8   : > { %v8237_v12 = vrot.slane %v8232_v48, 2  ;;  %v11267_v3 = vpop.f32.mrb[29].mxu0  ;;  %v8238_v34 = vrot.slane %v8232_v48, 3  ;;  %v8239_v11 = vrot.slane %v8232_v48, 4  ;;  %v8240_v44 = vrot.slane %v8232_v48, 5 }
0x30c9   : > { %v8241_v10 = vrot.slane %v8232_v48, 6  ;;  %v8242_v8 = vrot.slane %v8232_v48, 7  ;;  %v8243_v40 = vrot.slane %v8232_v48, 1  ;;  %v8258_v56 = vadd.f32 %v8232_v48, %v14012_v9 }
0x30ca   : > { %v8252_v38 = vadd.f32 %v8237_v12, %v13994_v61  ;;  %v8253_v42 = vadd.f32 %v8238_v34, %v13992_v15  ;;  %v8254_v36 = vadd.f32 %v8239_v11, %v14000_v2  ;;  %v8255_v52 = vadd.f32 %v8240_v44, %v13997_v54 }
0x30cb   : > { %v8256_v27 = vadd.f32 %v8241_v10, %v14006_v29  ;;  %v8257_v41 = vadd.f32 %v8242_v8, %v14003_v45  ;;  %v8259_v31 = vadd.f32 %v8243_v40, %v14009_v39  ;;  %v10681_v40 = vmul.f32 -1.442695, %v8258_v56 }
0x30cc   : > { %12286 = vtanh.f32 %v8252_v38  ;;  %v10675_v48 = vmul.f32 -1.442695, %v8252_v38  ;;  %v10676_v12 = vmul.f32 -1.442695, %v8253_v42  ;;  %v10677_v3 = vmul.f32 -1.442695, %v8254_v36 }
0x30cd   : > { %12288 = vtanh.f32 %v8253_v42  ;;  %v10678_v34 = vmul.f32 -1.442695, %v8255_v52  ;;  %v10679_v44 = vmul.f32 -1.442695, %v8256_v27  ;;  %v10680_v10 = vmul.f32 -1.442695, %v8257_v41 }
0x30ce   : > { %12290 = vtanh.f32 %v8254_v36 }
0x30cf   : > { %12292 = vtanh.f32 %v8255_v52 }
0x30d0   : > { %12294 = vtanh.f32 %v8256_v27 }
0x30d1   : > { %12296 = vtanh.f32 %v8257_v41 }
0x30d2   : > { %12298 = vtanh.f32 %v8259_v31 }
0x30d3   : > { %12300 = vtanh.f32 %v8258_v56 }
0x30d4   : > { %12302 = vpow2.f32 %v10675_v48 }
0x30d5   : > { %12304 = vpow2.f32 %v10676_v12 }
0x30d6   : > { %v12287_v62 = vpop.eup %12286  ;;  %12306 = vpow2.f32 %v10677_v3 }
0x30d7   : > { %8356 = vrot.lane.b32.xlu0 %v12287_v62, %s12770_s3  ;;  %v12289_v50 = vpop.eup %12288  ;;  %12308 = vpow2.f32 %v10678_v34  ;;  %v10682_v62 = vmul.f32 -1.442695, %v8259_v31 }
0x30d8   : > { %v12291_v17 = vpop.eup %12290  ;;  %8358 = vrot.lane.b32.xlu1 %v12289_v50, %s12770_s3  ;;  %12310 = vpow2.f32 %v10679_v44 }
0x30d9   : > { %v12293_v55 = vpop.eup %12292  ;;  %12312 = vpow2.f32 %v10680_v10 }
0x30da   : > { %v12295_v26 = vpop.eup %12294 }
0x30db   : > { %8360 = vrot.lane.b32.xlu0 %v12291_v17, %s12770_s3  ;;  %v12297_v6 = vpop.eup %12296 }
0x30dc   : > { %8362 = vrot.lane.b32.xlu1 %v12293_v55, %s12770_s3  ;;  %v12299_v23 = vpop.eup %12298 }
0x30dd   : > { %v12301_v20 = vpop.eup %12300 }
0x30de   : > { %v12303_v11 = vpop.eup %12302 }
0x30df   : > { %8364 = vrot.lane.b32.xlu0 %v12295_v26, %s12770_s3  ;;  %v8284_v8 = vadd.f32 1.0, %v12303_v11  ;;  %v12305_v50 = vpop.eup %12304 }
0x30e0   : > { %8366 = vrot.lane.b32.xlu1 %v12297_v6, %s12770_s3  ;;  %v12307_v17 = vpop.eup %12306  ;;  %v8285_v38 = vadd.f32 1.0, %v12305_v50 }
0x30e1   : > { %12314 = vrcp.f32 %v8284_v8  ;;  %v12309_v42 = vpop.eup %12308  ;;  %v8286_v36 = vadd.f32 1.0, %v12307_v17 }
0x30e2   : > { %12316 = vpow2.f32 %v10682_v62  ;;  %v12311_v55 = vpop.eup %12310  ;;  %v8287_v26 = vadd.f32 1.0, %v12309_v42 }
0x30e3   : > { %8370 = vrot.lane.b32.xlu0 %v12299_v23, %s12770_s3  ;;  %12318 = vpow2.f32 %v10681_v40  ;;  %v12313_v52 = vpop.eup %12312  ;;  %v8288_v6 = vadd.f32 1.0, %v12311_v55 }
0x30e4   : > { %8368 = vrot.lane.b32.xlu1 %v12301_v20, %s12770_s3  ;;  %12320 = vrcp.f32 %v8285_v38  ;;  %v8289_v23 = vadd.f32 1.0, %v12313_v52 }
0x30e5   : > { %12322 = vrcp.f32 %v8286_v36 }
0x30e6   : > { %12324 = vrcp.f32 %v8287_v26 }
0x30e7   : > { %12326 = vrcp.f32 %v8288_v6 }
0x30e8   : > { %12328 = vrcp.f32 %v8289_v23 }
0x30eb   : > { %v14781_v27 = vpop.eup %12314 }
0x30ec   : > { %v12317_v31 = vpop.eup %12316 }
0x30ed   : > { %v12319_v20 = vpop.eup %12318  ;;  %v8291_v48 = vadd.f32 1.0, %v12317_v31 }
0x30ee   : > { %v8290_v12 = vadd.f32 1.0, %v12319_v20  ;;  %v14785_v3 = vpop.eup %12320  ;;  %v8324_v20 = vrot.slane %v14687_v19, 7 }
0x30ef   : > { %12330 = vrcp.f32 %v8291_v48  ;;  %v14787_v11 = vpop.eup %12322 }
0x30f0   : > { %12332 = vrcp.f32 %v8290_v12  ;;  %v14792_v62 = vpop.eup %12324  ;;  %v8340_v48 = vmul.f32 %v14781_v27, %v8324_v20 }
0x30f1   : > { %v14795_v50 = vpop.eup %12326 }
0x30f2   : > { %v14800_v36 = vpop.eup %12328 }
0x30f9   : > { %v14803_v52 = vpop.eup %12330 }
0x30fa   : > { %v14808_v31 = vpop.eup %12332 }
0x3149   : > { %v8357_v41 = vpop.permute.xlu0 %8356 }
0x314a   : > { %v8380_v56 = vmul.f32 %v14781_v27, %v8357_v41  ;;  %v8359_v34 = vpop.permute.xlu1 %8358 }
0x314b   : > { %v8381_v44 = vmul.f32 %v14785_v3, %v8359_v34 }
0x314c   : > { %8396 = vrot.lane.b32.xlu0 %v8380_v56, %s12770_s3 }
0x314d   : > { %v8361_v10 = vpop.permute.xlu0 %8360  ;;  %8398 = vrot.lane.b32.xlu1 %v8381_v44, %s12770_s3  ;;  %v8325_v44 = vrot.slane %v14695_v18, 7 }
0x314e   : > { %v8382_v8 = vmul.f32 %v14787_v11, %v8361_v10  ;;  %v8363_v40 = vpop.permute.xlu1 %8362  ;;  %v8326_v10 = vrot.slane %v14698_v59, 7 }
0x314f   : > { %v8383_v17 = vmul.f32 %v14792_v62, %v8363_v40 }
0x3150   : > { %8400 = vrot.lane.b32.xlu0 %v8382_v8, %s12770_s3  ;;  %v8341_v8 = vmul.f32 %v14785_v3, %v8325_v44 }
0x3151   : > { %v8365_v38 = vpop.permute.xlu0 %8364  ;;  %8402 = vrot.lane.b32.xlu1 %v8383_v17, %s12770_s3  ;;  %v8342_v17 = vmul.f32 %v14787_v11, %v8326_v10 }
0x3152   : > { %v8384_v42 = vmul.f32 %v14795_v50, %v8365_v38  ;;  %v8367_v55 = vpop.permute.xlu1 %8366  ;;  %v8327_v38 = vrot.slane %v14705_v32, 7 }
0x3153   : > { %v8385_v26 = vmul.f32 %v14800_v36, %v8367_v55  ;;  %v8328_v55 = vrot.slane %v14709_v51, 7  ;;  %v8331_v51 = vrot.slane %v14723_v47, 7 }
0x3154   : > { %8404 = vrot.lane.b32.xlu0 %v8384_v42, %s12770_s3  ;;  %v8343_v18 = vmul.f32 %v14792_v62, %v8327_v38 }
0x3155   : > { %v8371_v41 = vpop.permute.xlu0 %8370  ;;  %8406 = vrot.lane.b32.xlu1 %v8385_v26, %s12770_s3  ;;  %v8347_v44 = vmul.f32 %v14803_v52, %v8331_v51 }
0x3156   : > { %v8387_v6 = vmul.f32 %v14803_v52, %v8371_v41  ;;  %v8369_v56 = vpop.permute.xlu1 %8368 }
0x3157   : > { %v8386_v23 = vmul.f32 %v14808_v31, %v8369_v56  ;;  %v8329_v56 = vrot.slane %v14718_v21, 7  ;;  %v8330_v21 = vrot.slane %v14716_v1, 7 }
0x3158   : > { %8410 = vrot.lane.b32.xlu0 %v8387_v6, %s12770_s3  ;;  %v8344_v6 = vmul.f32 %v14795_v50, %v8328_v55 }
0x3159   : > { %8408 = vrot.lane.b32.xlu1 %v8386_v23, %s12770_s3  ;;  %v8346_v47 = vmul.f32 %v14808_v31, %v8330_v21 }
0x31be   : > { %v8397_v12 = vpop.permute.xlu0 %8396 }
0x31bf   : > { %v14815_v34 = vadd.f32 %v8397_v12, %v8340_v48  ;;  %v8399_v40 = vpop.permute.xlu1 %8398  ;;  %v8345_v48 = vmul.f32 %v14800_v36, %v8329_v56 }
0x31c0   : > { %v14823_v42 = vadd.f32 %v8399_v40, %v8341_v8 }
0x31c1   : > { %12334 = vtanh.f32 %v14815_v34 }
0x31c2   : > { %v8401_v19 = vpop.permute.xlu0 %8400  ;;  %12336 = vtanh.f32 %v14823_v42 }
0x31c3   : > { %v14826_v26 = vadd.f32 %v8401_v19, %v8342_v17  ;;  %v8403_v59 = vpop.permute.xlu1 %8402 }
0x31c4   : > { %v14833_v32 = vadd.f32 %v8403_v59, %v8343_v18 }
0x31c5   : > { %12338 = vtanh.f32 %v14826_v26 }
0x31c6   : > { %v8405_v23 = vpop.permute.xlu0 %8404  ;;  %12340 = vtanh.f32 %v14833_v32 }
0x31c7   : > { %v14837_v20 = vadd.f32 %v8405_v23, %v8344_v6  ;;  %v8407_v12 = vpop.permute.xlu1 %8406 }
0x31c8   : > { %v14844_v10 = vadd.f32 %v8407_v12, %v8345_v48 }
0x31c9   : > { %12342 = vtanh.f32 %v14837_v20 }
0x31ca   : > { %v8411_v8 = vpop.permute.xlu0 %8410  ;;  %12344 = vtanh.f32 %v14844_v10 }
0x31cb   : > { %v12335_v41 = vpop.eup %12334  ;;  %v14846_v40 = vadd.f32 %v8411_v8, %v8347_v44  ;;  %v8409_v17 = vpop.permute.xlu1 %8408 }
0x31cc   : > { %8444 = vrot.lane.b32.xlu0 %v12335_v41, %s12770_s3  ;;  %v12337_v38 = vpop.eup %12336  ;;  %v14851_v19 = vadd.f32 %v8409_v17, %v8346_v47 }
0x31cd   : > { %12346 = vtanh.f32 %v14846_v40  ;;  %8446 = vrot.lane.b32.xlu1 %v12337_v38, %s12770_s3 }
0x31ce   : > { %12348 = vtanh.f32 %v14851_v19 }
0x31cf   : > { %v12339_v55 = vpop.eup %12338 }
0x31d0   : > { %8448 = vrot.lane.b32.xlu0 %v12339_v55, %s12770_s3  ;;  %v12341_v1 = vpop.eup %12340 }
0x31d1   : > { %8450 = vrot.lane.b32.xlu1 %v12341_v1, %s12770_s3  ;;  %v9012_v1 = vld [vmem:[%s15517_s1] sm:$0xff] }
0x31d3   : > { %v12343_v18 = vpop.eup %12342 }
0x31d4   : > { %8452 = vrot.lane.b32.xlu0 %v12343_v18, %s12770_s3  ;;  %v12345_v41 = vpop.eup %12344 }
0x31d5   : > { %8454 = vrot.lane.b32.xlu1 %v12345_v41, %s12770_s3 }
0x31d7   : > { %v12347_v59 = vpop.eup %12346 }
0x31d8   : > { %8458 = vrot.lane.b32.xlu0 %v12347_v59, %s12770_s3  ;;  %v12349_v6 = vpop.eup %12348 }
0x31d9   : > { %8456 = vrot.lane.b32.xlu1 %v12349_v6, %s12770_s3 }
0x323e   : > { %v8445_v56 = vpop.permute.xlu0 %8444 }
0x323f   : > { %v8468_v23 = vmul.f32 %v14781_v27, %v8445_v56  ;;  %v8447_v51 = vpop.permute.xlu1 %8446  ;;  %v9013_v27 = vld [vmem:[%s15517_s1 + $0x8] sm:$0xff] }
0x3240   : > { %v8469_v48 = vmul.f32 %v14785_v3, %v8447_v51  ;;  %v11488_v59 = vpack.c.bf16 %v9013_v27, %v9012_v1 }
0x3241   : > { %v8508_v12 = vrot.slane %v8468_v23, 6 }
0x3242   : > { %v8449_v44 = vpop.permute.xlu0 %8448  ;;  %v8484_v8 = vrot.slane %v8469_v48, 7  ;;  %v8509_v47 = vrot.slane %v8469_v48, 5  ;;  %11489 = vmatprep.subr.bf16.mxu0 %v11488_v59 }
0x3243   : > { %v8470_v21 = vmul.f32 %v14787_v11, %v8449_v44  ;;  %v8451_v17 = vpop.permute.xlu1 %8450 }
0x3244   : > { %v8510_v18 = vsel %vm6340_vm9, %v8509_v47, %v8508_v12  ;;  %v8471_v3 = vmul.f32 %v14792_v62, %v8451_v17  ;;  %v14873_v11 = vsel %vm15465_vm15, %v8484_v8, %v8468_v23 }
0x3245   : > { %v8486_v38 = vrot.slane %v8470_v21, 6  ;;  %v8511_v55 = vrot.slane %v8470_v21, 4 }
0x3246   : > { %v8453_v41 = vpop.permute.xlu0 %8452  ;;  %v8487_v51 = vrot.slane %v8471_v3, 5  ;;  %v8513_v48 = vrot.slane %v8471_v3, 3 }
0x3247   : > { %v8512_v6 = vsel %vm6343_vm10, %v8511_v55, %v8510_v18  ;;  %v8472_v56 = vmul.f32 %v14795_v50, %v8453_v41  ;;  %v8455_v44 = vpop.permute.xlu1 %8454 }
0x3248   : > { %v8488_v60 = vsel %vm6340_vm9, %v8487_v51, %v8486_v38  ;;  %v8473_v12 = vmul.f32 %v14800_v36, %v8455_v44  ;;  %v8514_v62 = vsel %vm6346_vm11, %v8513_v48, %v8512_v6 }
0x3249   : > { %v8489_v21 = vrot.slane %v8472_v56, 4  ;;  %v8515_v22 = vrot.slane %v8472_v56, 2 }
0x324a   : > { %v8459_v47 = vpop.permute.xlu0 %8458  ;;  %v8491_v50 = vrot.slane %v8473_v12, 3  ;;  %v8517_v55 = vrot.slane %v8473_v12, 1 }
0x324b   : > { %v8490_v23 = vsel %vm6343_vm10, %v8489_v21, %v8488_v60  ;;  %v8516_v8 = vsel %vm6349_vm12, %v8515_v22, %v8514_v62  ;;  %v8475_v17 = vmul.f32 %v14803_v52, %v8459_v47  ;;  %v8457_v1 = vpop.permute.xlu1 %8456 }
0x324c   : > { %v8474_v18 = vmul.f32 %v14808_v31, %v8457_v1  ;;  %v8518_v3 = vsel %vm6352_vm13, %v8517_v55, %v8516_v8  ;;  %v8492_v38 = vsel %vm6346_vm11, %v8491_v50, %v8490_v23 }
0x324d   : > { %v8520_v27 = vrot.slane %v8475_v17, 7  ;;  %v8495_v36 = vrot.slane %v8475_v17, 1 }
0x324e   : > { %v8493_v41 = vrot.slane %v8474_v18, 2  ;;  %v8519_v6 = vsel %vm6355_vm14, %v8474_v18, %v8518_v3 }
0x324f   : > { %v8521_v60 = vsel %vm15465_vm15, %v8520_v27, %v8519_v6  ;;  %vm8146_vm15 = vcmask 258048  }
0x3250   : > { %8522 = vrot.lane.b32.xlu0 %v8521_v60, %s12771_s11  ;;  %v8494_v22 = vsel %vm6349_vm12, %v8493_v41, %v8492_v38 }
0x3251   : > { %v14891_v52 = vsel %vm6352_vm13, %v8495_v36, %v8494_v22 }
0x32c2   : > { %v8523_v56 = vpop.permute.xlu0 %8522 }
0x32c3   : > { %11277 = vmatmul.mubr.msk.f32.vlgmr.msra.gmra.mrb[30].mxu0 %vm6042_vm0, %v8523_v56 }
0x32c4   : > { %11491 = vmatpush3.bf16.msra.mxu0 %v11488_v59  ;;  %11283 = vmatprep.mubr.msk.f32.mxu0 %vm15463_vm4, %v13510_v5 }
0x32c5   : > { %11500 = vmatprep.subr.bf16.mxu0 %v15516_v35 }
0x32c7   : > { %11284 = vmatmul.mubr.msk.f32.vlgmr.msra.gmra.mrb[32].mxu0 %vm15463_vm4, %v13508_v4 }
0x32c8   : > { %11286 = vmatprep.mubr.msk.f32.mxu0 %vm15463_vm4, %v13518_v16 }
0x32cb   : > { %11287 = vmatmul.mubr.msk.f32.gmra.mrb[34].mxu0 %vm15463_vm4, %v13516_v14  ;;  %v10692_v14 = vld [vmem:[%s15518_s29] ss:$0 sm:$0xff] }
0x32cc   : > { %11289 = vmatprep.mubr.msk.f32.mxu0 %vm15463_vm4, %v13526_v30 }
0x32cf   : > { %11290 = vmatmul.mubr.msk.f32.gmra.mrb[36].mxu0 %vm15463_vm4, %v13524_v24 }
0x32d0   : > { %11292 = vmatprep.mubr.msk.f32.mxu0 %vm15463_vm4, %v13534_v33 }
0x32d3   : > { %11293 = vmatmul.mubr.msk.f32.gmra.mrb[38].mxu0 %vm15463_vm4, %v13532_v28  ;;  %vm7426_vm4 = vcmask 256000  }
0x32d4   : > { %11323 = vmatprep.mubr.msk.f32.mxu0 %vm12767_vm8, %v15515_v25 }
0x3396   : > { %v8592_v4 = vpop.f32.mrb[30].mxu0 }
0x3397   : > { %v11278_v5 = vpop.f32.mrb[31].mxu0  ;;  %v8598_v30 = vrot.slane %v8592_v4, 2  ;;  %v8599_v31 = vrot.slane %v8592_v4, 3  ;;  %v8600_v28 = vrot.slane %v8592_v4, 4  ;;  %v8601_v44 = vrot.slane %v8592_v4, 5 }
0x3398   : > { %v8602_v47 = vrot.slane %v8592_v4, 6  ;;  %v8603_v8 = vrot.slane %v8592_v4, 7  ;;  %v8619_v27 = vadd.f32 %v8592_v4, %v14009_v39 }
0x3399   : > { %v8613_v48 = vadd.f32 %v8598_v30, %v13992_v15  ;;  %v8614_v21 = vadd.f32 %v8599_v31, %v14000_v2  ;;  %v8615_v23 = vadd.f32 %v8600_v28, %v13997_v54  ;;  %v8616_v17 = vadd.f32 %v8601_v44, %v14006_v29 }
0x339a   : > { %v11285_v16 = vpop.f32.mrb[32].mxu0  ;;  %v8617_v15 = vadd.f32 %v8602_v47, %v14003_v45  ;;  %v8597_v2 = vrot.slane %v8592_v4, 1  ;;  %v8618_v1 = vadd.f32 %v8603_v8, %v14012_v9  ;;  %v10691_v4 = vmul.f32 -1.442695, %v8619_v27 }
0x339b   : > { %v14916_v59 = vadd.f32 %v11285_v16, %v10692_v14  ;;  %v14918_v24 = vpop.f32.mrb[33].mxu0  ;;  %12350 = vtanh.f32 %v8613_v48  ;;  %v10685_v36 = vmul.f32 -1.442695, %v8613_v48  ;;  %v10686_v41 = vmul.f32 -1.442695, %v8614_v21 }
0x339c   : > { %12352 = vtanh.f32 %v8614_v21  ;;  %v8612_v54 = vadd.f32 %v8597_v2, %v13994_v61  ;;  %v10687_v6 = vmul.f32 -1.442695, %v8615_v23  ;;  %v10688_v60 = vmul.f32 -1.442695, %v8616_v17 }
0x339d   : > { %12354 = vtanh.f32 %v8615_v23  ;;  %v10689_v22 = vmul.f32 -1.442695, %v8617_v15  ;;  %v10690_v56 = vmul.f32 -1.442695, %v8618_v1 }
0x339e   : > { %v14920_v33 = vpop.f32.mrb[34].mxu0  ;;  %12356 = vtanh.f32 %v8616_v17  ;;  %v10684_v5 = vmul.f32 -1.442695, %v8612_v54 }
0x339f   : > { %v14922_v51 = vpop.f32.mrb[35].mxu0  ;;  %12358 = vtanh.f32 %v8617_v15 }
0x33a0   : > { %12360 = vtanh.f32 %v8618_v1 }
0x33a1   : > { %12362 = vtanh.f32 %v8619_v27 }
0x33a2   : > { %v14926_v12 = vpop.f32.mrb[36].mxu0  ;;  %12364 = vtanh.f32 %v8612_v54 }
0x33a3   : > { %v14928_v62 = vpop.f32.mrb[37].mxu0  ;;  %12366 = vpow2.f32 %v10685_v36 }
0x33a4   : > { %12368 = vpow2.f32 %v10686_v41 }
0x33a5   : > { %v12351_v18 = vpop.eup %12350  ;;  %12370 = vpow2.f32 %v10687_v6 }
0x33a6   : > { %v14932_v50 = vpop.f32.mrb[38].mxu0  ;;  %v12353_v29 = vpop.eup %12352  ;;  %8718 = vrot.lane.b32.xlu1 %v12351_v18, %s12770_s3  ;;  %12372 = vpow2.f32 %v10688_v60 }
0x33a7   : > { %v14934_v55 = vpop.f32.mrb[39].mxu0  ;;  %8720 = vrot.lane.b32.xlu0 %v12353_v29, %s12770_s3  ;;  %v12355_v45 = vpop.eup %12354  ;;  %12374 = vpow2.f32 %v10689_v22 }
0x33a8   : > { %v12357_v3 = vpop.eup %12356  ;;  %12376 = vpow2.f32 %v10690_v56 }
0x33a9   : > { %v12359_v9 = vpop.eup %12358  ;;  %12378 = vpow2.f32 %v10691_v4 }
0x33aa   : > { %8722 = vrot.lane.b32.xlu1 %v12355_v45, %s12770_s3  ;;  %v12361_v39 = vpop.eup %12360  ;;  %12380 = vpow2.f32 %v10684_v5 }
0x33ab   : > { %8724 = vrot.lane.b32.xlu0 %v12357_v3, %s12770_s3  ;;  %v12363_v61 = vpop.eup %12362 }
0x33ac   : > { %v12365_v38 = vpop.eup %12364 }
0x33ad   : > { %v12367_v16 = vpop.eup %12366 }
0x33ae   : > { %8726 = vrot.lane.b32.xlu1 %v12359_v9, %s12770_s3  ;;  %v12369_v14 = vpop.eup %12368  ;;  %v8645_v30 = vadd.f32 1.0, %v12367_v16 }
0x33af   : > { %8728 = vrot.lane.b32.xlu0 %v12361_v39, %s12770_s3  ;;  %v12371_v31 = vpop.eup %12370  ;;  %v8646_v28 = vadd.f32 1.0, %v12369_v14 }
0x33b0   : > { %v12373_v48 = vpop.eup %12372  ;;  %12382 = vrcp.f32 %v8645_v30  ;;  %v8647_v44 = vadd.f32 1.0, %v12371_v31 }
0x33b1   : > { %v12375_v21 = vpop.eup %12374  ;;  %12384 = vrcp.f32 %v8646_v28  ;;  %v8648_v47 = vadd.f32 1.0, %v12373_v48 }
0x33b2   : > { %8730 = vrot.lane.b32.xlu1 %v12363_v61, %s12770_s3  ;;  %v12377_v23 = vpop.eup %12376  ;;  %12386 = vrcp.f32 %v8647_v44  ;;  %v8649_v8 = vadd.f32 1.0, %v12375_v21  ;;  %v8685_v21 = vrot.slane %v14823_v42, 7 }
0x33b3   : > { %8716 = vrot.lane.b32.xlu0 %v12365_v38, %s12770_s3  ;;  %v12379_v17 = vpop.eup %12378  ;;  %12388 = vrcp.f32 %v8648_v47  ;;  %v8650_v15 = vadd.f32 1.0, %v12377_v23  ;;  %v8686_v47 = vrot.slane %v14826_v26, 7  ;;  %v8689_v26 = vrot.slane %v14844_v10, 7 }
0x33b4   : > { %v12381_v2 = vpop.eup %12380  ;;  %v8651_v1 = vadd.f32 1.0, %v12379_v17  ;;  %12390 = vrcp.f32 %v8649_v8 }
0x33b5   : > { %12392 = vrcp.f32 %v8650_v15  ;;  %v8644_v27 = vadd.f32 1.0, %v12381_v2  ;;  %v8687_v15 = vrot.slane %v14833_v32, 7 }
0x33b6   : > { %12394 = vrcp.f32 %v8651_v1 }
0x33b7   : > { %12396 = vrcp.f32 %v8644_v27  ;;  %v8688_v27 = vrot.slane %v14837_v20, 7 }
0x33ba   : > { %v14948_v54 = vpop.eup %12382 }
0x33bb   : > { %v14950_v29 = vpop.eup %12384  ;;  %v8701_v23 = vmul.f32 %v14948_v54, %v8685_v21 }
0x33bc   : > { %v14955_v39 = vpop.eup %12386  ;;  %v8702_v17 = vmul.f32 %v14950_v29, %v8686_v47 }
0x33bd   : > { %v14958_v38 = vpop.eup %12388 }
0x33be   : > { %v14963_v60 = vpop.eup %12390  ;;  %v8704_v42 = vmul.f32 %v14958_v38, %v8688_v27  ;;  %v9354_v27 = vld [vmem:[#allocation15] sm:$0xff] }
0x33bf   : > { %v14966_v56 = vpop.eup %12392  ;;  %v8705_v32 = vmul.f32 %v14963_v60, %v8689_v26 }
0x33c0   : > { %v14971_v14 = vpop.eup %12394 }
0x33c1   : > { %v14974_v31 = vpop.eup %12396 }
0x3418   : > { %v8719_v18 = vpop.permute.xlu1 %8718 }
0x3419   : > { %v8721_v45 = vpop.permute.xlu0 %8720  ;;  %v8741_v3 = vmul.f32 %v14948_v54, %v8719_v18 }
0x341a   : > { %v8742_v9 = vmul.f32 %v14950_v29, %v8721_v45  ;;  %v8703_v45 = vmul.f32 %v14955_v39, %v8687_v15 }
0x341b   : > { %8758 = vrot.lane.b32.xlu1 %v8741_v3, %s12770_s3 }
0x341c   : > { %8760 = vrot.lane.b32.xlu0 %v8742_v9, %s12770_s3  ;;  %v8723_v61 = vpop.permute.xlu1 %8722 }
0x341d   : > { %v8725_v36 = vpop.permute.xlu0 %8724  ;;  %v8743_v41 = vmul.f32 %v14955_v39, %v8723_v61 }
0x341e   : > { %v8744_v6 = vmul.f32 %v14958_v38, %v8725_v36  ;;  %v8690_v36 = vrot.slane %v14851_v19, 7 }
0x341f   : > { %8762 = vrot.lane.b32.xlu1 %v8743_v41, %s12770_s3 }
0x3420   : > { %8764 = vrot.lane.b32.xlu0 %v8744_v6, %s12770_s3  ;;  %v8727_v22 = vpop.permute.xlu1 %8726  ;;  %v8706_v6 = vmul.f32 %v14966_v56, %v8690_v36 }
0x3421   : > { %v8729_v4 = vpop.permute.xlu0 %8728  ;;  %v8745_v5 = vmul.f32 %v14963_v60, %v8727_v22  ;;  %v8691_v22 = vrot.slane %v14846_v40, 7 }
0x3422   : > { %v8746_v16 = vmul.f32 %v14966_v56, %v8729_v4 }
0x3423   : > { %8766 = vrot.lane.b32.xlu1 %v8745_v5, %s12770_s3  ;;  %v8707_v10 = vmul.f32 %v14971_v14, %v8691_v22 }
0x3424   : > { %8768 = vrot.lane.b32.xlu0 %v8746_v16, %s12770_s3  ;;  %v8731_v30 = vpop.permute.xlu1 %8730  ;;  %v8684_v16 = vrot.slane %v14815_v34, 7 }
0x3425   : > { %v8747_v28 = vmul.f32 %v14971_v14, %v8731_v30  ;;  %v8717_v48 = vpop.permute.xlu0 %8716 }
0x3426   : > { %v8740_v44 = vmul.f32 %v14974_v31, %v8717_v48 }
0x3427   : > { %8770 = vrot.lane.b32.xlu1 %v8747_v28, %s12770_s3  ;;  %v8700_v28 = vmul.f32 %v14974_v31, %v8684_v16 }
0x3428   : > { %8756 = vrot.lane.b32.xlu0 %v8740_v44, %s12770_s3 }
0x348d   : > { %v8759_v8 = vpop.permute.xlu1 %8758 }
0x348e   : > { %v8781_v2 = vadd.f32 %v8759_v8, %v8701_v23  ;;  %v8761_v1 = vpop.permute.xlu0 %8760 }
0x348f   : > { %v8782_v18 = vadd.f32 %v8761_v1, %v8702_v17  ;;  %v6696_v1 = vrot.slane %v14232_v0, 1 }
0x3490   : > { %12398 = vtanh.f32 %v8781_v2 }
0x3491   : > { %12400 = vtanh.f32 %v8782_v18  ;;  %v8763_v3 = vpop.permute.xlu1 %8762  ;;  %v9356_v18 = vld [vmem:[#allocation15 + $0x10] sm:$0xff] }
0x3492   : > { %v8783_v9 = vadd.f32 %v8763_v3, %v8703_v45  ;;  %v8765_v61 = vpop.permute.xlu0 %8764  ;;  %v9357_v3 = vld [vmem:[#allocation15 + $0x18] sm:$0xff] }
0x3493   : > { %v8784_v41 = vadd.f32 %v8765_v61, %v8704_v42  ;;  %v11496_v42 = vpack.c.bf16 %v9357_v3, %v9356_v18 }
0x3494   : > { %12402 = vtanh.f32 %v8783_v9 }
0x3495   : > { %12404 = vtanh.f32 %v8784_v41  ;;  %v8767_v20 = vpop.permute.xlu1 %8766 }
0x3496   : > { %v8785_v4 = vadd.f32 %v8767_v20, %v8705_v32  ;;  %v8769_v5 = vpop.permute.xlu0 %8768 }
0x3497   : > { %v8786_v30 = vadd.f32 %v8769_v5, %v8706_v6 }
0x3498   : > { %12406 = vtanh.f32 %v8785_v4 }
0x3499   : > { %12408 = vtanh.f32 %v8786_v30  ;;  %v8771_v19 = vpop.permute.xlu1 %8770 }
0x349a   : > { %v12399_v48 = vpop.eup %12398  ;;  %v8787_v44 = vadd.f32 %v8771_v19, %v8707_v10  ;;  %v8757_v21 = vpop.permute.xlu0 %8756 }
0x349b   : > { %v12401_v47 = vpop.eup %12400  ;;  %v8780_v23 = vadd.f32 %v8757_v21, %v8700_v28  ;;  %8806 = vrot.lane.b32.xlu1 %v12399_v48, %s12770_s3 }
0x349c   : > { %12410 = vtanh.f32 %v8787_v44  ;;  %8808 = vrot.lane.b32.xlu0 %v12401_v47, %s12770_s3 }
0x349d   : > { %12412 = vtanh.f32 %v8780_v23 }
0x349e   : > { %v12403_v34 = vpop.eup %12402 }
0x349f   : > { %v12405_v40 = vpop.eup %12404  ;;  %8810 = vrot.lane.b32.xlu1 %v12403_v34, %s12770_s3 }
0x34a0   : > { %8812 = vrot.lane.b32.xlu0 %v12405_v40, %s12770_s3 }
0x34a2   : > { %v12407_v8 = vpop.eup %12406 }
0x34a3   : > { %v12409_v17 = vpop.eup %12408  ;;  %8814 = vrot.lane.b32.xlu1 %v12407_v8, %s12770_s3 }
0x34a4   : > { %8816 = vrot.lane.b32.xlu0 %v12409_v17, %s12770_s3 }
0x34a6   : > { %v12411_v15 = vpop.eup %12410 }
0x34a7   : > { %v12413_v2 = vpop.eup %12412  ;;  %8818 = vrot.lane.b32.xlu1 %v12411_v15, %s12770_s3 }
0x34a8   : > { %8804 = vrot.lane.b32.xlu0 %v12413_v2, %s12770_s3  ;;  %s1021_s3 = scalar_lea.vmem %s15552_s21, %s10454_s4 }
0x34ab   : > { %6697 = vrot.lane.b32.xlu1 %v14239_v57, %s12771_s11 }
0x34ac   : > { %6699 = vrot.lane.b32.xlu0 %v6696_v1, %s12771_s11 }
0x34af   : > { %7057 = vrot.lane.b32.xlu1 %v14364_v46, %s12771_s11 }
0x34b0   : > { %7059 = vrot.lane.b32.xlu0 %v14369_v58, %s12771_s11 }
0x34b3   : > { %7417 = vrot.lane.b32.xlu1 %v14492_v43, %s12771_s11 }
0x34b4   : > { %7419 = vrot.lane.b32.xlu0 %v14498_v7, %s12771_s11 }
0x34b7   : > { %7777 = vrot.lane.b32.xlu1 %v14620_v13, %s12771_s11 }
0x34b8   : > { %7779 = vrot.lane.b32.xlu0 %v14627_v53, %s12771_s11 }
0x34bb   : > { %8137 = vrot.lane.b32.xlu1 %v14742_v63, %s12771_s11 }
0x34bc   : > { %8139 = vrot.lane.b32.xlu0 %v14756_v37, %s12771_s11  ;;  %v9355_v37 = vld [vmem:[#allocation15 + $0x8] sm:$0xff] }
0x34bd   : > { %v11492_v45 = vpack.c.bf16 %v9355_v37, %v9354_v27 }
0x34bf   : > { %8497 = vrot.lane.b32.xlu1 %v14873_v11, %s12771_s11  ;;  %11493 = vmatprep.subr.bf16.mxu1 %v11492_v45 }
0x34c0   : > { %8499 = vrot.lane.b32.xlu0 %v14891_v52, %s12771_s11  ;;  %11495 = vmatpush3.bf16.msra.mxu1 %v11492_v45 }
0x34c1   : > { %11497 = vmatprep.subr.bf16.mxu1 %v11496_v42 }
0x34c4   : > { %11499 = vmatpush3.bf16.msra.mxu1 %v11496_v42  ;;  %v9944_v42 = vld [vmem:[%s15520_s22] sm:$0xff] }
0x34c5   : > { %11506 = vmatprep.subr.bf16.mxu1 %v15516_v35 }
0x350d   : > { %v8807_v0 = vpop.permute.xlu1 %8806 }
0x350e   : > { %v8829_v57 = vmul.f32 %v14948_v54, %v8807_v0  ;;  %v8809_v46 = vpop.permute.xlu0 %8808 }
0x350f   : > { %v8830_v58 = vmul.f32 %v14950_v29, %v8809_v46 }
0x3510   : > { %v8844_v43 = vrot.slane %v8829_v57, 7 }
0x3511   : > { %v8845_v7 = vrot.slane %v8830_v58, 6  ;;  %v8811_v13 = vpop.permute.xlu1 %8810 }
0x3512   : > { %v8831_v53 = vmul.f32 %v14955_v39, %v8811_v13  ;;  %v8813_v63 = vpop.permute.xlu0 %8812 }
0x3513   : > { %v8832_v11 = vmul.f32 %v14958_v38, %v8813_v63  ;;  %v8846_v54 = vsel %vm6340_vm9, %v8845_v7, %v8844_v43 }
0x3514   : > { %v8847_v52 = vrot.slane %v8831_v53, 5 }
0x3515   : > { %v8849_v26 = vrot.slane %v8832_v11, 4  ;;  %v8815_v9 = vpop.permute.xlu1 %8814 }
0x3516   : > { %v8848_v29 = vsel %vm6343_vm10, %v8847_v52, %v8846_v54  ;;  %v8833_v61 = vmul.f32 %v14963_v60, %v8815_v9  ;;  %v8817_v39 = vpop.permute.xlu0 %8816 }
0x3517   : > { %v8834_v36 = vmul.f32 %v14966_v56, %v8817_v39  ;;  %v8850_v38 = vsel %vm6346_vm11, %v8849_v26, %v8848_v29  ;;  %v9946_v39 = vld [vmem:[%s15520_s22 + $0x10] sm:$0xff] }
0x3518   : > { %v8851_v41 = vrot.slane %v8833_v61, 3  ;;  %v9945_v61 = vld [vmem:[%s15520_s22 + $0x8] sm:$0xff] }
0x3519   : > { %v8853_v32 = vrot.slane %v8834_v36, 2  ;;  %v8819_v20 = vpop.permute.xlu1 %8818  ;;  %v15521_v36 = vld [vmem:[#allocation31_spill] sm:$0xff] }
0x351a   : > { %v8852_v6 = vsel %vm6349_vm12, %v8851_v41, %v8850_v38  ;;  %v8835_v22 = vmul.f32 %v14971_v14, %v8819_v20  ;;  %v8805_v4 = vpop.permute.xlu0 %8804 }
0x351b   : > { %v8828_v5 = vmul.f32 %v14974_v31, %v8805_v4  ;;  %v8854_v56 = vsel %vm6352_vm13, %v8853_v32, %v8852_v6 }
0x351c   : > { %v8855_v60 = vrot.slane %v8835_v22, 1 }
0x351d   : > { %8857 = vrot.lane.b32.xlu1 %v8828_v5, %s12771_s11  ;;  %v6698_v16 = vpop.permute.xlu1 %6697 }
0x351e   : > { %6705 = vst.msk [vmem:[#allocation3 + $0x7] sm:$0xfe] %vm6704_vm1, %v6698_v16  ;;  %v6700_v30 = vpop.permute.xlu0 %6699  ;;  %v8856_v10 = vsel %vm6355_vm14, %v8855_v60, %v8854_v56  ;;  %vm7786_vm1 = vcmask 257024   ;;  %v11507_v60 = vpack.c.bf16 %v9945_v61, %v9944_v42 }
0x351f   : > { %6707 = vst.msk [vmem:[#allocation3 + $0xf] sm:$0x1] %vm6706_vm2, %v6700_v30  ;;  %8859 = vrot.lane.b32.xlu0 %v8856_v10, %s12771_s11  ;;  %vm8144_vm2 = vcmask 261125  }
0x3521   : > { %v7058_v14 = vpop.permute.xlu1 %7057 }
0x3522   : > { %7065 = vst.msk [vmem:[#allocation3 + $0xe] sm:$0xfc] %vm7064_vm3, %v7058_v14  ;;  %v7060_v31 = vpop.permute.xlu0 %7059  ;;  %vm8504_vm3 = vcmask 261126  }
0x3523   : > { %7067 = vst.msk [vmem:[#allocation3 + $0x16] sm:$0x3] %vm7066_vm6, %v7060_v31  ;;  %vm8506_vm6 = vcmask 259072  }
0x3525   : > { %v7418_v19 = vpop.permute.xlu1 %7417 }
0x3526   : > { %7425 = vst.msk [vmem:[#allocation3 + $0x15] sm:$0xf8] %vm7424_vm7, %v7418_v19  ;;  %v7420_v28 = vpop.permute.xlu0 %7419  ;;  %vm8864_vm7 = vcmask 261127  }
0x3527   : > { %7427 = vst.msk [vmem:[#allocation3 + $0x1d] sm:$0x7] %vm7426_vm4, %v7420_v28  ;;  %vm8866_vm4 = vcmask 260096  }
0x3529   : > { %v7778_v48 = vpop.permute.xlu1 %7777  ;;  %v11746_v15 = vld [vmem:[#allocation3] ss:$16 sps:$4 sm:$0xff]  }
0x352a   : > { %7785 = vst.msk [vmem:[#allocation3 + $0x1c] sm:$0xf0] %vm7784_vm5, %v7778_v48  ;;  %v7780_v44 = vpop.permute.xlu0 %7779  ;;  %v11754_v0 = vld [vmem:[#allocation3 + $0x4] ss:$16 sps:$4 sm:$0xff]   ;;  %v8884_v58 = vrot.slane %v11746_v15, %v13493_v49  ;;  %vm15522_vm5 = vcmask 1047559  }
0x352b   : > { %7787 = vst.msk [vmem:[#allocation3 + $0x24] sm:$0xf] %vm7786_vm1, %v7780_v44  ;;  %v8891_v27 = vrot.slane %v11754_v0, %v13493_v49  ;;  %vm15526_vm1 = vcmask 64512  }
0x352d   : > { %v8138_v21 = vpop.permute.xlu1 %8137  ;;  %v11748_v17 = vld [vmem:[#allocation3 + $0x8] ss:$16 sps:$4 sm:$0xff]  }
0x352e   : > { %8145 = vst.msk [vmem:[#allocation3 + $0x23] sm:$0xe0] %vm8144_vm2, %v8138_v21  ;;  %v8140_v47 = vpop.permute.xlu0 %8139  ;;  %v11755_v2 = vld [vmem:[#allocation3 + $0xc] ss:$16 sps:$4 sm:$0xff]   ;;  %v8900_v1 = vrot.slane %v11748_v17, %v13493_v49  ;;  %vm15529_vm2 = vmmov %vm15522_vm5 }
0x352f   : > { %8147 = vst.msk [vmem:[#allocation3 + $0x2b] sm:$0x1f] %vm8146_vm15, %v8140_v47  ;;  %v8907_v43 = vrot.slane %v11755_v2, %v13493_v49  ;;  %vm15525_vm15 = vmmov %vm15522_vm5 }
0x3530   : > { %v8940_v53 = vcombine.low %v8884_v58, %v8900_v1  ;;  %v8941_v63 = vcombine.high %v8884_v58, %v8900_v1 }
0x3531   : > { %v8498_v23 = vpop.permute.xlu1 %8497  ;;  %v8956_v3 = vcombine.low %v8891_v27, %v8907_v43  ;;  %v8957_v52 = vcombine.high %v8891_v27, %v8907_v43 }
0x3532   : > { %8505 = vst.msk [vmem:[#allocation3 + $0x2a] sm:$0xc0] %vm8504_vm3, %v8498_v23  ;;  %v8500_v34 = vpop.permute.xlu0 %8499  ;;  %v8948_v41 = vrot.slane %v8940_v53, %v15521_v36  ;;  %v8955_v38 = vrot.slane %v8941_v63, %v15521_v36  ;;  %vm15530_vm3 = vmmov %vm15526_vm1 }
0x3533   : > { %8507 = vst.msk [vmem:[#allocation3 + $0x32] sm:$0x3f] %vm8506_vm6, %v8500_v34  ;;  %v8964_v4 = vrot.slane %v8956_v3, %v15521_v36  ;;  %v8971_v5 = vrot.slane %v8957_v52, %v15521_v36  ;;  %vm15531_vm6 = vcmask 130048  }
0x353a   : > { %v11750_v57 = vld [vmem:[#allocation3 + $0x20] ss:$16 sps:$4 sm:$0xff]   ;;  %v11756_v46 = vld [vmem:[#allocation3 + $0x24] ss:$16 sps:$4 sm:$0xff]  }
0x353b   : > { %v8916_v37 = vrot.slane %v11750_v57, %v13493_v49  ;;  %v8923_v11 = vrot.slane %v11756_v46, %v13493_v49 }
0x358f   : > { %v8858_v40 = vpop.permute.xlu1 %8857 }
0x3590   : > { %8865 = vst.msk [vmem:[#allocation3 + $0x31] sm:$0x80] %vm8864_vm7, %v8858_v40  ;;  %vm15532_vm7 = vmmov %vm15531_vm6 }
0x3591   : > { %v8860_v8 = vpop.permute.xlu0 %8859 }
0x3592   : > { %8867 = vst.msk [vmem:[#allocation3 + $0x39] sm:$0x7f] %vm8866_vm4, %v8860_v8  ;;  %vm15533_vm4 = vmmov %vm15531_vm6 }
0x3599   : > { %v11752_v7 = vld [vmem:[#allocation3 + $0x28] ss:$16 sps:$4 sm:$0xff]   ;;  %v11757_v13 = vld [vmem:[#allocation3 + $0x2c] ss:$16 sps:$4 sm:$0xff]  }
0x359a   : > { %v8932_v18 = vrot.slane %v11752_v7, %v13493_v49  ;;  %v8939_v45 = vrot.slane %v11757_v13, %v13493_v49  ;;  %v9947_v49 = vld [vmem:[%s15520_s22 + $0x18] sm:$0xff] }
0x359b   : > { %v11510_v56 = vpack.c.bf16 %v9947_v49, %v9946_v39 }
0x359c   : > { %v8972_v54 = vcombine.low %v8916_v37, %v8932_v18  ;;  %v8973_v26 = vcombine.high %v8916_v37, %v8932_v18  ;;  %v8988_v9 = vcombine.low %v8923_v11, %v8939_v45  ;;  %v8989_v29 = vcombine.high %v8923_v11, %v8939_v45 }
0x359e   : > { %v8980_v32 = vrot.slane %v8972_v54, %v15521_v36  ;;  %v8987_v20 = vrot.slane %v8973_v26, %v15521_v36  ;;  %v8996_v6 = vrot.slane %v8988_v9, %v15521_v36  ;;  %v9003_v22 = vrot.slane %v8989_v29, %v15521_v36 }
0x35a0   : > { %v15073_v16 = vcombine.low %v8948_v41, %v8980_v32  ;;  %v15075_v30 = vcombine.high %v8948_v41, %v8980_v32  ;;  %v15077_v10 = vcombine.low %v8955_v38, %v8987_v20  ;;  %v15079_v14 = vcombine.high %v8955_v38, %v8987_v20 }
0x35a1   : > { %v15081_v31 = vcombine.low %v8964_v4, %v8996_v6  ;;  %v15083_v19 = vcombine.high %v8964_v4, %v8996_v6  ;;  %v15085_v28 = vcombine.low %v8971_v5, %v9003_v22  ;;  %v15087_v48 = vcombine.high %v8971_v5, %v9003_v22 }
0x35a2   : > { %11303 = vmatprep.mubr.msk.f32.mxu1 %vm6042_vm0, %v15073_v16  ;;  %v9879_v44 = vsel %vm6042_vm0, %v15073_v16, 0.0  ;;  %v9886_v21 = vsel %vm6042_vm0, %v15075_v30, 0.0  ;;  %v9893_v47 = vsel %vm6042_vm0, %v15077_v10, 0.0  ;;  %v9900_v23 = vsel %vm6042_vm0, %v15079_v14, 0.0 }
0x35a3   : > { %v9880_v34 = vrot.slane %v9879_v44, 4  ;;  %v9887_v40 = vrot.slane %v9886_v21, 4  ;;  %11304 = vmatmul.mubr.msk.f32.vlgmr.msra.gmra.mrb[88].mxu1 %vm6042_vm0, %v15075_v30  ;;  %v9894_v8 = vrot.slane %v9893_v47, 4  ;;  %v9901_v17 = vrot.slane %v9900_v23, 4 }
0x35a4   : > { %11306 = vmatprep.mubr.msk.f32.mxu1 %vm6042_vm0, %v15077_v10  ;;  %v9907_v15 = vsel %vm6042_vm0, %v15081_v31, 0.0  ;;  %v9914_v2 = vsel %vm6042_vm0, %v15083_v19, 0.0  ;;  %v9921_v1 = vsel %vm6042_vm0, %v15085_v28, 0.0  ;;  %v9928_v0 = vsel %vm6042_vm0, %v15087_v48, 0.0  ;;  %11508 = vmatpush3.bf16.msra.mxu1 %v11507_v60 }
0x35a5   : > { %v9881_v57 = vadd.f32 %v9880_v34, %v9879_v44  ;;  %v9888_v46 = vadd.f32 %v9887_v40, %v9886_v21  ;;  %v9895_v58 = vadd.f32 %v9894_v8, %v9893_v47  ;;  %v9902_v43 = vadd.f32 %v9901_v17, %v9900_v23  ;;  %11509 = vmatprep.subr.bf16.mxu1 %v15516_v35 }
0x35a6   : > { %v9908_v7 = vrot.slane %v9907_v15, 4  ;;  %v9915_v13 = vrot.slane %v9914_v2, 4  ;;  %v9922_v53 = vrot.slane %v9921_v1, 4  ;;  %v9929_v63 = vrot.slane %v9928_v0, 4 }
0x35a7   : > { %v9882_v27 = vrot.slane %v9881_v57, 2  ;;  %v9889_v37 = vrot.slane %v9888_v46, 2  ;;  %v9896_v18 = vrot.slane %v9895_v58, 2  ;;  %11307 = vmatmul.mubr.msk.f32.gmra.mrb[90].mxu1 %vm6042_vm0, %v15079_v14  ;;  %v9903_v11 = vrot.slane %v9902_v43, 2 }
0x35a8   : > { %11309 = vmatprep.mubr.msk.f32.mxu1 %vm6042_vm0, %v15081_v31  ;;  %v9909_v45 = vadd.f32 %v9908_v7, %v9907_v15  ;;  %v9916_v3 = vadd.f32 %v9915_v13, %v9914_v2  ;;  %v9923_v52 = vadd.f32 %v9922_v53, %v9921_v1  ;;  %v9930_v42 = vadd.f32 %v9929_v63, %v9928_v0 }
0x35a9   : > { %v9883_v54 = vadd.f32 %v9882_v27, %v9881_v57  ;;  %v9890_v26 = vadd.f32 %v9889_v37, %v9888_v46  ;;  %v9897_v9 = vadd.f32 %v9896_v18, %v9895_v58  ;;  %v9904_v29 = vadd.f32 %v9903_v11, %v9902_v43  ;;  %11511 = vmatpush3.bf16.msra.mxu1 %v11510_v56 }
0x35aa   : > { %v9910_v61 = vrot.slane %v9909_v45, 2  ;;  %v9917_v39 = vrot.slane %v9916_v3, 2  ;;  %v9924_v49 = vrot.slane %v9923_v52, 2  ;;  %v9931_v36 = vrot.slane %v9930_v42, 2 }
0x35ab   : > { %v9884_v41 = vrot.slane %v9883_v54, 1  ;;  %v9891_v38 = vrot.slane %v9890_v26, 1  ;;  %v9898_v32 = vrot.slane %v9897_v9, 1  ;;  %v9905_v20 = vrot.slane %v9904_v29, 1  ;;  %11310 = vmatmul.mubr.msk.f32.gmra.mrb[92].mxu1 %vm6042_vm0, %v15083_v19 }
0x35ac   : > { %v9911_v6 = vadd.f32 %v9910_v61, %v9909_v45  ;;  %v9918_v22 = vadd.f32 %v9917_v39, %v9916_v3  ;;  %11312 = vmatprep.mubr.msk.f32.mxu1 %vm6042_vm0, %v15085_v28  ;;  %v9925_v4 = vadd.f32 %v9924_v49, %v9923_v52  ;;  %v9932_v5 = vadd.f32 %v9931_v36, %v9930_v42 }
0x35ad   : > { %v9885_v60 = vadd.f32 %v9884_v41, %v9883_v54  ;;  %v9892_v56 = vadd.f32 %v9891_v38, %v9890_v26  ;;  %v9899_v44 = vadd.f32 %v9898_v32, %v9897_v9  ;;  %v9906_v21 = vadd.f32 %v9905_v20, %v9904_v29  ;;  %v10711_v29 = vld [vmem:[#allocation16] ss:$0 sm:$0xff] }
0x35ae   : > { %v9912_v47 = vrot.slane %v9911_v6, 1  ;;  %v9919_v23 = vrot.slane %v9918_v22, 1  ;;  %v9926_v34 = vrot.slane %v9925_v4, 1  ;;  %v9933_v40 = vrot.slane %v9932_v5, 1 }
0x35af   : > { %v9936_v8 = vmul.f32 0.125, %v9885_v60  ;;  %v9937_v17 = vmul.f32 0.125, %v9892_v56  ;;  %v9938_v15 = vmul.f32 0.125, %v9899_v44  ;;  %11313 = vmatmul.mubr.msk.f32.gmra.mrb[94].mxu1 %vm6042_vm0, %v15087_v48  ;;  %v9939_v46 = vmul.f32 0.125, %v9906_v21 }
0x35b0   : > { %v9913_v2 = vadd.f32 %v9912_v47, %v9911_v6  ;;  %v9920_v1 = vadd.f32 %v9919_v23, %v9918_v22  ;;  %11334 = vmatprep.mubr.msk.f32.mxu1 %vm12767_vm8, %v15515_v25  ;;  %v9927_v0 = vadd.f32 %v9926_v34, %v9925_v4  ;;  %v9934_v58 = vadd.f32 %v9933_v40, %v9932_v5 }
0x35b1   : > { %v10047_v57 = vsel %vm6340_vm9, %v9937_v17, %v9936_v8 }
0x35b2   : > { %v9940_v43 = vmul.f32 0.125, %v9913_v2  ;;  %v10048_v7 = vsel %vm6343_vm10, %v9938_v15, %v10047_v57  ;;  %v9941_v13 = vmul.f32 0.125, %v9920_v1  ;;  %v9942_v63 = vmul.f32 0.125, %v9927_v0 }
0x35b3   : > { %v10049_v53 = vsel %vm6346_vm11, %v9939_v46, %v10048_v7  ;;  %v9943_v37 = vmul.f32 0.125, %v9934_v58  ;;  %v15523_v58 = vlaneseq  ;;  %v15524_v7 = vld [vmem:[#allocation28_spill] sm:$0xff] }
0x35b4   : > { %v10050_v27 = vsel %vm6349_vm12, %v9940_v43, %v10049_v53 }
0x35b5   : > { %v10051_v18 = vsel %vm6352_vm13, %v9941_v13, %v10050_v27  ;;  %v9312_v43 = vand.u32 127, %v15523_v58 }
0x35b6   : > { %v10052_v11 = vsel %vm6355_vm14, %v9942_v63, %v10051_v18 }
0x35b7   : > { %v10053_v45 = vsel %vm15522_vm5, %v9943_v37, %v10052_v11  ;;  %v15144_v13 = vsub.s32 %v9312_v43, %v15524_v7  ;;  %vm15534_vm5 = vmmov %vm15533_vm4 }
0x35b8   : > { %11335 = vmatmul.mubr.msk.f32.vlgmr.msra.gmra.mrb[96].mxu1 %vm6042_vm0, %v10053_v45 }
0x3676   : > { %v11305_v3 = vpop.f32.mrb[88].mxu1 }
0x3677   : > { %12414 = vtanh.f32 %v11305_v3  ;;  %v9448_v52 = vpop.f32.mrb[89].mxu1 }
0x3678   : > { %12416 = vtanh.f32 %v9448_v52 }
0x367a   : > { %v11308_v42 = vpop.f32.mrb[90].mxu1 }
0x367b   : > { %12418 = vtanh.f32 %v11308_v42  ;;  %v9458_v54 = vpop.f32.mrb[91].mxu1 }
0x367c   : > { %12420 = vtanh.f32 %v9458_v54 }
0x367e   : > { %v11311_v26 = vpop.f32.mrb[92].mxu1 }
0x367f   : > { %12422 = vtanh.f32 %v11311_v26  ;;  %v9468_v9 = vpop.f32.mrb[93].mxu1 }
0x3680   : > { %12424 = vtanh.f32 %v9468_v9 }
0x3681   : > { %v12415_v61 = vpop.eup %12414 }
0x3682   : > { %v12417_v39 = vpop.eup %12416  ;;  %v11314_v49 = vpop.f32.mrb[94].mxu1  ;;  %v9503_v36 = vmul.f32 %v12415_v61, %v10711_v29 }
0x3683   : > { %12426 = vtanh.f32 %v11314_v49  ;;  %v9478_v41 = vpop.f32.mrb[95].mxu1  ;;  %v9502_v38 = vmul.f32 %v12417_v39, %v10711_v29 }
0x3684   : > { %12428 = vtanh.f32 %v9478_v41  ;;  %v9513_v32 = vsel %vm6042_vm0, %v9503_v36, 0.0 }
0x3685   : > { %v12419_v20 = vpop.eup %12418  ;;  %9514 = vadd.xlane.f32.xlu0 %v9513_v32  ;;  %v9510_v6 = vsel %vm6042_vm0, %v9502_v38, 0.0 }
0x3686   : > { %v12421_v22 = vpop.eup %12420  ;;  %9511 = vadd.xlane.f32.xlu1 %v9510_v6  ;;  %v9505_v4 = vmul.f32 %v12419_v20, %v10711_v29 }
0x3687   : > { %v9504_v5 = vmul.f32 %v12421_v22, %v10711_v29 }
0x3688   : > { %v9519_v60 = vsel %vm6042_vm0, %v9505_v4, 0.0  ;;  %v12772_v4 = vmov 0  }
0x3689   : > { %v12423_v56 = vpop.eup %12422  ;;  %v9516_v44 = vsel %vm6042_vm0, %v9504_v5, 0.0  ;;  %11733 = vset.pattern.permute.xlu0 %v12772_v4  ;;  %11732 = vset.pattern.permute.xlu1 %v12772_v4  ;;  %v9596_v5 = vsub.s32 2, %v15524_v7 }
0x368a   : > { %v12425_v21 = vpop.eup %12424  ;;  %9520 = vadd.xlane.f32.xlu1 %v9519_v60  ;;  %9517 = vadd.xlane.f32.xlu0 %v9516_v44  ;;  %v9507_v47 = vmul.f32 %v12423_v56, %v10711_v29  ;;  %v9600_v60 = vsub.s32 3, %v15524_v7  ;;  %v15527_v44 = vld [vmem:[#allocation29_spill] sm:$0xff] }
0x368b   : > { %v9506_v23 = vmul.f32 %v12425_v21, %v10711_v29  ;;  %v15136_v34 = vpop.f32.mrb[96].mxu1 }
0x368c   : > { %v9525_v40 = vsel %vm6042_vm0, %v9507_v47, 0.0  ;;  %v11336_v17 = vpop.f32.mrb[97].mxu1  ;;  %v15528_v47 = vld [vmem:[#allocation30_spill] sm:$0xff] }
0x368d   : > { %v12427_v8 = vpop.eup %12426  ;;  %v9522_v15 = vsel %vm6042_vm0, %v9506_v23, 0.0 }
0x368e   : > { %v12429_v2 = vpop.eup %12428  ;;  %9526 = vadd.xlane.f32.xlu1 %v9525_v40  ;;  %9523 = vadd.xlane.f32.xlu0 %v9522_v15  ;;  %v9509_v1 = vmul.f32 %v12427_v8, %v10711_v29  ;;  %v9604_v8 = vsub.s32 4, %v15524_v7 }
0x368f   : > { %v9508_v0 = vmul.f32 %v12429_v2, %v10711_v29 }
0x3690   : > { %v9531_v57 = vsel %vm6042_vm0, %v9509_v1, 0.0 }
0x3691   : > { %v9528_v46 = vsel %vm6042_vm0, %v9508_v0, 0.0 }
0x3692   : > { %9532 = vadd.xlane.f32.xlu1 %v9531_v57  ;;  %9529 = vadd.xlane.f32.xlu0 %v9528_v46  ;;  %v9608_v46 = vsub.s32 5, %v15524_v7 }
0x3712   : > { %v9515_v53 = vpop.xlane.xlu0 %9514 }
0x3713   : > { %v9512_v63 = vpop.xlane.xlu1 %9511  ;;  %v9549_v27 = vrot.slane %v9515_v53, %v15144_v13 }
0x3714   : > { %v9545_v37 = vrot.slane %v9512_v63, %v15144_v13 }
0x3716   : > { %v9574_v3 = vsel %vm6340_vm9, %v9549_v27, %v9545_v37  ;;  %v9612_v37 = vsub.s32 6, %v15524_v7 }
0x3717   : > { %v9521_v18 = vpop.xlane.xlu1 %9520  ;;  %v9518_v11 = vpop.xlane.xlu0 %9517 }
0x3718   : > { %v9553_v45 = vrot.slane %v9518_v11, %v15144_v13  ;;  %v9557_v52 = vrot.slane %v9521_v18, %v15144_v13 }
0x371a   : > { %v9575_v42 = vsel %vm6343_vm10, %v9553_v45, %v9574_v3 }
0x371b   : > { %v9527_v54 = vpop.xlane.xlu1 %9526  ;;  %v9524_v26 = vpop.xlane.xlu0 %9523  ;;  %v9576_v61 = vsel %vm6346_vm11, %v9557_v52, %v9575_v42 }
0x371c   : > { %v9561_v9 = vrot.slane %v9524_v26, %v15144_v13  ;;  %v9565_v29 = vrot.slane %v9527_v54, %v15144_v13 }
0x371e   : > { %v9577_v39 = vsel %vm6349_vm12, %v9561_v9, %v9576_v61 }
0x371f   : > { %v9533_v49 = vpop.xlane.xlu1 %9532  ;;  %v9530_v36 = vpop.xlane.xlu0 %9529  ;;  %v9578_v32 = vsel %vm6352_vm13, %v9565_v29, %v9577_v39 }
0x3720   : > { %v9573_v41 = vrot.slane %v9533_v49, %v15144_v13  ;;  %v9569_v38 = vrot.slane %v9530_v36, %v15144_v13 }
0x3722   : > { %v9579_v20 = vsel %vm6355_vm14, %v9569_v38, %v9578_v32 }
0x3723   : > { %v9580_v6 = vsel %vm15525_vm15, %v9573_v41, %v9579_v20  ;;  %vm15535_vm15 = vmmov %vm15533_vm4 }
0x3724   : > { %v9582_v22 = vsel %vm15526_vm1, %v9580_v6, -inf  ;;  %vm15536_vm1 = vmmov %vm15533_vm4 }
0x3725   : > { %9583 = vmax.xlane.f32.xlu0 %v9582_v22 }
0x37b2   : > { %v9584_v56 = vpop.xlane.xlu0 %9583 }
0x37b3   : > { %v9589_v21 = vrot.slane %v9584_v56, %v15527_v44  ;;  %v9593_v23 = vrot.slane %v9584_v56, %v15528_v47  ;;  %v9597_v40 = vrot.slane %v9584_v56, %v9596_v5  ;;  %v9601_v17 = vrot.slane %v9584_v56, %v9600_v60 }
0x37b4   : > { %v9605_v58 = vrot.slane %v9584_v56, %v9604_v8  ;;  %v9609_v45 = vrot.slane %v9584_v56, %v9608_v46 }
0x37b5   : > { %v9626_v15 = vsub.f32 %v9512_v63, %v9589_v21  ;;  %v9627_v2 = vsub.f32 %v9515_v53, %v9593_v23  ;;  %v9628_v1 = vsub.f32 %v9518_v11, %v9597_v40  ;;  %v9629_v43 = vsub.f32 %v9521_v18, %v9601_v17 }
0x37b6   : > { %v9630_v3 = vsub.f32 %v9524_v26, %v9605_v58  ;;  %v9616_v63 = vsub.s32 7, %v15524_v7  ;;  %v9613_v11 = vrot.slane %v9584_v56, %v9612_v37  ;;  %v9631_v52 = vsub.f32 %v9527_v54, %v9609_v45  ;;  %v9948_v7 = vld [vmem:[%s15520_s22 + $0x20] sm:$0xff] }
0x37b7   : > { %v9634_v0 = vmul.f32 1.442695, %v9626_v15  ;;  %v9636_v57 = vmul.f32 1.442695, %v9627_v2  ;;  %v9638_v27 = vmul.f32 1.442695, %v9628_v1 }
0x37b8   : > { %v9640_v53 = vmul.f32 1.442695, %v9629_v43  ;;  %v9642_v42 = vmul.f32 1.442695, %v9630_v3  ;;  %v9617_v29 = vrot.slane %v9584_v56, %v9616_v63  ;;  %v9632_v26 = vsub.f32 %v9530_v36, %v9613_v11 }
0x37b9   : > { %12430 = vpow2.f32 %v9634_v0  ;;  %v9644_v61 = vmul.f32 1.442695, %v9631_v52 }
0x37ba   : > { %12432 = vpow2.f32 %v9636_v57  ;;  %v9633_v54 = vsub.f32 %v9533_v49, %v9617_v29  ;;  %v9646_v41 = vmul.f32 1.442695, %v9632_v26 }
0x37bb   : > { %12434 = vpow2.f32 %v9638_v27 }
0x37bc   : > { %12436 = vpow2.f32 %v9640_v53  ;;  %v9648_v32 = vmul.f32 1.442695, %v9633_v54  ;;  %v12480_v53 = vld [vmem:[%s15519_s27] ss:$0 sm:$0xff] }
0x37bd   : > { %12438 = vpow2.f32 %v9642_v42  ;;  %v9088_v11 = vadd.f32 %v12480_v53, %v14918_v24  ;;  %v15230_v24 = vadd.f32 %v12480_v53, %v14920_v33 }
0x37be   : > { %12440 = vpow2.f32 %v9644_v61 }
0x37bf   : > { %12442 = vpow2.f32 %v9646_v41  ;;  %v9126_v41 = vmul.f32 %v9088_v11, %v9088_v11 }
0x37c0   : > { %12444 = vpow2.f32 %v9648_v32  ;;  %v15226_v32 = vadd.f32 %v12480_v53, %v14922_v51 }
0x37c3   : > { %v15180_v18 = vpop.eup %12430 }
0x37c4   : > { %v15182_v9 = vpop.eup %12432  ;;  %9659 = vperm.xlu1 %11732, %v15180_v18  }
0x37c5   : > { %9662 = vperm.xlu0 %11733, %v15182_v9   ;;  %v15188_v39 = vpop.eup %12434 }
0x37c6   : > { %v15191_v38 = vpop.eup %12436 }
0x37c7   : > { %v15194_v20 = vpop.eup %12438 }
0x37c8   : > { %9665 = vperm.xlu1 %11732, %v15188_v39   ;;  %v15197_v36 = vpop.eup %12440 }
0x37c9   : > { %v15200_v6 = vpop.eup %12442 }
0x37ca   : > { %v15203_v49 = vpop.eup %12444 }
0x37cc   : > { %9668 = vperm.xlu1 %11732, %v15191_v38  }
0x37d0   : > { %9671 = vperm.xlu1 %11732, %v15194_v20  }
0x37d4   : > { %9674 = vperm.xlu1 %11732, %v15197_v36  }
0x37d8   : > { %9677 = vperm.xlu1 %11732, %v15200_v6  }
0x37dc   : > { %9680 = vperm.xlu1 %11732, %v15203_v49  }
0x3843   : > { %v9660_v22 = vpop.permute.xlu1 %9659 }
0x3844   : > { %v9663_v23 = vpop.permute.xlu0 %9662  ;;  %v9685_v15 = vrot.slane %v9660_v22, %v15144_v13 }
0x3845   : > { %v9689_v17 = vrot.slane %v9663_v23, %v15144_v13  ;;  %v15238_v23 = vadd.f32 %v12480_v53, %v14928_v62 }
0x3847   : > { %v9666_v4 = vpop.permute.xlu1 %9665  ;;  %v9714_v58 = vsel %vm6340_vm9, %v9689_v17, %v9685_v15  ;;  %v9130_v33 = vmul.f32 %v15238_v23, %v15238_v23 }
0x3848   : > { %v9693_v2 = vrot.slane %v9666_v4, %v15144_v13  ;;  %v9128_v4 = vmul.f32 %v15226_v32, %v15226_v32 }
0x3849   : > { %v9146_v62 = vsel %vm15534_vm5, %v9130_v33, 0.0 }
0x384a   : > { %v9715_v27 = vsel %vm6343_vm10, %v9693_v2, %v9714_v58  ;;  %v9140_v51 = vsel %vm15532_vm7, %v9128_v4, 0.0  ;;  %v15250_v2 = vadd.f32 %v12480_v53, %v14934_v55  ;;  %vm15538_vm7 = vmmov %vm15536_vm1 }
0x384b   : > { %v9669_v56 = vpop.permute.xlu1 %9668 }
0x384c   : > { %v9697_v1 = vrot.slane %v9669_v56, %v15144_v13  ;;  %v9134_v56 = vsel %vm15531_vm6, %v9126_v41, 0.0 }
0x384e   : > { %v9716_v3 = vsel %vm6346_vm11, %v9697_v1, %v9715_v27  ;;  %v15254_v1 = vadd.f32 %v12480_v53, %v14932_v50 }
0x384f   : > { %v9672_v21 = vpop.permute.xlu1 %9671 }
0x3850   : > { %v9701_v0 = vrot.slane %v9672_v21, %v15144_v13  ;;  %v9129_v21 = vmul.f32 %v15230_v24, %v15230_v24 }
0x3852   : > { %v9717_v52 = vsel %vm6349_vm12, %v9701_v0, %v9716_v3  ;;  %v9143_v17 = vsel %vm15533_vm4, %v9129_v21, 0.0 }
0x3853   : > { %v9675_v40 = vpop.permute.xlu1 %9674 }
0x3854   : > { %v9705_v43 = vrot.slane %v9675_v40, %v15144_v13  ;;  %v15242_v40 = vadd.f32 %v12480_v53, %v14926_v12  ;;  %v9132_v12 = vmul.f32 %v15250_v2, %v15250_v2 }
0x3856   : > { %v9718_v29 = vsel %vm6352_vm13, %v9705_v43, %v9717_v52  ;;  %v9131_v15 = vmul.f32 %v15242_v40, %v15242_v40  ;;  %v9152_v58 = vsel %vm15536_vm1, %v9132_v12, 0.0 }
0x3857   : > { %v9678_v57 = vpop.permute.xlu1 %9677 }
0x3858   : > { %v9709_v45 = vrot.slane %v9678_v57, %v15144_v13  ;;  %v9149_v0 = vsel %vm15535_vm15, %v9131_v15, 0.0  ;;  %v9133_v57 = vmul.f32 %v15254_v1, %v15254_v1 }
0x385a   : > { %v9719_v61 = vsel %vm6355_vm14, %v9709_v45, %v9718_v29 }
0x385b   : > { %v9681_v42 = vpop.permute.xlu1 %9680 }
0x385c   : > { %v9713_v26 = vrot.slane %v9681_v42, %v15144_v13 }
0x385e   : > { %v9720_v54 = vsel %vm15529_vm2, %v9713_v26, %v9719_v61  ;;  %vm15537_vm2 = vmmov %vm15536_vm1 }
0x385f   : > { %v9722_v22 = vsel %vm15530_vm3, %v9720_v54, 0.0  ;;  %v9155_v55 = vsel %vm15537_vm2, %v9133_v57, 0.0 }
0x3860   : > { %9723 = vadd.xlane.f32.xlu1 %v9722_v22 }
0x3864   : > { %9135 = vadd.xlane.f32.xlu1 %v9134_v56  ;;  %v15269_v56 = vld [vmem:[#allocation13] ss:$0 sm:$0xff] }
0x3868   : > { %9141 = vadd.xlane.f32.xlu1 %v9140_v51 }
0x386c   : > { %9144 = vadd.xlane.f32.xlu1 %v9143_v17 }
0x3870   : > { %9147 = vadd.xlane.f32.xlu1 %v9146_v62 }
0x3874   : > { %9150 = vadd.xlane.f32.xlu1 %v9149_v0 }
0x3878   : > { %9153 = vadd.xlane.f32.xlu1 %v9152_v58 }
0x387c   : > { %9156 = vadd.xlane.f32.xlu1 %v9155_v55 }
0x38ed   : > { %v9724_v43 = vpop.xlane.xlu1 %9723 }
0x38ee   : > { %12446 = vrcp.f32 %v9724_v43  ;;  %v9951_v43 = vld [vmem:[%s15520_s22 + $0x38] sm:$0xff] }
0x38f1   : > { %v9136_v27 = vpop.xlane.xlu1 %9135 }
0x38f2   : > { %12448 = vrsqrt.f32 %v9136_v27  ;;  %v9214_v50 = vadd.f32 1.0, %v9136_v27  ;;  %vm9160_vm3 = vcmp.eq.f32.partialorder %v9136_v27, inf  ;;  %v9163_v26 = vand.u32 2147483648, %v9136_v27 }
0x38f3   : > { %vm9162_vm6 = vcmp.eq.f32.partialorder %v9136_v27, 0.0 }
0x38f4   : > { %12450 = vrcp.f32 %v9214_v50 }
0x38f5   : > { %v9142_v51 = vpop.xlane.xlu1 %9141 }
0x38f6   : > { %12452 = vrsqrt.f32 %v9142_v51  ;;  %vm9174_vm4 = vcmp.eq.f32.partialorder %v9142_v51, inf  ;;  %vm9176_vm5 = vcmp.eq.f32.partialorder %v9142_v51, 0.0 }
0x38f8   : > { %v12447_v45 = vpop.eup %12446 }
0x38f9   : > { %v9730_v3 = vrot.slane %v12447_v45, %v15527_v44  ;;  %v9734_v52 = vrot.slane %v12447_v45, %v15528_v47  ;;  %v9738_v54 = vrot.slane %v12447_v45, %v9596_v5  ;;  %v9742_v21 = vrot.slane %v12447_v45, %v9600_v60  ;;  %v15279_v15 = vpop.xlane.xlu1 %9144 }
0x38fa   : > { %v9746_v17 = vrot.slane %v12447_v45, %v9604_v8  ;;  %v9750_v60 = vrot.slane %v12447_v45, %v9608_v46  ;;  %v9754_v62 = vrot.slane %v12447_v45, %v9612_v37  ;;  %v9758_v8 = vrot.slane %v12447_v45, %v9616_v63  ;;  %v9949_v63 = vld [vmem:[%s15520_s22 + $0x28] sm:$0xff] }
0x38fb   : > { %v9767_v53 = vmul.f32 %v15180_v18, %v9730_v3  ;;  %v9768_v61 = vmul.f32 %v15182_v9, %v9734_v52  ;;  %v9769_v47 = vmul.f32 %v15188_v39, %v9738_v54  ;;  %v9770_v33 = vmul.f32 %v15191_v38, %v9742_v21 }
0x38fc   : > { %v12449_v42 = vpop.eup %12448  ;;  %v9771_v39 = vmul.f32 %v15194_v20, %v9746_v17  ;;  %v9773_v38 = vmul.f32 %v15200_v6, %v9754_v62  ;;  %v9774_v20 = vmul.f32 %v15203_v49, %v9758_v8  ;;  %v9950_v6 = vld [vmem:[%s15520_s22 + $0x30] sm:$0xff]  ;;  %v11501_v49 = vpack.c.bf16 %v9949_v63, %v9948_v7  ;;  %v10702_v8 = vld [vmem:[#allocation4] ss:$0 sm:$0xff] }
0x38fd   : > { %9777 = vperm.xlu0 %11733, %v9767_v53   ;;  %v9159_v29 = vmul.f32 %v12449_v42, %v9136_v27  ;;  %v9148_v12 = vpop.xlane.xlu1 %9147  ;;  %v11504_v3 = vpack.c.bf16 %v9951_v43, %v9950_v6  ;;  %v9177_v52 = vand.u32 2147483648, %v9142_v51 }
0x38fe   : > { %v12451_v22 = vpop.eup %12450  ;;  %12454 = vrsqrt.f32 %v9148_v12  ;;  %v9218_v37 = vadd.f32 1.0, %v9148_v12  ;;  %11502 = vmatpush3.bf16.msra.mxu0 %v11501_v49  ;;  %vm9188_vm15 = vcmp.eq.f32.partialorder %v9148_v12, inf  ;;  %v9191_v54 = vand.u32 2147483648, %v9148_v12 }
0x38ff   : > { %v9161_v41 = vsel %vm9160_vm3, %v9136_v27, %v9159_v29  ;;  %11503 = vmatprep.subr.bf16.mxu0 %v15516_v35  ;;  %vm9190_vm1 = vcmp.eq.f32.partialorder %v9148_v12, 0.0 }
0x3900   : > { %v9164_v4 = vsel %vm9162_vm6, %v9163_v26, %v9161_v41  ;;  %v12453_v57 = vpop.eup %12452  ;;  %vm15539_vm6 = vmmov %vm15538_vm7 }
0x3901   : > { %9782 = vperm.xlu0 %11733, %v9768_v61   ;;  %v9230_v44 = vmul.f32 %v12451_v22, %v9164_v4  ;;  %v15290_v0 = vpop.xlane.xlu1 %9150  ;;  %v9173_v58 = vmul.f32 %v12453_v57, %v9142_v51 }
0x3902   : > { %11505 = vmatpush3.bf16.msra.mxu0 %v11504_v3 }
0x3903   : > { %v9238_v18 = vmul.f32 %v9230_v44, %v9088_v11  ;;  %v9772_v11 = vmul.f32 %v15197_v36, %v9750_v60  ;;  %v9216_v36 = vadd.f32 1.0, %v9142_v51  ;;  %v9175_v50 = vsel %vm9174_vm4, %v9142_v51, %v9173_v58  ;;  %11512 = vmatprep.subr.bf16.mxu0 %v15516_v35  ;;  %vm15541_vm4 = vmmov %vm15539_vm6 }
0x3904   : > { %v9178_v42 = vsel %vm9176_vm5, %v9177_v52, %v9175_v50  ;;  %vm15542_vm5 = vmmov %vm15541_vm4 }
0x3905   : > { %9787 = vperm.xlu0 %11733, %v9769_v47   ;;  %v9253_v9 = vmul.f32 %v15269_v56, %v9238_v18  ;;  %v9154_v46 = vpop.xlane.xlu1 %9153  ;;  %v9127_v18 = vmul.f32 %v14916_v59, %v14916_v59 }
0x3906   : > { %12456 = vrsqrt.f32 %v9154_v46  ;;  %v9220_v27 = vadd.f32 1.0, %v9154_v46  ;;  %vm9202_vm2 = vcmp.eq.f32.partialorder %v9154_v46, inf  ;;  %v9205_v47 = vand.u32 2147483648, %v9154_v46 }
0x3907   : > { %v9261_v5 = vsel %vm15538_vm7, %v9253_v9, 0.0  ;;  %12458 = vrcp.f32 %v9216_v36  ;;  %vm9204_vm3 = vcmp.eq.f32.partialorder %v9154_v46, 0.0  ;;  %vm15540_vm7 = vmmov %vm15539_vm6 }
0x3908   : > { %9262 = vadd.xlane.f32.xlu1 %v9261_v5  ;;  %v12455_v55 = vpop.eup %12454  ;;  %12460 = vrcp.f32 %v9218_v37 }
0x3909   : > { %9792 = vperm.xlu0 %11733, %v9770_v33   ;;  %v9187_v45 = vmul.f32 %v12455_v55, %v9148_v12  ;;  %12462 = vrcp.f32 %v9220_v27  ;;  %v9137_v33 = vsel %vm15539_vm6, %v9127_v18, 0.0  ;;  %vm9197_vm6 = vcmp.eq.f32.partialorder %v15290_v0, 0.0 }
0x390a   : > { %12464 = vrsqrt.f32 %v15279_v15 }
0x390b   : > { %v9189_v29 = vsel %vm9188_vm15, %v9148_v12, %v9187_v45  ;;  %vm15543_vm15 = vcmask 1047559   ;;  %12466 = vrsqrt.f32 %v15290_v0 }
0x390c   : > { %v9192_v22 = vsel %vm9190_vm1, %v9191_v54, %v9189_v29  ;;  %vm9195_vm1 = vcmp.eq.f32.partialorder %v15290_v0, inf }
0x390d   : > { %9797 = vperm.xlu0 %11733, %v9771_v39  }
0x3910   : > { %v12457_v53 = vpop.eup %12456 }
0x3911   : > { %9802 = vperm.xlu0 %11733, %v9772_v11   ;;  %v9201_v26 = vmul.f32 %v12457_v53, %v9154_v46  ;;  %v12459_v61 = vpop.eup %12458 }
0x3912   : > { %v9232_v41 = vmul.f32 %v12459_v61, %v9178_v42  ;;  %v12461_v44 = vpop.eup %12460 }
0x3913   : > { %v9203_v4 = vsel %vm9202_vm2, %v9154_v46, %v9201_v26  ;;  %v9234_v51 = vmul.f32 %v12461_v44, %v9192_v22  ;;  %v12463_v5 = vpop.eup %12462 }
0x3914   : > { %v9240_v21 = vmul.f32 %v9232_v41, %v15226_v32  ;;  %v9206_v9 = vsel %vm9204_vm3, %v9205_v47, %v9203_v4 }
0x3915   : > { %9807 = vperm.xlu0 %11733, %v9773_v38   ;;  %v9242_v17 = vmul.f32 %v9234_v51, %v15238_v23  ;;  %v9236_v39 = vmul.f32 %v12463_v5, %v9206_v9 }
0x3916   : > { %v9255_v35 = vmul.f32 %v15269_v56, %v9240_v21 }
0x3917   : > { %v9257_v11 = vmul.f32 %v15269_v56, %v9242_v17  ;;  %v9244_v62 = vmul.f32 %v9236_v39, %v15250_v2 }
0x3918   : > { %v9267_v60 = vsel %vm15540_vm7, %v9255_v35, 0.0 }
0x3919   : > { %9812 = vperm.xlu0 %11733, %v9774_v20   ;;  %v9273_v32 = vsel %vm15541_vm4, %v9257_v11, 0.0  ;;  %v9259_v12 = vmul.f32 %v15269_v56, %v9244_v62 }
0x391b   : > { %v9279_v38 = vsel %vm15542_vm5, %v9259_v12, 0.0 }
0x3938   : > { %9138 = vadd.xlane.f32.xlu0 %v9137_v33 }
0x393c   : > { %9268 = vadd.xlane.f32.xlu0 %v9267_v60 }
0x3940   : > { %9274 = vadd.xlane.f32.xlu0 %v9273_v32 }
0x3944   : > { %9280 = vadd.xlane.f32.xlu0 %v9279_v38 }
0x395a   : > { %9292 = vperm.xlu0 %11733, %v10702_v8  }
0x397c   : > { %v9778_v23 = vpop.permute.xlu0 %9777 }
0x397d   : > { %v9815_v57 = vmul.f32 %v9778_v23, %v15073_v16 }
0x397f   : > { %v9823_v7 = vsel %vm6042_vm0, %v9815_v57, 0.0 }
0x3980   : > { %v9783_v20 = vpop.permute.xlu0 %9782  ;;  %v9824_v27 = vrot.slane %v9823_v7, 4 }
0x3981   : > { %v9816_v46 = vmul.f32 %v9783_v20, %v15075_v30 }
0x3982   : > { %v9825_v53 = vadd.f32 %v9824_v27, %v9823_v7 }
0x3983   : > { %v9830_v37 = vsel %vm6042_vm0, %v9816_v46, 0.0 }
0x3984   : > { %v9788_v36 = vpop.permute.xlu0 %9787  ;;  %v9831_v6 = vrot.slane %v9830_v37, 4  ;;  %v9826_v22 = vrot.slane %v9825_v53, 2 }
0x3985   : > { %v9817_v2 = vmul.f32 %v9788_v36, %v15077_v10 }
0x3986   : > { %v9832_v45 = vadd.f32 %v9831_v6, %v9830_v37  ;;  %v9827_v33 = vadd.f32 %v9826_v22, %v9825_v53  ;;  %v9219_v22 = vadd.f32 1.0, %v15290_v0 }
0x3987   : > { %v9837_v58 = vsel %vm6042_vm0, %v9817_v2, 0.0 }
0x3988   : > { %v9793_v55 = vpop.permute.xlu0 %9792  ;;  %v9838_v49 = vrot.slane %v9837_v58, 4 }
0x3989   : > { %v9818_v63 = vmul.f32 %v9793_v55, %v15079_v14  ;;  %v9833_v14 = vrot.slane %v9832_v45, 2 }
0x398a   : > { %v9839_v10 = vadd.f32 %v9838_v49, %v9837_v58 }
0x398b   : > { %v9844_v43 = vsel %vm6042_vm0, %v9818_v63, 0.0  ;;  %v9834_v21 = vadd.f32 %v9833_v14, %v9832_v45  ;;  %v9217_v14 = vadd.f32 1.0, %v15279_v15 }
0x398c   : > { %v9845_v30 = vrot.slane %v9844_v43, 4  ;;  %v9798_v50 = vpop.permute.xlu0 %9797  ;;  %v9840_v54 = vrot.slane %v9839_v10, 2 }
0x398d   : > { %v9819_v16 = vmul.f32 %v9798_v50, %v15081_v31  ;;  %v9835_v62 = vrot.slane %v9834_v21, 1 }
0x398e   : > { %v9846_v52 = vadd.f32 %v9845_v30, %v9844_v43  ;;  %v9841_v9 = vadd.f32 %v9840_v54, %v9839_v10  ;;  %v12465_v54 = vpop.eup %12464 }
0x398f   : > { %v9851_v3 = vsel %vm6042_vm0, %v9819_v16, 0.0  ;;  %v9836_v57 = vadd.f32 %v9835_v62, %v9834_v21  ;;  %v9184_v21 = vand.u32 2147483648, %v15279_v15 }
0x3990   : > { %v9852_v42 = vrot.slane %v9851_v3, 4  ;;  %v9803_v29 = vpop.permute.xlu0 %9802  ;;  %v9847_v4 = vrot.slane %v9846_v52, 2  ;;  %v9842_v38 = vrot.slane %v9841_v9, 1 }
0x3991   : > { %v9820_v26 = vmul.f32 %v9803_v29, %v15083_v19 }
0x3992   : > { %v9853_v61 = vadd.f32 %v9852_v42, %v9851_v3  ;;  %v9848_v35 = vadd.f32 %v9847_v4, %v9846_v52  ;;  %v9843_v55 = vadd.f32 %v9842_v38, %v9841_v9  ;;  %v9180_v4 = vmul.f32 %v12465_v54, %v15279_v15 }
0x3993   : > { %v9858_v41 = vsel %vm6042_vm0, %v9820_v26, 0.0  ;;  %v9157_v26 = vpop.xlane.xlu1 %9156 }
0x3994   : > { %v9859_v44 = vrot.slane %v9858_v41, 4  ;;  %v9808_v47 = vpop.permute.xlu0 %9807  ;;  %v9854_v31 = vrot.slane %v9853_v61, 2  ;;  %v9849_v23 = vrot.slane %v9848_v35, 1  ;;  %12468 = vrsqrt.f32 %v9157_v26 }
0x3995   : > { %v9821_v18 = vmul.f32 %v9808_v47, %v15085_v28  ;;  %v9828_v28 = vrot.slane %v9827_v33, 1  ;;  %vm9209_vm7 = vcmp.eq.f32.partialorder %v9157_v26, inf  ;;  %vm9211_vm4 = vcmp.eq.f32.partialorder %v9157_v26, 0.0 }
0x3996   : > { %v9860_v51 = vadd.f32 %v9859_v44, %v9858_v41  ;;  %v9855_v60 = vadd.f32 %v9854_v31, %v9853_v61  ;;  %v9850_v63 = vadd.f32 %v9849_v23, %v9848_v35  ;;  %v12467_v44 = vpop.eup %12466 }
0x3997   : > { %v9865_v5 = vsel %vm6042_vm0, %v9821_v18, 0.0  ;;  %v9829_v7 = vadd.f32 %v9828_v28, %v9827_v33  ;;  %v9194_v31 = vmul.f32 %v12467_v44, %v15290_v0  ;;  %v9212_v28 = vand.u32 2147483648, %v9157_v26 }
0x3998   : > { %v9861_v19 = vrot.slane %v9860_v51, 2  ;;  %v9866_v17 = vrot.slane %v9865_v5, 4  ;;  %v9813_v39 = vpop.permute.xlu0 %9812  ;;  %v9856_v36 = vrot.slane %v9855_v60, 1 }
0x3999   : > { %v9822_v11 = vmul.f32 %v9813_v39, %v15087_v48  ;;  %v9960_v43 = vsel %vm6340_vm9, %v9836_v57, %v9829_v7  ;;  %v9196_v33 = vsel %vm9195_vm1, %v15290_v0, %v9194_v31  ;;  %v9198_v39 = vand.u32 2147483648, %v15290_v0 }
0x399a   : > { %v9862_v32 = vadd.f32 %v9861_v19, %v9860_v51  ;;  %v9867_v12 = vadd.f32 %v9866_v17, %v9865_v5  ;;  %v9857_v49 = vadd.f32 %v9856_v36, %v9855_v60  ;;  %v9961_v50 = vsel %vm6343_vm10, %v9843_v55, %v9960_v43 }
0x399b   : > { %v9872_v8 = vsel %vm6042_vm0, %v9822_v11, 0.0  ;;  %v9962_v45 = vsel %vm6346_vm11, %v9850_v63, %v9961_v50  ;;  %v9263_v50 = vpop.xlane.xlu1 %9262 }
0x399c   : > { %v9868_v20 = vrot.slane %v9867_v12, 2  ;;  %v9873_v46 = vrot.slane %v9872_v8, 4  ;;  %v9863_v2 = vrot.slane %v9862_v32, 1  ;;  %v9963_v3 = vsel %vm6349_vm12, %v9857_v49, %v9962_v45  ;;  %v10136_v49 = vld [vmem:[%s15547_s0 + $0x8] sm:$0xff] }
0x399e   : > { %v9869_v37 = vadd.f32 %v9868_v20, %v9867_v12  ;;  %v9874_v58 = vadd.f32 %v9873_v46, %v9872_v8  ;;  %v9864_v27 = vadd.f32 %v9863_v2, %v9862_v32  ;;  %v12469_v18 = vpop.eup %12468  ;;  %v9199_v32 = vsel %vm9197_vm6, %v9198_v39, %v9196_v33  ;;  %v10714_v39 = vld [vmem:[#allocation18] ss:$0 sm:$0xff] }
0x399f   : > { %v9208_v35 = vmul.f32 %v12469_v18, %v9157_v26 }
0x39a0   : > { %v9870_v6 = vrot.slane %v9869_v37, 1  ;;  %v9875_v48 = vrot.slane %v9874_v58, 2  ;;  %v9964_v53 = vsel %vm6352_vm13, %v9864_v27, %v9963_v3 }
0x39a1   : > { %v9210_v38 = vsel %vm9209_vm7, %v9157_v26, %v9208_v35 }
0x39a2   : > { %v9876_v30 = vadd.f32 %v9875_v48, %v9874_v58  ;;  %v9871_v16 = vadd.f32 %v9870_v6, %v9869_v37  ;;  %v9213_v36 = vsel %vm9211_vm4, %v9212_v28, %v9210_v38 }
0x39a4   : > { %v9877_v10 = vrot.slane %v9876_v30, 1  ;;  %v9965_v42 = vsel %vm6355_vm14, %v9871_v16, %v9964_v53 }
0x39a6   : > { %v9878_v52 = vadd.f32 %v9877_v10, %v9876_v30 }
0x39a8   : > { %v9966_v29 = vsel %vm15543_vm15, %v9878_v52, %v9965_v42  ;;  %vm15544_vm15 = vmmov %vm15542_vm5 }
0x39a9   : > { %11324 = vmatmul.mubr.msk.f32.vlgmr.msra.gmra.mrb[40].mxu0 %vm6042_vm0, %v9966_v29  ;;  %vm9183_vm0 = vcmp.eq.f32.partialorder %v15279_v15, 0.0 }
0x39aa   : > { %11341 = vmatprep.mubr.msk.f32.mxu0 %vm12767_vm8, %v15515_v25  ;;  %v9221_v25 = vadd.f32 1.0, %v9157_v26  ;;  %vm9181_vm8 = vcmp.eq.f32.partialorder %v15279_v15, inf }
0x39ab   : > { %v9182_v47 = vsel %vm9181_vm8, %v15279_v15, %v9180_v4  ;;  %vm15545_vm8 = vmmov %vm15542_vm5 }
0x39ac   : > { %v9185_v9 = vsel %vm9183_vm0, %v9184_v21, %v9182_v47  ;;  %vm15546_vm0 = vmmov %vm15542_vm5 }
0x39c5   : > { %v9139_v61 = vpop.xlane.xlu0 %9138 }
0x39c6   : > { %12470 = vrsqrt.f32 %v9139_v61  ;;  %v9215_v41 = vadd.f32 1.0, %v9139_v61  ;;  %vm9167_vm2 = vcmp.eq.f32.partialorder %v9139_v61, inf  ;;  %v9170_v17 = vand.u32 2147483648, %v9139_v61 }
0x39c7   : > { %12472 = vrcp.f32 %v9217_v14  ;;  %vm9169_vm3 = vcmp.eq.f32.partialorder %v9139_v61, 0.0 }
0x39c8   : > { %12474 = vrcp.f32 %v9215_v41 }
0x39c9   : > { %12476 = vrcp.f32 %v9219_v22 }
0x39ca   : > { %12478 = vrcp.f32 %v9221_v25 }
0x39d0   : > { %v12471_v51 = vpop.eup %12470 }
0x39d1   : > { %v9166_v5 = vmul.f32 %v12471_v51, %v9139_v61  ;;  %v12473_v19 = vpop.eup %12472 }
0x39d2   : > { %v9233_v11 = vmul.f32 %v12473_v19, %v9185_v9  ;;  %v12475_v15 = vpop.eup %12474 }
0x39d3   : > { %v9168_v60 = vsel %vm9167_vm2, %v9139_v61, %v9166_v5  ;;  %v12477_v8 = vpop.eup %12476 }
0x39d4   : > { %v9171_v62 = vsel %vm9169_vm3, %v9170_v17, %v9168_v60  ;;  %v9241_v20 = vmul.f32 %v9233_v11, %v15230_v24  ;;  %v9235_v46 = vmul.f32 %v12477_v8, %v9199_v32  ;;  %v12479_v2 = vpop.eup %12478  ;;  %v10715_v32 = vld [vmem:[#allocation19] ss:$0 sm:$0xff] }
0x39d5   : > { %v9231_v12 = vmul.f32 %v12475_v15, %v9171_v62  ;;  %v9237_v55 = vmul.f32 %v12479_v2, %v9213_v36 }
0x39d6   : > { %v9256_v37 = vmul.f32 %v15269_v56, %v9241_v20  ;;  %v9243_v58 = vmul.f32 %v9235_v46, %v15242_v40  ;;  %v10135_v40 = vld [vmem:[%s15547_s0] sm:$0xff] }
0x39d7   : > { %v9239_v23 = vmul.f32 %v9231_v12, %v14916_v59  ;;  %v9245_v24 = vmul.f32 %v9237_v55, %v15254_v1  ;;  %v11513_v43 = vpack.c.bf16 %v10136_v49, %v10135_v40  ;;  %v9269_v1 = vpop.xlane.xlu0 %9268 }
0x39d8   : > { %v9270_v7 = vsel %vm15544_vm15, %v9256_v37, 0.0  ;;  %v9258_v59 = vmul.f32 %v15269_v56, %v9243_v58 }
0x39d9   : > { %v9254_v57 = vmul.f32 %v15269_v56, %v9239_v23  ;;  %v9260_v6 = vmul.f32 %v15269_v56, %v9245_v24  ;;  %11514 = vmatpush3.bf16.msra.mxu0 %v11513_v43 }
0x39da   : > { %v9276_v63 = vsel %vm15545_vm8, %v9258_v59, 0.0 }
0x39db   : > { %v9264_v0 = vsel %vm15542_vm5, %v9254_v57, 0.0  ;;  %v9282_v48 = vsel %vm15546_vm0, %v9260_v6, 0.0  ;;  %v9275_v27 = vpop.xlane.xlu0 %9274 }
0x39dc   : > { %9265 = vadd.xlane.f32.xlu1 %v9264_v0 }
0x39df   : > { %v9281_v30 = vpop.xlane.xlu0 %9280 }
0x39e0   : > { %9271 = vadd.xlane.f32.xlu1 %v9270_v7 }
0x39e3   : > { %v9293_v56 = vpop.permute.xlu0 %9292 }
0x39e4   : > { %9277 = vadd.xlane.f32.xlu1 %v9276_v63  ;;  %v9295_v16 = vadd.f32 %v9293_v56, %v9263_v50  ;;  %v9297_v3 = vadd.f32 %v9293_v56, %v9269_v1  ;;  %v9299_v14 = vadd.f32 %v9293_v56, %v9275_v27  ;;  %v9301_v25 = vadd.f32 %v9293_v56, %v9281_v30 }
0x39e6   : > { %v9316_v53 = vrot.slane %v9295_v16, %v15144_v13  ;;  %v9324_v61 = vrot.slane %v9297_v3, %v15144_v13  ;;  %v9332_v47 = vrot.slane %v9299_v14, %v15144_v13  ;;  %v9340_v5 = vrot.slane %v9301_v25, %v15144_v13 }
0x39e8   : > { %9283 = vadd.xlane.f32.xlu1 %v9282_v48 }
0x3a69   : > { %v9266_v45 = vpop.xlane.xlu1 %9265 }
0x3a6a   : > { %v9296_v10 = vadd.f32 %v9293_v56, %v9266_v45 }
0x3a6c   : > { %v9320_v52 = vrot.slane %v9296_v10, %v15144_v13 }
0x3a6d   : > { %v9272_v42 = vpop.xlane.xlu1 %9271 }
0x3a6e   : > { %v9345_v29 = vsel %vm6340_vm9, %v9320_v52, %v9316_v53  ;;  %v9298_v26 = vadd.f32 %v9293_v56, %v9272_v42  ;;  %vm15549_vm9 = vcmask 1047559  }
0x3a6f   : > { %v9346_v41 = vsel %vm6343_vm10, %v9324_v61, %v9345_v29  ;;  %vm15550_vm10 = vcmask 64512  }
0x3a70   : > { %v9328_v54 = vrot.slane %v9298_v26, %v15144_v13 }
0x3a71   : > { %v9278_v22 = vpop.xlane.xlu1 %9277 }
0x3a72   : > { %v9347_v4 = vsel %vm6346_vm11, %v9328_v54, %v9346_v41  ;;  %v9300_v44 = vadd.f32 %v9293_v56, %v9278_v22  ;;  %vm15551_vm11 = vmmov %vm15546_vm0 }
0x3a73   : > { %v9348_v18 = vsel %vm6349_vm12, %v9332_v47, %v9347_v4  ;;  %vm10217_vm12 = vcmask 23552  }
0x3a74   : > { %v9336_v31 = vrot.slane %v9300_v44, %v15144_v13 }
0x3a75   : > { %v9284_v21 = vpop.xlane.xlu1 %9283 }
0x3a76   : > { %v9349_v51 = vsel %vm6352_vm13, %v9336_v31, %v9348_v18  ;;  %v9302_v9 = vadd.f32 %v9293_v56, %v9284_v21 }
0x3a77   : > { %v9350_v35 = vsel %vm6355_vm14, %v9340_v5, %v9349_v51 }
0x3a78   : > { %v9344_v33 = vrot.slane %v9302_v9, %v15144_v13 }
0x3a7a   : > { %v9351_v19 = vsel %vm15549_vm9, %v9344_v33, %v9350_v35 }
0x3a7b   : > { %9353 = vst.msk [vmem:[%s1025_s12] sm:$0xff] %vm15550_vm10, %v9351_v19 }
0x3a7c   : > { %v10035_v17 = vpop.f32.mrb[40].mxu0 }
0x3a7d   : > { %v10123_v60 = vadd.f32 %v15136_v34, %v10035_v17  ;;  %v11325_v11 = vpop.f32.mrb[41].mxu0 }
0x3a7f   : > { %v10133_v15 = vadd.f32 %v10714_v39, %v10123_v60 }
0x3a81   : > { %v10134_v62 = vmax.f32 %v10133_v15, 0.0 }
0x3a83   : > { %11342 = vmatmul.mubr.msk.f32.vlgmr.msra.gmra.mrb[42].mxu0 %vm15551_vm11, %v10134_v62 }
0x3b56   : > { %v10213_v13 = vpop.f32.mrb[42].mxu0 }
0x3b57   : > { %v10214_v12 = vadd.f32 %v10715_v32, %v10213_v13  ;;  %v11343_v38 = vpop.f32.mrb[43].mxu0 }
0x3b59   : > { %10218 = vst.msk [vmem:[%s1021_s3] sm:$0xff] %vm10217_vm12, %v10214_v12 }
0x3b5a PF: > { %s15553_s4 = sld [smem:[#allocation26_spill]]  ;;  %s15554_s11 = sld [smem:[#allocation27_spill]] }
0x3b5b   : > { %s15555_s29 = smov %s12743_s30 }
0x3b60   : > { %p37_p9 = scmp.ge.s32.totalorder %s15553_s4, 4   ;;  %s15556_s30 = smov %s15554_s11 }
0x3b62   :  { %39 = sbr.rel (!%p37_p9) target bundleno = 20 (0x14), region = 328 }
0x3b69   :  { %10252 = vsyncpa [#allocation9], 1 }
0x3b6a   :  { %10254 = vsyncpa [#allocation9 + $0x1], 1 }
0x3b6b   :  { %10255 = vsyncpa [#allocation11], 1 }
0x3b6c   :  { %10256 = vsyncpa [#allocation14], 1 }
0x3b6d   :  { %10257 = vsyncpa [#allocation17], 1 }
0x3b6e   :  { %10258 = vsyncpa [#allocation20], 1 }

</bundles_post_ra>
